<compile_context>
chip_gen: v7x
topology: tpu7x:2x2x1
jax: 0.10.0
libtpu: 0.0.40
codegen_flags: <defaults>
</compile_context>

<pallas_src>
import jax
import jax.numpy as jnp
from jax.experimental import pallas as pl
from jax.experimental.pallas import tpu as pltpu

NUM_CLASSES = 10
NB = 8  # images per grid step


def _round_up(x, m):
    return (x + m - 1) // m * m


# ----------------------------------------------------------------------------
# Fused kernel: conv1+pool -> conv2+pool -> FC1 -> FC2 for NB images per step
# ----------------------------------------------------------------------------
def _cnn_fused_kernel(a1_ref, b1_ref, s1_ref, b2c_ref, s2_ref, w1_ref, s3_ref,
                      w2_ref, bf2_ref, o_ref, z_scr):
    nb16 = a1_ref.shape[1]          # NB*16 rows: (parity p, k, image n) with hp = 2k+p
    nb = nb16 // 16
    nb8 = nb * 8

    # ---------- Block 1: Conv(1->32, 3x3, pad 1) + BN + ReLU + MaxPool(2) ----------
    # a1_ref[a] rows hold xpad rows 2*hp-2+a+kh (kh folded into the 90-wide K dim);
    # b1_ref[b] is the banded weight producing all 16 w'-groups for pool w-parity b.
    zmax = None
    for a in range(2):
        lhs = a1_ref[a]                                             # (NB*16, 90) bf16
        for b in range(2):
            z = jnp.dot(lhs, b1_ref[b], preferred_element_type=jnp.float32)  # (NB*16, 512)
            zmax = z if zmax is None else jnp.maximum(zmax, z)
    # rows hp=0 / hp=15 are conv2's spatial zero-padding -> force them to exactly 0
    row = jax.lax.broadcasted_iota(jnp.int32, (nb16, 1), 0)
    valid = jnp.logical_and(row >= nb, row < 15 * nb).astype(jnp.float32)
    z1 = jnp.maximum(zmax + s1_ref[...], 0.0) * valid               # pooled1, padded layout
    z_scr[0:nb16, :] = z1.astype(z_scr.dtype)
    z_scr[nb16:nb16 + nb, :] = jnp.zeros((nb, z_scr.shape[1]), z_scr.dtype)

    # ---------- Block 2: Conv(32->64, 3x3, pad 1) + BN + ReLU + MaxPool(2) ----------
    # Row-band j = a2 + kh of the padded pooled1 image is a contiguous, 8-aligned
    # slice of z_scr thanks to the (p, k, n) row ordering written above.
    def band(j):
        s = (j % 2) * nb8 + (j // 2) * nb
        return z_scr[s:s + nb8, :]                                  # (NB*8, 512) bf16

    p2max = None
    for a2 in range(2):
        lhs2 = jnp.concatenate([band(a2), band(a2 + 1), band(a2 + 2)], axis=1)  # (NB*8, 1536)
        for b2 in range(2):
            z2 = jnp.dot(lhs2, b2c_ref[b2], preferred_element_type=jnp.float32)  # (NB*8, 448)
            p2max = z2 if p2max is None else jnp.maximum(p2max, z2)
    p2 = jnp.maximum(p2max + s2_ref[...], 0.0).astype(jnp.bfloat16)  # pooled2: rows (hh, n)

    # ---------- Flatten + FC1(3136->256) + BN1d + ReLU + FC2(256->10 pad 128) ----------
    h = jnp.zeros((nb, 256), jnp.float32)
    for hh in range(7):                                              # hh=7 rows are junk -> skipped
        h = h + jnp.dot(p2[hh * nb:(hh + 1) * nb, :], w1_ref[hh],
                        preferred_element_type=jnp.float32)
    h = jnp.maximum(h + s3_ref[...], 0.0).astype(jnp.bfloat16)
    o_ref[...] = jnp.dot(h, w2_ref[...], preferred_element_type=jnp.float32) + bf2_ref[...]


# ----------------------------------------------------------------------------
# Wrapper: conv1 row-band prep (tiny) + pallas_call
# ----------------------------------------------------------------------------
def _build_conv1_bands(xp, nb):
    """xp: (Np, 30, 30) padded images. Returns (2, Np*16, 90) row bands, rows
    ordered per batch-block as (parity p, k, image n) with hp = 2k+p; the 90-wide
    last dim is (kh, wi)."""
    n_p = xp.shape[0]
    hp = jnp.arange(16)
    kh = jnp.arange(3)
    bands = []
    for a in range(2):
        rows = jnp.clip(2 * hp[:, None] - 2 + a + kh[None, :], 0, 29)   # (16, 3)
        bands.append(xp[:, rows, :])                                     # (Np, 16, 3, 30)
    a1 = jnp.stack(bands, axis=0)                                        # (2, Np, 16, 3, 30)
    nblk = n_p // nb
    a1 = a1.reshape(2, nblk, nb, 8, 2, 3, 30)                            # hp -> (k, p)
    a1 = jnp.transpose(a1, (0, 1, 4, 3, 2, 5, 6))                        # (a, blk, p, k, n, kh, wi)
    return a1.reshape(2, n_p * 16, 90)


@jax.jit
def cnn_forward(prep, x_nchw):
    n = x_nchw.shape[0]
    n_pad = max(2 * NB, _round_up(n, NB))        # >=2 grid steps keeps both v7x cores busy
    x = x_nchw.reshape(n, 28, 28)
    if n_pad != n:
        x = jnp.pad(x, ((0, n_pad - n), (0, 0), (0, 0)))
    xp = jnp.pad(x, ((0, 0), (1, 1), (1, 1))).astype(jnp.bfloat16)        # (n_pad, 30, 30)
    a1 = _build_conv1_bands(xp, NB)                                       # (2, n_pad*16, 90)
    nblk = n_pad // NB

    flops_per_blk = 2 * (4 * (NB * 16) * 90 * 512 + 4 * (NB * 8) * 1536 * 448
                         + 7 * NB * 448 * 256 + NB * 256 * 128)
    bytes_accessed = int(a1.nbytes + prep["b1"].nbytes + prep["b2"].nbytes
                         + prep["w1"].nbytes + prep["w2"].nbytes
                         + prep["s1"].nbytes + prep["s2"].nbytes + prep["s3"].nbytes
                         + prep["bf2"].nbytes + n_pad * 128 * 4)

    out = pl.pallas_call(
        _cnn_fused_kernel,
        grid_spec=pltpu.PrefetchScalarGridSpec(
            num_scalar_prefetch=0,
            grid=(nblk,),
            in_specs=[
                pl.BlockSpec((2, NB * 16, 90), lambda i: (0, i, 0)),     # conv1 row bands
                pl.BlockSpec((2, 90, 512), lambda i: (0, 0, 0)),         # conv1 banded weight
                pl.BlockSpec((1, 512), lambda i: (0, 0)),                # conv1 shift
                pl.BlockSpec((2, 1536, 448), lambda i: (0, 0, 0)),       # conv2 banded weight
                pl.BlockSpec((1, 448), lambda i: (0, 0)),                # conv2 shift
                pl.BlockSpec((7, 448, 256), lambda i: (0, 0, 0)),        # fc1 (permuted, BN folded)
                pl.BlockSpec((1, 256), lambda i: (0, 0)),                # fc1 shift
                pl.BlockSpec((256, 128), lambda i: (0, 0)),              # fc2 (padded to 128 lanes)
                pl.BlockSpec((1, 128), lambda i: (0, 0)),                # fc2 bias
            ],
            out_specs=pl.BlockSpec((NB, 128), lambda i: (i, 0)),
            scratch_shapes=[pltpu.VMEM((NB * 16 + NB, 512), jnp.bfloat16)],
        ),
        out_shape=jax.ShapeDtypeStruct((n_pad, 128), jnp.float32),
        compiler_params=pltpu.CompilerParams(
            dimension_semantics=("parallel",),
            vmem_limit_bytes=32 * 1024 * 1024,
        ),
        cost_estimate=pl.CostEstimate(flops=flops_per_blk * nblk, transcendentals=0,
                                      bytes_accessed=bytes_accessed),
    )(a1, prep["b1"], prep["s1"], prep["b2"], prep["s2"], prep["w1"], prep["s3"],
      prep["w2"], prep["bf2"])
    return out[:n, :NUM_CLASSES]


# ----------------------------------------------------------------------------
# Parameter prep (runs ONCE): BN folding, banded conv weights, fc1 permutation
# ----------------------------------------------------------------------------
def _fold_bn(gamma, beta, mean, var, bias, eps=1e-5):
    scale = gamma / jnp.sqrt(var + eps)
    shift = beta + (bias - mean) * scale
    return scale, shift


def prepare_params(p):
    q = {}
    # ---- Conv1 (1->32) + BN2d(32): banded weight (2 pool-w-parities, 90 x 512) ----
    s1, t1 = _fold_bn(p["bn1_gamma"], p["bn1_beta"], p["bn1_mean"], p["bn1_var"], p["b_conv1"])
    w1s = jnp.transpose(p["w_conv1"][:, 0, :, :], (1, 2, 0)) * s1[None, None, :]   # (kh, kw, c)
    wi = jnp.arange(30)
    wq = jnp.arange(16)
    b1 = []
    for b in range(2):
        kw = wi[:, None] - 2 * wq[None, :] - b
        ok = (kw >= 0) & (kw <= 2) & (wq[None, :] <= 13)
        tap = w1s[:, jnp.clip(kw, 0, 2), :] * ok[None, :, :, None]                  # (3,30,16,32)
        b1.append(tap.reshape(90, 512))
    q["b1"] = jnp.stack(b1).astype(jnp.bfloat16)
    q["s1"] = jnp.tile(t1, 16).reshape(1, 512).astype(jnp.float32)

    # ---- Conv2 (32->64) + BN2d(64): banded weight (2 parities, 1536 x 448) ----
    s2, t2 = _fold_bn(p["bn2_gamma"], p["bn2_beta"], p["bn2_mean"], p["bn2_var"], p["b_conv2"])
    w2s = jnp.transpose(p["w_conv2"], (2, 3, 1, 0)) * s2                            # (kh, kw, ci, co)
    wq = jnp.arange(16)
    ww = jnp.arange(7)
    b2 = []
    for bb in range(2):
        kw = wq[:, None] - 2 * ww[None, :] - bb + 1
        ok = (kw >= 0) & (kw <= 2) & (wq[:, None] <= 13)
        tap = w2s[:, jnp.clip(kw, 0, 2), :, :] * ok[None, :, :, None, None]         # (3,16,7,32,64)
        tap = jnp.transpose(tap, (0, 1, 3, 2, 4))                                   # (3,16,32,7,64)
        b2.append(tap.reshape(1536, 448))
    q["b2"] = jnp.stack(b2).astype(jnp.bfloat16)
    q["s2"] = jnp.tile(t2, 7).reshape(1, 448).astype(jnp.float32)

    # ---- FC1 (3136->256) + BN1d: permuted to the conv tower's (hh, ww, c) order ----
    s3, t3 = _fold_bn(p["bn3_gamma"], p["bn3_beta"], p["bn3_mean"], p["bn3_var"], p["b_fc1"])
    w1 = (p["w_fc1"] * s3[:, None]).reshape(256, 64, 7, 7)                          # (m, c, h, w)
    w1 = jnp.transpose(w1, (2, 3, 1, 0)).reshape(7, 448, 256)                       # (hh, ww*64+c, m)
    q["w1"] = w1.astype(jnp.bfloat16)
    q["s3"] = t3.reshape(1, 256).astype(jnp.float32)

    # ---- FC2 (256->10), output padded to 128 lanes for a lane-dense store ----
    w2 = p["w_fc2"].T
    q["w2"] = jnp.pad(w2, ((0, 0), (0, 128 - w2.shape[1]))).astype(jnp.bfloat16)
    q["bf2"] = jnp.pad(p["b_fc2"], (0, 128 - p["b_fc2"].shape[0])).reshape(1, 128).astype(jnp.float32)
    return q


# ----------------------------------------------------------------------------
# Parameter init (deterministic, matches the torch module's shapes)
# ----------------------------------------------------------------------------
def init_params(key):
    ks = jax.random.split(key, 12)
    p = {}
    p["w_conv1"] = 0.1 * jax.random.normal(ks[0], (32, 1, 3, 3), jnp.float32)
    p["b_conv1"] = 0.1 * jax.random.normal(ks[1], (32,), jnp.float32)
    p["bn1_gamma"] = 1.0 + 0.1 * jax.random.normal(ks[2], (32,), jnp.float32)
    p["bn1_beta"] = 0.1 * jax.random.normal(ks[3], (32,), jnp.float32)
    p["bn1_mean"] = jnp.zeros((32,), jnp.float32)
    p["bn1_var"] = jnp.ones((32,), jnp.float32)
    p["w_conv2"] = 0.05 * jax.random.normal(ks[4], (64, 32, 3, 3), jnp.float32)
    p["b_conv2"] = 0.1 * jax.random.normal(ks[5], (64,), jnp.float32)
    p["bn2_gamma"] = 1.0 + 0.1 * jax.random.normal(ks[6], (64,), jnp.float32)
    p["bn2_beta"] = 0.1 * jax.random.normal(ks[7], (64,), jnp.float32)
    p["bn2_mean"] = jnp.zeros((64,), jnp.float32)
    p["bn2_var"] = jnp.ones((64,), jnp.float32)
    p["w_fc1"] = 0.02 * jax.random.normal(ks[8], (256, 7 * 7 * 64), jnp.float32)
    p["b_fc1"] = 0.1 * jax.random.normal(ks[9], (256,), jnp.float32)
    p["bn3_gamma"] = jnp.ones((256,), jnp.float32)
    p["bn3_beta"] = jnp.zeros((256,), jnp.float32)
    p["bn3_mean"] = jnp.zeros((256,), jnp.float32)
    p["bn3_var"] = jnp.ones((256,), jnp.float32)
    p["w_fc2"] = 0.05 * jax.random.normal(ks[10], (10, 256), jnp.float32)
    p["b_fc2"] = 0.1 * jax.random.normal(ks[11], (10,), jnp.float32)
    return p


if __name__ == "__main__":
    key = jax.random.PRNGKey(0)
    pkey, xkey = jax.random.split(key)
    params = init_params(pkey)
    prep = prepare_params(params)   # one-time weight prep (BN folding, banded weights, fc1 permute)
    # Spatial size must be 28x28 (the Linear(7*7*64, 256) layer hard-codes it).
    x = jax.random.normal(xkey, (2, 1, 28, 28), jnp.float32)   # NCHW like PyTorch

    # TODO(synk): training-mode BatchNorm statistics / Dropout masks are not implemented
    # (eval-mode semantics only, matching the PyTorch module in .eval()).
    out = cnn_forward(prep, x)
    out = jax.block_until_ready(out)

    assert out.shape == (2, 10), out.shape
    assert bool(jnp.all(jnp.isfinite(out)))
    print("KERNEL_OK")
</pallas_src>

<mosaic_0001>
module attributes {stable_mosaic.version = 11 : i64} {
  func.func @_cnn_fused_kernel(%arg0: i32, %arg1: memref<2x128x90xbf16, #tpu.memory_space<vmem>>, %arg2: memref<2x90x512xbf16, #tpu.memory_space<vmem>>, %arg3: memref<1x512xf32, #tpu.memory_space<vmem>>, %arg4: memref<2x1536x448xbf16, #tpu.memory_space<vmem>>, %arg5: memref<1x448xf32, #tpu.memory_space<vmem>>, %arg6: memref<7x448x256xbf16, #tpu.memory_space<vmem>>, %arg7: memref<1x256xf32, #tpu.memory_space<vmem>>, %arg8: memref<256x128xbf16, #tpu.memory_space<vmem>>, %arg9: memref<1x128xf32, #tpu.memory_space<vmem>>, %arg10: memref<8x128xf32, #tpu.memory_space<vmem>>, %arg11: memref<136x512xbf16, #tpu.memory_space<vmem>>) attributes {dimension_semantics = [#tpu.dimension_semantics<parallel>], iteration_bounds = array<i64: 2>, scalar_prefetch = 0 : i64, scratch_operands = 1 : i64, tpu.core_type = #tpu.core_type<tc>, window_params = [{transform_indices = @transform_0, window_bounds = array<i64: 2, 128, 90>}, {pipeline_mode = #tpu.pipeline_mode<synchronous>, transform_indices = @transform_1, window_bounds = array<i64: 2, 90, 512>}, {pipeline_mode = #tpu.pipeline_mode<synchronous>, transform_indices = @transform_2, window_bounds = array<i64: 1, 512>}, {pipeline_mode = #tpu.pipeline_mode<synchronous>, transform_indices = @transform_3, window_bounds = array<i64: 2, 1536, 448>}, {pipeline_mode = #tpu.pipeline_mode<synchronous>, transform_indices = @transform_4, window_bounds = array<i64: 1, 448>}, {pipeline_mode = #tpu.pipeline_mode<synchronous>, transform_indices = @transform_5, window_bounds = array<i64: 7, 448, 256>}, {pipeline_mode = #tpu.pipeline_mode<synchronous>, transform_indices = @transform_6, window_bounds = array<i64: 1, 256>}, {pipeline_mode = #tpu.pipeline_mode<synchronous>, transform_indices = @transform_7, window_bounds = array<i64: 256, 128>}, {pipeline_mode = #tpu.pipeline_mode<synchronous>, transform_indices = @transform_8, window_bounds = array<i64: 1, 128>}, {transform_indices = @transform_9, window_bounds = array<i64: 8, 128>}]} {
    %c0 = arith.constant 0 : index
    %c0_0 = arith.constant 0 : index
    %c0_1 = arith.constant 0 : index
    %0 = vector.load %arg1[%c0, %c0_0, %c0_1] : memref<2x128x90xbf16, #tpu.memory_space<vmem>>, vector<1x128x90xbf16>
    %1 = vector.shape_cast %0 : vector<1x128x90xbf16> to vector<128x90xbf16>
    %c0_2 = arith.constant 0 : index
    %c0_3 = arith.constant 0 : index
    %c0_4 = arith.constant 0 : index
    %2 = vector.load %arg2[%c0_2, %c0_3, %c0_4] : memref<2x90x512xbf16, #tpu.memory_space<vmem>>, vector<1x90x512xbf16>
    %3 = vector.shape_cast %2 : vector<1x90x512xbf16> to vector<90x512xbf16>
    %cst = arith.constant dense<0.000000e+00> : vector<128x512xf32>
    %4 = tpu.matmul %1, %3, %cst {dimension_numbers = #tpu.dot_dimension_numbers<[1], [0], [0], [1], [0, 0, 1, 1], [], []>} : vector<128x90xbf16>, vector<90x512xbf16>, vector<128x512xf32> -> vector<128x512xf32>
    %c1 = arith.constant 1 : index
    %c0_5 = arith.constant 0 : index
    %c0_6 = arith.constant 0 : index
    %5 = vector.load %arg2[%c1, %c0_5, %c0_6] : memref<2x90x512xbf16, #tpu.memory_space<vmem>>, vector<1x90x512xbf16>
    %6 = vector.shape_cast %5 : vector<1x90x512xbf16> to vector<90x512xbf16>
    %cst_7 = arith.constant dense<0.000000e+00> : vector<128x512xf32>
    %7 = tpu.matmul %1, %6, %cst_7 {dimension_numbers = #tpu.dot_dimension_numbers<[1], [0], [0], [1], [0, 0, 1, 1], [], []>} : vector<128x90xbf16>, vector<90x512xbf16>, vector<128x512xf32> -> vector<128x512xf32>
    %8 = arith.maximumf %4, %7 : vector<128x512xf32>
    %c1_8 = arith.constant 1 : index
    %c0_9 = arith.constant 0 : index
    %c0_10 = arith.constant 0 : index
    %9 = vector.load %arg1[%c1_8, %c0_9, %c0_10] : memref<2x128x90xbf16, #tpu.memory_space<vmem>>, vector<1x128x90xbf16>
    %10 = vector.shape_cast %9 : vector<1x128x90xbf16> to vector<128x90xbf16>
    %c0_11 = arith.constant 0 : index
    %c0_12 = arith.constant 0 : index
    %c0_13 = arith.constant 0 : index
    %11 = vector.load %arg2[%c0_11, %c0_12, %c0_13] : memref<2x90x512xbf16, #tpu.memory_space<vmem>>, vector<1x90x512xbf16>
    %12 = vector.shape_cast %11 : vector<1x90x512xbf16> to vector<90x512xbf16>
    %cst_14 = arith.constant dense<0.000000e+00> : vector<128x512xf32>
    %13 = tpu.matmul %10, %12, %cst_14 {dimension_numbers = #tpu.dot_dimension_numbers<[1], [0], [0], [1], [0, 0, 1, 1], [], []>} : vector<128x90xbf16>, vector<90x512xbf16>, vector<128x512xf32> -> vector<128x512xf32>
    %14 = arith.maximumf %8, %13 : vector<128x512xf32>
    %c1_15 = arith.constant 1 : index
    %c0_16 = arith.constant 0 : index
    %c0_17 = arith.constant 0 : index
    %15 = vector.load %arg2[%c1_15, %c0_16, %c0_17] : memref<2x90x512xbf16, #tpu.memory_space<vmem>>, vector<1x90x512xbf16>
    %16 = vector.shape_cast %15 : vector<1x90x512xbf16> to vector<90x512xbf16>
    %cst_18 = arith.constant dense<0.000000e+00> : vector<128x512xf32>
    %17 = tpu.matmul %10, %16, %cst_18 {dimension_numbers = #tpu.dot_dimension_numbers<[1], [0], [0], [1], [0, 0, 1, 1], [], []>} : vector<128x90xbf16>, vector<90x512xbf16>, vector<128x512xf32> -> vector<128x512xf32>
    %18 = arith.maximumf %14, %17 : vector<128x512xf32>
    %19 = tpu.iota {dimensions = array<i32: 0>} : vector<128x1xi32>
    %c8_i32 = arith.constant 8 : i32
    %20 = vector.broadcast %c8_i32 : i32 to vector<128x1xi32>
    %21 = arith.cmpi sge, %19, %20 : vector<128x1xi32>
    %c120_i32 = arith.constant 120 : i32
    %22 = vector.broadcast %c120_i32 : i32 to vector<128x1xi32>
    %23 = arith.cmpi slt, %19, %22 : vector<128x1xi32>
    %24 = arith.andi %21, %23 : vector<128x1xi1>
    %25 = arith.extui %24 : vector<128x1xi1> to vector<128x1xi32>
    %26 = arith.sitofp %25 : vector<128x1xi32> to vector<128x1xf32>
    %c0_19 = arith.constant 0 : index
    %c0_20 = arith.constant 0 : index
    %27 = vector.load %arg3[%c0_19, %c0_20] : memref<1x512xf32, #tpu.memory_space<vmem>>, vector<1x512xf32>
    %28 = vector.broadcast %27 : vector<1x512xf32> to vector<128x512xf32>
    %29 = arith.addf %18, %28 : vector<128x512xf32>
    %cst_21 = arith.constant 0.000000e+00 : f32
    %30 = vector.broadcast %cst_21 : f32 to vector<128x512xf32>
    %31 = arith.maximumf %29, %30 : vector<128x512xf32>
    %32 = vector.broadcast %26 : vector<128x1xf32> to vector<128x512xf32>
    %33 = arith.mulf %31, %32 : vector<128x512xf32>
    %34 = arith.truncf %33 : vector<128x512xf32> to vector<128x512xbf16>
    %c0_22 = arith.constant 0 : index
    %c0_23 = arith.constant 0 : index
    %35 = vector.load %arg11[%c0_22, %c0_23] : memref<136x512xbf16, #tpu.memory_space<vmem>>, vector<128x512xbf16>
    tpu.vector_store %arg11[%c0_22, %c0_23], %34 {strides = array<i32>} : memref<136x512xbf16, #tpu.memory_space<vmem>>, vector<128x512xbf16>,
    %cst_24 = arith.constant 0.000000e+00 : bf16
    %36 = vector.broadcast %cst_24 : bf16 to vector<8x512xbf16>
    %c128 = arith.constant 128 : index
    %c0_25 = arith.constant 0 : index
    %37 = vector.load %arg11[%c128, %c0_25] : memref<136x512xbf16, #tpu.memory_space<vmem>>, vector<8x512xbf16>
    tpu.vector_store %arg11[%c128, %c0_25], %36 {strides = array<i32>} : memref<136x512xbf16, #tpu.memory_space<vmem>>, vector<8x512xbf16>,
    %c0_26 = arith.constant 0 : index
    %c0_27 = arith.constant 0 : index
    %38 = vector.load %arg11[%c0_26, %c0_27] : memref<136x512xbf16, #tpu.memory_space<vmem>>, vector<64x512xbf16>
    %c64 = arith.constant 64 : index
    %c0_28 = arith.constant 0 : index
    %39 = vector.load %arg11[%c64, %c0_28] : memref<136x512xbf16, #tpu.memory_space<vmem>>, vector<64x512xbf16>
    %c8 = arith.constant 8 : index
    %c0_29 = arith.constant 0 : index
    %40 = vector.load %arg11[%c8, %c0_29] : memref<136x512xbf16, #tpu.memory_space<vmem>>, vector<64x512xbf16>
    %41 = tpu.concatenate %38, %39, %40 in 1 : vector<64x512xbf16>, vector<64x512xbf16>, vector<64x512xbf16> -> vector<64x1536xbf16>
    %c0_30 = arith.constant 0 : index
    %c0_31 = arith.constant 0 : index
    %c0_32 = arith.constant 0 : index
    %42 = vector.load %arg4[%c0_30, %c0_31, %c0_32] : memref<2x1536x448xbf16, #tpu.memory_space<vmem>>, vector<1x1536x448xbf16>
    %43 = vector.shape_cast %42 : vector<1x1536x448xbf16> to vector<1536x448xbf16>
    %cst_33 = arith.constant dense<0.000000e+00> : vector<64x448xf32>
    %44 = tpu.matmul %41, %43, %cst_33 {dimension_numbers = #tpu.dot_dimension_numbers<[1], [0], [0], [1], [0, 0, 1, 1], [], []>} : vector<64x1536xbf16>, vector<1536x448xbf16>, vector<64x448xf32> -> vector<64x448xf32>
    %c1_34 = arith.constant 1 : index
    %c0_35 = arith.constant 0 : index
    %c0_36 = arith.constant 0 : index
    %45 = vector.load %arg4[%c1_34, %c0_35, %c0_36] : memref<2x1536x448xbf16, #tpu.memory_space<vmem>>, vector<1x1536x448xbf16>
    %46 = vector.shape_cast %45 : vector<1x1536x448xbf16> to vector<1536x448xbf16>
    %cst_37 = arith.constant dense<0.000000e+00> : vector<64x448xf32>
    %47 = tpu.matmul %41, %46, %cst_37 {dimension_numbers = #tpu.dot_dimension_numbers<[1], [0], [0], [1], [0, 0, 1, 1], [], []>} : vector<64x1536xbf16>, vector<1536x448xbf16>, vector<64x448xf32> -> vector<64x448xf32>
    %48 = arith.maximumf %44, %47 : vector<64x448xf32>
    %c64_38 = arith.constant 64 : index
    %c0_39 = arith.constant 0 : index
    %49 = vector.load %arg11[%c64_38, %c0_39] : memref<136x512xbf16, #tpu.memory_space<vmem>>, vector<64x512xbf16>
    %c8_40 = arith.constant 8 : index
    %c0_41 = arith.constant 0 : index
    %50 = vector.load %arg11[%c8_40, %c0_41] : memref<136x512xbf16, #tpu.memory_space<vmem>>, vector<64x512xbf16>
    %c72 = arith.constant 72 : index
    %c0_42 = arith.constant 0 : index
    %51 = vector.load %arg11[%c72, %c0_42] : memref<136x512xbf16, #tpu.memory_space<vmem>>, vector<64x512xbf16>
    %52 = tpu.concatenate %49, %50, %51 in 1 : vector<64x512xbf16>, vector<64x512xbf16>, vector<64x512xbf16> -> vector<64x1536xbf16>
    %c0_43 = arith.constant 0 : index
    %c0_44 = arith.constant 0 : index
    %c0_45 = arith.constant 0 : index
    %53 = vector.load %arg4[%c0_43, %c0_44, %c0_45] : memref<2x1536x448xbf16, #tpu.memory_space<vmem>>, vector<1x1536x448xbf16>
    %54 = vector.shape_cast %53 : vector<1x1536x448xbf16> to vector<1536x448xbf16>
    %cst_46 = arith.constant dense<0.000000e+00> : vector<64x448xf32>
    %55 = tpu.matmul %52, %54, %cst_46 {dimension_numbers = #tpu.dot_dimension_numbers<[1], [0], [0], [1], [0, 0, 1, 1], [], []>} : vector<64x1536xbf16>, vector<1536x448xbf16>, vector<64x448xf32> -> vector<64x448xf32>
    %56 = arith.maximumf %48, %55 : vector<64x448xf32>
    %c1_47 = arith.constant 1 : index
    %c0_48 = arith.constant 0 : index
    %c0_49 = arith.constant 0 : index
    %57 = vector.load %arg4[%c1_47, %c0_48, %c0_49] : memref<2x1536x448xbf16, #tpu.memory_space<vmem>>, vector<1x1536x448xbf16>
    %58 = vector.shape_cast %57 : vector<1x1536x448xbf16> to vector<1536x448xbf16>
    %cst_50 = arith.constant dense<0.000000e+00> : vector<64x448xf32>
    %59 = tpu.matmul %52, %58, %cst_50 {dimension_numbers = #tpu.dot_dimension_numbers<[1], [0], [0], [1], [0, 0, 1, 1], [], []>} : vector<64x1536xbf16>, vector<1536x448xbf16>, vector<64x448xf32> -> vector<64x448xf32>
    %60 = arith.maximumf %56, %59 : vector<64x448xf32>
    %c0_51 = arith.constant 0 : index
    %c0_52 = arith.constant 0 : index
    %61 = vector.load %arg5[%c0_51, %c0_52] : memref<1x448xf32, #tpu.memory_space<vmem>>, vector<1x448xf32>
    %62 = vector.broadcast %61 : vector<1x448xf32> to vector<64x448xf32>
    %63 = arith.addf %60, %62 : vector<64x448xf32>
    %cst_53 = arith.constant 0.000000e+00 : f32
    %64 = vector.broadcast %cst_53 : f32 to vector<64x448xf32>
    %65 = arith.maximumf %63, %64 : vector<64x448xf32>
    %66 = arith.truncf %65 : vector<64x448xf32> to vector<64x448xbf16>
    %cst_54 = arith.constant 0.000000e+00 : f32
    %67 = vector.broadcast %cst_54 : f32 to vector<8x256xf32>
    %68 = vector.extract_strided_slice %66 {offsets = [0, 0], sizes = [8, 448], strides = [1, 1]} : vector<64x448xbf16> to vector<8x448xbf16>
    %c0_55 = arith.constant 0 : index
    %c0_56 = arith.constant 0 : index
    %c0_57 = arith.constant 0 : index
    %69 = vector.load %arg6[%c0_55, %c0_56, %c0_57] : memref<7x448x256xbf16, #tpu.memory_space<vmem>>, vector<1x448x256xbf16>
    %70 = vector.shape_cast %69 : vector<1x448x256xbf16> to vector<448x256xbf16>
    %cst_58 = arith.constant dense<0.000000e+00> : vector<8x256xf32>
    %71 = tpu.matmul %68, %70, %cst_58 {dimension_numbers = #tpu.dot_dimension_numbers<[1], [0], [0], [1], [0, 0, 1, 1], [], []>} : vector<8x448xbf16>, vector<448x256xbf16>, vector<8x256xf32> -> vector<8x256xf32>
    %72 = arith.addf %67, %71 : vector<8x256xf32>
    %73 = vector.extract_strided_slice %66 {offsets = [8, 0], sizes = [8, 448], strides = [1, 1]} : vector<64x448xbf16> to vector<8x448xbf16>
    %c1_59 = arith.constant 1 : index
    %c0_60 = arith.constant 0 : index
    %c0_61 = arith.constant 0 : index
    %74 = vector.load %arg6[%c1_59, %c0_60, %c0_61] : memref<7x448x256xbf16, #tpu.memory_space<vmem>>, vector<1x448x256xbf16>
    %75 = vector.shape_cast %74 : vector<1x448x256xbf16> to vector<448x256xbf16>
    %cst_62 = arith.constant dense<0.000000e+00> : vector<8x256xf32>
    %76 = tpu.matmul %73, %75, %cst_62 {dimension_numbers = #tpu.dot_dimension_numbers<[1], [0], [0], [1], [0, 0, 1, 1], [], []>} : vector<8x448xbf16>, vector<448x256xbf16>, vector<8x256xf32> -> vector<8x256xf32>
    %77 = arith.addf %72, %76 : vector<8x256xf32>
    %78 = vector.extract_strided_slice %66 {offsets = [16, 0], sizes = [8, 448], strides = [1, 1]} : vector<64x448xbf16> to vector<8x448xbf16>
    %c2 = arith.constant 2 : index
    %c0_63 = arith.constant 0 : index
    %c0_64 = arith.constant 0 : index
    %79 = vector.load %arg6[%c2, %c0_63, %c0_64] : memref<7x448x256xbf16, #tpu.memory_space<vmem>>, vector<1x448x256xbf16>
    %80 = vector.shape_cast %79 : vector<1x448x256xbf16> to vector<448x256xbf16>
    %cst_65 = arith.constant dense<0.000000e+00> : vector<8x256xf32>
    %81 = tpu.matmul %78, %80, %cst_65 {dimension_numbers = #tpu.dot_dimension_numbers<[1], [0], [0], [1], [0, 0, 1, 1], [], []>} : vector<8x448xbf16>, vector<448x256xbf16>, vector<8x256xf32> -> vector<8x256xf32>
    %82 = arith.addf %77, %81 : vector<8x256xf32>
    %83 = vector.extract_strided_slice %66 {offsets = [24, 0], sizes = [8, 448], strides = [1, 1]} : vector<64x448xbf16> to vector<8x448xbf16>
    %c3 = arith.constant 3 : index
    %c0_66 = arith.constant 0 : index
    %c0_67 = arith.constant 0 : index
    %84 = vector.load %arg6[%c3, %c0_66, %c0_67] : memref<7x448x256xbf16, #tpu.memory_space<vmem>>, vector<1x448x256xbf16>
    %85 = vector.shape_cast %84 : vector<1x448x256xbf16> to vector<448x256xbf16>
    %cst_68 = arith.constant dense<0.000000e+00> : vector<8x256xf32>
    %86 = tpu.matmul %83, %85, %cst_68 {dimension_numbers = #tpu.dot_dimension_numbers<[1], [0], [0], [1], [0, 0, 1, 1], [], []>} : vector<8x448xbf16>, vector<448x256xbf16>, vector<8x256xf32> -> vector<8x256xf32>
    %87 = arith.addf %82, %86 : vector<8x256xf32>
    %88 = vector.extract_strided_slice %66 {offsets = [32, 0], sizes = [8, 448], strides = [1, 1]} : vector<64x448xbf16> to vector<8x448xbf16>
    %c4 = arith.constant 4 : index
    %c0_69 = arith.constant 0 : index
    %c0_70 = arith.constant 0 : index
    %89 = vector.load %arg6[%c4, %c0_69, %c0_70] : memref<7x448x256xbf16, #tpu.memory_space<vmem>>, vector<1x448x256xbf16>
    %90 = vector.shape_cast %89 : vector<1x448x256xbf16> to vector<448x256xbf16>
    %cst_71 = arith.constant dense<0.000000e+00> : vector<8x256xf32>
    %91 = tpu.matmul %88, %90, %cst_71 {dimension_numbers = #tpu.dot_dimension_numbers<[1], [0], [0], [1], [0, 0, 1, 1], [], []>} : vector<8x448xbf16>, vector<448x256xbf16>, vector<8x256xf32> -> vector<8x256xf32>
    %92 = arith.addf %87, %91 : vector<8x256xf32>
    %93 = vector.extract_strided_slice %66 {offsets = [40, 0], sizes = [8, 448], strides = [1, 1]} : vector<64x448xbf16> to vector<8x448xbf16>
    %c5 = arith.constant 5 : index
    %c0_72 = arith.constant 0 : index
    %c0_73 = arith.constant 0 : index
    %94 = vector.load %arg6[%c5, %c0_72, %c0_73] : memref<7x448x256xbf16, #tpu.memory_space<vmem>>, vector<1x448x256xbf16>
    %95 = vector.shape_cast %94 : vector<1x448x256xbf16> to vector<448x256xbf16>
    %cst_74 = arith.constant dense<0.000000e+00> : vector<8x256xf32>
    %96 = tpu.matmul %93, %95, %cst_74 {dimension_numbers = #tpu.dot_dimension_numbers<[1], [0], [0], [1], [0, 0, 1, 1], [], []>} : vector<8x448xbf16>, vector<448x256xbf16>, vector<8x256xf32> -> vector<8x256xf32>
    %97 = arith.addf %92, %96 : vector<8x256xf32>
    %98 = vector.extract_strided_slice %66 {offsets = [48, 0], sizes = [8, 448], strides = [1, 1]} : vector<64x448xbf16> to vector<8x448xbf16>
    %c6 = arith.constant 6 : index
    %c0_75 = arith.constant 0 : index
    %c0_76 = arith.constant 0 : index
    %99 = vector.load %arg6[%c6, %c0_75, %c0_76] : memref<7x448x256xbf16, #tpu.memory_space<vmem>>, vector<1x448x256xbf16>
    %100 = vector.shape_cast %99 : vector<1x448x256xbf16> to vector<448x256xbf16>
    %cst_77 = arith.constant dense<0.000000e+00> : vector<8x256xf32>
    %101 = tpu.matmul %98, %100, %cst_77 {dimension_numbers = #tpu.dot_dimension_numbers<[1], [0], [0], [1], [0, 0, 1, 1], [], []>} : vector<8x448xbf16>, vector<448x256xbf16>, vector<8x256xf32> -> vector<8x256xf32>
    %102 = arith.addf %97, %101 : vector<8x256xf32>
    %c0_78 = arith.constant 0 : index
    %c0_79 = arith.constant 0 : index
    %103 = vector.load %arg7[%c0_78, %c0_79] : memref<1x256xf32, #tpu.memory_space<vmem>>, vector<1x256xf32>
    %104 = vector.broadcast %103 : vector<1x256xf32> to vector<8x256xf32>
    %105 = arith.addf %102, %104 : vector<8x256xf32>
    %cst_80 = arith.constant 0.000000e+00 : f32
    %106 = vector.broadcast %cst_80 : f32 to vector<8x256xf32>
    %107 = arith.maximumf %105, %106 : vector<8x256xf32>
    %108 = arith.truncf %107 : vector<8x256xf32> to vector<8x256xbf16>
    %c0_81 = arith.constant 0 : index
    %c0_82 = arith.constant 0 : index
    %109 = vector.load %arg8[%c0_81, %c0_82] : memref<256x128xbf16, #tpu.memory_space<vmem>>, vector<256x128xbf16>
    %cst_83 = arith.constant dense<0.000000e+00> : vector<8x128xf32>
    %110 = tpu.matmul %108, %109, %cst_83 {dimension_numbers = #tpu.dot_dimension_numbers<[1], [0], [0], [1], [0, 0, 1, 1], [], []>} : vector<8x256xbf16>, vector<256x128xbf16>, vector<8x128xf32> -> vector<8x128xf32>
    %c0_84 = arith.constant 0 : index
    %c0_85 = arith.constant 0 : index
    %111 = vector.load %arg9[%c0_84, %c0_85] : memref<1x128xf32, #tpu.memory_space<vmem>>, vector<1x128xf32>
    %112 = vector.broadcast %111 : vector<1x128xf32> to vector<8x128xf32>
    %113 = arith.addf %110, %112 : vector<8x128xf32>
    %c0_86 = arith.constant 0 : index
    %c0_87 = arith.constant 0 : index
    %114 = vector.load %arg10[%c0_86, %c0_87] : memref<8x128xf32, #tpu.memory_space<vmem>>, vector<8x128xf32>
    tpu.vector_store %arg10[%c0_86, %c0_87], %113 {strides = array<i32>} : memref<8x128xf32, #tpu.memory_space<vmem>>, vector<8x128xf32>,
    return
  }
  func.func @transform_0(%arg0: i32) -> (i32, i32, i32) {
    %c0_i32 = arith.constant 0 : i32
    %c0_i32_0 = arith.constant 0 : i32
    %c0_i32_1 = arith.constant 0 : i32
    return %c0_i32, %arg0, %c0_i32_0 : i32, i32, i32
  }
  func.func @transform_1(%arg0: i32) -> (i32, i32, i32) {
    %c0_i32 = arith.constant 0 : i32
    %c0_i32_0 = arith.constant 0 : i32
    %c0_i32_1 = arith.constant 0 : i32
    %c0_i32_2 = arith.constant 0 : i32
    return %c0_i32, %c0_i32_0, %c0_i32_1 : i32, i32, i32
  }
  func.func @transform_2(%arg0: i32) -> (i32, i32) {
    %c0_i32 = arith.constant 0 : i32
    %c0_i32_0 = arith.constant 0 : i32
    %c0_i32_1 = arith.constant 0 : i32
    return %c0_i32, %c0_i32_0 : i32, i32
  }
  func.func @transform_3(%arg0: i32) -> (i32, i32, i32) {
    %c0_i32 = arith.constant 0 : i32
    %c0_i32_0 = arith.constant 0 : i32
    %c0_i32_1 = arith.constant 0 : i32
    %c0_i32_2 = arith.constant 0 : i32
    return %c0_i32, %c0_i32_0, %c0_i32_1 : i32, i32, i32
  }
  func.func @transform_4(%arg0: i32) -> (i32, i32) {
    %c0_i32 = arith.constant 0 : i32
    %c0_i32_0 = arith.constant 0 : i32
    %c0_i32_1 = arith.constant 0 : i32
    return %c0_i32, %c0_i32_0 : i32, i32
  }
  func.func @transform_5(%arg0: i32) -> (i32, i32, i32) {
    %c0_i32 = arith.constant 0 : i32
    %c0_i32_0 = arith.constant 0 : i32
    %c0_i32_1 = arith.constant 0 : i32
    %c0_i32_2 = arith.constant 0 : i32
    return %c0_i32, %c0_i32_0, %c0_i32_1 : i32, i32, i32
  }
  func.func @transform_6(%arg0: i32) -> (i32, i32) {
    %c0_i32 = arith.constant 0 : i32
    %c0_i32_0 = arith.constant 0 : i32
    %c0_i32_1 = arith.constant 0 : i32
    return %c0_i32, %c0_i32_0 : i32, i32
  }
  func.func @transform_7(%arg0: i32) -> (i32, i32) {
    %c0_i32 = arith.constant 0 : i32
    %c0_i32_0 = arith.constant 0 : i32
    %c0_i32_1 = arith.constant 0 : i32
    return %c0_i32, %c0_i32_0 : i32, i32
  }
  func.func @transform_8(%arg0: i32) -> (i32, i32) {
    %c0_i32 = arith.constant 0 : i32
    %c0_i32_0 = arith.constant 0 : i32
    %c0_i32_1 = arith.constant 0 : i32
    return %c0_i32, %c0_i32_0 : i32, i32
  }
  func.func @transform_9(%arg0: i32) -> (i32, i32) {
    %c0_i32 = arith.constant 0 : i32
    %c0_i32_0 = arith.constant 0 : i32
    return %arg0, %c0_i32 : i32, i32
  }
}

</mosaic_0001>

<bundles_post_ra>
// kernel: cnn_forward.1
= control target key start
LH: loop header
LB: loop body
LE: loop exit
PB: predicated region body
PF: predicated region fallthrough
CT: control target
= control target key end

     0   :  { %s20150_s30 = smov 0   ;;  %s20152_s10 = smov 0   ;;  %s28561_s0 = inlined_call_operand.vmem [shape: bf16[2,256,90], index: 0, kind: input, shape index: {}]   ;;  %s28562_s1 = inlined_call_operand.vmem [shape: bf16[2,90,512], index: 1, kind: input, shape index: {}]   ;;  %s28563_s2 = inlined_call_operand.vmem [shape: f32[1,512], index: 2, kind: input, shape index: {}]   ;;  %s28564_s3 = inlined_call_operand.vmem [shape: bf16[2,1536,448], index: 3, kind: input, shape index: {}]   ;;  %s28565_s4 = inlined_call_operand.vmem [shape: f32[1,448], index: 4, kind: input, shape index: {}]   ;;  %s28566_s5 = inlined_call_operand.vmem [shape: bf16[7,448,256], index: 5, kind: input, shape index: {}]   ;;  %s28567_s6 = inlined_call_operand.vmem [shape: f32[1,256], index: 6, kind: input, shape index: {}]   ;;  %s28568_s7 = inlined_call_operand.vmem [shape: bf16[256,128], index: 7, kind: input, shape index: {}]   ;;  %s28569_s8 = inlined_call_operand.vmem [shape: f32[1,128], index: 8, kind: input, shape index: {}]   ;;  %s28570_s9 = inlined_call_operand.vmem [shape: f32[16,128], index: 9, kind: output, shape index: {}]  }
   0x1   :  { %s20154_s11 = smov 0  }
   0x2 LB: > { %s14481_s12 = sadd.s32 4294967295, %s20097_s11   ;;  %s20167_s13 = sadd.s32 1, %s20097_s11   ;;  %s20097_s11 = sphi %s20154_s11, %s29249_s11   ;;  %s20093_s10 = sphi %s20152_s10, %s29248_s10   ;;  %s20089_s30 = sphi %s20150_s30, %s29247_s30  }
   0x3   : > { %s23_s14 = ssub.s32 %s20097_s11, %s20167_s13  ;;  %s26_s15 = sadd.s32 1, %s20093_s10 }
   0x4   : > { %p24_p0 = scmp.eq.s32.totalorder %s23_s14, 0  ;;  %p33_p1 = scmp.ne.s32.totalorder %s20093_s10, %s20089_s30 }
   0x5   : > { %p34_p2 = scmp.eq.s32.totalorder %s20097_s11, 0  ;;  %p14484_p4 = scmp.ge.s32.totalorder %s20097_s11, 2 }
   0x6   : > { %s20176_s16 = scalar_select %p24_p0, %s20093_s10, %s26_s15  }
   0x7   : > { %p35_p3 = por %p34_p2, %p33_p1  ;;  %277 = sbr.rel (%p14484_p4) target bundleno = 26 (0x1a), region = 48 }
   0xe   : > { %280 = sbr.rel (!%p35_p3) target bundleno = 26 (0x1a), region = 52  ;;  %s282_s17 = sand.u32 (%p35_p3), 1, %s20093_s10  }
   0xf   : > { %s16669_s18 = sshll.u32 (%p35_p3), %s20097_s11, 6  ;;  %s14485_s19 = sshll.u32 (%p35_p3), %s282_s17, 7 }
  0x10   : > { %s20184_s22 = scalar_lea.vmem (%p35_p3), %s28561_s0, %s16669_s18  ;;  %s284_s23 = scalar_lea.vmem (%p35_p3), [#allocation3], %s14485_s19 }
  0x11   : > { %v303_v0 = vld [vmem:[%s20184_s22] sm:$0xff] (%p35_p3)   ;;  %v307_v1 = vld [vmem:[%s20184_s22 + $0x8] sm:$0xff] (%p35_p3)   ;;  %v311_v2 = vld [vmem:[%s20184_s22 + $0x10] sm:$0xff] (%p35_p3)  }
  0x12   : > { %304 = vst [vmem:[%s284_s23] sm:$0xff] (%p35_p3), %v303_v0   ;;  %308 = vst [vmem:[%s284_s23 + $0x8] sm:$0xff] (%p35_p3), %v307_v1   ;;  %v315_v3 = vld [vmem:[%s20184_s22 + $0x18] sm:$0xff] (%p35_p3)   ;;  %v319_v4 = vld [vmem:[%s20184_s22 + $0x20] sm:$0xff] (%p35_p3)  }
  0x13   : > { %312 = vst [vmem:[%s284_s23 + $0x10] sm:$0xff] (%p35_p3), %v311_v2   ;;  %v323_v5 = vld [vmem:[%s20184_s22 + $0x28] sm:$0xff] (%p35_p3)   ;;  %316 = vst [vmem:[%s284_s23 + $0x18] sm:$0xff] (%p35_p3), %v315_v3   ;;  %v327_v6 = vld [vmem:[%s20184_s22 + $0x30] sm:$0xff] (%p35_p3)  }
  0x14   : > { %320 = vst [vmem:[%s284_s23 + $0x20] sm:$0xff] (%p35_p3), %v319_v4   ;;  %324 = vst [vmem:[%s284_s23 + $0x28] sm:$0xff] (%p35_p3), %v323_v5   ;;  %v331_v7 = vld [vmem:[%s20184_s22 + $0x38] sm:$0xff] (%p35_p3)   ;;  %v335_v8 = vld [vmem:[%s20184_s22 + $0x80] sm:$0xff] (%p35_p3)  }
  0x15   : > { %328 = vst [vmem:[%s284_s23 + $0x30] sm:$0xff] %v327_v6   ;;  %332 = vst [vmem:[%s284_s23 + $0x38] sm:$0xff] %v331_v7   ;;  %v339_v9 = vld [vmem:[%s20184_s22 + $0x88] sm:$0xff]   ;;  %v343_v10 = vld [vmem:[%s20184_s22 + $0x90] sm:$0xff]  }
  0x16   : > { %336 = vst [vmem:[%s284_s23 + $0x40] sm:$0xff] %v335_v8   ;;  %v347_v11 = vld [vmem:[%s20184_s22 + $0x98] sm:$0xff]   ;;  %340 = vst [vmem:[%s284_s23 + $0x48] sm:$0xff] %v339_v9   ;;  %v351_v12 = vld [vmem:[%s20184_s22 + $0xa0] sm:$0xff]  }
  0x17   : > { %344 = vst [vmem:[%s284_s23 + $0x50] sm:$0xff] %v343_v10   ;;  %348 = vst [vmem:[%s284_s23 + $0x58] sm:$0xff] %v347_v11   ;;  %v355_v13 = vld [vmem:[%s20184_s22 + $0xa8] sm:$0xff]   ;;  %v359_v14 = vld [vmem:[%s20184_s22 + $0xb0] sm:$0xff]  }
  0x18   : > { %352 = vst [vmem:[%s284_s23 + $0x60] sm:$0xff] %v351_v12   ;;  %356 = vst [vmem:[%s284_s23 + $0x68] sm:$0xff] %v355_v13   ;;  %v363_v15 = vld [vmem:[%s20184_s22 + $0xb8] sm:$0xff]  }
  0x19   : > { %360 = vst [vmem:[%s284_s23 + $0x70] sm:$0xff] %v359_v14   ;;  %364 = vst [vmem:[%s284_s23 + $0x78] sm:$0xff] %v363_v15  }
  0x1a PF: > { %p14488_p5 = scmp.ge.s32.totalorder %s20097_s11, 1  ;;  %p452_p6 = scmp.lt.s32.totalorder %s20097_s11, 3 }
  0x1c   : > { %p453_p7 = pnand %p14488_p5, %p452_p6 }
  0x1e   : > { %456 = sbr.rel (%p453_p7) target bundleno = 2983 (0xba7), region = 93 }
  0x25   : > { %v20207_v16 = vld [vmem:[%s28562_s1 + $0x4] ss:$16 sps:$4 sm:$0xff]   ;;  %v20212_v17 = vld [vmem:[%s28562_s1 + $0xc] ss:$16 sps:$4 sm:$0xff]   ;;  %v28571_v18 = vmov 0   ;;  %s459_s20 = sand.u32 1, %s20089_s30  }
  0x26   : > { %765 = vmatprep.mubr.bf16.mxu0 %v28571_v18  ;;  %878 = vmatprep.mubr.bf16.mxu1 %v28571_v18  ;;  %v20220_v19 = vld [vmem:[%s28562_s1] ss:$16 sps:$4 sm:$0xff]   ;;  %v20225_v20 = vld [vmem:[%s28562_s1 + $0x8] ss:$16 sps:$4 sm:$0xff]   ;;  %v20231_v21 = vld [vmem:[%s28562_s1 + $0x24] ss:$16 sps:$4 sm:$0xff]  }
  0x27   : > { %733 = vmatprep.subr.bf16.mxu0 %v20207_v16  ;;  %846 = vmatprep.subr.bf16.mxu1 %v20212_v17  ;;  %v20238_v22 = vld [vmem:[%s28562_s1 + $0x2c] ss:$16 sps:$4 sm:$0xff]   ;;  %v20243_v23 = vld [vmem:[%s28562_s1 + $0x20] ss:$16 sps:$4 sm:$0xff]   ;;  %v20249_v24 = vld [vmem:[%s28562_s1 + $0x28] ss:$16 sps:$4 sm:$0xff]  }
  0x28   : > { %734 = vmatpush1.bf16.msra.mxu0 %v20220_v19  ;;  %847 = vmatpush1.bf16.msra.mxu1 %v20225_v20  ;;  %v20255_v25 = vld [vmem:[%s28562_s1 + $0x44] ss:$16 sps:$4 sm:$0xff]   ;;  %v20260_v26 = vld [vmem:[%s28562_s1 + $0x4c] ss:$16 sps:$4 sm:$0xff]   ;;  %v20265_v27 = vld [vmem:[%s28562_s1 + $0x40] ss:$16 sps:$4 sm:$0xff]  }
  0x29   : > { %735 = vmatprep.subr.bf16.mxu0 %v20231_v21  ;;  %848 = vmatprep.subr.bf16.mxu1 %v20238_v22  ;;  %v20270_v28 = vld [vmem:[%s28562_s1 + $0x48] ss:$16 sps:$4 sm:$0xff]   ;;  %v20277_v29 = vld [vmem:[%s28562_s1 + $0x64] ss:$16 sps:$4 sm:$0xff]   ;;  %v20285_v30 = vld [vmem:[%s28562_s1 + $0x6c] ss:$16 sps:$4 sm:$0xff]  }
  0x2a   : > { %v20290_v31 = vld [vmem:[%s28562_s1 + $0x60] ss:$16 sps:$4 sm:$0xff]   ;;  %s14489_s25 = sshll.u32 %s459_s20, 7  ;;  %v20297_v32 = vld [vmem:[%s28562_s1 + $0x68] ss:$16 sps:$4 sm:$0xff]   ;;  %vm720_vm0 = vcmask 1044480  }
  0x2b   : > { %v20302_v33 = vld [vmem:[%s28562_s1 + $0x84] ss:$16 sps:$4 sm:$0xff]   ;;  %v20309_v34 = vld [vmem:[%s28562_s1 + $0x8c] ss:$16 sps:$4 sm:$0xff]   ;;  %v20314_v35 = vld [vmem:[%s28562_s1 + $0x80] ss:$16 sps:$4 sm:$0xff]  }
  0x2c   : > { %736 = vmatpush1.bf16.msra.mxu0 %v20243_v23  ;;  %849 = vmatpush1.bf16.msra.mxu1 %v20249_v24  ;;  %v20319_v36 = vld [vmem:[%s28562_s1 + $0x88] ss:$16 sps:$4 sm:$0xff]   ;;  %v20324_v37 = vld [vmem:[%s28562_s1 + $0xa4] ss:$16 sps:$4 sm:$0x1f]   ;;  %s20339_s28 = scalar_lea.vmem [#allocation3], %s14489_s25 }
  0x2d   : > { %737 = vmatprep.subr.bf16.mxu0 %v20255_v25  ;;  %850 = vmatprep.subr.bf16.mxu1 %v20260_v26  ;;  %v20329_v38 = vld [vmem:[%s28562_s1 + $0xac] ss:$16 sps:$4 sm:$0x1f]   ;;  %v17483_v39 = vld [vmem:[%s28562_s1 + $0xa0] ss:$16 sps:$4 sm:$0x1f]  }
  0x2e   : > { %v17484_v40 = vld [vmem:[%s28562_s1 + $0xa8] ss:$16 sps:$4 sm:$0x1f]   ;;  %v20346_v41 = vsel %vm720_vm0, %v17483_v39, 0  ;;  %v20358_v43 = vld [vmem:[%s28562_s1 + $0xc4] ss:$16 sps:$4 sm:$0xff]  }
  0x2f   : > { %v20349_v42 = vsel %vm720_vm0, %v17484_v40, 0  ;;  %v20361_v44 = vld [vmem:[%s20339_s28] sm:$0xff]   ;;  %vm695_vm1 = vcmask 736256   ;;  %v20383_v48 = vld [vmem:[%s28562_s1 + $0xc8] ss:$16 sps:$4 sm:$0xff]   ;;  %v20432_v59 = vld [vmem:[%s20339_s28 + $0x10] sm:$0xff]  }
  0x30   : > { %738 = vmatpush1.bf16.msra.mxu0 %v20265_v27  ;;  %851 = vmatpush1.bf16.msra.mxu1 %v20270_v28  ;;  %v17486_v45 = vld [vmem:[%s28562_s1 + $0xc0] ss:$16 sps:$4 sm:$0xff]   ;;  %v17492_v46 = vld [vmem:[%s28562_s1 + $0xe4] ss:$16 sps:$4 sm:$0xff]   ;;  %v20388_v49 = vld [vmem:[%s28562_s1 + $0xcc] ss:$16 sps:$4 sm:$0xff]  }
  0x31   : > { %739 = vmatprep.subr.bf16.mxu0 %v20277_v29  ;;  %852 = vmatprep.subr.bf16.mxu1 %v20285_v30  ;;  %v17490_v47 = vld [vmem:[%s28562_s1 + $0xe0] ss:$16 sps:$4 sm:$0xff]   ;;  %v17496_v50 = vld [vmem:[%s28562_s1 + $0x104] ss:$16 sps:$4 sm:$0xff]   ;;  %v20396_v51 = vld [vmem:[%s20339_s28 + $0x8] sm:$0xff]   ;;  %vm11635_vm2 = vcmask 523264  }
  0x32   : > { %v20402_v52 = vld [vmem:[%s28562_s1 + $0xec] ss:$16 sps:$4 sm:$0xff]   ;;  %v17494_v53 = vld [vmem:[%s28562_s1 + $0x100] ss:$16 sps:$4 sm:$0xff]   ;;  %v17501_v54 = vld [vmem:[%s28562_s1 + $0x124] ss:$16 sps:$4 sm:$0xff]  }
  0x33   : > { %v20413_v55 = vld [vmem:[%s28562_s1 + $0xe8] ss:$16 sps:$4 sm:$0xff]   ;;  %v17515_v56 = vld [vmem:[%s28562_s1 + $0x10c] ss:$16 sps:$4 sm:$0xff]   ;;  %v17499_v57 = vld [vmem:[%s28562_s1 + $0x120] ss:$16 sps:$4 sm:$0xff]  }
  0x34   : > { %740 = vmatpush1.bf16.msra.mxu0 %v20290_v31  ;;  %853 = vmatpush1.bf16.msra.mxu1 %v20297_v32  ;;  %v17508_v58 = vld [vmem:[%s28562_s1 + $0x144] ss:$16 sps:$4 sm:$0xff]   ;;  %v20438_v60 = vld [vmem:[%s28562_s1 + $0x108] ss:$16 sps:$4 sm:$0xff]   ;;  %v20443_v61 = vld [vmem:[%s28562_s1 + $0x12c] ss:$16 sps:$4 sm:$0xff]  }
  0x35   : > { %741 = vmatprep.subr.bf16.mxu0 %v20302_v33  ;;  %854 = vmatprep.subr.bf16.mxu1 %v20309_v34  ;;  %v17521_v62 = vld [vmem:[%s28562_s1 + $0x160] ss:$16 sps:$4 sm:$0x1f]   ;;  %v17519_v0 = vld [vmem:[%s28562_s1 + $0x164] ss:$16 sps:$4 sm:$0x1f]  }
  0x36   : > { %v17506_v63 = vld [vmem:[%s28562_s1 + $0x140] ss:$16 sps:$4 sm:$0xff]   ;;  %v20458_v1 = vld [vmem:[%s28562_s1 + $0x128] ss:$16 sps:$4 sm:$0xff]   ;;  %v17525_v2 = vld [vmem:[%s28562_s1 + $0x14c] ss:$16 sps:$4 sm:$0xff]  }
  0x37   : > { %v20469_v3 = vsel %vm720_vm0, %v17521_v62, 0  ;;  %v17523_v4 = vld [vmem:[%s28562_s1 + $0x148] ss:$16 sps:$4 sm:$0xff]   ;;  %v17526_v5 = vld [vmem:[%s28562_s1 + $0x16c] ss:$16 sps:$4 sm:$0x1f]  }
  0x38   : > { %742 = vmatpush1.bf16.msra.mxu0 %v20314_v35  ;;  %855 = vmatpush1.bf16.msra.mxu1 %v20319_v36  ;;  %v17528_v6 = vld [vmem:[%s28562_s1 + $0x168] ss:$16 sps:$4 sm:$0x1f]   ;;  %v20500_v9 = vld [vmem:[%s20339_s28 + $0x20] sm:$0xff]   ;;  %v17512_v11 = vld [vmem:[%s20339_s28 + $0x30] sm:$0xff]   ;;  %p494_p8 = scmp.lt.s32.totalorder %s14481_s12, 1 }
  0x39   : > { %14523 = vmatprep.subr.msk.bf16.mxu0 %vm720_vm0, %v20324_v37  ;;  %14532 = vmatprep.subr.msk.bf16.mxu1 %vm720_vm0, %v20329_v38  ;;  %v20483_v7 = vld [vmem:[%s20339_s28 + $0x18] sm:$0xff]   ;;  %v20490_v8 = vsel %vm720_vm0, %v17528_v6, 0  ;;  %v17502_v10 = vld [vmem:[%s20339_s28 + $0x28] sm:$0xff]   ;;  %v20594_v13 = vld [vmem:[%s20339_s28 + $0x40] sm:$0xff]  }
  0x3a   : > { %v17522_v12 = vld [vmem:[%s20339_s28 + $0x38] sm:$0xff]   ;;  %v19293_v14 = vld [vmem:[%s28562_s1 + $0xc0] ss:$16 sps:$4 sm:$0xff]   ;;  %v20606_v15 = vld [vmem:[%s20339_s28 + $0x48] sm:$0xff]   ;;  %s29251_s12 = smov (!%p494_p8, %s14481_s12), 1 }
  0x3b   : > { %v17549_v6 = vld [vmem:[%s28564_s3 + $0x40] ss:$16 sps:$4 sm:$0xff]   ;;  %s14490_s19 = sshll.u32 %s29251_s12, 3 }
  0x3c   : > { %744 = vmatpush1.bf16.msra.mxu0 %v20346_v41  ;;  %857 = vmatpush1.bf16.msra.mxu1 %v20349_v42  ;;  %s497_s24 = scalar_lea.vmem %s28570_s9, %s14490_s19 }
  0x3d   : > { %1112 = vmatprep.subr.bf16.mxu0 %v20358_v43  ;;  %1225 = vmatprep.subr.bf16.mxu1 %v20388_v49 }
  0x3f   : > { %14524 = vmatmul.mubr.msk.bf16.vlgmr.msra.gmra.mrb[0].mxu0 %vm695_vm1, %v20361_v44  ;;  %14533 = vmatmul.mubr.msk.bf16.vlgmr.msra.gmra.mrb[0].mxu1 %vm695_vm1, %v20361_v44 }
  0x40   : > { %1113 = vmatpush1.bf16.msra.mxu0 %v17486_v45  ;;  %775 = vmatprep.mubr.bf16.mxu0 %v28571_v18 }
  0x41   : > { %888 = vmatprep.mubr.bf16.mxu1 %v28571_v18  ;;  %1114 = vmatprep.subr.bf16.mxu0 %v17492_v46 }
  0x42   : > { %1226 = vmatpush1.bf16.msra.mxu1 %v20383_v48 }
  0x43   : > { %1227 = vmatprep.subr.bf16.mxu1 %v20402_v52 }
  0x44   : > { %1115 = vmatpush1.bf16.msra.mxu0 %v17490_v47 }
  0x45   : > { %1116 = vmatprep.subr.bf16.mxu0 %v17496_v50  ;;  %v17539_v50 = vld [vmem:[%s28564_s3 + $0x4] ss:$16 sps:$4 sm:$0xff]  }
  0x46   : > { %1228 = vmatpush1.bf16.msra.mxu1 %v20413_v55 }
  0x47   : > { %14525 = vmatmul.mubr.msk.bf16.gmra.mrb[4].mxu0 %vm695_vm1, %v20396_v51  ;;  %14534 = vmatmul.mubr.msk.bf16.gmra.mrb[4].mxu1 %vm695_vm1, %v20396_v51 }
  0x48   : > { %785 = vmatprep.mubr.bf16.mxu0 %v28571_v18  ;;  %898 = vmatprep.mubr.bf16.mxu1 %v28571_v18 }
  0x49   : > { %1117 = vmatpush1.bf16.msra.mxu0 %v17494_v53  ;;  %1229 = vmatprep.subr.bf16.mxu1 %v17515_v56  ;;  %v17545_v56 = vld [vmem:[%s28564_s3 + $0x24] ss:$16 sps:$4 sm:$0xff]  }
  0x4a   : > { %1118 = vmatprep.subr.bf16.mxu0 %v17501_v54  ;;  %1230 = vmatpush1.bf16.msra.mxu1 %v20438_v60  ;;  %v17537_v54 = vld [vmem:[%s28564_s3] ss:$16 sps:$4 sm:$0xff]  }
  0x4b   : > { %1231 = vmatprep.subr.bf16.mxu1 %v20443_v61 }
  0x4d   : > { %1119 = vmatpush1.bf16.msra.mxu0 %v17499_v57  ;;  %v17548_v57 = vld [vmem:[%s28564_s3 + $0x2c] ss:$16 sps:$4 sm:$0xff]  }
  0x4e   : > { %1120 = vmatprep.subr.bf16.mxu0 %v17508_v58  ;;  %1232 = vmatpush1.bf16.msra.mxu1 %v20458_v1  ;;  %v17543_v58 = vld [vmem:[%s28564_s3 + $0x20] ss:$16 sps:$4 sm:$0xff]  }
  0x4f   : > { %14526 = vmatmul.mubr.msk.bf16.gmra.mrb[8].mxu0 %vm695_vm1, %v20432_v59  ;;  %14535 = vmatmul.mubr.msk.bf16.gmra.mrb[8].mxu1 %vm695_vm1, %v20432_v59 }
  0x50   : > { %795 = vmatprep.mubr.bf16.mxu0 %v28571_v18  ;;  %908 = vmatprep.mubr.bf16.mxu1 %v28571_v18 }
  0x51   : > { %1121 = vmatpush1.bf16.msra.mxu0 %v17506_v63  ;;  %1233 = vmatprep.subr.bf16.mxu1 %v17525_v2  ;;  %v17551_v2 = vld [vmem:[%s28564_s3 + $0x44] ss:$16 sps:$4 sm:$0xff]  }
  0x52   : > { %14589 = vmatprep.subr.msk.bf16.mxu0 %vm720_vm0, %v17519_v0  ;;  %1234 = vmatpush1.bf16.msra.mxu1 %v17523_v4 }
  0x53   : > { %14598 = vmatprep.subr.msk.bf16.mxu1 %vm720_vm0, %v17526_v5 }
  0x55   : > { %1123 = vmatpush1.bf16.msra.mxu0 %v20469_v3 }
  0x56   : > { %1483 = vmatprep.subr.bf16.mxu0 %v20207_v16  ;;  %1236 = vmatpush1.bf16.msra.mxu1 %v20490_v8  ;;  %v19294_v16 = vld [vmem:[%s28562_s1 + $0xe4] ss:$16 sps:$4 sm:$0xff]  }
  0x57   : > { %14527 = vmatmul.mubr.msk.bf16.gmra.mrb[12].mxu0 %vm695_vm1, %v20483_v7  ;;  %14536 = vmatmul.mubr.msk.bf16.gmra.mrb[12].mxu1 %vm695_vm1, %v20483_v7 }
  0x58   : > { %805 = vmatprep.mubr.bf16.mxu0 %v28571_v18  ;;  %918 = vmatprep.mubr.bf16.mxu1 %v28571_v18 }
  0x59   : > { %1596 = vmatprep.subr.bf16.mxu1 %v20212_v17  ;;  %v19295_v17 = vld [vmem:[%s28562_s1 + $0xe0] ss:$16 sps:$4 sm:$0xff]  }
  0x5f   : > { %14528 = vmatmul.mubr.msk.bf16.gmra.mrb[16].mxu0 %vm695_vm1, %v20500_v9  ;;  %14537 = vmatmul.mubr.msk.bf16.gmra.mrb[16].mxu1 %vm695_vm1, %v20500_v9 }
  0x60   : > { %815 = vmatprep.mubr.bf16.mxu0 %v28571_v18  ;;  %928 = vmatprep.mubr.bf16.mxu1 %v28571_v18 }
  0x67   : > { %14529 = vmatmul.mubr.msk.bf16.gmra.mrb[20].mxu0 %vm695_vm1, %v17502_v10  ;;  %14538 = vmatmul.mubr.msk.bf16.gmra.mrb[20].mxu1 %vm695_vm1, %v17502_v10 }
  0x68   : > { %825 = vmatprep.mubr.bf16.mxu0 %v28571_v18  ;;  %938 = vmatprep.mubr.bf16.mxu1 %v28571_v18 }
  0x6f   : > { %14530 = vmatmul.mubr.msk.bf16.gmra.mrb[24].mxu0 %vm695_vm1, %v17512_v11  ;;  %14539 = vmatmul.mubr.msk.bf16.gmra.mrb[24].mxu1 %vm695_vm1, %v17512_v11 }
  0x70   : > { %835 = vmatprep.mubr.bf16.mxu0 %v28571_v18  ;;  %948 = vmatprep.mubr.bf16.mxu1 %v28571_v18 }
  0x77   : > { %14531 = vmatmul.mubr.msk.bf16.gmra.mrb[28].mxu0 %vm695_vm1, %v17522_v12  ;;  %14540 = vmatmul.mubr.msk.bf16.gmra.mrb[28].mxu1 %vm695_vm1, %v17522_v12 }
  0x78   : > { %1144 = vmatprep.mubr.bf16.mxu0 %v28571_v18  ;;  %1257 = vmatprep.mubr.bf16.mxu1 %v28571_v18 }
  0x7f   : > { %14590 = vmatmul.mubr.msk.bf16.vlgmr.msra.gmra.mrb[32].mxu0 %vm695_vm1, %v20361_v44  ;;  %14599 = vmatmul.mubr.msk.bf16.vlgmr.msra.gmra.mrb[32].mxu1 %vm695_vm1, %v20361_v44 }
  0x80   : > { %1484 = vmatpush1.bf16.msra.mxu0 %v20220_v19  ;;  %1154 = vmatprep.mubr.bf16.mxu0 %v28571_v18  ;;  %v19296_v19 = vld [vmem:[%s28562_s1 + $0x104] ss:$16 sps:$4 sm:$0xff]  }
  0x81   : > { %1267 = vmatprep.mubr.bf16.mxu1 %v28571_v18  ;;  %1485 = vmatprep.subr.bf16.mxu0 %v20231_v21  ;;  %v19297_v21 = vld [vmem:[%s28562_s1 + $0x100] ss:$16 sps:$4 sm:$0xff]  }
  0x82   : > { %1597 = vmatpush1.bf16.msra.mxu1 %v20225_v20  ;;  %v20627_v20 = vld [vmem:[%s20339_s28 + $0x50] sm:$0xff]  }
  0x83   : > { %1598 = vmatprep.subr.bf16.mxu1 %v20238_v22  ;;  %v19298_v22 = vld [vmem:[%s28562_s1 + $0x10c] ss:$16 sps:$4 sm:$0xff]  }
  0x84   : > { %1486 = vmatpush1.bf16.msra.mxu0 %v20243_v23  ;;  %v19299_v23 = vld [vmem:[%s28562_s1 + $0x124] ss:$16 sps:$4 sm:$0xff]  }
  0x85   : > { %1487 = vmatprep.subr.bf16.mxu0 %v20255_v25  ;;  %v19301_v25 = vld [vmem:[%s28562_s1 + $0x144] ss:$16 sps:$4 sm:$0xff]  }
  0x86   : > { %1599 = vmatpush1.bf16.msra.mxu1 %v20249_v24  ;;  %v19300_v24 = vld [vmem:[%s28562_s1 + $0x120] ss:$16 sps:$4 sm:$0xff]  }
  0x87   : > { %14591 = vmatmul.mubr.msk.bf16.gmra.mrb[36].mxu0 %vm695_vm1, %v20396_v51  ;;  %14600 = vmatmul.mubr.msk.bf16.gmra.mrb[36].mxu1 %vm695_vm1, %v20396_v51  ;;  %v17542_v51 = vld [vmem:[%s28564_s3 + $0xc] ss:$16 sps:$4 sm:$0xff]  }
  0x88   : > { %1164 = vmatprep.mubr.bf16.mxu0 %v28571_v18  ;;  %1277 = vmatprep.mubr.bf16.mxu1 %v28571_v18 }
  0x89   : > { %1488 = vmatpush1.bf16.msra.mxu0 %v20265_v27  ;;  %1600 = vmatprep.subr.bf16.mxu1 %v20260_v26  ;;  %v17532_v26 = vld [vmem:[%s20339_s28 + $0x58] sm:$0xff]   ;;  %v19302_v27 = vld [vmem:[%s28562_s1 + $0x140] ss:$16 sps:$4 sm:$0xff]  }
  0x8a   : > { %1489 = vmatprep.subr.bf16.mxu0 %v20277_v29  ;;  %1601 = vmatpush1.bf16.msra.mxu1 %v20270_v28  ;;  %v19303_v28 = vld [vmem:[%s28562_s1 + $0x14c] ss:$16 sps:$4 sm:$0xff]   ;;  %v19304_v29 = vld [vmem:[%s28562_s1 + $0x164] ss:$16 sps:$4 sm:$0x1f]  }
  0x8b   : > { %1602 = vmatprep.subr.bf16.mxu1 %v20285_v30  ;;  %v19305_v30 = vld [vmem:[%s28562_s1 + $0x148] ss:$16 sps:$4 sm:$0xff]  }
  0x8d   : > { %1490 = vmatpush1.bf16.msra.mxu0 %v20290_v31  ;;  %v19306_v31 = vld [vmem:[%s28562_s1 + $0x16c] ss:$16 sps:$4 sm:$0x1f]  }
  0x8e   : > { %1491 = vmatprep.subr.bf16.mxu0 %v20302_v33  ;;  %1603 = vmatpush1.bf16.msra.mxu1 %v20297_v32  ;;  %v17533_v32 = vld [vmem:[%s20339_s28 + $0x60] sm:$0xff]   ;;  %v20683_v33 = vld [vmem:[%s20339_s28 + $0x68] sm:$0xff]  }
  0x8f   : > { %14592 = vmatmul.mubr.msk.bf16.gmra.mrb[40].mxu0 %vm695_vm1, %v20432_v59  ;;  %14601 = vmatmul.mubr.msk.bf16.gmra.mrb[40].mxu1 %vm695_vm1, %v20432_v59  ;;  %v17546_v59 = vld [vmem:[%s28564_s3 + $0x28] ss:$16 sps:$4 sm:$0xff]  }
  0x90   : > { %1174 = vmatprep.mubr.bf16.mxu0 %v28571_v18  ;;  %1287 = vmatprep.mubr.bf16.mxu1 %v28571_v18 }
  0x91   : > { %1492 = vmatpush1.bf16.msra.mxu0 %v20314_v35  ;;  %1604 = vmatprep.subr.bf16.mxu1 %v20309_v34  ;;  %v20692_v34 = vld [vmem:[%s20339_s28 + $0x70] sm:$0xff]   ;;  %v20701_v35 = vld [vmem:[%s20339_s28 + $0x78] sm:$0xff]  }
  0x92   : > { %14631 = vmatprep.subr.msk.bf16.mxu0 %vm720_vm0, %v20324_v37  ;;  %1605 = vmatpush1.bf16.msra.mxu1 %v20319_v36 }
  0x93   : > { %14640 = vmatprep.subr.msk.bf16.mxu1 %vm720_vm0, %v20329_v38 }
  0x95   : > { %1494 = vmatpush1.bf16.msra.mxu0 %v20346_v41 }
  0x96   : > { %1607 = vmatpush1.bf16.msra.mxu1 %v20349_v42  ;;  %1773 = vmatprep.subr.bf16.mxu0 %v20358_v43 }
  0x97   : > { %14593 = vmatmul.mubr.msk.bf16.gmra.mrb[44].mxu0 %vm695_vm1, %v20483_v7  ;;  %14602 = vmatmul.mubr.msk.bf16.gmra.mrb[44].mxu1 %vm695_vm1, %v20483_v7  ;;  %v17552_v7 = vld [vmem:[%s28564_s3 + $0x48] ss:$16 sps:$4 sm:$0xff]  }
  0x98   : > { %1184 = vmatprep.mubr.bf16.mxu0 %v28571_v18  ;;  %1297 = vmatprep.mubr.bf16.mxu1 %v28571_v18 }
  0x99   : > { %1886 = vmatprep.subr.bf16.mxu1 %v20388_v49 }
  0x9f   : > { %14594 = vmatmul.mubr.msk.bf16.gmra.mrb[48].mxu0 %vm695_vm1, %v20500_v9  ;;  %14603 = vmatmul.mubr.msk.bf16.gmra.mrb[48].mxu1 %vm695_vm1, %v20500_v9  ;;  %v17560_v9 = vld [vmem:[%s28564_s3 + $0x6c] ss:$16 sps:$4 sm:$0xff]  }
  0xa0   : > { %1194 = vmatprep.mubr.bf16.mxu0 %v28571_v18  ;;  %1307 = vmatprep.mubr.bf16.mxu1 %v28571_v18 }
  0xa7   : > { %14595 = vmatmul.mubr.msk.bf16.gmra.mrb[52].mxu0 %vm695_vm1, %v17502_v10  ;;  %14604 = vmatmul.mubr.msk.bf16.gmra.mrb[52].mxu1 %vm695_vm1, %v17502_v10  ;;  %v17555_v10 = vld [vmem:[%s28564_s3 + $0x60] ss:$16 sps:$4 sm:$0xff]  }
  0xa8   : > { %1204 = vmatprep.mubr.bf16.mxu0 %v28571_v18  ;;  %1317 = vmatprep.mubr.bf16.mxu1 %v28571_v18 }
  0xaf   : > { %14596 = vmatmul.mubr.msk.bf16.gmra.mrb[56].mxu0 %vm695_vm1, %v17512_v11  ;;  %14605 = vmatmul.mubr.msk.bf16.gmra.mrb[56].mxu1 %vm695_vm1, %v17512_v11  ;;  %v17558_v11 = vld [vmem:[%s28564_s3 + $0x68] ss:$16 sps:$4 sm:$0xff]  }
  0xb0   : > { %1214 = vmatprep.mubr.bf16.mxu0 %v28571_v18  ;;  %1327 = vmatprep.mubr.bf16.mxu1 %v28571_v18 }
  0xb7   : > { %14597 = vmatmul.mubr.msk.bf16.gmra.mrb[60].mxu0 %vm695_vm1, %v17522_v12  ;;  %14606 = vmatmul.mubr.msk.bf16.gmra.mrb[60].mxu1 %vm695_vm1, %v17522_v12 }
  0xb8   : > { %1515 = vmatprep.mubr.bf16.mxu0 %v28571_v18  ;;  %1628 = vmatprep.mubr.bf16.mxu1 %v28571_v18 }
  0xbf   : > { %14632 = vmatmul.mubr.msk.bf16.vlgmr.msra.gmra.mrb[64].mxu0 %vm695_vm1, %v20594_v13  ;;  %14641 = vmatmul.mubr.msk.bf16.vlgmr.msra.gmra.mrb[64].mxu1 %vm695_vm1, %v20594_v13 }
  0xc0   : > { %1774 = vmatpush1.bf16.msra.mxu0 %v19293_v14  ;;  %1525 = vmatprep.mubr.bf16.mxu0 %v28571_v18 }
  0xc1   : > { %1638 = vmatprep.mubr.bf16.mxu1 %v28571_v18  ;;  %1775 = vmatprep.subr.bf16.mxu0 %v19294_v16 }
  0xc2   : > { %1887 = vmatpush1.bf16.msra.mxu1 %v20383_v48 }
  0xc3   : > { %1888 = vmatprep.subr.bf16.mxu1 %v20402_v52 }
  0xc4   : > { %1776 = vmatpush1.bf16.msra.mxu0 %v19295_v17 }
  0xc5   : > { %1777 = vmatprep.subr.bf16.mxu0 %v19296_v19  ;;  %v17563_v19 = vld [vmem:[%s28564_s3 + $0x84] ss:$16 sps:$4 sm:$0xff]  }
  0xc6   : > { %1889 = vmatpush1.bf16.msra.mxu1 %v20413_v55  ;;  %v17540_v55 = vld [vmem:[%s28564_s3 + $0x8] ss:$16 sps:$4 sm:$0xff]  }
  0xc7   : > { %14633 = vmatmul.mubr.msk.bf16.gmra.mrb[68].mxu0 %vm695_vm1, %v20606_v15  ;;  %14642 = vmatmul.mubr.msk.bf16.gmra.mrb[68].mxu1 %vm695_vm1, %v20606_v15 }
  0xc8   : > { %1535 = vmatprep.mubr.bf16.mxu0 %v28571_v18  ;;  %1648 = vmatprep.mubr.bf16.mxu1 %v28571_v18 }
  0xc9   : > { %1778 = vmatpush1.bf16.msra.mxu0 %v19297_v21  ;;  %1890 = vmatprep.subr.bf16.mxu1 %v19298_v22 }
  0xca   : > { %1779 = vmatprep.subr.bf16.mxu0 %v19299_v23  ;;  %1891 = vmatpush1.bf16.msra.mxu1 %v20438_v60  ;;  %v17561_v23 = vld [vmem:[%s28564_s3 + $0x80] ss:$16 sps:$4 sm:$0xff]  }
  0xcb   : > { %1892 = vmatprep.subr.bf16.mxu1 %v20443_v61 }
  0xcd   : > { %1780 = vmatpush1.bf16.msra.mxu0 %v19300_v24  ;;  %v17564_v24 = vld [vmem:[%s28564_s3 + $0x88] ss:$16 sps:$4 sm:$0xff]  }
  0xce   : > { %1781 = vmatprep.subr.bf16.mxu0 %v19301_v25  ;;  %1893 = vmatpush1.bf16.msra.mxu1 %v20458_v1  ;;  %v17569_v25 = vld [vmem:[%s28564_s3 + $0xa4] ss:$16 sps:$4 sm:$0xff]  }
  0xcf   : > { %14634 = vmatmul.mubr.msk.bf16.gmra.mrb[72].mxu0 %vm695_vm1, %v20627_v20  ;;  %14643 = vmatmul.mubr.msk.bf16.gmra.mrb[72].mxu1 %vm695_vm1, %v20627_v20 }
  0xd0   : > { %1545 = vmatprep.mubr.bf16.mxu0 %v28571_v18  ;;  %1658 = vmatprep.mubr.bf16.mxu1 %v28571_v18 }
  0xd1   : > { %1782 = vmatpush1.bf16.msra.mxu0 %v19302_v27  ;;  %1894 = vmatprep.subr.bf16.mxu1 %v19303_v28  ;;  %v17567_v27 = vld [vmem:[%s28564_s3 + $0xa0] ss:$16 sps:$4 sm:$0xff]   ;;  %v17570_v28 = vld [vmem:[%s28564_s3 + $0xa8] ss:$16 sps:$4 sm:$0xff]  }
  0xd2   : > { %14649 = vmatprep.subr.msk.bf16.mxu0 %vm720_vm0, %v19304_v29  ;;  %1895 = vmatpush1.bf16.msra.mxu1 %v19305_v30 }
  0xd3   : > { %14658 = vmatprep.subr.msk.bf16.mxu1 %vm720_vm0, %v19306_v31 }
  0xd5   : > { %1784 = vmatpush1.bf16.msra.mxu0 %v20469_v3  ;;  %v17554_v3 = vld [vmem:[%s28564_s3 + $0x4c] ss:$16 sps:$4 sm:$0xff]  }
  0xd6   : > { %1897 = vmatpush1.bf16.msra.mxu1 %v20490_v8  ;;  %5128 = vmatprep.subr.bf16.mxu0 %v17539_v50  ;;  %v17557_v8 = vld [vmem:[%s28564_s3 + $0x64] ss:$16 sps:$4 sm:$0xff]  }
  0xd7   : > { %14635 = vmatmul.mubr.msk.bf16.gmra.mrb[76].mxu0 %vm695_vm1, %v17532_v26  ;;  %14644 = vmatmul.mubr.msk.bf16.gmra.mrb[76].mxu1 %vm695_vm1, %v17532_v26  ;;  %v17575_v50 = vld [vmem:[%s28564_s3 + $0xc4] ss:$16 sps:$4 sm:$0xff]  }
  0xd8   : > { %1555 = vmatprep.mubr.bf16.mxu0 %v28571_v18  ;;  %1668 = vmatprep.mubr.bf16.mxu1 %v28571_v18 }
  0xd9   : > { %5566 = vmatprep.subr.bf16.mxu1 %v17542_v51  ;;  %v17578_v51 = vld [vmem:[%s28564_s3 + $0xcc] ss:$16 sps:$4 sm:$0xff]  }
  0xdf   : > { %14636 = vmatmul.mubr.msk.bf16.gmra.mrb[80].mxu0 %vm695_vm1, %v17533_v32  ;;  %14645 = vmatmul.mubr.msk.bf16.gmra.mrb[80].mxu1 %vm695_vm1, %v17533_v32 }
  0xe0   : > { %1565 = vmatprep.mubr.bf16.mxu0 %v28571_v18  ;;  %1678 = vmatprep.mubr.bf16.mxu1 %v28571_v18 }
  0xe7   : > { %14637 = vmatmul.mubr.msk.bf16.gmra.mrb[84].mxu0 %vm695_vm1, %v20683_v33  ;;  %14646 = vmatmul.mubr.msk.bf16.gmra.mrb[84].mxu1 %vm695_vm1, %v20683_v33 }
  0xe8   : > { %1575 = vmatprep.mubr.bf16.mxu0 %v28571_v18  ;;  %1688 = vmatprep.mubr.bf16.mxu1 %v28571_v18 }
  0xef   : > { %14638 = vmatmul.mubr.msk.bf16.gmra.mrb[88].mxu0 %vm695_vm1, %v20692_v34  ;;  %14647 = vmatmul.mubr.msk.bf16.gmra.mrb[88].mxu1 %vm695_vm1, %v20692_v34 }
  0xf0   : > { %1585 = vmatprep.mubr.bf16.mxu0 %v28571_v18  ;;  %1698 = vmatprep.mubr.bf16.mxu1 %v28571_v18 }
  0xf7   : > { %14639 = vmatmul.mubr.msk.bf16.gmra.mrb[92].mxu0 %vm695_vm1, %v20701_v35  ;;  %14648 = vmatmul.mubr.msk.bf16.gmra.mrb[92].mxu1 %vm695_vm1, %v20701_v35 }
  0xf8   : > { %1805 = vmatprep.mubr.bf16.mxu0 %v28571_v18  ;;  %1918 = vmatprep.mubr.bf16.mxu1 %v28571_v18 }
  0xff   : > { %14650 = vmatmul.mubr.msk.bf16.vlgmr.msra.gmra.mrb[96].mxu0 %vm695_vm1, %v20594_v13  ;;  %14659 = vmatmul.mubr.msk.bf16.vlgmr.msra.gmra.mrb[96].mxu1 %vm695_vm1, %v20594_v13 }
 0x100   : > { %1815 = vmatprep.mubr.bf16.mxu0 %v28571_v18  ;;  %1928 = vmatprep.mubr.bf16.mxu1 %v28571_v18 }
 0x101   : > { %5129 = vmatpush1.bf16.msra.mxu0 %v17537_v54  ;;  %5567 = vmatpush1.bf16.msra.mxu1 %v17540_v55 }
 0x102   : > { %5130 = vmatprep.subr.bf16.mxu0 %v17545_v56  ;;  %5568 = vmatprep.subr.bf16.mxu1 %v17548_v57  ;;  %v17573_v56 = vld [vmem:[%s28564_s3 + $0xc0] ss:$16 sps:$4 sm:$0xff]   ;;  %v17576_v57 = vld [vmem:[%s28564_s3 + $0xc8] ss:$16 sps:$4 sm:$0xff]  }
 0x105   : > { %5131 = vmatpush1.bf16.msra.mxu0 %v17543_v58  ;;  %5569 = vmatpush1.bf16.msra.mxu1 %v17546_v59  ;;  %v17581_v58 = vld [vmem:[%s28564_s3 + $0xe4] ss:$16 sps:$4 sm:$0xff]   ;;  %v17584_v59 = vld [vmem:[%s28564_s3 + $0xec] ss:$16 sps:$4 sm:$0xff]  }
 0x106   : > { %5132 = vmatprep.subr.bf16.mxu0 %v17551_v2  ;;  %5570 = vmatprep.subr.bf16.mxu1 %v17554_v3  ;;  %v17579_v2 = vld [vmem:[%s28564_s3 + $0xe0] ss:$16 sps:$4 sm:$0xff]   ;;  %v17582_v3 = vld [vmem:[%s28564_s3 + $0xe8] ss:$16 sps:$4 sm:$0xff]  }
 0x107   : > { %14651 = vmatmul.mubr.msk.bf16.gmra.mrb[100].mxu0 %vm695_vm1, %v20606_v15  ;;  %14660 = vmatmul.mubr.msk.bf16.gmra.mrb[100].mxu1 %vm695_vm1, %v20606_v15 }
 0x108   : > { %1825 = vmatprep.mubr.bf16.mxu0 %v28571_v18  ;;  %1938 = vmatprep.mubr.bf16.mxu1 %v28571_v18 }
 0x109   : > { %5133 = vmatpush1.bf16.msra.mxu0 %v17549_v6  ;;  %5571 = vmatpush1.bf16.msra.mxu1 %v17552_v7 }
 0x10a   : > { %5134 = vmatprep.subr.bf16.mxu0 %v17557_v8  ;;  %5572 = vmatprep.subr.bf16.mxu1 %v17560_v9 }
 0x10d   : > { %5135 = vmatpush1.bf16.msra.mxu0 %v17555_v10  ;;  %5573 = vmatpush1.bf16.msra.mxu1 %v17558_v11  ;;  %v17587_v11 = vld [vmem:[%s28564_s3 + $0x104] ss:$16 sps:$4 sm:$0xff]  }
 0x10e   : > { %5136 = vmatprep.subr.bf16.mxu0 %v17563_v19  ;;  %v17590_v19 = vld [vmem:[%s28564_s3 + $0x10c] ss:$16 sps:$4 sm:$0xff]  }
 0x10f   : > { %14652 = vmatmul.mubr.msk.bf16.gmra.mrb[104].mxu0 %vm695_vm1, %v20627_v20  ;;  %14661 = vmatmul.mubr.msk.bf16.gmra.mrb[104].mxu1 %vm695_vm1, %v20627_v20  ;;  %v17566_v20 = vld [vmem:[%s28564_s3 + $0x8c] ss:$16 sps:$4 sm:$0xff]  }
 0x110   : > { %1835 = vmatprep.mubr.bf16.mxu0 %v28571_v18  ;;  %1948 = vmatprep.mubr.bf16.mxu1 %v28571_v18 }
 0x111   : > { %5574 = vmatprep.subr.bf16.mxu1 %v17566_v20  ;;  %5137 = vmatpush1.bf16.msra.mxu0 %v17561_v23 }
 0x112   : > { %v20727_v36 = vpop.f32.mrb[0].mxu0  ;;  %v20729_v37 = vpop.f32.mrb[0].mxu1  ;;  %5575 = vmatpush1.bf16.msra.mxu1 %v17564_v24  ;;  %5138 = vmatprep.subr.bf16.mxu0 %v17569_v25  ;;  %v17585_v24 = vld [vmem:[%s28564_s3 + $0x100] ss:$16 sps:$4 sm:$0xff]   ;;  %v17588_v25 = vld [vmem:[%s28564_s3 + $0x108] ss:$16 sps:$4 sm:$0xff]  }
 0x113   : > { %v20731_v38 = vpop.f32.mrb[1].mxu0  ;;  %v20733_v39 = vpop.f32.mrb[1].mxu1 }
 0x114   : > { %28761 = vst [vmem:[#allocation4_spill] sm:$0xff] %v20733_v39  ;;  %v20735_v40 = vpop.f32.mrb[2].mxu0  ;;  %v20737_v41 = vpop.f32.mrb[2].mxu1  ;;  %v17624_v39 = vld [vmem:[%s28564_s3 + $0x1c8] ss:$16 sps:$4 sm:$0xff]  }
 0x115   : > { %v20739_v42 = vpop.f32.mrb[3].mxu0  ;;  %v20741_v43 = vpop.f32.mrb[3].mxu1  ;;  %5139 = vmatpush1.bf16.msra.mxu0 %v17567_v27  ;;  %v17596_v27 = vld [vmem:[%s28564_s3 + $0x12c] ss:$16 sps:$4 sm:$0xff]  }
 0x116   : > { %28762 = vst [vmem:[#allocation5_spill] sm:$0xff] %v20739_v42  ;;  %28763 = vst [vmem:[#allocation6_spill] sm:$0xff] %v20741_v43  ;;  %5140 = vmatprep.subr.bf16.mxu0 %v17575_v50  ;;  %v17594_v50 = vld [vmem:[%s28564_s3 + $0x128] ss:$16 sps:$4 sm:$0xff]  }
 0x117   : > { %14653 = vmatmul.mubr.msk.bf16.gmra.mrb[108].mxu0 %vm695_vm1, %v17532_v26  ;;  %14662 = vmatmul.mubr.msk.bf16.gmra.mrb[108].mxu1 %vm695_vm1, %v17532_v26  ;;  %v17572_v26 = vld [vmem:[%s28564_s3 + $0xac] ss:$16 sps:$4 sm:$0xff]  }
 0x118   : > { %1845 = vmatprep.mubr.bf16.mxu0 %v28571_v18  ;;  %1958 = vmatprep.mubr.bf16.mxu1 %v28571_v18 }
 0x119   : > { %5576 = vmatprep.subr.bf16.mxu1 %v17572_v26  ;;  %5141 = vmatpush1.bf16.msra.mxu0 %v17573_v56  ;;  %v17593_v26 = vld [vmem:[%s28564_s3 + $0x124] ss:$16 sps:$4 sm:$0xff]  }
 0x11a   : > { %v20747_v44 = vpop.f32.mrb[4].mxu0  ;;  %v20749_v45 = vpop.f32.mrb[4].mxu1  ;;  %5577 = vmatpush1.bf16.msra.mxu1 %v17570_v28  ;;  %5142 = vmatprep.subr.bf16.mxu0 %v17581_v58  ;;  %v17591_v28 = vld [vmem:[%s28564_s3 + $0x120] ss:$16 sps:$4 sm:$0xff]  }
 0x11b   : > { %v20751_v46 = vpop.f32.mrb[5].mxu0  ;;  %v20753_v47 = vpop.f32.mrb[5].mxu1  ;;  %5578 = vmatprep.subr.bf16.mxu1 %v17578_v51 }
 0x11c   : > { %28764 = vst [vmem:[#allocation7_spill] sm:$0xff] %v20753_v47  ;;  %v20755_v48 = vpop.f32.mrb[6].mxu0  ;;  %v20757_v49 = vpop.f32.mrb[6].mxu1 }
 0x11d   : > { %28765 = vst [vmem:[#allocation8_spill] sm:$0xff] %v20757_v49  ;;  %v20765_v52 = vpop.f32.mrb[7].mxu0  ;;  %v20767_v53 = vpop.f32.mrb[7].mxu1  ;;  %5143 = vmatpush1.bf16.msra.mxu0 %v17579_v2 }
 0x11e   : > { %5579 = vmatpush1.bf16.msra.mxu1 %v17576_v57  ;;  %5144 = vmatprep.subr.bf16.mxu0 %v17587_v11  ;;  %v17602_v11 = vld [vmem:[%s28564_s3 + $0x14c] ss:$16 sps:$4 sm:$0xff]  }
 0x11f   : > { %14654 = vmatmul.mubr.msk.bf16.gmra.mrb[112].mxu0 %vm695_vm1, %v17533_v32  ;;  %14663 = vmatmul.mubr.msk.bf16.gmra.mrb[112].mxu1 %vm695_vm1, %v17533_v32 }
 0x120   : > { %1855 = vmatprep.mubr.bf16.mxu0 %v28571_v18  ;;  %1968 = vmatprep.mubr.bf16.mxu1 %v28571_v18 }
 0x121   : > { %5580 = vmatprep.subr.bf16.mxu1 %v17584_v59  ;;  %5145 = vmatpush1.bf16.msra.mxu0 %v17585_v24 }
 0x122   : > { %v20791_v60 = vpop.f32.mrb[8].mxu0  ;;  %v20793_v61 = vpop.f32.mrb[8].mxu1  ;;  %5581 = vmatpush1.bf16.msra.mxu1 %v17582_v3  ;;  %5146 = vmatprep.subr.bf16.mxu0 %v17593_v26  ;;  %v17599_v3 = vld [vmem:[%s28564_s3 + $0x144] ss:$16 sps:$4 sm:$0xff]   ;;  %v17600_v26 = vld [vmem:[%s28564_s3 + $0x148] ss:$16 sps:$4 sm:$0xff]  }
 0x123   : > { %28766 = vst [vmem:[#allocation9_spill] sm:$0xff] %v20793_v61  ;;  %v20795_v62 = vpop.f32.mrb[9].mxu0  ;;  %v20797_v63 = vpop.f32.mrb[9].mxu1  ;;  %5582 = vmatprep.subr.bf16.mxu1 %v17590_v19 }
 0x124   : > { %28767 = vst [vmem:[#allocation10_spill] sm:$0xff] %v20797_v63  ;;  %v20799_v0 = vpop.f32.mrb[10].mxu0  ;;  %v20801_v1 = vpop.f32.mrb[10].mxu1 }
 0x125   : > { %28768 = vst [vmem:[#allocation11_spill] sm:$0xff] %v20801_v1  ;;  %v20809_v4 = vpop.f32.mrb[11].mxu0  ;;  %v20811_v5 = vpop.f32.mrb[11].mxu1  ;;  %5147 = vmatpush1.bf16.msra.mxu0 %v17591_v28  ;;  %v17603_v28 = vld [vmem:[%s28564_s3 + $0x160] ss:$16 sps:$4 sm:$0xff]  }
 0x126   : > { %28769 = vst [vmem:[#allocation12_spill] sm:$0xff] %v20811_v5  ;;  %5583 = vmatpush1.bf16.msra.mxu1 %v17588_v25  ;;  %v17597_v25 = vld [vmem:[%s28564_s3 + $0x140] ss:$16 sps:$4 sm:$0xff]   ;;  %5148 = vmatprep.subr.bf16.mxu0 %v17599_v3 }
 0x127   : > { %14655 = vmatmul.mubr.msk.bf16.gmra.mrb[116].mxu0 %vm695_vm1, %v20683_v33  ;;  %14664 = vmatmul.mubr.msk.bf16.gmra.mrb[116].mxu1 %vm695_vm1, %v20683_v33 }
 0x128   : > { %1865 = vmatprep.mubr.bf16.mxu0 %v28571_v18  ;;  %1978 = vmatprep.mubr.bf16.mxu1 %v28571_v18 }
 0x129   : > { %5584 = vmatprep.subr.bf16.mxu1 %v17596_v27  ;;  %v17605_v27 = vld [vmem:[%s28564_s3 + $0x164] ss:$16 sps:$4 sm:$0xff]   ;;  %5149 = vmatpush1.bf16.msra.mxu0 %v17597_v25 }
 0x12a   : > { %v20837_v12 = vpop.f32.mrb[12].mxu0  ;;  %v20839_v13 = vpop.f32.mrb[12].mxu1  ;;  %5585 = vmatpush1.bf16.msra.mxu1 %v17594_v50  ;;  %v17606_v50 = vld [vmem:[%s28564_s3 + $0x168] ss:$16 sps:$4 sm:$0xff]   ;;  %5150 = vmatprep.subr.bf16.mxu0 %v17605_v27 }
 0x12b   : > { %28770 = vst [vmem:[#allocation13_spill] sm:$0xff] %v20839_v13  ;;  %v20841_v14 = vpop.f32.mrb[13].mxu0  ;;  %v20843_v15 = vpop.f32.mrb[13].mxu1  ;;  %5586 = vmatprep.subr.bf16.mxu1 %v17602_v11 }
 0x12c   : > { %28771 = vst [vmem:[#allocation14_spill] sm:$0xff] %v20843_v15  ;;  %v20845_v16 = vpop.f32.mrb[14].mxu0  ;;  %v20847_v17 = vpop.f32.mrb[14].mxu1 }
 0x12d   : > { %28772 = vst [vmem:[#allocation15_spill] sm:$0xff] %v20847_v17  ;;  %v20855_v21 = vpop.f32.mrb[15].mxu0  ;;  %v20857_v22 = vpop.f32.mrb[15].mxu1  ;;  %5151 = vmatpush1.bf16.msra.mxu0 %v17603_v28  ;;  %v17615_v28 = vld [vmem:[%s28564_s3 + $0x1a0] ss:$16 sps:$4 sm:$0xff]  }
 0x12e   : > { %28773 = vst [vmem:[#allocation16_spill] sm:$0xff] %v20857_v22  ;;  %5587 = vmatpush1.bf16.msra.mxu1 %v17600_v26 }
 0x12f   : > { %14656 = vmatmul.mubr.msk.bf16.gmra.mrb[120].mxu0 %vm695_vm1, %v20692_v34  ;;  %14665 = vmatmul.mubr.msk.bf16.gmra.mrb[120].mxu1 %vm695_vm1, %v20692_v34 }
 0x130   : > { %1875 = vmatprep.mubr.bf16.mxu0 %v28571_v18  ;;  %1988 = vmatprep.mubr.bf16.mxu1 %v28571_v18  ;;  %v17608_v18 = vld [vmem:[%s28564_s3 + $0x16c] ss:$16 sps:$4 sm:$0xff]  }
 0x131   : > { %5588 = vmatprep.subr.bf16.mxu1 %v17608_v18  ;;  %v17609_v18 = vld [vmem:[%s28564_s3 + $0x180] ss:$16 sps:$4 sm:$0xff]  }
 0x132   : > { %v20883_v29 = vpop.f32.mrb[16].mxu0  ;;  %v20885_v30 = vpop.f32.mrb[16].mxu1  ;;  %5589 = vmatpush1.bf16.msra.mxu1 %v17606_v50  ;;  %v17618_v50 = vld [vmem:[%s28564_s3 + $0x1a8] ss:$16 sps:$4 sm:$0xff]  }
 0x133   : > { %28774 = vst [vmem:[#allocation17_spill] sm:$0xff] %v20885_v30  ;;  %v20887_v31 = vpop.f32.mrb[17].mxu0  ;;  %v20889_v32 = vpop.f32.mrb[17].mxu1 }
 0x134   : > { %28775 = vst [vmem:[#allocation18_spill] sm:$0xff] %v20889_v32  ;;  %v20891_v33 = vpop.f32.mrb[18].mxu0  ;;  %v20893_v34 = vpop.f32.mrb[18].mxu1 }
 0x135   : > { %28776 = vst [vmem:[#allocation19_spill] sm:$0xff] %v20893_v34  ;;  %v20901_v54 = vpop.f32.mrb[19].mxu0  ;;  %v20903_v55 = vpop.f32.mrb[19].mxu1 }
 0x136   : > { %28777 = vst [vmem:[#allocation20_spill] sm:$0xff] %v20903_v55 }
 0x137   : > { %14657 = vmatmul.mubr.msk.bf16.gmra.mrb[124].mxu0 %vm695_vm1, %v20701_v35  ;;  %14666 = vmatmul.mubr.msk.bf16.gmra.mrb[124].mxu1 %vm695_vm1, %v20701_v35 }
 0x13a   : > { %v20927_v6 = vpop.f32.mrb[20].mxu0  ;;  %v20929_v35 = vpop.f32.mrb[20].mxu1 }
 0x13b   : > { %28778 = vst [vmem:[#allocation21_spill] sm:$0xff] %v20929_v35  ;;  %v20931_v7 = vpop.f32.mrb[21].mxu0  ;;  %v20933_v8 = vpop.f32.mrb[21].mxu1 }
 0x13c   : > { %28779 = vst [vmem:[#allocation22_spill] sm:$0xff] %v20933_v8  ;;  %v20935_v9 = vpop.f32.mrb[22].mxu0  ;;  %v20937_v10 = vpop.f32.mrb[22].mxu1 }
 0x13d   : > { %28780 = vst [vmem:[#allocation23_spill] sm:$0xff] %v20937_v10  ;;  %v20945_v20 = vpop.f32.mrb[23].mxu0  ;;  %v20947_v23 = vpop.f32.mrb[23].mxu1 }
 0x13e   : > { %28781 = vst [vmem:[#allocation24_spill] sm:$0xff] %v20945_v20  ;;  %28782 = vst [vmem:[#allocation25_spill] sm:$0xff] %v20947_v23 }
 0x142   : > { %v20967_v51 = vpop.f32.mrb[24].mxu0  ;;  %v20969_v56 = vpop.f32.mrb[24].mxu1 }
 0x143   : > { %28783 = vst [vmem:[#allocation26_spill] sm:$0xff] %v20967_v51  ;;  %28784 = vst [vmem:[#allocation27_spill] sm:$0xff] %v20969_v56  ;;  %v20971_v57 = vpop.f32.mrb[25].mxu0  ;;  %v20973_v58 = vpop.f32.mrb[25].mxu1 }
 0x144   : > { %28785 = vst [vmem:[#allocation28_spill] sm:$0xff] %v20971_v57  ;;  %28786 = vst [vmem:[#allocation29_spill] sm:$0xff] %v20973_v58  ;;  %v20975_v59 = vpop.f32.mrb[26].mxu0  ;;  %v20977_v2 = vpop.f32.mrb[26].mxu1 }
 0x145   : > { %28787 = vst [vmem:[#allocation30_spill] sm:$0xff] %v20975_v59  ;;  %28788 = vst [vmem:[#allocation31_spill] sm:$0xff] %v20977_v2  ;;  %v20985_v19 = vpop.f32.mrb[27].mxu0  ;;  %v20987_v24 = vpop.f32.mrb[27].mxu1  ;;  %v17611_v2 = vld [vmem:[%s28564_s3 + $0x184] ss:$16 sps:$4 sm:$0xff]  }
 0x146   : > { %28789 = vst [vmem:[#allocation32_spill] sm:$0xff] %v20985_v19  ;;  %28790 = vst [vmem:[#allocation33_spill] sm:$0xff] %v20987_v24  ;;  %5152 = vmatprep.subr.bf16.mxu0 %v17611_v2 }
 0x147   : > { %5153 = vmatpush1.bf16.msra.mxu0 %v17609_v18 }
 0x14a   : > { %v21007_v3 = vpop.f32.mrb[28].mxu0  ;;  %v21009_v11 = vpop.f32.mrb[28].mxu1 }
 0x14b   : > { %28791 = vst [vmem:[#allocation34_spill] sm:$0xff] %v21007_v3  ;;  %28792 = vst [vmem:[#allocation35_spill] sm:$0xff] %v21009_v11  ;;  %v21011_v24 = vpop.f32.mrb[29].mxu0  ;;  %v21013_v19 = vpop.f32.mrb[29].mxu1  ;;  %v17614_v3 = vld [vmem:[%s28564_s3 + $0x18c] ss:$16 sps:$4 sm:$0xff]  }
 0x14c   : > { %28793 = vst [vmem:[#allocation36_spill] sm:$0xff] %v21011_v24  ;;  %28794 = vst [vmem:[#allocation37_spill] sm:$0xff] %v21013_v19  ;;  %v21015_v25 = vpop.f32.mrb[30].mxu0  ;;  %v21017_v26 = vpop.f32.mrb[30].mxu1  ;;  %5590 = vmatprep.subr.bf16.mxu1 %v17614_v3  ;;  %v17630_v24 = vld [vmem:[%s28564_s3 + $0x1e8] ss:$16 sps:$4 sm:$0xff]  }
 0x14d   : > { %28795 = vst [vmem:[#allocation38_spill] sm:$0xff] %v21015_v25  ;;  %28796 = vst [vmem:[#allocation39_spill] sm:$0xff] %v21017_v26  ;;  %v21025_v59 = vpop.f32.mrb[31].mxu0  ;;  %v21027_v27 = vpop.f32.mrb[31].mxu1  ;;  %v17612_v26 = vld [vmem:[%s28564_s3 + $0x188] ss:$16 sps:$4 sm:$0xff]  }
 0x14e   : > { %28797 = vst [vmem:[#allocation40_spill] sm:$0xff] %v21025_v59  ;;  %28798 = vst [vmem:[#allocation41_spill] sm:$0xff] %v21027_v27  ;;  %v17617_v25 = vld [vmem:[%s28564_s3 + $0x1a4] ss:$16 sps:$4 sm:$0xff]   ;;  %v17620_v27 = vld [vmem:[%s28564_s3 + $0x1ac] ss:$16 sps:$4 sm:$0xff]   ;;  %5591 = vmatpush1.bf16.msra.mxu1 %v17612_v26 }
 0x14f   : > { %5154 = vmatprep.subr.bf16.mxu0 %v17617_v25  ;;  %5592 = vmatprep.subr.bf16.mxu1 %v17620_v27  ;;  %v17623_v27 = vld [vmem:[%s28564_s3 + $0x1c4] ss:$16 sps:$4 sm:$0xff]   ;;  %v17626_v26 = vld [vmem:[%s28564_s3 + $0x1cc] ss:$16 sps:$4 sm:$0xff]  }
 0x150   : > { %5155 = vmatpush1.bf16.msra.mxu0 %v17615_v28  ;;  %v17629_v28 = vld [vmem:[%s28564_s3 + $0x1e4] ss:$16 sps:$4 sm:$0xff]  }
 0x151   : > { %5156 = vmatprep.subr.bf16.mxu0 %v17623_v27 }
 0x152   : > { %v21047_v2 = vpop.f32.mrb[32].mxu0  ;;  %v21049_v3 = vpop.f32.mrb[32].mxu1  ;;  %5593 = vmatpush1.bf16.msra.mxu1 %v17618_v50  ;;  %v17632_v50 = vld [vmem:[%s28564_s3 + $0x1ec] ss:$16 sps:$4 sm:$0xff]  }
 0x153   : > { %v21055_v18 = vpop.f32.mrb[33].mxu0  ;;  %v21057_v19 = vpop.f32.mrb[33].mxu1  ;;  %5594 = vmatprep.subr.bf16.mxu1 %v17626_v26  ;;  %v28854_v20 = vmax.f32 %v20727_v36, %v21047_v2 }
 0x154   : > { %28799 = vst [vmem:[#allocation42_spill] sm:$0xff] %v21055_v18  ;;  %28800 = vst [vmem:[#allocation43_spill] sm:$0xff] %v21057_v19  ;;  %v21063_v58 = vpop.f32.mrb[34].mxu0  ;;  %v21065_v25 = vpop.f32.mrb[34].mxu1  ;;  %v17621_v19 = vld [vmem:[%s28564_s3 + $0x1c0] ss:$16 sps:$4 sm:$0xff]  }
 0x155   : > { %28801 = vst [vmem:[#allocation44_spill] sm:$0xff] %v21065_v25  ;;  %v21077_v18 = vpop.f32.mrb[35].mxu0  ;;  %v21079_v11 = vpop.f32.mrb[35].mxu1  ;;  %5157 = vmatpush1.bf16.msra.mxu0 %v17621_v19  ;;  %v17627_v25 = vld [vmem:[%s28564_s3 + $0x1e0] ss:$16 sps:$4 sm:$0xff]  }
 0x156   : > { %28802 = vst [vmem:[#allocation45_spill] sm:$0xff] %v21077_v18  ;;  %28803 = vst [vmem:[#allocation46_spill] sm:$0xff] %v21079_v11  ;;  %5595 = vmatpush1.bf16.msra.mxu1 %v17624_v39  ;;  %5158 = vmatprep.subr.bf16.mxu0 %v17629_v28  ;;  %v17638_v18 = vld [vmem:[%s28564_s3 + $0x20c] ss:$16 sps:$4 sm:$0xff]   ;;  %v28848_v51 = vld [vmem:[#allocation38_spill] sm:$0xff] }
 0x157   : > { %5596 = vmatprep.subr.bf16.mxu1 %v17632_v50  ;;  %v17635_v50 = vld [vmem:[%s28564_s3 + $0x204] ss:$16 sps:$4 sm:$0xff]  }
 0x159   : > { %5159 = vmatpush1.bf16.msra.mxu0 %v17627_v25 }
 0x15a   : > { %v21103_v27 = vpop.f32.mrb[36].mxu0  ;;  %v21105_v26 = vpop.f32.mrb[36].mxu1  ;;  %5597 = vmatpush1.bf16.msra.mxu1 %v17630_v24  ;;  %5201 = vmatprep.subr.bf16.mxu0 %v17635_v50  ;;  %v28855_v24 = vmax.f32 %v20729_v37, %v21049_v3 }
 0x15b   : > { %28804 = vst [vmem:[#allocation47_spill] sm:$0xff] %v21105_v26  ;;  %v21111_v19 = vpop.f32.mrb[37].mxu0  ;;  %v21113_v11 = vpop.f32.mrb[37].mxu1  ;;  %5639 = vmatprep.subr.bf16.mxu1 %v17638_v18  ;;  %v28858_v18 = vld [vmem:[#allocation4_spill] sm:$0xff] }
 0x15c   : > { %28805 = vst [vmem:[#allocation48_spill] sm:$0xff] %v21113_v11  ;;  %v21119_v42 = vpop.f32.mrb[38].mxu0  ;;  %v21121_v28 = vpop.f32.mrb[38].mxu1 }
 0x15d   : > { %28806 = vst [vmem:[#allocation49_spill] sm:$0xff] %v21121_v28  ;;  %v21130_v26 = vpop.f32.mrb[39].mxu0  ;;  %v21132_v43 = vpop.f32.mrb[39].mxu1 }
 0x162   : > { %v21141_v39 = vpop.f32.mrb[40].mxu0  ;;  %v21143_v59 = vpop.f32.mrb[40].mxu1 }
 0x163   : > { %28807 = vst [vmem:[#allocation50_spill] sm:$0xff] %v21143_v59  ;;  %v21149_v28 = vpop.f32.mrb[41].mxu0  ;;  %v21151_v49 = vpop.f32.mrb[41].mxu1 }
 0x164   : > { %28808 = vst [vmem:[#allocation51_spill] sm:$0xff] %v21151_v49  ;;  %v21157_v50 = vpop.f32.mrb[42].mxu0  ;;  %v21159_v47 = vpop.f32.mrb[42].mxu1 }
 0x165   : > { %28809 = vst [vmem:[#allocation52_spill] sm:$0xff] %v21159_v47  ;;  %v21165_v59 = vpop.f32.mrb[43].mxu0  ;;  %v21167_v61 = vpop.f32.mrb[43].mxu1 }
 0x166   : > { %28810 = vst [vmem:[#allocation53_spill] sm:$0xff] %v21167_v61 }
 0x16a   : > { %v21173_v49 = vpop.f32.mrb[44].mxu0  ;;  %v21175_v63 = vpop.f32.mrb[44].mxu1 }
 0x16b   : > { %28811 = vst [vmem:[#allocation54_spill] sm:$0xff] %v21175_v63  ;;  %v21181_v47 = vpop.f32.mrb[45].mxu0  ;;  %v21183_v1 = vpop.f32.mrb[45].mxu1 }
 0x16c   : > { %28812 = vst [vmem:[#allocation55_spill] sm:$0xff] %v21183_v1  ;;  %v21189_v61 = vpop.f32.mrb[46].mxu0  ;;  %v21191_v5 = vpop.f32.mrb[46].mxu1 }
 0x16d   : > { %28813 = vst [vmem:[#allocation56_spill] sm:$0xff] %v21191_v5  ;;  %v21197_v63 = vpop.f32.mrb[47].mxu0  ;;  %v21199_v13 = vpop.f32.mrb[47].mxu1 }
 0x16e   : > { %28814 = vst [vmem:[#allocation57_spill] sm:$0xff] %v21199_v13 }
 0x172   : > { %v21205_v1 = vpop.f32.mrb[48].mxu0  ;;  %v21207_v15 = vpop.f32.mrb[48].mxu1 }
 0x173   : > { %28815 = vst [vmem:[#allocation58_spill] sm:$0xff] %v21207_v15  ;;  %v21213_v5 = vpop.f32.mrb[49].mxu0  ;;  %v21215_v17 = vpop.f32.mrb[49].mxu1 }
 0x174   : > { %28816 = vst [vmem:[#allocation59_spill] sm:$0xff] %v21215_v17  ;;  %v21221_v13 = vpop.f32.mrb[50].mxu0  ;;  %v21223_v22 = vpop.f32.mrb[50].mxu1 }
 0x175   : > { %28817 = vst [vmem:[#allocation60_spill] sm:$0xff] %v21223_v22  ;;  %v21229_v15 = vpop.f32.mrb[51].mxu0  ;;  %v21231_v30 = vpop.f32.mrb[51].mxu1 }
 0x176   : > { %28818 = vst [vmem:[#allocation61_spill] sm:$0xff] %v21231_v30 }
 0x17a   : > { %v21237_v17 = vpop.f32.mrb[52].mxu0  ;;  %v21239_v32 = vpop.f32.mrb[52].mxu1 }
 0x17b   : > { %28819 = vst [vmem:[#allocation62_spill] sm:$0xff] %v21239_v32  ;;  %v21245_v22 = vpop.f32.mrb[53].mxu0  ;;  %v21247_v34 = vpop.f32.mrb[53].mxu1 }
 0x17c   : > { %28820 = vst [vmem:[#allocation63_spill] sm:$0xff] %v21247_v34  ;;  %v21253_v30 = vpop.f32.mrb[54].mxu0  ;;  %v21255_v55 = vpop.f32.mrb[54].mxu1 }
 0x17d   : > { %28821 = vst [vmem:[#allocation64_spill] sm:$0xff] %v21253_v30  ;;  %28822 = vst [vmem:[#allocation65_spill] sm:$0xff] %v21255_v55  ;;  %v21261_v32 = vpop.f32.mrb[55].mxu0  ;;  %v21263_v35 = vpop.f32.mrb[55].mxu1 }
 0x17e   : > { %28823 = vst [vmem:[#allocation66_spill] sm:$0xff] %v21261_v32  ;;  %28824 = vst [vmem:[#allocation67_spill] sm:$0xff] %v21263_v35 }
 0x182   : > { %v21269_v34 = vpop.f32.mrb[56].mxu0  ;;  %v21271_v8 = vpop.f32.mrb[56].mxu1 }
 0x183   : > { %28825 = vst [vmem:[#allocation68_spill] sm:$0xff] %v21269_v34  ;;  %28826 = vst [vmem:[#allocation69_spill] sm:$0xff] %v21271_v8  ;;  %v21277_v55 = vpop.f32.mrb[57].mxu0  ;;  %v21279_v10 = vpop.f32.mrb[57].mxu1 }
 0x184   : > { %28827 = vst [vmem:[#allocation70_spill] sm:$0xff] %v21277_v55  ;;  %28828 = vst [vmem:[#allocation71_spill] sm:$0xff] %v21279_v10  ;;  %v21285_v35 = vpop.f32.mrb[58].mxu0  ;;  %v21287_v23 = vpop.f32.mrb[58].mxu1 }
 0x185   : > { %28830 = vst [vmem:[#allocation72_spill] sm:$0xff] %v21285_v35  ;;  %28831 = vst [vmem:[#allocation73_spill] sm:$0xff] %v21287_v23  ;;  %v21293_v8 = vpop.f32.mrb[59].mxu0  ;;  %v21295_v56 = vpop.f32.mrb[59].mxu1 }
 0x186   : > { %28834 = vst [vmem:[#allocation74_spill] sm:$0xff] %v21293_v8  ;;  %28835 = vst [vmem:[#allocation75_spill] sm:$0xff] %v21295_v56 }
 0x18a   : > { %v21301_v10 = vpop.f32.mrb[60].mxu0  ;;  %v21303_v32 = vpop.f32.mrb[60].mxu1 }
 0x18b   : > { %28838 = vst [vmem:[#allocation76_spill] sm:$0xff] %v21301_v10  ;;  %28839 = vst [vmem:[#allocation77_spill] sm:$0xff] %v21303_v32  ;;  %v21309_v23 = vpop.f32.mrb[61].mxu0  ;;  %v21311_v34 = vpop.f32.mrb[61].mxu1 }
 0x18c   : > { %28842 = vst [vmem:[#allocation78_spill] sm:$0xff] %v21309_v23  ;;  %28843 = vst [vmem:[#allocation79_spill] sm:$0xff] %v21311_v34  ;;  %v21317_v56 = vpop.f32.mrb[62].mxu0  ;;  %v21319_v55 = vpop.f32.mrb[62].mxu1 }
 0x18d   : > { %28846 = vst [vmem:[#allocation80_spill] sm:$0xff] %v21317_v56  ;;  %28847 = vst [vmem:[#allocation81_spill] sm:$0xff] %v21319_v55  ;;  %v21325_v32 = vpop.f32.mrb[63].mxu0  ;;  %v21327_v35 = vpop.f32.mrb[63].mxu1  ;;  %v28856_v56 = vld [vmem:[#allocation42_spill] sm:$0xff] }
 0x18e   : > { %28850 = vst [vmem:[#allocation38_spill] sm:$0xff] %v21325_v32  ;;  %28851 = vst [vmem:[#allocation82_spill] sm:$0xff] %v21327_v35  ;;  %v28857_v11 = vmax.f32 %v20731_v38, %v28856_v56  ;;  %v28859_v35 = vld [vmem:[#allocation43_spill] sm:$0xff]  ;;  %v28865_v56 = vld [vmem:[#allocation5_spill] sm:$0xff] }
 0x18f   : > { %v28860_v23 = vmax.f32 %v28858_v18, %v28859_v35 }
 0x192   : > { %v1517_v34 = vpop.f32.mrb[64].mxu0  ;;  %v1630_v8 = vpop.f32.mrb[64].mxu1 }
 0x193   : > { %v21336_v30 = vmax.f32 %v28854_v20, %v1517_v34  ;;  %v21341_v25 = vmax.f32 %v28855_v24, %v1630_v8  ;;  %v1519_v55 = vpop.f32.mrb[65].mxu0  ;;  %v1632_v10 = vpop.f32.mrb[65].mxu1  ;;  %v28862_v20 = vmax.f32 %v20735_v40, %v21063_v58  ;;  %v28863_v8 = vld [vmem:[#allocation44_spill] sm:$0xff] }
 0x194   : > { %v21346_v32 = vmax.f32 %v28857_v11, %v1519_v55  ;;  %v21351_v57 = vmax.f32 %v28860_v23, %v1632_v10  ;;  %v1521_v36 = vpop.f32.mrb[66].mxu0  ;;  %v1634_v34 = vpop.f32.mrb[66].mxu1  ;;  %v28864_v2 = vmax.f32 %v20737_v41, %v28863_v8  ;;  %v28866_v11 = vld [vmem:[#allocation45_spill] sm:$0xff]  ;;  %v28868_v10 = vld [vmem:[#allocation6_spill] sm:$0xff] }
 0x195   : > { %v21356_v37 = vmax.f32 %v28862_v20, %v1521_v36  ;;  %v1523_v38 = vpop.f32.mrb[67].mxu0  ;;  %v1636_v55 = vpop.f32.mrb[67].mxu1  ;;  %v28867_v24 = vmax.f32 %v28865_v56, %v28866_v11  ;;  %v28869_v23 = vld [vmem:[#allocation46_spill] sm:$0xff]  ;;  %v28871_v36 = vmax.f32 %v20747_v44, %v21103_v27  ;;  %v28874_v56 = vmax.f32 %v20751_v46, %v21111_v19 }
 0x196   : > { %28861 = vst [vmem:[#allocation42_spill] sm:$0xff] %v21351_v57  ;;  %v21361_v3 = vmax.f32 %v28864_v2, %v1634_v34  ;;  %v28870_v18 = vmax.f32 %v28868_v10, %v28869_v23  ;;  %v28872_v34 = vld [vmem:[#allocation47_spill] sm:$0xff] }
 0x197   : > { %v21366_v35 = vmax.f32 %v28867_v24, %v1523_v38  ;;  %v28873_v20 = vmax.f32 %v20749_v45, %v28872_v34  ;;  %v28876_v24 = vld [vmem:[#allocation48_spill] sm:$0xff] }
 0x198   : > { %v21371_v57 = vmax.f32 %v28870_v18, %v1636_v55  ;;  %v28875_v55 = vld [vmem:[#allocation7_spill] sm:$0xff]  ;;  %v28878_v18 = vmax.f32 %v20755_v48, %v21119_v42 }
 0x199   : > { %v28877_v10 = vmax.f32 %v28875_v55, %v28876_v24  ;;  %v28884_v55 = vmax.f32 %v20791_v60, %v21141_v39 }
 0x19a   : > { %v1527_v40 = vpop.f32.mrb[68].mxu0  ;;  %v1640_v58 = vpop.f32.mrb[68].mxu1 }
 0x19b   : > { %v21376_v41 = vmax.f32 %v28871_v36, %v1527_v40  ;;  %v21381_v8 = vmax.f32 %v28873_v20, %v1640_v58  ;;  %v1529_v2 = vpop.f32.mrb[69].mxu0  ;;  %v1642_v38 = vpop.f32.mrb[69].mxu1  ;;  %v28879_v40 = vld [vmem:[#allocation8_spill] sm:$0xff]  ;;  %v28880_v58 = vld [vmem:[#allocation49_spill] sm:$0xff]  ;;  %v28882_v20 = vmax.f32 %v20765_v52, %v21130_v26 }
 0x19c   : > { %v21386_v11 = vmax.f32 %v28874_v56, %v1529_v2  ;;  %v21391_v23 = vmax.f32 %v28877_v10, %v1642_v38  ;;  %v1531_v44 = vpop.f32.mrb[70].mxu0  ;;  %v1644_v27 = vpop.f32.mrb[70].mxu1  ;;  %v28881_v36 = vmax.f32 %v28879_v40, %v28880_v58  ;;  %v28883_v38 = vmax.f32 %v20767_v53, %v21132_v43  ;;  %v28885_v10 = vld [vmem:[#allocation9_spill] sm:$0xff]  ;;  %v28889_v53 = vld [vmem:[#allocation10_spill] sm:$0xff]  ;;  %v28890_v58 = vld [vmem:[#allocation51_spill] sm:$0xff] }
 0x19d   : > { %v21396_v45 = vmax.f32 %v28878_v18, %v1531_v44  ;;  %v1533_v46 = vpop.f32.mrb[71].mxu0  ;;  %v1646_v19 = vpop.f32.mrb[71].mxu1  ;;  %v28886_v44 = vld [vmem:[#allocation50_spill] sm:$0xff]  ;;  %v28888_v40 = vmax.f32 %v20795_v62, %v21149_v28 }
 0x19e   : > { %v21401_v34 = vmax.f32 %v28881_v36, %v1644_v27  ;;  %v21406_v2 = vmax.f32 %v28882_v20, %v1533_v46  ;;  %v21411_v56 = vmax.f32 %v28883_v38, %v1646_v19  ;;  %v28887_v27 = vmax.f32 %v28885_v10, %v28886_v44  ;;  %v28893_v38 = vld [vmem:[#allocation11_spill] sm:$0xff] }
 0x19f   : > { %v28891_v36 = vmax.f32 %v28889_v53, %v28890_v58  ;;  %v28892_v19 = vmax.f32 %v20799_v0, %v21157_v50  ;;  %v28896_v10 = vmax.f32 %v20809_v4, %v21165_v59  ;;  %v28900_v53 = vmax.f32 %v20837_v12, %v21173_v49 }
 0x1a2   : > { %v1537_v42 = vpop.f32.mrb[72].mxu0  ;;  %v1650_v48 = vpop.f32.mrb[72].mxu1 }
 0x1a3   : > { %v21416_v24 = vmax.f32 %v28884_v55, %v1537_v42  ;;  %v21421_v18 = vmax.f32 %v28887_v27, %v1650_v48  ;;  %v1539_v52 = vpop.f32.mrb[73].mxu0  ;;  %v1652_v26 = vpop.f32.mrb[73].mxu1  ;;  %v28894_v42 = vld [vmem:[#allocation52_spill] sm:$0xff] }
 0x1a4   : > { %v21426_v43 = vmax.f32 %v28888_v40, %v1539_v52  ;;  %v21431_v46 = vmax.f32 %v28891_v36, %v1652_v26  ;;  %v1541_v60 = vpop.f32.mrb[74].mxu0  ;;  %v1654_v39 = vpop.f32.mrb[74].mxu1  ;;  %v28895_v48 = vmax.f32 %v28893_v38, %v28894_v42  ;;  %v28897_v27 = vld [vmem:[#allocation12_spill] sm:$0xff]  ;;  %v28898_v52 = vld [vmem:[#allocation53_spill] sm:$0xff]  ;;  %v28904_v38 = vmax.f32 %v20841_v14, %v21181_v47 }
 0x1a5   : > { %v21436_v20 = vmax.f32 %v28892_v19, %v1541_v60  ;;  %v1543_v62 = vpop.f32.mrb[75].mxu0  ;;  %v1656_v28 = vpop.f32.mrb[75].mxu1  ;;  %v28899_v26 = vmax.f32 %v28897_v27, %v28898_v52  ;;  %v28901_v36 = vld [vmem:[#allocation13_spill] sm:$0xff]  ;;  %v28902_v60 = vld [vmem:[#allocation54_spill] sm:$0xff]  ;;  %v28908_v27 = vmax.f32 %v20845_v16, %v21189_v61 }
 0x1a6   : > { %v21441_v55 = vmax.f32 %v28895_v48, %v1654_v39  ;;  %v21446_v44 = vmax.f32 %v28896_v10, %v1543_v62  ;;  %v28903_v39 = vmax.f32 %v28901_v36, %v28902_v60  ;;  %v28905_v48 = vld [vmem:[#allocation14_spill] sm:$0xff]  ;;  %v28906_v62 = vld [vmem:[#allocation55_spill] sm:$0xff]  ;;  %v28912_v36 = vmax.f32 %v20855_v21, %v21197_v63 }
 0x1a7   : > { %v21451_v40 = vmax.f32 %v28899_v26, %v1656_v28  ;;  %v28907_v28 = vmax.f32 %v28905_v48, %v28906_v62  ;;  %v28909_v26 = vld [vmem:[#allocation15_spill] sm:$0xff]  ;;  %v28916_v48 = vmax.f32 %v20883_v29, %v21205_v1 }
 0x1aa   : > { %v1547_v0 = vpop.f32.mrb[76].mxu0  ;;  %v1660_v50 = vpop.f32.mrb[76].mxu1 }
 0x1ab   : > { %v21456_v58 = vmax.f32 %v28900_v53, %v1547_v0  ;;  %v21461_v19 = vmax.f32 %v28903_v39, %v1660_v50  ;;  %v1549_v4 = vpop.f32.mrb[77].mxu0  ;;  %v1662_v59 = vpop.f32.mrb[77].mxu1  ;;  %v28910_v0 = vld [vmem:[#allocation56_spill] sm:$0xff] }
 0x1ac   : > { %v21466_v42 = vmax.f32 %v28904_v38, %v1549_v4  ;;  %v21471_v10 = vmax.f32 %v28907_v28, %v1662_v59  ;;  %v1551_v49 = vpop.f32.mrb[78].mxu0  ;;  %v1664_v12 = vpop.f32.mrb[78].mxu1  ;;  %v28911_v50 = vmax.f32 %v28909_v26, %v28910_v0  ;;  %v28913_v39 = vld [vmem:[#allocation16_spill] sm:$0xff]  ;;  %v28914_v4 = vld [vmem:[#allocation57_spill] sm:$0xff]  ;;  %v28920_v26 = vmax.f32 %v20887_v31, %v21213_v5 }
 0x1ad   : > { %v21476_v52 = vmax.f32 %v28908_v27, %v1551_v49  ;;  %v1553_v47 = vpop.f32.mrb[79].mxu0  ;;  %v1666_v14 = vpop.f32.mrb[79].mxu1  ;;  %v28915_v59 = vmax.f32 %v28913_v39, %v28914_v4  ;;  %v28917_v28 = vld [vmem:[#allocation17_spill] sm:$0xff]  ;;  %v28918_v49 = vld [vmem:[#allocation58_spill] sm:$0xff]  ;;  %v28924_v39 = vmax.f32 %v20891_v33, %v21221_v13 }
 0x1ae   : > { %v21481_v53 = vmax.f32 %v28911_v50, %v1664_v12  ;;  %v21486_v60 = vmax.f32 %v28912_v36, %v1553_v47  ;;  %v28919_v12 = vmax.f32 %v28917_v28, %v28918_v49  ;;  %v28921_v50 = vld [vmem:[#allocation18_spill] sm:$0xff]  ;;  %v28922_v47 = vld [vmem:[#allocation59_spill] sm:$0xff]  ;;  %v28928_v28 = vmax.f32 %v20901_v54, %v21229_v15 }
 0x1af   : > { %v21491_v38 = vmax.f32 %v28915_v59, %v1666_v14  ;;  %v28923_v14 = vmax.f32 %v28921_v50, %v28922_v47  ;;  %v28925_v59 = vld [vmem:[#allocation19_spill] sm:$0xff]  ;;  %v28932_v50 = vmax.f32 %v20927_v6, %v21237_v17 }
 0x1b2   : > { %v1557_v61 = vpop.f32.mrb[80].mxu0  ;;  %v1670_v16 = vpop.f32.mrb[80].mxu1 }
 0x1b3   : > { %v21496_v62 = vmax.f32 %v28916_v48, %v1557_v61  ;;  %v21501_v27 = vmax.f32 %v28919_v12, %v1670_v16  ;;  %v1559_v63 = vpop.f32.mrb[81].mxu0  ;;  %v1672_v21 = vpop.f32.mrb[81].mxu1  ;;  %v28926_v61 = vld [vmem:[#allocation60_spill] sm:$0xff] }
 0x1b4   : > { %v21506_v0 = vmax.f32 %v28920_v26, %v1559_v63  ;;  %v21511_v36 = vmax.f32 %v28923_v14, %v1672_v21  ;;  %v1561_v1 = vpop.f32.mrb[82].mxu0  ;;  %v1674_v29 = vpop.f32.mrb[82].mxu1  ;;  %v28927_v16 = vmax.f32 %v28925_v59, %v28926_v61  ;;  %v28929_v12 = vld [vmem:[#allocation20_spill] sm:$0xff]  ;;  %v28930_v63 = vld [vmem:[#allocation61_spill] sm:$0xff]  ;;  %v28936_v59 = vmax.f32 %v20931_v7, %v21245_v22 }
 0x1b5   : > { %v21516_v4 = vmax.f32 %v28924_v39, %v1561_v1  ;;  %v1563_v5 = vpop.f32.mrb[83].mxu0  ;;  %v1676_v31 = vpop.f32.mrb[83].mxu1  ;;  %v28931_v21 = vmax.f32 %v28929_v12, %v28930_v63  ;;  %v28933_v14 = vld [vmem:[#allocation21_spill] sm:$0xff]  ;;  %v28934_v1 = vld [vmem:[#allocation62_spill] sm:$0xff]  ;;  %v28941_v12 = vld [vmem:[#allocation64_spill] sm:$0xff] }
 0x1b6   : > { %v21521_v48 = vmax.f32 %v28927_v16, %v1674_v29  ;;  %v21526_v49 = vmax.f32 %v28928_v28, %v1563_v5  ;;  %v28935_v29 = vmax.f32 %v28933_v14, %v28934_v1  ;;  %v28937_v16 = vld [vmem:[#allocation22_spill] sm:$0xff]  ;;  %v28938_v5 = vld [vmem:[#allocation63_spill] sm:$0xff]  ;;  %v28942_v63 = vmax.f32 %v20935_v9, %v28941_v12  ;;  %v28948_v1 = vld [vmem:[#allocation24_spill] sm:$0xff] }
 0x1b7   : > { %v21531_v26 = vmax.f32 %v28931_v21, %v1676_v31  ;;  %v28939_v31 = vmax.f32 %v28937_v16, %v28938_v5  ;;  %v28953_v16 = vld [vmem:[#allocation67_spill] sm:$0xff]  ;;  %v28956_v12 = vld [vmem:[#allocation26_spill] sm:$0xff] }
 0x1ba   : > { %v1567_v13 = vpop.f32.mrb[84].mxu0  ;;  %v1680_v33 = vpop.f32.mrb[84].mxu1 }
 0x1bb   : > { %v21536_v47 = vmax.f32 %v28932_v50, %v1567_v13  ;;  %v21541_v39 = vmax.f32 %v28935_v29, %v1680_v33  ;;  %v1569_v15 = vpop.f32.mrb[85].mxu0  ;;  %v1682_v54 = vpop.f32.mrb[85].mxu1  ;;  %v28944_v13 = vld [vmem:[#allocation23_spill] sm:$0xff]  ;;  %v28945_v33 = vld [vmem:[#allocation65_spill] sm:$0xff]  ;;  %v28949_v29 = vld [vmem:[#allocation66_spill] sm:$0xff] }
 0x1bc   : > { %v21546_v61 = vmax.f32 %v28936_v59, %v1569_v15  ;;  %v21551_v28 = vmax.f32 %v28939_v31, %v1682_v54  ;;  %v1571_v17 = vpop.f32.mrb[86].mxu0  ;;  %v1684_v6 = vpop.f32.mrb[86].mxu1  ;;  %v28946_v50 = vmax.f32 %v28944_v13, %v28945_v33  ;;  %v28950_v15 = vmax.f32 %v28948_v1, %v28949_v29  ;;  %v28952_v54 = vld [vmem:[#allocation25_spill] sm:$0xff]  ;;  %v28964_v29 = vld [vmem:[#allocation28_spill] sm:$0xff] }
 0x1bd   : > { %v21556_v21 = vmax.f32 %v28942_v63, %v1571_v17  ;;  %v1573_v22 = vpop.f32.mrb[87].mxu0  ;;  %v1686_v7 = vpop.f32.mrb[87].mxu1  ;;  %v28954_v5 = vmax.f32 %v28952_v54, %v28953_v16  ;;  %v28957_v63 = vld [vmem:[#allocation68_spill] sm:$0xff]  ;;  %v28961_v33 = vld [vmem:[#allocation69_spill] sm:$0xff]  ;;  %v28969_v16 = vld [vmem:[#allocation71_spill] sm:$0xff] }
 0x1be   : > { %28940 = vst [vmem:[#allocation4_spill] sm:$0xff] %v21551_v28  ;;  %v21561_v14 = vmax.f32 %v28946_v50, %v1684_v6  ;;  %v21566_v59 = vmax.f32 %v28950_v15, %v1573_v22  ;;  %v28960_v6 = vld [vmem:[#allocation27_spill] sm:$0xff]  ;;  %v28965_v15 = vld [vmem:[#allocation70_spill] sm:$0xff] }
 0x1bf   : > { %28943 = vst [vmem:[#allocation43_spill] sm:$0xff] %v21556_v21  ;;  %v21571_v31 = vmax.f32 %v28954_v5, %v1686_v7  ;;  %v28958_v21 = vmax.f32 %v28956_v12, %v28957_v63  ;;  %v28962_v50 = vmax.f32 %v28960_v6, %v28961_v33  ;;  %v28968_v7 = vld [vmem:[#allocation29_spill] sm:$0xff]  ;;  %v28973_v63 = vld [vmem:[#allocation72_spill] sm:$0xff] }
 0x1c0   : > { %28947 = vst [vmem:[#allocation44_spill] sm:$0xff] %v21561_v14  ;;  %28951 = vst [vmem:[#allocation5_spill] sm:$0xff] %v21566_v59  ;;  %v28966_v59 = vmax.f32 %v28964_v29, %v28965_v15  ;;  %v28970_v5 = vmax.f32 %v28968_v7, %v28969_v16  ;;  %v28977_v33 = vld [vmem:[#allocation73_spill] sm:$0xff]  ;;  %v28980_v15 = vld [vmem:[#allocation32_spill] sm:$0xff] }
 0x1c1   : > { %28955 = vst [vmem:[#allocation45_spill] sm:$0xff] %v21571_v31  ;;  %v28984_v16 = vld [vmem:[#allocation33_spill] sm:$0xff] }
 0x1c2   : > { %v1577_v9 = vpop.f32.mrb[88].mxu0  ;;  %v1690_v17 = vpop.f32.mrb[88].mxu1 }
 0x1c3   : > { %v21576_v13 = vmax.f32 %v28958_v21, %v1577_v9  ;;  %v21581_v14 = vmax.f32 %v28962_v50, %v1690_v17  ;;  %v1579_v1 = vpop.f32.mrb[89].mxu0  ;;  %v1692_v22 = vpop.f32.mrb[89].mxu1  ;;  %v28972_v9 = vld [vmem:[#allocation30_spill] sm:$0xff]  ;;  %v28976_v17 = vld [vmem:[#allocation31_spill] sm:$0xff] }
 0x1c4   : > { %v21586_v54 = vmax.f32 %v28966_v59, %v1579_v1  ;;  %v21591_v31 = vmax.f32 %v28970_v5, %v1692_v22  ;;  %v1581_v12 = vpop.f32.mrb[90].mxu0  ;;  %v1694_v21 = vpop.f32.mrb[90].mxu1  ;;  %v28978_v50 = vmax.f32 %v28976_v17, %v28977_v33  ;;  %v2162_v1 = vlaneseq  ;;  %v28985_v5 = vld [vmem:[#allocation75_spill] sm:$0xff] }
 0x1c5   : > { %28959 = vst [vmem:[#allocation6_spill] sm:$0xff] %v21576_v13  ;;  %28963 = vst [vmem:[#allocation46_spill] sm:$0xff] %v21581_v14  ;;  %v28974_v13 = vmax.f32 %v28972_v9, %v28973_v63  ;;  %v1583_v29 = vpop.f32.mrb[91].mxu0  ;;  %v1696_v59 = vpop.f32.mrb[91].mxu1  ;;  %v28989_v63 = vld [vmem:[#allocation34_spill] sm:$0xff] }
 0x1c6   : > { %28967 = vst [vmem:[#allocation47_spill] sm:$0xff] %v21586_v54  ;;  %28971 = vst [vmem:[#allocation7_spill] sm:$0xff] %v21591_v31  ;;  %v21601_v14 = vmax.f32 %v28978_v50, %v1694_v21  ;;  %v28981_v54 = vld [vmem:[#allocation74_spill] sm:$0xff]  ;;  %v28986_v31 = vmax.f32 %v28984_v16, %v28985_v5  ;;  %v28990_v21 = vld [vmem:[#allocation76_spill] sm:$0xff] }
 0x1c7   : > { %v21596_v6 = vmax.f32 %v28974_v13, %v1581_v12  ;;  %v28982_v7 = vmax.f32 %v28980_v15, %v28981_v54  ;;  %v21613_v13 = vshrl.u32 %v2162_v1, 7  ;;  %v28991_v17 = vmax.f32 %v28989_v63, %v28990_v21  ;;  %v28993_v50 = vld [vmem:[#allocation35_spill] sm:$0xff]  ;;  %v28998_v16 = vld [vmem:[#allocation78_spill] sm:$0xff]  ;;  %v29001_v1 = vld [vmem:[#allocation37_spill] sm:$0xff] }
 0x1c8   : > { %28979 = vst [vmem:[#allocation8_spill] sm:$0xff] %v21601_v14  ;;  %v21611_v28 = vmax.f32 %v28986_v31, %v1696_v59  ;;  %v28994_v14 = vld [vmem:[#allocation77_spill] sm:$0xff]  ;;  %v29002_v5 = vld [vmem:[#allocation79_spill] sm:$0xff]  ;;  %v29005_v21 = vld [vmem:[#allocation80_spill] sm:$0xff] }
 0x1c9   : > { %28975 = vst [vmem:[#allocation48_spill] sm:$0xff] %v21596_v6  ;;  %v21606_v22 = vmax.f32 %v28982_v7, %v1583_v29  ;;  %28988 = vst [vmem:[#allocation50_spill] sm:$0xff] %v21613_v13  ;;  %v28995_v6 = vmax.f32 %v28993_v50, %v28994_v14  ;;  %v28997_v7 = vld [vmem:[#allocation36_spill] sm:$0xff] }
 0x1ca   : > { %28987 = vst [vmem:[#allocation9_spill] sm:$0xff] %v21611_v28  ;;  %v1587_v12 = vpop.f32.mrb[92].mxu0  ;;  %v1700_v9 = vpop.f32.mrb[92].mxu1  ;;  %v28999_v31 = vmax.f32 %v28997_v7, %v28998_v16  ;;  %v29003_v28 = vmax.f32 %v29001_v1, %v29002_v5  ;;  %v2160_v16 = vld [vmem:[%s28563_s2] sm:$0xf] }
 0x1cb   : > { %28983 = vst [vmem:[#allocation49_spill] sm:$0xff] %v21606_v22  ;;  %v21618_v33 = vmax.f32 %v28991_v17, %v1587_v12  ;;  %v21623_v54 = vmax.f32 %v28995_v6, %v1700_v9  ;;  %v1589_v29 = vpop.f32.mrb[93].mxu0  ;;  %v1702_v15 = vpop.f32.mrb[93].mxu1  ;;  %v29006_v17 = vmax.f32 %v28848_v51, %v29005_v21  ;;  %v29008_v6 = vld [vmem:[#allocation39_spill] sm:$0xff]  ;;  %v29009_v9 = vld [vmem:[#allocation81_spill] sm:$0xff]  ;;  %v29014_v51 = vld [vmem:[#allocation38_spill] sm:$0xff] }
 0x1cc   : > { %v21628_v59 = vmax.f32 %v28999_v31, %v1589_v29  ;;  %v21633_v22 = vmax.f32 %v29003_v28, %v1702_v15  ;;  %v1591_v63 = vpop.f32.mrb[94].mxu0  ;;  %v1704_v12 = vpop.f32.mrb[94].mxu1  ;;  %v29010_v50 = vmax.f32 %v29008_v6, %v29009_v9  ;;  %v21649_v28 = vsub.s32 0, %v21613_v13  ;;  %v29013_v31 = vld [vmem:[#allocation40_spill] sm:$0xff]  ;;  %v29018_v21 = vld [vmem:[#allocation82_spill] sm:$0xff] }
 0x1cd   : > { %28992 = vst [vmem:[#allocation10_spill] sm:$0xff] %v21618_v33  ;;  %28996 = vst [vmem:[#allocation51_spill] sm:$0xff] %v21623_v54  ;;  %v21638_v14 = vmax.f32 %v29006_v17, %v1591_v63  ;;  %v1593_v7 = vpop.f32.mrb[95].mxu0  ;;  %v1706_v29 = vpop.f32.mrb[95].mxu1  ;;  %v28655_v15 = vsub.s32 2, %v21613_v13  ;;  %v29015_v1 = vmax.f32 %v29013_v31, %v29014_v51  ;;  %v29017_v63 = vld [vmem:[#allocation41_spill] sm:$0xff] }
 0x1ce   : > { %29000 = vst [vmem:[#allocation11_spill] sm:$0xff] %v21628_v59  ;;  %29004 = vst [vmem:[#allocation52_spill] sm:$0xff] %v21633_v22  ;;  %v21643_v54 = vmax.f32 %v29010_v50, %v1704_v12  ;;  %v29019_v12 = vmax.f32 %v29017_v63, %v29018_v21  ;;  %v21663_v6 = vsub.s32 1, %v21613_v13  ;;  %v28660_v9 = vsub.s32 3, %v21613_v13 }
 0x1cf   : > { %29007 = vst [vmem:[#allocation12_spill] sm:$0xff] %v21638_v14  ;;  %29012 = vst [vmem:[#allocation13_spill] sm:$0xff] %v21649_v28  ;;  %v21655_v5 = vmax.f32 %v29015_v1, %v1593_v7  ;;  %v21667_v50 = vrot.slane %v2160_v16, %v21649_v28 }
 0x1d0   : > { %29011 = vst [vmem:[#allocation53_spill] sm:$0xff] %v21643_v54  ;;  %v21660_v17 = vmax.f32 %v29019_v12, %v1706_v29  ;;  %29021 = vst [vmem:[#allocation55_spill] sm:$0xff] %v21663_v6  ;;  %v21671_v54 = vrot.slane %v2160_v16, %v28655_v15  ;;  %v21674_v51 = vrot.slane %v2160_v16, %v21663_v6 }
 0x1d1   : > { %29016 = vst [vmem:[#allocation54_spill] sm:$0xff] %v21655_v5  ;;  %v21678_v29 = vrot.slane %v2160_v16, %v28660_v9 }
 0x1d2   : > { %29020 = vst [vmem:[#allocation14_spill] sm:$0xff] %v21660_v17  ;;  %v1807_v31 = vpop.f32.mrb[96].mxu0  ;;  %v1920_v7 = vpop.f32.mrb[96].mxu1  ;;  %v29022_v17 = vld [vmem:[#allocation42_spill] sm:$0xff] }
 0x1d3   : > { %v1999_v1 = vmax.f32 %v21336_v30, %v1807_v31  ;;  %v2001_v63 = vmax.f32 %v21341_v25, %v1920_v7  ;;  %v1809_v21 = vpop.f32.mrb[97].mxu0  ;;  %v1922_v12 = vpop.f32.mrb[97].mxu1 }
 0x1d4   : > { %v2000_v28 = vmax.f32 %v21346_v32, %v1809_v21  ;;  %v2002_v15 = vmax.f32 %v29022_v17, %v1922_v12  ;;  %v1811_v5 = vpop.f32.mrb[98].mxu0  ;;  %v1924_v14 = vpop.f32.mrb[98].mxu1 }
 0x1d5   : > { %v2182_v22 = vadd.f32 %v21667_v50, %v1999_v1  ;;  %v2184_v6 = vadd.f32 %v21671_v54, %v2001_v63  ;;  %v2003_v13 = vmax.f32 %v21356_v37, %v1811_v5  ;;  %v2005_v16 = vmax.f32 %v21361_v3, %v1924_v14  ;;  %v1813_v9 = vpop.f32.mrb[99].mxu0  ;;  %v1926_v30 = vpop.f32.mrb[99].mxu1 }
 0x1d6   : > { %v2183_v25 = vadd.f32 %v21674_v51, %v2000_v28  ;;  %v2185_v31 = vadd.f32 %v21678_v29, %v2002_v15  ;;  %v2004_v32 = vmax.f32 %v21366_v35, %v1813_v9  ;;  %v2006_v17 = vmax.f32 %v21371_v57, %v1926_v30 }
 0x1d7   : > { %v2246_v7 = vmax.f32 %v2182_v22, 0.0  ;;  %v2248_v21 = vmax.f32 %v2184_v6, 0.0  ;;  %v2186_v1 = vadd.f32 %v21667_v50, %v2003_v13  ;;  %v2188_v63 = vadd.f32 %v21671_v54, %v2005_v16 }
 0x1d8   : > { %v2247_v12 = vmax.f32 %v2183_v25, 0.0  ;;  %v2249_v37 = vmax.f32 %v2185_v31, 0.0  ;;  %v2187_v3 = vadd.f32 %v21674_v51, %v2004_v32  ;;  %v2189_v14 = vadd.f32 %v21678_v29, %v2006_v17 }
 0x1d9   : > { %v2310_v5 = vmul.f32 0.0, %v2246_v7  ;;  %v2312_v28 = vmul.f32 0.0, %v2248_v21  ;;  %v2250_v59 = vmax.f32 %v2186_v1, 0.0  ;;  %v2252_v15 = vmax.f32 %v2188_v63, 0.0 }
 0x1da   : > { %v2311_v33 = vmul.f32 0.0, %v2247_v12  ;;  %v2313_v35 = vmul.f32 0.0, %v2249_v37  ;;  %v2251_v9 = vmax.f32 %v2187_v3, 0.0  ;;  %v2253_v57 = vmax.f32 %v2189_v14, 0.0  ;;  %v1817_v22 = vpop.f32.mrb[100].mxu0  ;;  %v1930_v6 = vpop.f32.mrb[100].mxu1 }
 0x1db   : > { %v21696_v30 = vpack.c.bf16 %v2250_v59, %v2310_v5  ;;  %v21698_v13 = vpack.c.bf16 %v2252_v15, %v2312_v28  ;;  %v2007_v16 = vmax.f32 %v21376_v41, %v1817_v22  ;;  %v2009_v25 = vmax.f32 %v21381_v8, %v1930_v6  ;;  %v1819_v31 = vpop.f32.mrb[101].mxu0  ;;  %v1932_v32 = vpop.f32.mrb[101].mxu1  ;;  %v17633_v37 = vld [vmem:[%s28564_s3 + $0x200] ss:$16 sps:$4 sm:$0xff]   ;;  %v17636_v41 = vld [vmem:[%s28564_s3 + $0x208] ss:$16 sps:$4 sm:$0xff]  }
 0x1dc   : > { %v21702_v17 = vpack.c.bf16 %v2251_v9, %v2311_v33  ;;  %v21704_v7 = vpack.c.bf16 %v2253_v57, %v2313_v35  ;;  %v2008_v21 = vmax.f32 %v21386_v11, %v1819_v31  ;;  %v2010_v1 = vmax.f32 %v21391_v23, %v1932_v32  ;;  %v1821_v63 = vpop.f32.mrb[102].mxu0  ;;  %v1934_v12 = vpop.f32.mrb[102].mxu1  ;;  %v17641_v5 = vld [vmem:[%s28564_s3 + $0x224] ss:$16 sps:$4 sm:$0xff]   ;;  %v17644_v28 = vld [vmem:[%s28564_s3 + $0x22c] ss:$16 sps:$4 sm:$0xff]  }
 0x1dd   : > { %29023 = vst [vmem:[#allocation15_spill] sm:$0xff] %v21696_v30  ;;  %v2190_v8 = vadd.f32 %v21667_v50, %v2007_v16  ;;  %v2192_v33 = vadd.f32 %v21671_v54, %v2009_v25  ;;  %v2011_v3 = vmax.f32 %v21396_v45, %v1821_v63  ;;  %v2013_v11 = vmax.f32 %v21401_v34, %v1934_v12  ;;  %v1823_v14 = vpop.f32.mrb[103].mxu0  ;;  %v1936_v23 = vpop.f32.mrb[103].mxu1  ;;  %v17639_v34 = vld [vmem:[%s28564_s3 + $0x220] ss:$16 sps:$4 sm:$0xff]  }
 0x1de   : > { %29024 = vst [vmem:[#allocation56_spill] sm:$0xff] %v21702_v17  ;;  %29025 = vst [vmem:[#allocation16_spill] sm:$0xff] %v21704_v7  ;;  %v2191_v35 = vadd.f32 %v21674_v51, %v2008_v21  ;;  %v2193_v22 = vadd.f32 %v21678_v29, %v2010_v1  ;;  %v2012_v6 = vmax.f32 %v21406_v2, %v1823_v14  ;;  %5160 = vmatprep.mubr.bf16.mxu0 %v21702_v17 }
 0x1df   : > { %v2014_v45 = vmax.f32 %v21411_v56, %v1936_v23  ;;  %v2254_v16 = vmax.f32 %v2190_v8, 0.0  ;;  %v2256_v25 = vmax.f32 %v2192_v33, 0.0  ;;  %v21733_v31 = vadd.f32 %v21667_v50, %v2011_v3  ;;  %5598 = vmatprep.mubr.bf16.mxu1 %v21702_v17  ;;  %5161 = vmatmul.mubr.bf16.vlgmr.msra.gmra.mrb[128].mxu0 %v21696_v30  ;;  %v17642_v3 = vld [vmem:[%s28564_s3 + $0x228] ss:$16 sps:$4 sm:$0xff]  }
 0x1e0   : > { %v21736_v32 = vadd.f32 %v21671_v54, %v2013_v11  ;;  %v2255_v2 = vmax.f32 %v2191_v35, 0.0  ;;  %v2257_v56 = vmax.f32 %v2193_v22, 0.0  ;;  %v21741_v21 = vadd.f32 %v21674_v51, %v2012_v6  ;;  %5202 = vmatpush1.bf16.msra.mxu0 %v17633_v37  ;;  %5599 = vmatmul.mubr.bf16.vlgmr.msra.gmra.mrb[128].mxu1 %v21696_v30  ;;  %v29054_v30 = vld [vmem:[#allocation8_spill] sm:$0xff] }
 0x1e1   : > { %v21744_v1 = vadd.f32 %v21678_v29, %v2014_v45  ;;  %v21747_v63 = vpack.c.bf16 %v2254_v16, %v2250_v59  ;;  %v21749_v12 = vpack.c.bf16 %v2256_v25, %v2252_v15  ;;  %v2258_v8 = vmax.f32 %v21733_v31, 0.0  ;;  %5640 = vmatpush1.bf16.msra.mxu1 %v17636_v41  ;;  %5203 = vmatprep.subr.bf16.mxu0 %v17641_v5  ;;  %v17647_v41 = vld [vmem:[%s28564_s3 + $0x244] ss:$16 sps:$4 sm:$0xff]   ;;  %v17650_v45 = vld [vmem:[%s28564_s3 + $0x24c] ss:$16 sps:$4 sm:$0xff]  }
 0x1e2   : > { %v2260_v33 = vmax.f32 %v21736_v32, 0.0  ;;  %v21756_v11 = vpack.c.bf16 %v2255_v2, %v2251_v9  ;;  %v21758_v14 = vpack.c.bf16 %v2257_v56, %v2253_v57  ;;  %v2259_v37 = vmax.f32 %v21741_v21, 0.0  ;;  %v1827_v15 = vpop.f32.mrb[104].mxu0  ;;  %v1940_v23 = vpop.f32.mrb[104].mxu1  ;;  %5641 = vmatprep.subr.bf16.mxu1 %v17644_v28 }
 0x1e3   : > { %29026 = vst [vmem:[#allocation57_spill] sm:$0xff] %v21749_v12  ;;  %v2261_v59 = vmax.f32 %v21744_v1, 0.0  ;;  %v21765_v5 = vpack.c.bf16 %v2258_v8, %v2254_v16  ;;  %v2015_v9 = vmax.f32 %v21416_v24, %v1827_v15  ;;  %v2017_v57 = vmax.f32 %v21421_v18, %v1940_v23  ;;  %v1829_v22 = vpop.f32.mrb[105].mxu0  ;;  %v1942_v6 = vpop.f32.mrb[105].mxu1 }
 0x1e4   : > { %v21767_v35 = vpack.c.bf16 %v2260_v33, %v2256_v25  ;;  %v21774_v31 = vpack.c.bf16 %v2259_v37, %v2255_v2  ;;  %v2016_v32 = vmax.f32 %v21426_v43, %v1829_v22  ;;  %v2018_v16 = vmax.f32 %v21431_v46, %v1942_v6  ;;  %5204 = vmatpush1.bf16.msra.mxu0 %v17639_v34  ;;  %v1831_v25 = vpop.f32.mrb[106].mxu0  ;;  %v1944_v21 = vpop.f32.mrb[106].mxu1  ;;  %v17645_v43 = vld [vmem:[%s28564_s3 + $0x240] ss:$16 sps:$4 sm:$0xff]   ;;  %v17648_v46 = vld [vmem:[%s28564_s3 + $0x248] ss:$16 sps:$4 sm:$0xff]  }
 0x1e5   : > { %29027 = vst [vmem:[#allocation17_spill] sm:$0xff] %v21765_v5  ;;  %v21776_v28 = vpack.c.bf16 %v2261_v59, %v2257_v56  ;;  %v2198_v24 = vadd.f32 %v21667_v50, %v2015_v9  ;;  %v2200_v18 = vadd.f32 %v21671_v54, %v2017_v57  ;;  %5642 = vmatpush1.bf16.msra.mxu1 %v17642_v3  ;;  %v1833_v2 = vpop.f32.mrb[107].mxu0  ;;  %v1946_v23 = vpop.f32.mrb[107].mxu1  ;;  %v17656_v9 = vld [vmem:[%s28564_s3 + $0x26c] ss:$16 sps:$4 sm:$0xff]  }
 0x1e6   : > { %29028 = vst [vmem:[#allocation58_spill] sm:$0xff] %v21774_v31  ;;  %v2019_v1 = vmax.f32 %v21436_v20, %v1831_v25  ;;  %v2021_v15 = vmax.f32 %v21441_v55, %v1944_v21  ;;  %v2199_v34 = vadd.f32 %v21674_v51, %v2016_v32  ;;  %v2201_v56 = vadd.f32 %v21678_v29, %v2018_v16  ;;  %v17653_v55 = vld [vmem:[%s28564_s3 + $0x264] ss:$16 sps:$4 sm:$0xff]  }
 0x1e7   : > { %v2020_v3 = vmax.f32 %v21446_v44, %v1833_v2  ;;  %v2022_v20 = vmax.f32 %v21451_v40, %v1946_v23  ;;  %5170 = vmatprep.mubr.bf16.mxu0 %v21774_v31  ;;  %v2262_v57 = vmax.f32 %v2198_v24, 0.0  ;;  %v2264_v22 = vmax.f32 %v2200_v18, 0.0  ;;  %5205 = vmatprep.subr.bf16.mxu0 %v17647_v41  ;;  %v17651_v44 = vld [vmem:[%s28564_s3 + $0x260] ss:$16 sps:$4 sm:$0xff]  }
 0x1e8   : > { %v21802_v6 = vadd.f32 %v21667_v50, %v2019_v1  ;;  %v21805_v32 = vadd.f32 %v21671_v54, %v2021_v15  ;;  %5608 = vmatprep.mubr.bf16.mxu1 %v21774_v31  ;;  %v2263_v40 = vmax.f32 %v2199_v34, 0.0  ;;  %v2265_v16 = vmax.f32 %v2201_v56, 0.0  ;;  %5643 = vmatprep.subr.bf16.mxu1 %v17650_v45 }
 0x1e9   : > { %v21812_v25 = vadd.f32 %v21674_v51, %v2020_v3  ;;  %v21815_v21 = vadd.f32 %v21678_v29, %v2022_v20  ;;  %5171 = vmatmul.mubr.bf16.gmra.mrb[132].mxu0 %v21765_v5  ;;  %v21818_v24 = vpack.c.bf16 %v2262_v57, %v2258_v8  ;;  %v21820_v41 = vpack.c.bf16 %v2264_v22, %v2260_v33  ;;  %v17654_v33 = vld [vmem:[%s28564_s3 + $0x268] ss:$16 sps:$4 sm:$0xff]  }
 0x1ea   : > { %v2266_v18 = vmax.f32 %v21802_v6, 0.0  ;;  %v2268_v1 = vmax.f32 %v21805_v32, 0.0  ;;  %5206 = vmatpush1.bf16.msra.mxu0 %v17645_v43  ;;  %5609 = vmatmul.mubr.bf16.gmra.mrb[132].mxu1 %v21765_v5  ;;  %v21825_v15 = vpack.c.bf16 %v2263_v40, %v2259_v37  ;;  %v21827_v2 = vpack.c.bf16 %v2265_v16, %v2261_v59  ;;  %v1837_v8 = vpop.f32.mrb[108].mxu0  ;;  %v1950_v34 = vpop.f32.mrb[108].mxu1 }
 0x1eb   : > { %29029 = vst [vmem:[#allocation18_spill] sm:$0xff] %v21820_v41  ;;  %v2267_v23 = vmax.f32 %v21812_v25, 0.0  ;;  %v2269_v45 = vmax.f32 %v21815_v21, 0.0  ;;  %5644 = vmatpush1.bf16.msra.mxu1 %v17648_v46  ;;  %5207 = vmatprep.subr.bf16.mxu0 %v17653_v55  ;;  %v2023_v37 = vmax.f32 %v21456_v58, %v1837_v8  ;;  %v2025_v59 = vmax.f32 %v21461_v19, %v1950_v34  ;;  %v1839_v3 = vpop.f32.mrb[109].mxu0  ;;  %v1952_v20 = vpop.f32.mrb[109].mxu1 }
 0x1ec   : > { %29030 = vst [vmem:[#allocation59_spill] sm:$0xff] %v21827_v2  ;;  %v21834_v56 = vpack.c.bf16 %v2266_v18, %v2262_v57  ;;  %v21836_v43 = vpack.c.bf16 %v2268_v1, %v2264_v22  ;;  %5645 = vmatprep.subr.bf16.mxu1 %v17656_v9  ;;  %v17659_v46 = vld [vmem:[%s28564_s3 + $0x284] ss:$16 sps:$4 sm:$0xff]   ;;  %v2024_v57 = vmax.f32 %v21466_v42, %v1839_v3  ;;  %v1841_v32 = vpop.f32.mrb[110].mxu0  ;;  %v1954_v25 = vpop.f32.mrb[110].mxu1 }
 0x1ed   : > { %v21843_v55 = vpack.c.bf16 %v2267_v23, %v2263_v40  ;;  %v21845_v6 = vpack.c.bf16 %v2269_v45, %v2265_v16  ;;  %v2026_v22 = vmax.f32 %v21471_v10, %v1952_v20  ;;  %v17662_v58 = vld [vmem:[%s28564_s3 + $0x28c] ss:$16 sps:$4 sm:$0xff]   ;;  %v2206_v19 = vadd.f32 %v21667_v50, %v2023_v37  ;;  %v1843_v21 = vpop.f32.mrb[111].mxu0  ;;  %v1956_v8 = vpop.f32.mrb[111].mxu1  ;;  %v17657_v42 = vld [vmem:[%s28564_s3 + $0x280] ss:$16 sps:$4 sm:$0xff]  }
 0x1ee   : > { %29031 = vst [vmem:[#allocation19_spill] sm:$0xff] %v21834_v56  ;;  %v2208_v9 = vadd.f32 %v21671_v54, %v2025_v59  ;;  %5208 = vmatpush1.bf16.msra.mxu0 %v17651_v44  ;;  %v2027_v40 = vmax.f32 %v21476_v52, %v1841_v32  ;;  %v2029_v16 = vmax.f32 %v21481_v53, %v1954_v25  ;;  %v17660_v10 = vld [vmem:[%s28564_s3 + $0x288] ss:$16 sps:$4 sm:$0xff]   ;;  %v17665_v53 = vld [vmem:[%s28564_s3 + $0x2a4] ss:$16 sps:$4 sm:$0xff]  }
 0x1ef   : > { %29032 = vst [vmem:[#allocation60_spill] sm:$0xff] %v21843_v55  ;;  %v2207_v34 = vadd.f32 %v21674_v51, %v2024_v57  ;;  %v2209_v37 = vadd.f32 %v21678_v29, %v2026_v22  ;;  %5646 = vmatpush1.bf16.msra.mxu1 %v17654_v33  ;;  %v2028_v44 = vmax.f32 %v21486_v60, %v1843_v21  ;;  %v17668_v59 = vld [vmem:[%s28564_s3 + $0x2ac] ss:$16 sps:$4 sm:$0xff]   ;;  %v2270_v3 = vmax.f32 %v2206_v19, 0.0  ;;  %v17663_v25 = vld [vmem:[%s28564_s3 + $0x2a0] ss:$16 sps:$4 sm:$0xff]  }
 0x1f0   : > { %v2030_v52 = vmax.f32 %v21491_v38, %v1956_v8  ;;  %v2272_v20 = vmax.f32 %v2208_v9, 0.0  ;;  %v21873_v32 = vadd.f32 %v21667_v50, %v2027_v40  ;;  %v21876_v57 = vadd.f32 %v21671_v54, %v2029_v16  ;;  %5180 = vmatprep.mubr.bf16.mxu0 %v21843_v55  ;;  %5209 = vmatprep.subr.bf16.mxu0 %v17659_v46 }
 0x1f1   : > { %v2271_v60 = vmax.f32 %v2207_v34, 0.0  ;;  %v2273_v38 = vmax.f32 %v2209_v37, 0.0  ;;  %v21880_v33 = vadd.f32 %v21674_v51, %v2028_v44  ;;  %5618 = vmatprep.mubr.bf16.mxu1 %v21843_v55  ;;  %5647 = vmatprep.subr.bf16.mxu1 %v17662_v58  ;;  %v21889_v19 = vpack.c.bf16 %v2270_v3, %v2266_v18  ;;  %v17666_v34 = vld [vmem:[%s28564_s3 + $0x2a8] ss:$16 sps:$4 sm:$0xff]  }
 0x1f2   : > { %v21883_v22 = vadd.f32 %v21678_v29, %v2030_v52  ;;  %v21891_v9 = vpack.c.bf16 %v2272_v20, %v2268_v1  ;;  %v2274_v46 = vmax.f32 %v21873_v32, 0.0  ;;  %v2276_v40 = vmax.f32 %v21876_v57, 0.0  ;;  %5181 = vmatmul.mubr.bf16.gmra.mrb[136].mxu0 %v21834_v56  ;;  %5619 = vmatmul.mubr.bf16.gmra.mrb[136].mxu1 %v21834_v56  ;;  %v1847_v18 = vpop.f32.mrb[112].mxu0  ;;  %v1960_v1 = vpop.f32.mrb[112].mxu1  ;;  %v29042_v56 = vld [vmem:[#allocation44_spill] sm:$0xff] }
 0x1f3   : > { %v21897_v16 = vpack.c.bf16 %v2271_v60, %v2267_v23  ;;  %v21899_v21 = vpack.c.bf16 %v2273_v38, %v2269_v45  ;;  %v2275_v58 = vmax.f32 %v21880_v33, 0.0  ;;  %5210 = vmatpush1.bf16.msra.mxu0 %v17657_v42  ;;  %5648 = vmatpush1.bf16.msra.mxu1 %v17660_v10  ;;  %v2031_v23 = vmax.f32 %v21496_v62, %v1847_v18  ;;  %v1849_v52 = vpop.f32.mrb[113].mxu0  ;;  %v1962_v32 = vpop.f32.mrb[113].mxu1  ;;  %v17671_v42 = vld [vmem:[%s28564_s3 + $0x2c4] ss:$16 sps:$4 sm:$0xff]  }
 0x1f4   : > { %29033 = vst [vmem:[#allocation20_spill] sm:$0xff] %v21891_v9  ;;  %v2277_v8 = vmax.f32 %v21883_v22, 0.0  ;;  %v21906_v37 = vpack.c.bf16 %v2274_v46, %v2270_v3  ;;  %v21908_v44 = vpack.c.bf16 %v2276_v40, %v2272_v20  ;;  %v2033_v45 = vmax.f32 %v21501_v27, %v1960_v1  ;;  %5211 = vmatprep.subr.bf16.mxu0 %v17665_v53  ;;  %v1851_v33 = vpop.f32.mrb[114].mxu0  ;;  %v1964_v62 = vpop.f32.mrb[114].mxu1  ;;  %v17674_v27 = vld [vmem:[%s28564_s3 + $0x2cc] ss:$16 sps:$4 sm:$0xff]  }
 0x1f5   : > { %29034 = vst [vmem:[#allocation61_spill] sm:$0xff] %v21899_v21  ;;  %v21915_v10 = vpack.c.bf16 %v2275_v58, %v2271_v60  ;;  %5649 = vmatprep.subr.bf16.mxu1 %v17668_v59  ;;  %v2032_v3 = vmax.f32 %v21506_v0, %v1849_v52  ;;  %v2034_v20 = vmax.f32 %v21511_v36, %v1962_v32  ;;  %v1853_v18 = vpop.f32.mrb[115].mxu0  ;;  %v1966_v59 = vpop.f32.mrb[115].mxu1  ;;  %v17669_v0 = vld [vmem:[%s28564_s3 + $0x2c0] ss:$16 sps:$4 sm:$0xff]   ;;  %v29066_v9 = vld [vmem:[#allocation53_spill] sm:$0xff] }
 0x1f6   : > { %29035 = vst [vmem:[#allocation21_spill] sm:$0xff] %v21906_v37  ;;  %v21917_v57 = vpack.c.bf16 %v2277_v8, %v2273_v38  ;;  %v2214_v53 = vadd.f32 %v21667_v50, %v2031_v23  ;;  %v2216_v22 = vadd.f32 %v21671_v54, %v2033_v45  ;;  %v2035_v60 = vmax.f32 %v21516_v4, %v1851_v33  ;;  %v17672_v36 = vld [vmem:[%s28564_s3 + $0x2c8] ss:$16 sps:$4 sm:$0xff]   ;;  %v17680_v45 = vld [vmem:[%s28564_s3 + $0x2ec] ss:$16 sps:$4 sm:$0xff]  }
 0x1f7   : > { %29036 = vst [vmem:[#allocation62_spill] sm:$0xff] %v21915_v10  ;;  %v2037_v38 = vmax.f32 %v21521_v48, %v1964_v62  ;;  %v2215_v1 = vadd.f32 %v21674_v51, %v2032_v3  ;;  %v2217_v23 = vadd.f32 %v21678_v29, %v2034_v20  ;;  %5212 = vmatpush1.bf16.msra.mxu0 %v17663_v25  ;;  %v17677_v48 = vld [vmem:[%s28564_s3 + $0x2e4] ss:$16 sps:$4 sm:$0xff]   ;;  %v17675_v62 = vld [vmem:[%s28564_s3 + $0x2e0] ss:$16 sps:$4 sm:$0xff]  }
 0x1f8   : > { %5650 = vmatpush1.bf16.msra.mxu1 %v17666_v34  ;;  %v2036_v4 = vmax.f32 %v21526_v49, %v1853_v18  ;;  %v2278_v52 = vmax.f32 %v2214_v53, 0.0  ;;  %v2280_v32 = vmax.f32 %v2216_v22, 0.0  ;;  %v21944_v33 = vadd.f32 %v21667_v50, %v2035_v60  ;;  %5190 = vmatprep.mubr.bf16.mxu0 %v21915_v10 }
 0x1f9   : > { %v21947_v3 = vadd.f32 %v21671_v54, %v2037_v38  ;;  %5213 = vmatprep.subr.bf16.mxu0 %v17671_v42  ;;  %v2279_v49 = vmax.f32 %v2215_v1, 0.0  ;;  %v2281_v25 = vmax.f32 %v2217_v23, 0.0  ;;  %v2038_v20 = vmax.f32 %v21531_v26, %v1966_v59  ;;  %5628 = vmatprep.mubr.bf16.mxu1 %v21915_v10  ;;  %v17678_v59 = vld [vmem:[%s28564_s3 + $0x2e8] ss:$16 sps:$4 sm:$0xff]  }
 0x1fa   : > { %v21951_v34 = vadd.f32 %v21674_v51, %v2036_v4  ;;  %5651 = vmatprep.subr.bf16.mxu1 %v17674_v27  ;;  %v21958_v53 = vpack.c.bf16 %v2278_v52, %v2274_v46  ;;  %v21960_v22 = vpack.c.bf16 %v2280_v32, %v2276_v40  ;;  %v2282_v42 = vmax.f32 %v21944_v33, 0.0  ;;  %5191 = vmatmul.mubr.bf16.gmra.mrb[140].mxu0 %v21906_v37  ;;  %v1857_v46 = vpop.f32.mrb[116].mxu0  ;;  %v1970_v40 = vpop.f32.mrb[116].mxu1 }
 0x1fb   : > { %v2284_v60 = vmax.f32 %v21947_v3, 0.0  ;;  %5629 = vmatmul.mubr.bf16.gmra.mrb[140].mxu1 %v21906_v37  ;;  %v21966_v26 = vpack.c.bf16 %v2279_v49, %v2275_v58  ;;  %v21968_v38 = vpack.c.bf16 %v2281_v25, %v2277_v8  ;;  %v21972_v18 = vadd.f32 %v21678_v29, %v2038_v20  ;;  %5214 = vmatpush1.bf16.msra.mxu0 %v17669_v0  ;;  %v1859_v8 = vpop.f32.mrb[117].mxu0  ;;  %v1972_v4 = vpop.f32.mrb[117].mxu1  ;;  %v17683_v0 = vld [vmem:[%s28564_s3 + $0x304] ss:$16 sps:$4 sm:$0xff]   ;;  %v29041_v37 = vld [vmem:[#allocation43_spill] sm:$0xff] }
 0x1fc   : > { %29037 = vst [vmem:[#allocation22_spill] sm:$0xff] %v21958_v53  ;;  %29038 = vst [vmem:[#allocation63_spill] sm:$0xff] %v21960_v22  ;;  %v2283_v27 = vmax.f32 %v21951_v34, 0.0  ;;  %5652 = vmatpush1.bf16.msra.mxu1 %v17672_v36  ;;  %v21977_v1 = vpack.c.bf16 %v2282_v42, %v2278_v52  ;;  %5233 = vmatprep.mubr.bf16.mxu0 %v21704_v7  ;;  %v2039_v58 = vmax.f32 %v21536_v47, %v1857_v46  ;;  %v17686_v36 = vld [vmem:[%s28564_s3 + $0x30c] ss:$16 sps:$4 sm:$0xff]   ;;  %v1861_v3 = vpop.f32.mrb[118].mxu0 }
 0x1fd   : > { %29039 = vst [vmem:[#allocation64_spill] sm:$0xff] %v21968_v38  ;;  %v21979_v23 = vpack.c.bf16 %v2284_v60, %v2280_v32  ;;  %5671 = vmatprep.mubr.bf16.mxu1 %v21704_v7  ;;  %v2285_v32 = vmax.f32 %v21972_v18, 0.0  ;;  %v2041_v33 = vmax.f32 %v21541_v39, %v1970_v40  ;;  %5215 = vmatprep.subr.bf16.mxu0 %v17677_v48  ;;  %v1974_v34 = vpop.f32.mrb[118].mxu1  ;;  %v29040_v46 = vld [vmem:[#allocation4_spill] sm:$0xff] }
 0x1fe   : > { %v21990_v52 = vpack.c.bf16 %v2283_v27, %v2279_v49  ;;  %5653 = vmatprep.subr.bf16.mxu1 %v17680_v45  ;;  %v2040_v47 = vmax.f32 %v21546_v61, %v1859_v8  ;;  %v2222_v20 = vadd.f32 %v21667_v50, %v2039_v58  ;;  %v2042_v7 = vmax.f32 %v29040_v46, %v1972_v4  ;;  %v1863_v49 = vpop.f32.mrb[119].mxu0  ;;  %v1976_v5 = vpop.f32.mrb[119].mxu1  ;;  %v17681_v39 = vld [vmem:[%s28564_s3 + $0x300] ss:$16 sps:$4 sm:$0xff]   ;;  %v17684_v61 = vld [vmem:[%s28564_s3 + $0x308] ss:$16 sps:$4 sm:$0xff]  }
 0x1ff   : > { %v2043_v10 = vmax.f32 %v29041_v37, %v1861_v3  ;;  %v2045_v55 = vmax.f32 %v29042_v56, %v1974_v34  ;;  %v22005_v48 = vpack.c.bf16 %v2285_v32, %v2281_v25  ;;  %v2224_v45 = vadd.f32 %v21671_v54, %v2041_v33  ;;  %5216 = vmatpush1.bf16.msra.mxu0 %v17675_v62  ;;  %v17689_v56 = vld [vmem:[%s28564_s3 + $0x324] ss:$16 sps:$4 sm:$0xff]   ;;  %v17692_v37 = vld [vmem:[%s28564_s3 + $0x32c] ss:$16 sps:$4 sm:$0xff]  }
 0x200   : > { %v2223_v18 = vadd.f32 %v21674_v51, %v2040_v47  ;;  %5654 = vmatpush1.bf16.msra.mxu1 %v17678_v59  ;;  %v2286_v40 = vmax.f32 %v2222_v20, 0.0  ;;  %v2225_v58 = vadd.f32 %v21678_v29, %v2042_v7  ;;  %5217 = vmatprep.subr.bf16.mxu0 %v17683_v0  ;;  %v29043_v4 = vld [vmem:[#allocation5_spill] sm:$0xff] }
 0x201   : > { %v22017_v25 = vadd.f32 %v21667_v50, %v2043_v10  ;;  %v22020_v8 = vadd.f32 %v21671_v54, %v2045_v55  ;;  %5655 = vmatprep.subr.bf16.mxu1 %v17686_v36  ;;  %v2288_v62 = vmax.f32 %v2224_v45, 0.0  ;;  %v2044_v33 = vmax.f32 %v29043_v4, %v1863_v49  ;;  %v29044_v47 = vld [vmem:[#allocation45_spill] sm:$0xff]  ;;  %v17687_v55 = vld [vmem:[%s28564_s3 + $0x320] ss:$16 sps:$4 sm:$0xff]  }
 0x202   : > { %v2287_v59 = vmax.f32 %v2223_v18, 0.0  ;;  %v2046_v3 = vmax.f32 %v29044_v47, %v1976_v5  ;;  %v22024_v34 = vpack.c.bf16 %v2286_v40, %v2282_v42  ;;  %v2289_v46 = vmax.f32 %v2225_v58, 0.0  ;;  %v1867_v5 = vpop.f32.mrb[120].mxu0  ;;  %v1980_v42 = vpop.f32.mrb[120].mxu1  ;;  %v17690_v45 = vld [vmem:[%s28564_s3 + $0x328] ss:$16 sps:$4 sm:$0xff]  }
 0x203   : > { %v2290_v20 = vmax.f32 %v22017_v25, 0.0  ;;  %v2292_v7 = vmax.f32 %v22020_v8, 0.0  ;;  %v22031_v10 = vpack.c.bf16 %v2288_v62, %v2284_v60  ;;  %v2227_v36 = vadd.f32 %v21674_v51, %v2044_v33  ;;  %5218 = vmatpush1.bf16.msra.mxu0 %v17681_v39  ;;  %v17695_v18 = vld [vmem:[%s28564_s3 + $0x344] ss:$16 sps:$4 sm:$0xff]   ;;  %v1869_v39 = vpop.f32.mrb[121].mxu0  ;;  %v1982_v4 = vpop.f32.mrb[121].mxu1 }
 0x204   : > { %29045 = vst [vmem:[#allocation23_spill] sm:$0xff] %v22024_v34  ;;  %v22033_v0 = vpack.c.bf16 %v2287_v59, %v2283_v27  ;;  %v22037_v49 = vadd.f32 %v21678_v29, %v2046_v3  ;;  %v22045_v60 = vpack.c.bf16 %v2289_v46, %v2285_v32  ;;  %5656 = vmatpush1.bf16.msra.mxu1 %v17684_v61  ;;  %v29049_v25 = vld [vmem:[#allocation6_spill] sm:$0xff]  ;;  %v17698_v33 = vld [vmem:[%s28564_s3 + $0x34c] ss:$16 sps:$4 sm:$0xff]  }
 0x205   : > { %29046 = vst [vmem:[#allocation65_spill] sm:$0xff] %v22031_v10  ;;  %v22047_v27 = vpack.c.bf16 %v2290_v20, %v2286_v40  ;;  %v22049_v58 = vpack.c.bf16 %v2292_v7, %v2288_v62  ;;  %v2047_v8 = vmax.f32 %v29049_v25, %v1867_v5  ;;  %v2291_v47 = vmax.f32 %v2227_v36, 0.0  ;;  %v29050_v10 = vld [vmem:[#allocation46_spill] sm:$0xff]  ;;  %5219 = vmatprep.subr.bf16.mxu0 %v17689_v56  ;;  %v29051_v32 = vld [vmem:[#allocation47_spill] sm:$0xff]  ;;  %v1871_v62 = vpop.f32.mrb[122].mxu0 }
 0x206   : > { %29047 = vst [vmem:[#allocation24_spill] sm:$0xff] %v22033_v0  ;;  %29048 = vst [vmem:[#allocation66_spill] sm:$0xff] %v22045_v60  ;;  %v2293_v3 = vmax.f32 %v22037_v49, 0.0  ;;  %v2049_v34 = vmax.f32 %v29050_v10, %v1980_v42  ;;  %5657 = vmatprep.subr.bf16.mxu1 %v17692_v37  ;;  %v2048_v40 = vmax.f32 %v29051_v32, %v1869_v39  ;;  %v1984_v60 = vpop.f32.mrb[122].mxu1  ;;  %v29052_v5 = vld [vmem:[#allocation7_spill] sm:$0xff]  ;;  %v29053_v0 = vld [vmem:[#allocation48_spill] sm:$0xff] }
 0x207   : > { %v2230_v61 = vadd.f32 %v21667_v50, %v2047_v8  ;;  %v2050_v25 = vmax.f32 %v29052_v5, %v1982_v4  ;;  %v2051_v31 = vmax.f32 %v29053_v0, %v1871_v62  ;;  %v2053_v17 = vmax.f32 %v29054_v30, %v1984_v60  ;;  %v1873_v22 = vpop.f32.mrb[123].mxu0  ;;  %v1986_v36 = vpop.f32.mrb[123].mxu1  ;;  %v17693_v10 = vld [vmem:[%s28564_s3 + $0x340] ss:$16 sps:$4 sm:$0xff]   ;;  %v17696_v56 = vld [vmem:[%s28564_s3 + $0x348] ss:$16 sps:$4 sm:$0xff]   ;;  %5220 = vmatpush1.bf16.msra.mxu0 %v17687_v55 }
 0x208   : > { %v22068_v37 = vpack.c.bf16 %v2291_v47, %v2287_v59  ;;  %v22070_v49 = vpack.c.bf16 %v2293_v3, %v2289_v46  ;;  %v2232_v42 = vadd.f32 %v21671_v54, %v2049_v34  ;;  %v2231_v0 = vadd.f32 %v21674_v51, %v2048_v40  ;;  %v17701_v30 = vld [vmem:[%s28564_s3 + $0x364] ss:$16 sps:$4 sm:$0xff]   ;;  %v17704_v60 = vld [vmem:[%s28564_s3 + $0x36c] ss:$16 sps:$4 sm:$0xff]   ;;  %5658 = vmatpush1.bf16.msra.mxu1 %v17690_v45 }
 0x209   : > { %v2294_v8 = vmax.f32 %v2230_v61, 0.0  ;;  %v2233_v39 = vadd.f32 %v21678_v29, %v2050_v25  ;;  %v22082_v59 = vadd.f32 %v21667_v50, %v2051_v31  ;;  %v22085_v34 = vadd.f32 %v21671_v54, %v2053_v17  ;;  %5221 = vmatprep.subr.bf16.mxu0 %v17695_v18  ;;  %v29055_v4 = vld [vmem:[#allocation49_spill] sm:$0xff]  ;;  %5659 = vmatprep.subr.bf16.mxu1 %v17698_v33  ;;  %v17699_v17 = vld [vmem:[%s28564_s3 + $0x360] ss:$16 sps:$4 sm:$0xff]  }
 0x20a   : > { %v2296_v46 = vmax.f32 %v2232_v42, 0.0  ;;  %v2295_v55 = vmax.f32 %v2231_v0, 0.0  ;;  %v2052_v32 = vmax.f32 %v29055_v4, %v1873_v22  ;;  %v29056_v40 = vld [vmem:[#allocation9_spill] sm:$0xff]  ;;  %v1990_v33 = vpop.f32.mrb[124].mxu1  ;;  %v17707_v0 = vld [vmem:[%s28564_s3 + $0x384] ss:$16 sps:$4 sm:$0xff]  }
 0x20b   : > { %v2054_v62 = vmax.f32 %v29056_v40, %v1986_v36  ;;  %v22089_v5 = vpack.c.bf16 %v2294_v8, %v2290_v20  ;;  %v2297_v61 = vmax.f32 %v2233_v39, 0.0  ;;  %v2298_v25 = vmax.f32 %v22082_v59, 0.0  ;;  %5222 = vmatpush1.bf16.msra.mxu0 %v17693_v10  ;;  %v1877_v20 = vpop.f32.mrb[124].mxu0  ;;  %v17702_v42 = vld [vmem:[%s28564_s3 + $0x368] ss:$16 sps:$4 sm:$0xff]   ;;  %v29061_v59 = vld [vmem:[#allocation10_spill] sm:$0xff] }
 0x20c   : > { %v2300_v45 = vmax.f32 %v22085_v34, 0.0  ;;  %v22096_v31 = vpack.c.bf16 %v2296_v46, %v2292_v7  ;;  %v22098_v18 = vpack.c.bf16 %v2295_v55, %v2291_v47  ;;  %v2235_v22 = vadd.f32 %v21674_v51, %v2052_v32  ;;  %5660 = vmatpush1.bf16.msra.mxu1 %v17696_v56  ;;  %v1879_v10 = vpop.f32.mrb[125].mxu0  ;;  %v1992_v4 = vpop.f32.mrb[125].mxu1  ;;  %v17710_v32 = vld [vmem:[%s28564_s3 + $0x38c] ss:$16 sps:$4 sm:$0xff]   ;;  %5223 = vmatprep.subr.bf16.mxu0 %v17701_v30 }
 0x20d   : > { %29057 = vst [vmem:[#allocation25_spill] sm:$0xff] %v22089_v5  ;;  %v2237_v36 = vadd.f32 %v21678_v29, %v2054_v62  ;;  %v22108_v39 = vpack.c.bf16 %v2297_v61, %v2293_v3  ;;  %v22110_v7 = vpack.c.bf16 %v2298_v25, %v2294_v8  ;;  %v2055_v34 = vmax.f32 %v29061_v59, %v1877_v20  ;;  %v29063_v3 = vld [vmem:[#allocation11_spill] sm:$0xff]  ;;  %v29065_v59 = vld [vmem:[#allocation12_spill] sm:$0xff] }
 0x20e   : > { %29058 = vst [vmem:[#allocation67_spill] sm:$0xff] %v22096_v31  ;;  %29059 = vst [vmem:[#allocation26_spill] sm:$0xff] %v22098_v18  ;;  %v22112_v47 = vpack.c.bf16 %v2300_v45, %v2296_v46  ;;  %v2299_v40 = vmax.f32 %v2235_v22, 0.0  ;;  %v29062_v31 = vld [vmem:[#allocation51_spill] sm:$0xff]  ;;  %5661 = vmatprep.subr.bf16.mxu1 %v17704_v60  ;;  %v2056_v8 = vmax.f32 %v29063_v3, %v1879_v10  ;;  %v1994_v46 = vpop.f32.mrb[126].mxu1  ;;  %v29064_v18 = vld [vmem:[#allocation52_spill] sm:$0xff] }
 0x20f   : > { %29060 = vst [vmem:[#allocation68_spill] sm:$0xff] %v22108_v39  ;;  %v2301_v62 = vmax.f32 %v2237_v36, 0.0  ;;  %v2057_v5 = vmax.f32 %v29062_v31, %v1990_v33  ;;  %v1881_v39 = vpop.f32.mrb[126].mxu0  ;;  %v2238_v56 = vadd.f32 %v21667_v50, %v2055_v34  ;;  %v2058_v20 = vmax.f32 %v29064_v18, %v1992_v4  ;;  %v1996_v2 = vpop.f32.mrb[127].mxu1  ;;  %v17705_v31 = vld [vmem:[%s28564_s3 + $0x380] ss:$16 sps:$4 sm:$0xff]   ;;  %5224 = vmatpush1.bf16.msra.mxu0 %v17699_v17 }
 0x210   : > { %v2059_v38 = vmax.f32 %v29065_v59, %v1881_v39  ;;  %v2061_v21 = vmax.f32 %v29066_v9, %v1994_v46  ;;  %v1883_v41 = vpop.f32.mrb[127].mxu0  ;;  %v17708_v30 = vld [vmem:[%s28564_s3 + $0x388] ss:$16 sps:$4 sm:$0xff]   ;;  %v22130_v60 = vpack.c.bf16 %v2299_v40, %v2295_v55  ;;  %v2239_v36 = vadd.f32 %v21674_v51, %v2056_v8  ;;  %v17713_v9 = vld [vmem:[%s28564_s3 + $0x3a4] ss:$16 sps:$4 sm:$0xff]   ;;  %5662 = vmatpush1.bf16.msra.mxu1 %v17702_v42 }
 0x211   : > { %v22132_v22 = vpack.c.bf16 %v2301_v62, %v2297_v61  ;;  %v2240_v18 = vadd.f32 %v21671_v54, %v2057_v5  ;;  %v17716_v33 = vld [vmem:[%s28564_s3 + $0x3ac] ss:$16 sps:$4 sm:$0xff]   ;;  %v2302_v39 = vmax.f32 %v2238_v56, 0.0  ;;  %v2241_v34 = vadd.f32 %v21678_v29, %v2058_v20  ;;  %5225 = vmatprep.subr.bf16.mxu0 %v17707_v0  ;;  %v29067_v17 = vld [vmem:[#allocation54_spill] sm:$0xff]  ;;  %5663 = vmatprep.subr.bf16.mxu1 %v17710_v32 }
 0x212   : > { %v2242_v55 = vadd.f32 %v21667_v50, %v2059_v38  ;;  %v2244_v61 = vadd.f32 %v21671_v54, %v2061_v21  ;;  %v2303_v10 = vmax.f32 %v2239_v36, 0.0  ;;  %v2060_v4 = vmax.f32 %v29067_v17, %v1883_v41  ;;  %v29068_v3 = vld [vmem:[#allocation14_spill] sm:$0xff]  ;;  %v17728_v36 = vld [vmem:[%s28564_s3 + $0x3ec] ss:$16 sps:$4 sm:$0xff]  }
 0x213   : > { %v2304_v5 = vmax.f32 %v2240_v18, 0.0  ;;  %v2062_v8 = vmax.f32 %v29068_v3, %v1996_v2  ;;  %v22147_v46 = vpack.c.bf16 %v2302_v39, %v2298_v25  ;;  %v2305_v59 = vmax.f32 %v2241_v34, 0.0  ;;  %v17711_v42 = vld [vmem:[%s28564_s3 + $0x3a0] ss:$16 sps:$4 sm:$0xff]   ;;  %5226 = vmatpush1.bf16.msra.mxu0 %v17705_v31  ;;  %v17714_v2 = vld [vmem:[%s28564_s3 + $0x3a8] ss:$16 sps:$4 sm:$0xff]  }
 0x214   : > { %v2306_v12 = vmax.f32 %v2242_v55, 0.0  ;;  %v2308_v56 = vmax.f32 %v2244_v61, 0.0  ;;  %v22154_v54 = vpack.c.bf16 %v2303_v10, %v2299_v40  ;;  %v2243_v21 = vadd.f32 %v21674_v51, %v2060_v4  ;;  %v17719_v38 = vld [vmem:[%s28564_s3 + $0x3c4] ss:$16 sps:$4 sm:$0xff]   ;;  %v17722_v25 = vld [vmem:[%s28564_s3 + $0x3cc] ss:$16 sps:$4 sm:$0xff]   ;;  %5664 = vmatpush1.bf16.msra.mxu1 %v17708_v30  ;;  %5227 = vmatprep.subr.bf16.mxu0 %v17713_v9 }
 0x215   : > { %29069 = vst [vmem:[#allocation27_spill] sm:$0xff] %v22147_v46  ;;  %v22152_v50 = vpack.c.bf16 %v2304_v5, %v2300_v45  ;;  %v2245_v41 = vadd.f32 %v21678_v29, %v2062_v8  ;;  %v22167_v45 = vpack.c.bf16 %v2305_v59, %v2301_v62  ;;  %5665 = vmatprep.subr.bf16.mxu1 %v17716_v33  ;;  %v17717_v31 = vld [vmem:[%s28564_s3 + $0x3c0] ss:$16 sps:$4 sm:$0xff]   ;;  %v17720_v62 = vld [vmem:[%s28564_s3 + $0x3c8] ss:$16 sps:$4 sm:$0xff]  }
 0x216   : > { %29071 = vst [vmem:[#allocation28_spill] sm:$0xff] %v22154_v54  ;;  %v2370_v0 = vmul.f32 0.0, %v2306_v12  ;;  %v2372_v32 = vmul.f32 0.0, %v2308_v56  ;;  %v2307_v51 = vmax.f32 %v2243_v21, 0.0  ;;  %v17725_v12 = vld [vmem:[%s28564_s3 + $0x3e4] ss:$16 sps:$4 sm:$0xff]  }
 0x217   : > { %29070 = vst [vmem:[#allocation69_spill] sm:$0xff] %v22152_v50  ;;  %29072 = vst [vmem:[#allocation70_spill] sm:$0xff] %v22167_v45  ;;  %v2309_v29 = vmax.f32 %v2245_v41, 0.0  ;;  %5228 = vmatpush1.bf16.msra.mxu0 %v17711_v42  ;;  %v17723_v55 = vld [vmem:[%s28564_s3 + $0x3e0] ss:$16 sps:$4 sm:$0xff]  }
 0x218   : > { %v22169_v40 = vpack.c.bf16 %v2370_v0, %v2302_v39  ;;  %v22171_v20 = vpack.c.bf16 %v2372_v32, %v2304_v5  ;;  %v2371_v30 = vmul.f32 0.0, %v2307_v51  ;;  %5666 = vmatpush1.bf16.msra.mxu1 %v17714_v2  ;;  %5229 = vmatprep.subr.bf16.mxu0 %v17719_v38  ;;  %v17726_v61 = vld [vmem:[%s28564_s3 + $0x3e8] ss:$16 sps:$4 sm:$0xff]   ;;  %v17731_v5 = vld [vmem:[%s28564_s3 + $0x404] ss:$16 sps:$4 sm:$0xff]  }
 0x219   : > { %v2373_v18 = vmul.f32 0.0, %v2309_v29  ;;  %5667 = vmatprep.subr.bf16.mxu1 %v17722_v25  ;;  %v17729_v17 = vld [vmem:[%s28564_s3 + $0x400] ss:$16 sps:$4 sm:$0xff]   ;;  %v17732_v4 = vld [vmem:[%s28564_s3 + $0x408] ss:$16 sps:$4 sm:$0xff]  }
 0x21a   : > { %v22185_v9 = vpack.c.bf16 %v2371_v30, %v2370_v0  ;;  %v22187_v33 = vpack.c.bf16 %v2371_v30, %v2303_v10  ;;  %v17734_v10 = vld [vmem:[%s28564_s3 + $0x40c] ss:$16 sps:$4 sm:$0xff]   ;;  %v17737_v3 = vld [vmem:[%s28564_s3 + $0x424] ss:$16 sps:$4 sm:$0xff]   ;;  %v17738_v56 = vld [vmem:[%s28564_s3 + $0x428] ss:$16 sps:$4 sm:$0xff]  }
 0x21b   : > { %v22189_v39 = vpack.c.bf16 %v2373_v18, %v2372_v32  ;;  %v22191_v34 = vpack.c.bf16 %v2373_v18, %v2305_v59  ;;  %5230 = vmatpush1.bf16.msra.mxu0 %v17717_v31  ;;  %v17740_v8 = vld [vmem:[%s28564_s3 + $0x42c] ss:$16 sps:$4 sm:$0xff]   ;;  %v17735_v59 = vld [vmem:[%s28564_s3 + $0x420] ss:$16 sps:$4 sm:$0xff]   ;;  %v17743_v42 = vld [vmem:[%s28564_s3 + $0x444] ss:$16 sps:$4 sm:$0xff]  }
 0x21c   : > { %29073 = vst [vmem:[#allocation29_spill] sm:$0xff] %v22185_v9  ;;  %5668 = vmatpush1.bf16.msra.mxu1 %v17720_v62  ;;  %5231 = vmatprep.subr.bf16.mxu0 %v17725_v12  ;;  %v17746_v21 = vld [vmem:[%s28564_s3 + $0x44c] ss:$16 sps:$4 sm:$0xff]   ;;  %v17741_v41 = vld [vmem:[%s28564_s3 + $0x440] ss:$16 sps:$4 sm:$0xff]  }
 0x21d   : > { %29074 = vst [vmem:[#allocation71_spill] sm:$0xff] %v22189_v39  ;;  %5669 = vmatprep.subr.bf16.mxu1 %v17728_v36  ;;  %v17744_v2 = vld [vmem:[%s28564_s3 + $0x448] ss:$16 sps:$4 sm:$0xff]   ;;  %v17749_v38 = vld [vmem:[%s28564_s3 + $0x464] ss:$16 sps:$4 sm:$0xff]  }
 0x21e   : > { %v17752_v25 = vld [vmem:[%s28564_s3 + $0x46c] ss:$16 sps:$4 sm:$0xff]   ;;  %v17747_v0 = vld [vmem:[%s28564_s3 + $0x460] ss:$16 sps:$4 sm:$0xff]   ;;  %v17750_v32 = vld [vmem:[%s28564_s3 + $0x468] ss:$16 sps:$4 sm:$0xff]  }
 0x21f   : > { %5232 = vmatpush1.bf16.msra.mxu0 %v17723_v55  ;;  %v17755_v51 = vld [vmem:[%s28564_s3 + $0x484] ss:$16 sps:$4 sm:$0xff]   ;;  %v17758_v29 = vld [vmem:[%s28564_s3 + $0x48c] ss:$16 sps:$4 sm:$0xff]   ;;  %v17753_v31 = vld [vmem:[%s28564_s3 + $0x480] ss:$16 sps:$4 sm:$0xff]  }
 0x220   : > { %5670 = vmatpush1.bf16.msra.mxu1 %v17726_v61  ;;  %5274 = vmatprep.subr.bf16.mxu0 %v17731_v5  ;;  %v17756_v62 = vld [vmem:[%s28564_s3 + $0x488] ss:$16 sps:$4 sm:$0xff]   ;;  %v17761_v12 = vld [vmem:[%s28564_s3 + $0x4a4] ss:$16 sps:$4 sm:$0xff]   ;;  %v17764_v30 = vld [vmem:[%s28564_s3 + $0x4ac] ss:$16 sps:$4 sm:$0xff]  }
 0x221   : > { %5712 = vmatprep.subr.bf16.mxu1 %v17734_v10  ;;  %v17759_v18 = vld [vmem:[%s28564_s3 + $0x4a0] ss:$16 sps:$4 sm:$0xff]   ;;  %v17762_v36 = vld [vmem:[%s28564_s3 + $0x4a8] ss:$16 sps:$4 sm:$0xff]   ;;  %v17767_v55 = vld [vmem:[%s28564_s3 + $0x4c4] ss:$16 sps:$4 sm:$0xff]  }
 0x222   : > { %5234 = vmatmul.mubr.bf16.vlgmr.msra.gmra.mrb[128].mxu0 %v21698_v13  ;;  %v17770_v61 = vld [vmem:[%s28564_s3 + $0x4cc] ss:$16 sps:$4 sm:$0xff]   ;;  %v17765_v5 = vld [vmem:[%s28564_s3 + $0x4c0] ss:$16 sps:$4 sm:$0xff]   ;;  %v17768_v10 = vld [vmem:[%s28564_s3 + $0x4c8] ss:$16 sps:$4 sm:$0xff]  }
 0x223   : > { %5672 = vmatmul.mubr.bf16.vlgmr.msra.gmra.mrb[128].mxu1 %v21698_v13  ;;  %5243 = vmatprep.mubr.bf16.mxu0 %v21776_v28  ;;  %v18464_v9 = vld [vmem:[%s28564_s3 + $0x1348] ss:$16 sps:$4 sm:$0xff]  }
 0x224   : > { %5275 = vmatpush1.bf16.msra.mxu0 %v17729_v17  ;;  %5681 = vmatprep.mubr.bf16.mxu1 %v21776_v28  ;;  %v17773_v17 = vld [vmem:[%s28564_s3 + $0x4e4] ss:$16 sps:$4 sm:$0xff]  }
 0x225   : > { %5713 = vmatpush1.bf16.msra.mxu1 %v17732_v4  ;;  %5276 = vmatprep.subr.bf16.mxu0 %v17737_v3  ;;  %v17776_v4 = vld [vmem:[%s28564_s3 + $0x4ec] ss:$16 sps:$4 sm:$0xff]   ;;  %v17771_v3 = vld [vmem:[%s28564_s3 + $0x4e0] ss:$16 sps:$4 sm:$0xff]  }
 0x226   : > { %5714 = vmatprep.subr.bf16.mxu1 %v17740_v8  ;;  %v17774_v8 = vld [vmem:[%s28564_s3 + $0x4e8] ss:$16 sps:$4 sm:$0xff]  }
 0x228   : > { %5277 = vmatpush1.bf16.msra.mxu0 %v17735_v59  ;;  %v17779_v59 = vld [vmem:[%s28564_s3 + $0x504] ss:$16 sps:$4 sm:$0xff]  }
 0x229   : > { %5715 = vmatpush1.bf16.msra.mxu1 %v17738_v56  ;;  %5278 = vmatprep.subr.bf16.mxu0 %v17743_v42  ;;  %v17782_v56 = vld [vmem:[%s28564_s3 + $0x50c] ss:$16 sps:$4 sm:$0xff]   ;;  %v17777_v42 = vld [vmem:[%s28564_s3 + $0x500] ss:$16 sps:$4 sm:$0xff]  }
 0x22a   : > { %5244 = vmatmul.mubr.bf16.gmra.mrb[132].mxu0 %v21767_v35  ;;  %5716 = vmatprep.subr.bf16.mxu1 %v17746_v21  ;;  %v17780_v21 = vld [vmem:[%s28564_s3 + $0x508] ss:$16 sps:$4 sm:$0xff]  }
 0x22b   : > { %5682 = vmatmul.mubr.bf16.gmra.mrb[132].mxu1 %v21767_v35  ;;  %5253 = vmatprep.mubr.bf16.mxu0 %v21845_v6 }
 0x22c   : > { %5279 = vmatpush1.bf16.msra.mxu0 %v17741_v41  ;;  %5691 = vmatprep.mubr.bf16.mxu1 %v21845_v6  ;;  %v17785_v41 = vld [vmem:[%s28564_s3 + $0x524] ss:$16 sps:$4 sm:$0xff]  }
 0x22d   : > { %5717 = vmatpush1.bf16.msra.mxu1 %v17744_v2  ;;  %5280 = vmatprep.subr.bf16.mxu0 %v17749_v38  ;;  %v17788_v2 = vld [vmem:[%s28564_s3 + $0x52c] ss:$16 sps:$4 sm:$0xff]   ;;  %v17783_v38 = vld [vmem:[%s28564_s3 + $0x520] ss:$16 sps:$4 sm:$0xff]  }
 0x22e   : > { %5718 = vmatprep.subr.bf16.mxu1 %v17752_v25  ;;  %v17786_v25 = vld [vmem:[%s28564_s3 + $0x528] ss:$16 sps:$4 sm:$0xff]  }
 0x230   : > { %5281 = vmatpush1.bf16.msra.mxu0 %v17747_v0  ;;  %v17791_v0 = vld [vmem:[%s28564_s3 + $0x544] ss:$16 sps:$4 sm:$0xff]  }
 0x231   : > { %5719 = vmatpush1.bf16.msra.mxu1 %v17750_v32  ;;  %5282 = vmatprep.subr.bf16.mxu0 %v17755_v51  ;;  %v17794_v32 = vld [vmem:[%s28564_s3 + $0x54c] ss:$16 sps:$4 sm:$0xff]   ;;  %v17789_v51 = vld [vmem:[%s28564_s3 + $0x540] ss:$16 sps:$4 sm:$0xff]  }
 0x232   : > { %5254 = vmatmul.mubr.bf16.gmra.mrb[136].mxu0 %v21836_v43  ;;  %5720 = vmatprep.subr.bf16.mxu1 %v17758_v29  ;;  %v17792_v29 = vld [vmem:[%s28564_s3 + $0x548] ss:$16 sps:$4 sm:$0xff]  }
 0x233   : > { %5692 = vmatmul.mubr.bf16.gmra.mrb[136].mxu1 %v21836_v43  ;;  %5263 = vmatprep.mubr.bf16.mxu0 %v21917_v57 }
 0x234   : > { %5283 = vmatpush1.bf16.msra.mxu0 %v17753_v31  ;;  %5701 = vmatprep.mubr.bf16.mxu1 %v21917_v57  ;;  %v17797_v31 = vld [vmem:[%s28564_s3 + $0x564] ss:$16 sps:$4 sm:$0xff]  }
 0x235   : > { %5721 = vmatpush1.bf16.msra.mxu1 %v17756_v62  ;;  %5284 = vmatprep.subr.bf16.mxu0 %v17761_v12  ;;  %v17800_v62 = vld [vmem:[%s28564_s3 + $0x56c] ss:$16 sps:$4 sm:$0xff]   ;;  %v17795_v12 = vld [vmem:[%s28564_s3 + $0x560] ss:$16 sps:$4 sm:$0xff]  }
 0x236   : > { %5722 = vmatprep.subr.bf16.mxu1 %v17764_v30  ;;  %v17798_v30 = vld [vmem:[%s28564_s3 + $0x568] ss:$16 sps:$4 sm:$0xff]  }
 0x238   : > { %5285 = vmatpush1.bf16.msra.mxu0 %v17759_v18  ;;  %v17803_v18 = vld [vmem:[%s28564_s3 + $0x584] ss:$16 sps:$4 sm:$0xff]  }
 0x239   : > { %5723 = vmatpush1.bf16.msra.mxu1 %v17762_v36  ;;  %5286 = vmatprep.subr.bf16.mxu0 %v17767_v55  ;;  %v17806_v36 = vld [vmem:[%s28564_s3 + $0x58c] ss:$16 sps:$4 sm:$0xff]   ;;  %v17801_v55 = vld [vmem:[%s28564_s3 + $0x580] ss:$16 sps:$4 sm:$0xff]  }
 0x23a   : > { %5264 = vmatmul.mubr.bf16.gmra.mrb[140].mxu0 %v21908_v44  ;;  %5724 = vmatprep.subr.bf16.mxu1 %v17770_v61  ;;  %v17804_v61 = vld [vmem:[%s28564_s3 + $0x588] ss:$16 sps:$4 sm:$0xff]  }
 0x23b   : > { %5702 = vmatmul.mubr.bf16.gmra.mrb[140].mxu1 %v21908_v44  ;;  %5306 = vmatprep.mubr.bf16.mxu0 %v21990_v52 }
 0x23c   : > { %5287 = vmatpush1.bf16.msra.mxu0 %v17765_v5  ;;  %5744 = vmatprep.mubr.bf16.mxu1 %v21990_v52  ;;  %v17809_v5 = vld [vmem:[%s28564_s3 + $0x5a4] ss:$16 sps:$4 sm:$0xff]  }
 0x23d   : > { %5725 = vmatpush1.bf16.msra.mxu1 %v17768_v10  ;;  %5288 = vmatprep.subr.bf16.mxu0 %v17773_v17  ;;  %v17812_v10 = vld [vmem:[%s28564_s3 + $0x5ac] ss:$16 sps:$4 sm:$0xff]   ;;  %v17807_v17 = vld [vmem:[%s28564_s3 + $0x5a0] ss:$16 sps:$4 sm:$0xff]  }
 0x23e   : > { %5726 = vmatprep.subr.bf16.mxu1 %v17776_v4  ;;  %v17810_v4 = vld [vmem:[%s28564_s3 + $0x5a8] ss:$16 sps:$4 sm:$0xff]  }
 0x240   : > { %5289 = vmatpush1.bf16.msra.mxu0 %v17771_v3  ;;  %v17815_v3 = vld [vmem:[%s28564_s3 + $0x5c4] ss:$16 sps:$4 sm:$0xff]  }
 0x241   : > { %5727 = vmatpush1.bf16.msra.mxu1 %v17774_v8  ;;  %5290 = vmatprep.subr.bf16.mxu0 %v17779_v59  ;;  %v17818_v8 = vld [vmem:[%s28564_s3 + $0x5cc] ss:$16 sps:$4 sm:$0xff]   ;;  %v17813_v59 = vld [vmem:[%s28564_s3 + $0x5c0] ss:$16 sps:$4 sm:$0xff]  }
 0x242   : > { %5728 = vmatprep.subr.bf16.mxu1 %v17782_v56  ;;  %v17816_v56 = vld [vmem:[%s28564_s3 + $0x5c8] ss:$16 sps:$4 sm:$0xff]  }
 0x244   : > { %5291 = vmatpush1.bf16.msra.mxu0 %v17777_v42  ;;  %v17821_v42 = vld [vmem:[%s28564_s3 + $0x5e4] ss:$16 sps:$4 sm:$0xff]  }
 0x245   : > { %5729 = vmatpush1.bf16.msra.mxu1 %v17780_v21  ;;  %5292 = vmatprep.subr.bf16.mxu0 %v17785_v41  ;;  %v17824_v21 = vld [vmem:[%s28564_s3 + $0x5ec] ss:$16 sps:$4 sm:$0xff]   ;;  %v17819_v41 = vld [vmem:[%s28564_s3 + $0x5e0] ss:$16 sps:$4 sm:$0xff]  }
 0x246   : > { %5730 = vmatprep.subr.bf16.mxu1 %v17788_v2  ;;  %v17822_v2 = vld [vmem:[%s28564_s3 + $0x5e8] ss:$16 sps:$4 sm:$0xff]  }
 0x248   : > { %5293 = vmatpush1.bf16.msra.mxu0 %v17783_v38  ;;  %v17827_v38 = vld [vmem:[%s28564_s3 + $0x604] ss:$16 sps:$4 sm:$0xff]  }
 0x249   : > { %5731 = vmatpush1.bf16.msra.mxu1 %v17786_v25  ;;  %5294 = vmatprep.subr.bf16.mxu0 %v17791_v0  ;;  %v17830_v25 = vld [vmem:[%s28564_s3 + $0x60c] ss:$16 sps:$4 sm:$0xff]   ;;  %v17825_v0 = vld [vmem:[%s28564_s3 + $0x600] ss:$16 sps:$4 sm:$0xff]  }
 0x24a   : > { %5732 = vmatprep.subr.bf16.mxu1 %v17794_v32  ;;  %v17828_v32 = vld [vmem:[%s28564_s3 + $0x608] ss:$16 sps:$4 sm:$0xff]  }
 0x24c   : > { %5295 = vmatpush1.bf16.msra.mxu0 %v17789_v51  ;;  %v17833_v51 = vld [vmem:[%s28564_s3 + $0x624] ss:$16 sps:$4 sm:$0xff]  }
 0x24d   : > { %5733 = vmatpush1.bf16.msra.mxu1 %v17792_v29  ;;  %5296 = vmatprep.subr.bf16.mxu0 %v17797_v31  ;;  %v17836_v29 = vld [vmem:[%s28564_s3 + $0x62c] ss:$16 sps:$4 sm:$0xff]   ;;  %v17831_v31 = vld [vmem:[%s28564_s3 + $0x620] ss:$16 sps:$4 sm:$0xff]  }
 0x24e   : > { %5734 = vmatprep.subr.bf16.mxu1 %v17800_v62  ;;  %v17834_v62 = vld [vmem:[%s28564_s3 + $0x628] ss:$16 sps:$4 sm:$0xff]  }
 0x250   : > { %5297 = vmatpush1.bf16.msra.mxu0 %v17795_v12  ;;  %v17839_v12 = vld [vmem:[%s28564_s3 + $0x644] ss:$16 sps:$4 sm:$0xff]  }
 0x251   : > { %5735 = vmatpush1.bf16.msra.mxu1 %v17798_v30  ;;  %5298 = vmatprep.subr.bf16.mxu0 %v17803_v18  ;;  %v17842_v30 = vld [vmem:[%s28564_s3 + $0x64c] ss:$16 sps:$4 sm:$0xff]   ;;  %v17837_v18 = vld [vmem:[%s28564_s3 + $0x640] ss:$16 sps:$4 sm:$0xff]  }
 0x252   : > { %5736 = vmatprep.subr.bf16.mxu1 %v17806_v36  ;;  %v17840_v36 = vld [vmem:[%s28564_s3 + $0x648] ss:$16 sps:$4 sm:$0xff]  }
 0x254   : > { %5299 = vmatpush1.bf16.msra.mxu0 %v17801_v55  ;;  %v17845_v55 = vld [vmem:[%s28564_s3 + $0x664] ss:$16 sps:$4 sm:$0xff]  }
 0x255   : > { %5737 = vmatpush1.bf16.msra.mxu1 %v17804_v61  ;;  %5300 = vmatprep.subr.bf16.mxu0 %v17809_v5  ;;  %v17848_v61 = vld [vmem:[%s28564_s3 + $0x66c] ss:$16 sps:$4 sm:$0xff]   ;;  %v17843_v5 = vld [vmem:[%s28564_s3 + $0x660] ss:$16 sps:$4 sm:$0xff]  }
 0x256   : > { %5738 = vmatprep.subr.bf16.mxu1 %v17812_v10  ;;  %v17846_v10 = vld [vmem:[%s28564_s3 + $0x668] ss:$16 sps:$4 sm:$0xff]  }
 0x258   : > { %5301 = vmatpush1.bf16.msra.mxu0 %v17807_v17  ;;  %v17851_v17 = vld [vmem:[%s28564_s3 + $0x684] ss:$16 sps:$4 sm:$0xff]  }
 0x259   : > { %5739 = vmatpush1.bf16.msra.mxu1 %v17810_v4  ;;  %5302 = vmatprep.subr.bf16.mxu0 %v17815_v3  ;;  %v17854_v4 = vld [vmem:[%s28564_s3 + $0x68c] ss:$16 sps:$4 sm:$0xff]   ;;  %v17849_v3 = vld [vmem:[%s28564_s3 + $0x680] ss:$16 sps:$4 sm:$0xff]  }
 0x25a   : > { %5740 = vmatprep.subr.bf16.mxu1 %v17818_v8  ;;  %v17852_v8 = vld [vmem:[%s28564_s3 + $0x688] ss:$16 sps:$4 sm:$0xff]  }
 0x25c   : > { %5303 = vmatpush1.bf16.msra.mxu0 %v17813_v59  ;;  %v17857_v59 = vld [vmem:[%s28564_s3 + $0x6a4] ss:$16 sps:$4 sm:$0xff]  }
 0x25d   : > { %5741 = vmatpush1.bf16.msra.mxu1 %v17816_v56  ;;  %5304 = vmatprep.subr.bf16.mxu0 %v17821_v42  ;;  %v17860_v56 = vld [vmem:[%s28564_s3 + $0x6ac] ss:$16 sps:$4 sm:$0xff]   ;;  %v17855_v42 = vld [vmem:[%s28564_s3 + $0x6a0] ss:$16 sps:$4 sm:$0xff]  }
 0x25e   : > { %5742 = vmatprep.subr.bf16.mxu1 %v17824_v21  ;;  %v17858_v21 = vld [vmem:[%s28564_s3 + $0x6a8] ss:$16 sps:$4 sm:$0xff]  }
 0x260   : > { %5305 = vmatpush1.bf16.msra.mxu0 %v17819_v41  ;;  %v17863_v41 = vld [vmem:[%s28564_s3 + $0x6c4] ss:$16 sps:$4 sm:$0xff]  }
 0x261   : > { %5743 = vmatpush1.bf16.msra.mxu1 %v17822_v2  ;;  %5347 = vmatprep.subr.bf16.mxu0 %v17827_v38  ;;  %v17866_v2 = vld [vmem:[%s28564_s3 + $0x6cc] ss:$16 sps:$4 sm:$0xff]   ;;  %v17861_v38 = vld [vmem:[%s28564_s3 + $0x6c0] ss:$16 sps:$4 sm:$0xff]  }
 0x262   : > { %5785 = vmatprep.subr.bf16.mxu1 %v17830_v25  ;;  %v17864_v25 = vld [vmem:[%s28564_s3 + $0x6c8] ss:$16 sps:$4 sm:$0xff]  }
 0x263   : > { %5307 = vmatmul.mubr.bf16.vlgmr.msra.gmra.mrb[128].mxu0 %v21977_v1 }
 0x264   : > { %5745 = vmatmul.mubr.bf16.vlgmr.msra.gmra.mrb[128].mxu1 %v21977_v1  ;;  %5316 = vmatprep.mubr.bf16.mxu0 %v22068_v37 }
 0x265   : > { %5348 = vmatpush1.bf16.msra.mxu0 %v17825_v0  ;;  %5754 = vmatprep.mubr.bf16.mxu1 %v22068_v37  ;;  %v17869_v0 = vld [vmem:[%s28564_s3 + $0x6e4] ss:$16 sps:$4 sm:$0xff]  }
 0x266   : > { %5786 = vmatpush1.bf16.msra.mxu1 %v17828_v32  ;;  %5349 = vmatprep.subr.bf16.mxu0 %v17833_v51  ;;  %v17872_v32 = vld [vmem:[%s28564_s3 + $0x6ec] ss:$16 sps:$4 sm:$0xff]   ;;  %v17867_v51 = vld [vmem:[%s28564_s3 + $0x6e0] ss:$16 sps:$4 sm:$0xff]  }
 0x267   : > { %5787 = vmatprep.subr.bf16.mxu1 %v17836_v29  ;;  %v17870_v29 = vld [vmem:[%s28564_s3 + $0x6e8] ss:$16 sps:$4 sm:$0xff]  }
 0x269   : > { %5350 = vmatpush1.bf16.msra.mxu0 %v17831_v31  ;;  %v17875_v31 = vld [vmem:[%s28564_s3 + $0x704] ss:$16 sps:$4 sm:$0xff]  }
 0x26a   : > { %5788 = vmatpush1.bf16.msra.mxu1 %v17834_v62  ;;  %5351 = vmatprep.subr.bf16.mxu0 %v17839_v12  ;;  %v17878_v62 = vld [vmem:[%s28564_s3 + $0x70c] ss:$16 sps:$4 sm:$0xff]   ;;  %v17873_v12 = vld [vmem:[%s28564_s3 + $0x700] ss:$16 sps:$4 sm:$0xff]  }
 0x26b   : > { %5317 = vmatmul.mubr.bf16.gmra.mrb[132].mxu0 %v22047_v27  ;;  %5789 = vmatprep.subr.bf16.mxu1 %v17842_v30  ;;  %v17876_v30 = vld [vmem:[%s28564_s3 + $0x708] ss:$16 sps:$4 sm:$0xff]  }
 0x26c   : > { %5755 = vmatmul.mubr.bf16.gmra.mrb[132].mxu1 %v22047_v27  ;;  %5326 = vmatprep.mubr.bf16.mxu0 %v22130_v60 }
 0x26d   : > { %5352 = vmatpush1.bf16.msra.mxu0 %v17837_v18  ;;  %5764 = vmatprep.mubr.bf16.mxu1 %v22130_v60  ;;  %v17881_v18 = vld [vmem:[%s28564_s3 + $0x724] ss:$16 sps:$4 sm:$0xff]  }
 0x26e   : > { %5790 = vmatpush1.bf16.msra.mxu1 %v17840_v36  ;;  %5353 = vmatprep.subr.bf16.mxu0 %v17845_v55  ;;  %v17884_v36 = vld [vmem:[%s28564_s3 + $0x72c] ss:$16 sps:$4 sm:$0xff]   ;;  %v17879_v55 = vld [vmem:[%s28564_s3 + $0x720] ss:$16 sps:$4 sm:$0xff]  }
 0x26f   : > { %5791 = vmatprep.subr.bf16.mxu1 %v17848_v61  ;;  %v17882_v61 = vld [vmem:[%s28564_s3 + $0x728] ss:$16 sps:$4 sm:$0xff]  }
 0x271   : > { %5354 = vmatpush1.bf16.msra.mxu0 %v17843_v5  ;;  %v17887_v5 = vld [vmem:[%s28564_s3 + $0x744] ss:$16 sps:$4 sm:$0xff]  }
 0x272   : > { %5792 = vmatpush1.bf16.msra.mxu1 %v17846_v10  ;;  %5355 = vmatprep.subr.bf16.mxu0 %v17851_v17  ;;  %v17890_v10 = vld [vmem:[%s28564_s3 + $0x74c] ss:$16 sps:$4 sm:$0xff]   ;;  %v17885_v17 = vld [vmem:[%s28564_s3 + $0x740] ss:$16 sps:$4 sm:$0xff]  }
 0x273   : > { %5327 = vmatmul.mubr.bf16.gmra.mrb[136].mxu0 %v22110_v7  ;;  %5793 = vmatprep.subr.bf16.mxu1 %v17854_v4  ;;  %v17888_v4 = vld [vmem:[%s28564_s3 + $0x748] ss:$16 sps:$4 sm:$0xff]  }
 0x274   : > { %5765 = vmatmul.mubr.bf16.gmra.mrb[136].mxu1 %v22110_v7  ;;  %5336 = vmatprep.mubr.bf16.mxu0 %v22187_v33 }
 0x275   : > { %5356 = vmatpush1.bf16.msra.mxu0 %v17849_v3  ;;  %5774 = vmatprep.mubr.bf16.mxu1 %v22187_v33  ;;  %v17893_v3 = vld [vmem:[%s28564_s3 + $0x764] ss:$16 sps:$4 sm:$0xff]  }
 0x276   : > { %5794 = vmatpush1.bf16.msra.mxu1 %v17852_v8  ;;  %5357 = vmatprep.subr.bf16.mxu0 %v17857_v59  ;;  %v17896_v8 = vld [vmem:[%s28564_s3 + $0x76c] ss:$16 sps:$4 sm:$0xff]   ;;  %v17891_v59 = vld [vmem:[%s28564_s3 + $0x760] ss:$16 sps:$4 sm:$0xff]  }
 0x277   : > { %5795 = vmatprep.subr.bf16.mxu1 %v17860_v56  ;;  %v17894_v56 = vld [vmem:[%s28564_s3 + $0x768] ss:$16 sps:$4 sm:$0xff]  }
 0x279   : > { %5358 = vmatpush1.bf16.msra.mxu0 %v17855_v42  ;;  %v17899_v42 = vld [vmem:[%s28564_s3 + $0x784] ss:$16 sps:$4 sm:$0xff]  }
 0x27a   : > { %5796 = vmatpush1.bf16.msra.mxu1 %v17858_v21  ;;  %5359 = vmatprep.subr.bf16.mxu0 %v17863_v41  ;;  %v17902_v21 = vld [vmem:[%s28564_s3 + $0x78c] ss:$16 sps:$4 sm:$0xff]   ;;  %v17897_v41 = vld [vmem:[%s28564_s3 + $0x780] ss:$16 sps:$4 sm:$0xff]  }
 0x27b   : > { %5337 = vmatmul.mubr.bf16.gmra.mrb[140].mxu0 %v22169_v40  ;;  %5797 = vmatprep.subr.bf16.mxu1 %v17866_v2  ;;  %v17900_v2 = vld [vmem:[%s28564_s3 + $0x788] ss:$16 sps:$4 sm:$0xff]  }
 0x27c   : > { %5775 = vmatmul.mubr.bf16.gmra.mrb[140].mxu1 %v22169_v40  ;;  %5379 = vmatprep.mubr.bf16.mxu0 %v22005_v48 }
 0x27d   : > { %5360 = vmatpush1.bf16.msra.mxu0 %v17861_v38  ;;  %5817 = vmatprep.mubr.bf16.mxu1 %v22005_v48  ;;  %v17905_v38 = vld [vmem:[%s28564_s3 + $0x7a4] ss:$16 sps:$4 sm:$0xff]  }
 0x27e   : > { %5798 = vmatpush1.bf16.msra.mxu1 %v17864_v25  ;;  %5361 = vmatprep.subr.bf16.mxu0 %v17869_v0  ;;  %v17908_v25 = vld [vmem:[%s28564_s3 + $0x7ac] ss:$16 sps:$4 sm:$0xff]   ;;  %v17903_v0 = vld [vmem:[%s28564_s3 + $0x7a0] ss:$16 sps:$4 sm:$0xff]  }
 0x27f   : > { %5799 = vmatprep.subr.bf16.mxu1 %v17872_v32  ;;  %v17906_v32 = vld [vmem:[%s28564_s3 + $0x7a8] ss:$16 sps:$4 sm:$0xff]  }
 0x281   : > { %5362 = vmatpush1.bf16.msra.mxu0 %v17867_v51  ;;  %v17911_v51 = vld [vmem:[%s28564_s3 + $0x7c4] ss:$16 sps:$4 sm:$0xff]  }
 0x282   : > { %5800 = vmatpush1.bf16.msra.mxu1 %v17870_v29  ;;  %5363 = vmatprep.subr.bf16.mxu0 %v17875_v31  ;;  %v17914_v29 = vld [vmem:[%s28564_s3 + $0x7cc] ss:$16 sps:$4 sm:$0xff]   ;;  %v17909_v31 = vld [vmem:[%s28564_s3 + $0x7c0] ss:$16 sps:$4 sm:$0xff]  }
 0x283   : > { %5801 = vmatprep.subr.bf16.mxu1 %v17878_v62  ;;  %v17912_v62 = vld [vmem:[%s28564_s3 + $0x7c8] ss:$16 sps:$4 sm:$0xff]  }
 0x285   : > { %5364 = vmatpush1.bf16.msra.mxu0 %v17873_v12  ;;  %v17917_v12 = vld [vmem:[%s28564_s3 + $0x7e4] ss:$16 sps:$4 sm:$0xff]  }
 0x286   : > { %5802 = vmatpush1.bf16.msra.mxu1 %v17876_v30  ;;  %5365 = vmatprep.subr.bf16.mxu0 %v17881_v18  ;;  %v17920_v30 = vld [vmem:[%s28564_s3 + $0x7ec] ss:$16 sps:$4 sm:$0xff]   ;;  %v17915_v18 = vld [vmem:[%s28564_s3 + $0x7e0] ss:$16 sps:$4 sm:$0xff]  }
 0x287   : > { %5803 = vmatprep.subr.bf16.mxu1 %v17884_v36  ;;  %v17918_v36 = vld [vmem:[%s28564_s3 + $0x7e8] ss:$16 sps:$4 sm:$0xff]  }
 0x289   : > { %5366 = vmatpush1.bf16.msra.mxu0 %v17879_v55  ;;  %v17923_v55 = vld [vmem:[%s28564_s3 + $0x804] ss:$16 sps:$4 sm:$0xff]  }
 0x28a   : > { %5804 = vmatpush1.bf16.msra.mxu1 %v17882_v61  ;;  %5367 = vmatprep.subr.bf16.mxu0 %v17887_v5  ;;  %v17926_v61 = vld [vmem:[%s28564_s3 + $0x80c] ss:$16 sps:$4 sm:$0xff]   ;;  %v17921_v5 = vld [vmem:[%s28564_s3 + $0x800] ss:$16 sps:$4 sm:$0xff]  }
 0x28b   : > { %5805 = vmatprep.subr.bf16.mxu1 %v17890_v10  ;;  %v17924_v10 = vld [vmem:[%s28564_s3 + $0x808] ss:$16 sps:$4 sm:$0xff]  }
 0x28d   : > { %5368 = vmatpush1.bf16.msra.mxu0 %v17885_v17  ;;  %v17929_v17 = vld [vmem:[%s28564_s3 + $0x824] ss:$16 sps:$4 sm:$0xff]  }
 0x28e   : > { %5806 = vmatpush1.bf16.msra.mxu1 %v17888_v4  ;;  %5369 = vmatprep.subr.bf16.mxu0 %v17893_v3  ;;  %v17932_v4 = vld [vmem:[%s28564_s3 + $0x82c] ss:$16 sps:$4 sm:$0xff]   ;;  %v17927_v3 = vld [vmem:[%s28564_s3 + $0x820] ss:$16 sps:$4 sm:$0xff]  }
 0x28f   : > { %5807 = vmatprep.subr.bf16.mxu1 %v17896_v8  ;;  %v17930_v8 = vld [vmem:[%s28564_s3 + $0x828] ss:$16 sps:$4 sm:$0xff]  }
 0x291   : > { %5370 = vmatpush1.bf16.msra.mxu0 %v17891_v59  ;;  %v17935_v59 = vld [vmem:[%s28564_s3 + $0x844] ss:$16 sps:$4 sm:$0xff]  }
 0x292   : > { %5808 = vmatpush1.bf16.msra.mxu1 %v17894_v56  ;;  %5371 = vmatprep.subr.bf16.mxu0 %v17899_v42  ;;  %v17938_v56 = vld [vmem:[%s28564_s3 + $0x84c] ss:$16 sps:$4 sm:$0xff]   ;;  %v17933_v42 = vld [vmem:[%s28564_s3 + $0x840] ss:$16 sps:$4 sm:$0xff]  }
 0x293   : > { %5809 = vmatprep.subr.bf16.mxu1 %v17902_v21  ;;  %v17936_v21 = vld [vmem:[%s28564_s3 + $0x848] ss:$16 sps:$4 sm:$0xff]  }
 0x295   : > { %5372 = vmatpush1.bf16.msra.mxu0 %v17897_v41  ;;  %v17941_v41 = vld [vmem:[%s28564_s3 + $0x864] ss:$16 sps:$4 sm:$0xff]  }
 0x296   : > { %5810 = vmatpush1.bf16.msra.mxu1 %v17900_v2  ;;  %5373 = vmatprep.subr.bf16.mxu0 %v17905_v38  ;;  %v17944_v2 = vld [vmem:[%s28564_s3 + $0x86c] ss:$16 sps:$4 sm:$0xff]   ;;  %v17939_v38 = vld [vmem:[%s28564_s3 + $0x860] ss:$16 sps:$4 sm:$0xff]  }
 0x297   : > { %5811 = vmatprep.subr.bf16.mxu1 %v17908_v25  ;;  %v17942_v25 = vld [vmem:[%s28564_s3 + $0x868] ss:$16 sps:$4 sm:$0xff]  }
 0x299   : > { %5374 = vmatpush1.bf16.msra.mxu0 %v17903_v0  ;;  %v17947_v0 = vld [vmem:[%s28564_s3 + $0x884] ss:$16 sps:$4 sm:$0xff]  }
 0x29a   : > { %5812 = vmatpush1.bf16.msra.mxu1 %v17906_v32  ;;  %5375 = vmatprep.subr.bf16.mxu0 %v17911_v51  ;;  %v17950_v32 = vld [vmem:[%s28564_s3 + $0x88c] ss:$16 sps:$4 sm:$0xff]   ;;  %v17945_v51 = vld [vmem:[%s28564_s3 + $0x880] ss:$16 sps:$4 sm:$0xff]  }
 0x29b   : > { %5813 = vmatprep.subr.bf16.mxu1 %v17914_v29  ;;  %v17948_v29 = vld [vmem:[%s28564_s3 + $0x888] ss:$16 sps:$4 sm:$0xff]  }
 0x29d   : > { %5376 = vmatpush1.bf16.msra.mxu0 %v17909_v31  ;;  %v17953_v31 = vld [vmem:[%s28564_s3 + $0x8a4] ss:$16 sps:$4 sm:$0xff]  }
 0x29e   : > { %5814 = vmatpush1.bf16.msra.mxu1 %v17912_v62  ;;  %5377 = vmatprep.subr.bf16.mxu0 %v17917_v12  ;;  %v17956_v62 = vld [vmem:[%s28564_s3 + $0x8ac] ss:$16 sps:$4 sm:$0xff]   ;;  %v17951_v12 = vld [vmem:[%s28564_s3 + $0x8a0] ss:$16 sps:$4 sm:$0xff]  }
 0x29f   : > { %5815 = vmatprep.subr.bf16.mxu1 %v17920_v30  ;;  %v17954_v30 = vld [vmem:[%s28564_s3 + $0x8a8] ss:$16 sps:$4 sm:$0xff]  }
 0x2a1   : > { %5378 = vmatpush1.bf16.msra.mxu0 %v17915_v18  ;;  %v17959_v18 = vld [vmem:[%s28564_s3 + $0x8c4] ss:$16 sps:$4 sm:$0xff]  }
 0x2a2   : > { %5816 = vmatpush1.bf16.msra.mxu1 %v17918_v36  ;;  %5420 = vmatprep.subr.bf16.mxu0 %v17923_v55  ;;  %v17962_v36 = vld [vmem:[%s28564_s3 + $0x8cc] ss:$16 sps:$4 sm:$0xff]   ;;  %v17957_v55 = vld [vmem:[%s28564_s3 + $0x8c0] ss:$16 sps:$4 sm:$0xff]  }
 0x2a3   : > { %5858 = vmatprep.subr.bf16.mxu1 %v17926_v61  ;;  %v17960_v61 = vld [vmem:[%s28564_s3 + $0x8c8] ss:$16 sps:$4 sm:$0xff]  }
 0x2a4   : > { %5380 = vmatmul.mubr.bf16.vlgmr.msra.gmra.mrb[128].mxu0 %v21979_v23 }
 0x2a5   : > { %5818 = vmatmul.mubr.bf16.vlgmr.msra.gmra.mrb[128].mxu1 %v21979_v23  ;;  %5389 = vmatprep.mubr.bf16.mxu0 %v22070_v49 }
 0x2a6   : > { %5421 = vmatpush1.bf16.msra.mxu0 %v17921_v5  ;;  %5827 = vmatprep.mubr.bf16.mxu1 %v22070_v49  ;;  %v17965_v5 = vld [vmem:[%s28564_s3 + $0x8e4] ss:$16 sps:$4 sm:$0xff]  }
 0x2a7   : > { %5859 = vmatpush1.bf16.msra.mxu1 %v17924_v10  ;;  %5422 = vmatprep.subr.bf16.mxu0 %v17929_v17  ;;  %v17968_v10 = vld [vmem:[%s28564_s3 + $0x8ec] ss:$16 sps:$4 sm:$0xff]   ;;  %v17963_v17 = vld [vmem:[%s28564_s3 + $0x8e0] ss:$16 sps:$4 sm:$0xff]  }
 0x2a8   : > { %5860 = vmatprep.subr.bf16.mxu1 %v17932_v4  ;;  %v17966_v4 = vld [vmem:[%s28564_s3 + $0x8e8] ss:$16 sps:$4 sm:$0xff]  }
 0x2aa   : > { %5423 = vmatpush1.bf16.msra.mxu0 %v17927_v3  ;;  %v17971_v3 = vld [vmem:[%s28564_s3 + $0x904] ss:$16 sps:$4 sm:$0xff]  }
 0x2ab   : > { %5861 = vmatpush1.bf16.msra.mxu1 %v17930_v8  ;;  %5424 = vmatprep.subr.bf16.mxu0 %v17935_v59  ;;  %v17974_v8 = vld [vmem:[%s28564_s3 + $0x90c] ss:$16 sps:$4 sm:$0xff]   ;;  %v17969_v59 = vld [vmem:[%s28564_s3 + $0x900] ss:$16 sps:$4 sm:$0xff]  }
 0x2ac   : > { %5390 = vmatmul.mubr.bf16.gmra.mrb[132].mxu0 %v22049_v58  ;;  %5862 = vmatprep.subr.bf16.mxu1 %v17938_v56  ;;  %v17972_v56 = vld [vmem:[%s28564_s3 + $0x908] ss:$16 sps:$4 sm:$0xff]  }
 0x2ad   : > { %5828 = vmatmul.mubr.bf16.gmra.mrb[132].mxu1 %v22049_v58  ;;  %5399 = vmatprep.mubr.bf16.mxu0 %v22132_v22 }
 0x2ae   : > { %5425 = vmatpush1.bf16.msra.mxu0 %v17933_v42  ;;  %5837 = vmatprep.mubr.bf16.mxu1 %v22132_v22  ;;  %v17977_v42 = vld [vmem:[%s28564_s3 + $0x924] ss:$16 sps:$4 sm:$0xff]  }
 0x2af   : > { %5863 = vmatpush1.bf16.msra.mxu1 %v17936_v21  ;;  %5426 = vmatprep.subr.bf16.mxu0 %v17941_v41  ;;  %v17980_v21 = vld [vmem:[%s28564_s3 + $0x92c] ss:$16 sps:$4 sm:$0xff]   ;;  %v17975_v41 = vld [vmem:[%s28564_s3 + $0x920] ss:$16 sps:$4 sm:$0xff]  }
 0x2b0   : > { %5864 = vmatprep.subr.bf16.mxu1 %v17944_v2  ;;  %v17978_v2 = vld [vmem:[%s28564_s3 + $0x928] ss:$16 sps:$4 sm:$0xff]  }
 0x2b2   : > { %5427 = vmatpush1.bf16.msra.mxu0 %v17939_v38  ;;  %v17983_v38 = vld [vmem:[%s28564_s3 + $0x944] ss:$16 sps:$4 sm:$0xff]  }
 0x2b3   : > { %5865 = vmatpush1.bf16.msra.mxu1 %v17942_v25  ;;  %5428 = vmatprep.subr.bf16.mxu0 %v17947_v0  ;;  %v17986_v25 = vld [vmem:[%s28564_s3 + $0x94c] ss:$16 sps:$4 sm:$0xff]   ;;  %v17981_v0 = vld [vmem:[%s28564_s3 + $0x940] ss:$16 sps:$4 sm:$0xff]  }
 0x2b4   : > { %5400 = vmatmul.mubr.bf16.gmra.mrb[136].mxu0 %v22112_v47  ;;  %5866 = vmatprep.subr.bf16.mxu1 %v17950_v32  ;;  %v17984_v32 = vld [vmem:[%s28564_s3 + $0x948] ss:$16 sps:$4 sm:$0xff]  }
 0x2b5   : > { %5838 = vmatmul.mubr.bf16.gmra.mrb[136].mxu1 %v22112_v47  ;;  %5409 = vmatprep.mubr.bf16.mxu0 %v22191_v34 }
 0x2b6   : > { %5429 = vmatpush1.bf16.msra.mxu0 %v17945_v51  ;;  %5847 = vmatprep.mubr.bf16.mxu1 %v22191_v34  ;;  %v17989_v51 = vld [vmem:[%s28564_s3 + $0x964] ss:$16 sps:$4 sm:$0xff]  }
 0x2b7   : > { %5867 = vmatpush1.bf16.msra.mxu1 %v17948_v29  ;;  %5430 = vmatprep.subr.bf16.mxu0 %v17953_v31  ;;  %v17992_v29 = vld [vmem:[%s28564_s3 + $0x96c] ss:$16 sps:$4 sm:$0xff]   ;;  %v17987_v31 = vld [vmem:[%s28564_s3 + $0x960] ss:$16 sps:$4 sm:$0xff]  }
 0x2b8   : > { %5868 = vmatprep.subr.bf16.mxu1 %v17956_v62  ;;  %v17990_v62 = vld [vmem:[%s28564_s3 + $0x968] ss:$16 sps:$4 sm:$0xff]  }
 0x2ba   : > { %5431 = vmatpush1.bf16.msra.mxu0 %v17951_v12  ;;  %v17995_v12 = vld [vmem:[%s28564_s3 + $0x984] ss:$16 sps:$4 sm:$0xff]  }
 0x2bb   : > { %5869 = vmatpush1.bf16.msra.mxu1 %v17954_v30  ;;  %5432 = vmatprep.subr.bf16.mxu0 %v17959_v18  ;;  %v17998_v30 = vld [vmem:[%s28564_s3 + $0x98c] ss:$16 sps:$4 sm:$0xff]   ;;  %v17993_v18 = vld [vmem:[%s28564_s3 + $0x980] ss:$16 sps:$4 sm:$0xff]  }
 0x2bc   : > { %5410 = vmatmul.mubr.bf16.gmra.mrb[140].mxu0 %v22171_v20  ;;  %5870 = vmatprep.subr.bf16.mxu1 %v17962_v36  ;;  %v17996_v36 = vld [vmem:[%s28564_s3 + $0x988] ss:$16 sps:$4 sm:$0xff]  }
 0x2bd   : > { %5848 = vmatmul.mubr.bf16.gmra.mrb[140].mxu1 %v22171_v20  ;;  %5452 = vmatprep.mubr.bf16.mxu0 %v21756_v11 }
 0x2be   : > { %5433 = vmatpush1.bf16.msra.mxu0 %v17957_v55  ;;  %5890 = vmatprep.mubr.bf16.mxu1 %v21756_v11  ;;  %v18001_v55 = vld [vmem:[%s28564_s3 + $0x9a4] ss:$16 sps:$4 sm:$0xff]  }
 0x2bf   : > { %5871 = vmatpush1.bf16.msra.mxu1 %v17960_v61  ;;  %5434 = vmatprep.subr.bf16.mxu0 %v17965_v5  ;;  %v18004_v61 = vld [vmem:[%s28564_s3 + $0x9ac] ss:$16 sps:$4 sm:$0xff]   ;;  %v17999_v5 = vld [vmem:[%s28564_s3 + $0x9a0] ss:$16 sps:$4 sm:$0xff]  }
 0x2c0   : > { %5872 = vmatprep.subr.bf16.mxu1 %v17968_v10  ;;  %v18002_v10 = vld [vmem:[%s28564_s3 + $0x9a8] ss:$16 sps:$4 sm:$0xff]  }
 0x2c2   : > { %5435 = vmatpush1.bf16.msra.mxu0 %v17963_v17  ;;  %v18007_v17 = vld [vmem:[%s28564_s3 + $0x9c4] ss:$16 sps:$4 sm:$0xff]  }
 0x2c3   : > { %5873 = vmatpush1.bf16.msra.mxu1 %v17966_v4  ;;  %5436 = vmatprep.subr.bf16.mxu0 %v17971_v3  ;;  %v18010_v4 = vld [vmem:[%s28564_s3 + $0x9cc] ss:$16 sps:$4 sm:$0xff]   ;;  %v18005_v3 = vld [vmem:[%s28564_s3 + $0x9c0] ss:$16 sps:$4 sm:$0xff]  }
 0x2c4   : > { %5874 = vmatprep.subr.bf16.mxu1 %v17974_v8  ;;  %v18008_v8 = vld [vmem:[%s28564_s3 + $0x9c8] ss:$16 sps:$4 sm:$0xff]  }
 0x2c6   : > { %5437 = vmatpush1.bf16.msra.mxu0 %v17969_v59  ;;  %v18013_v59 = vld [vmem:[%s28564_s3 + $0x9e4] ss:$16 sps:$4 sm:$0xff]  }
 0x2c7   : > { %5875 = vmatpush1.bf16.msra.mxu1 %v17972_v56  ;;  %5438 = vmatprep.subr.bf16.mxu0 %v17977_v42  ;;  %v18016_v56 = vld [vmem:[%s28564_s3 + $0x9ec] ss:$16 sps:$4 sm:$0xff]   ;;  %v18011_v42 = vld [vmem:[%s28564_s3 + $0x9e0] ss:$16 sps:$4 sm:$0xff]  }
 0x2c8   : > { %5876 = vmatprep.subr.bf16.mxu1 %v17980_v21  ;;  %v18014_v21 = vld [vmem:[%s28564_s3 + $0x9e8] ss:$16 sps:$4 sm:$0xff]  }
 0x2ca   : > { %5439 = vmatpush1.bf16.msra.mxu0 %v17975_v41  ;;  %v18019_v41 = vld [vmem:[%s28564_s3 + $0xa04] ss:$16 sps:$4 sm:$0xff]  }
 0x2cb   : > { %5877 = vmatpush1.bf16.msra.mxu1 %v17978_v2  ;;  %5440 = vmatprep.subr.bf16.mxu0 %v17983_v38  ;;  %v18022_v2 = vld [vmem:[%s28564_s3 + $0xa0c] ss:$16 sps:$4 sm:$0xff]   ;;  %v18017_v38 = vld [vmem:[%s28564_s3 + $0xa00] ss:$16 sps:$4 sm:$0xff]  }
 0x2cc   : > { %5878 = vmatprep.subr.bf16.mxu1 %v17986_v25  ;;  %v18020_v25 = vld [vmem:[%s28564_s3 + $0xa08] ss:$16 sps:$4 sm:$0xff]  }
 0x2ce   : > { %5441 = vmatpush1.bf16.msra.mxu0 %v17981_v0  ;;  %v18025_v0 = vld [vmem:[%s28564_s3 + $0xa24] ss:$16 sps:$4 sm:$0xff]  }
 0x2cf   : > { %5879 = vmatpush1.bf16.msra.mxu1 %v17984_v32  ;;  %5442 = vmatprep.subr.bf16.mxu0 %v17989_v51  ;;  %v18028_v32 = vld [vmem:[%s28564_s3 + $0xa2c] ss:$16 sps:$4 sm:$0xff]   ;;  %v18023_v51 = vld [vmem:[%s28564_s3 + $0xa20] ss:$16 sps:$4 sm:$0xff]  }
 0x2d0   : > { %5880 = vmatprep.subr.bf16.mxu1 %v17992_v29  ;;  %v18026_v29 = vld [vmem:[%s28564_s3 + $0xa28] ss:$16 sps:$4 sm:$0xff]  }
 0x2d2   : > { %5443 = vmatpush1.bf16.msra.mxu0 %v17987_v31  ;;  %v18031_v31 = vld [vmem:[%s28564_s3 + $0xa44] ss:$16 sps:$4 sm:$0xff]  }
 0x2d3   : > { %5881 = vmatpush1.bf16.msra.mxu1 %v17990_v62  ;;  %5444 = vmatprep.subr.bf16.mxu0 %v17995_v12  ;;  %v18034_v62 = vld [vmem:[%s28564_s3 + $0xa4c] ss:$16 sps:$4 sm:$0xff]   ;;  %v18029_v12 = vld [vmem:[%s28564_s3 + $0xa40] ss:$16 sps:$4 sm:$0xff]  }
 0x2d4   : > { %5882 = vmatprep.subr.bf16.mxu1 %v17998_v30  ;;  %v18032_v30 = vld [vmem:[%s28564_s3 + $0xa48] ss:$16 sps:$4 sm:$0xff]  }
 0x2d6   : > { %5445 = vmatpush1.bf16.msra.mxu0 %v17993_v18  ;;  %v18037_v18 = vld [vmem:[%s28564_s3 + $0xa64] ss:$16 sps:$4 sm:$0xff]  }
 0x2d7   : > { %5883 = vmatpush1.bf16.msra.mxu1 %v17996_v36  ;;  %5446 = vmatprep.subr.bf16.mxu0 %v18001_v55  ;;  %v18040_v36 = vld [vmem:[%s28564_s3 + $0xa6c] ss:$16 sps:$4 sm:$0xff]   ;;  %v18035_v55 = vld [vmem:[%s28564_s3 + $0xa60] ss:$16 sps:$4 sm:$0xff]  }
 0x2d8   : > { %5884 = vmatprep.subr.bf16.mxu1 %v18004_v61  ;;  %v18038_v61 = vld [vmem:[%s28564_s3 + $0xa68] ss:$16 sps:$4 sm:$0xff]  }
 0x2da   : > { %5447 = vmatpush1.bf16.msra.mxu0 %v17999_v5  ;;  %v18043_v5 = vld [vmem:[%s28564_s3 + $0xa84] ss:$16 sps:$4 sm:$0xff]  }
 0x2db   : > { %5885 = vmatpush1.bf16.msra.mxu1 %v18002_v10  ;;  %5448 = vmatprep.subr.bf16.mxu0 %v18007_v17  ;;  %v18046_v10 = vld [vmem:[%s28564_s3 + $0xa8c] ss:$16 sps:$4 sm:$0xff]   ;;  %v18041_v17 = vld [vmem:[%s28564_s3 + $0xa80] ss:$16 sps:$4 sm:$0xff]  }
 0x2dc   : > { %5886 = vmatprep.subr.bf16.mxu1 %v18010_v4  ;;  %v18044_v4 = vld [vmem:[%s28564_s3 + $0xa88] ss:$16 sps:$4 sm:$0xff]  }
 0x2de   : > { %5449 = vmatpush1.bf16.msra.mxu0 %v18005_v3  ;;  %v18049_v3 = vld [vmem:[%s28564_s3 + $0xaa4] ss:$16 sps:$4 sm:$0xff]  }
 0x2df   : > { %5887 = vmatpush1.bf16.msra.mxu1 %v18008_v8  ;;  %5450 = vmatprep.subr.bf16.mxu0 %v18013_v59  ;;  %v18052_v8 = vld [vmem:[%s28564_s3 + $0xaac] ss:$16 sps:$4 sm:$0xff]   ;;  %v18047_v59 = vld [vmem:[%s28564_s3 + $0xaa0] ss:$16 sps:$4 sm:$0xff]  }
 0x2e0   : > { %5888 = vmatprep.subr.bf16.mxu1 %v18016_v56  ;;  %v18050_v56 = vld [vmem:[%s28564_s3 + $0xaa8] ss:$16 sps:$4 sm:$0xff]  }
 0x2e2   : > { %5451 = vmatpush1.bf16.msra.mxu0 %v18011_v42  ;;  %v18055_v42 = vld [vmem:[%s28564_s3 + $0xac4] ss:$16 sps:$4 sm:$0xff]  }
 0x2e3   : > { %5889 = vmatpush1.bf16.msra.mxu1 %v18014_v21  ;;  %5493 = vmatprep.subr.bf16.mxu0 %v18019_v41  ;;  %v18058_v21 = vld [vmem:[%s28564_s3 + $0xacc] ss:$16 sps:$4 sm:$0xff]   ;;  %v18053_v41 = vld [vmem:[%s28564_s3 + $0xac0] ss:$16 sps:$4 sm:$0xff]  }
 0x2e4   : > { %5931 = vmatprep.subr.bf16.mxu1 %v18022_v2  ;;  %v18056_v2 = vld [vmem:[%s28564_s3 + $0xac8] ss:$16 sps:$4 sm:$0xff]  }
 0x2e5   : > { %5453 = vmatmul.mubr.bf16.vlgmr.msra.gmra.mrb[128].mxu0 %v21747_v63 }
 0x2e6   : > { %5891 = vmatmul.mubr.bf16.vlgmr.msra.gmra.mrb[128].mxu1 %v21747_v63  ;;  %5462 = vmatprep.mubr.bf16.mxu0 %v21825_v15 }
 0x2e7   : > { %5494 = vmatpush1.bf16.msra.mxu0 %v18017_v38  ;;  %5900 = vmatprep.mubr.bf16.mxu1 %v21825_v15  ;;  %v18061_v38 = vld [vmem:[%s28564_s3 + $0xae4] ss:$16 sps:$4 sm:$0xff]  }
 0x2e8   : > { %5932 = vmatpush1.bf16.msra.mxu1 %v18020_v25  ;;  %5495 = vmatprep.subr.bf16.mxu0 %v18025_v0  ;;  %v18064_v25 = vld [vmem:[%s28564_s3 + $0xaec] ss:$16 sps:$4 sm:$0xff]   ;;  %v18059_v0 = vld [vmem:[%s28564_s3 + $0xae0] ss:$16 sps:$4 sm:$0xff]  }
 0x2e9   : > { %5933 = vmatprep.subr.bf16.mxu1 %v18028_v32  ;;  %v18062_v32 = vld [vmem:[%s28564_s3 + $0xae8] ss:$16 sps:$4 sm:$0xff]  }
 0x2eb   : > { %5496 = vmatpush1.bf16.msra.mxu0 %v18023_v51  ;;  %v18067_v51 = vld [vmem:[%s28564_s3 + $0xb04] ss:$16 sps:$4 sm:$0xff]  }
 0x2ec   : > { %5934 = vmatpush1.bf16.msra.mxu1 %v18026_v29  ;;  %5497 = vmatprep.subr.bf16.mxu0 %v18031_v31  ;;  %v18070_v29 = vld [vmem:[%s28564_s3 + $0xb0c] ss:$16 sps:$4 sm:$0xff]   ;;  %v18065_v31 = vld [vmem:[%s28564_s3 + $0xb00] ss:$16 sps:$4 sm:$0xff]  }
 0x2ed   : > { %5463 = vmatmul.mubr.bf16.gmra.mrb[132].mxu0 %v21818_v24  ;;  %5935 = vmatprep.subr.bf16.mxu1 %v18034_v62  ;;  %v18068_v62 = vld [vmem:[%s28564_s3 + $0xb08] ss:$16 sps:$4 sm:$0xff]  }
 0x2ee   : > { %5901 = vmatmul.mubr.bf16.gmra.mrb[132].mxu1 %v21818_v24  ;;  %5472 = vmatprep.mubr.bf16.mxu0 %v21897_v16 }
 0x2ef   : > { %5498 = vmatpush1.bf16.msra.mxu0 %v18029_v12  ;;  %5910 = vmatprep.mubr.bf16.mxu1 %v21897_v16  ;;  %v18073_v12 = vld [vmem:[%s28564_s3 + $0xb24] ss:$16 sps:$4 sm:$0xff]  }
 0x2f0   : > { %5936 = vmatpush1.bf16.msra.mxu1 %v18032_v30  ;;  %5499 = vmatprep.subr.bf16.mxu0 %v18037_v18  ;;  %v18076_v30 = vld [vmem:[%s28564_s3 + $0xb2c] ss:$16 sps:$4 sm:$0xff]   ;;  %v18071_v18 = vld [vmem:[%s28564_s3 + $0xb20] ss:$16 sps:$4 sm:$0xff]  }
 0x2f1   : > { %5937 = vmatprep.subr.bf16.mxu1 %v18040_v36  ;;  %v18074_v36 = vld [vmem:[%s28564_s3 + $0xb28] ss:$16 sps:$4 sm:$0xff]  }
 0x2f3   : > { %5500 = vmatpush1.bf16.msra.mxu0 %v18035_v55  ;;  %v18079_v55 = vld [vmem:[%s28564_s3 + $0xb44] ss:$16 sps:$4 sm:$0xff]  }
 0x2f4   : > { %5938 = vmatpush1.bf16.msra.mxu1 %v18038_v61  ;;  %5501 = vmatprep.subr.bf16.mxu0 %v18043_v5  ;;  %v18082_v61 = vld [vmem:[%s28564_s3 + $0xb4c] ss:$16 sps:$4 sm:$0xff]   ;;  %v18077_v5 = vld [vmem:[%s28564_s3 + $0xb40] ss:$16 sps:$4 sm:$0xff]  }
 0x2f5   : > { %5473 = vmatmul.mubr.bf16.gmra.mrb[136].mxu0 %v21889_v19  ;;  %5939 = vmatprep.subr.bf16.mxu1 %v18046_v10  ;;  %v18080_v10 = vld [vmem:[%s28564_s3 + $0xb48] ss:$16 sps:$4 sm:$0xff]  }
 0x2f6   : > { %5911 = vmatmul.mubr.bf16.gmra.mrb[136].mxu1 %v21889_v19  ;;  %5482 = vmatprep.mubr.bf16.mxu0 %v21966_v26 }
 0x2f7   : > { %5502 = vmatpush1.bf16.msra.mxu0 %v18041_v17  ;;  %5920 = vmatprep.mubr.bf16.mxu1 %v21966_v26  ;;  %v18085_v17 = vld [vmem:[%s28564_s3 + $0xb64] ss:$16 sps:$4 sm:$0xff]  }
 0x2f8   : > { %5940 = vmatpush1.bf16.msra.mxu1 %v18044_v4  ;;  %5503 = vmatprep.subr.bf16.mxu0 %v18049_v3  ;;  %v18088_v4 = vld [vmem:[%s28564_s3 + $0xb6c] ss:$16 sps:$4 sm:$0xff]   ;;  %v18083_v3 = vld [vmem:[%s28564_s3 + $0xb60] ss:$16 sps:$4 sm:$0xff]  }
 0x2f9   : > { %5941 = vmatprep.subr.bf16.mxu1 %v18052_v8  ;;  %v18086_v8 = vld [vmem:[%s28564_s3 + $0xb68] ss:$16 sps:$4 sm:$0xff]  }
 0x2fb   : > { %5504 = vmatpush1.bf16.msra.mxu0 %v18047_v59  ;;  %v18091_v59 = vld [vmem:[%s28564_s3 + $0xb84] ss:$16 sps:$4 sm:$0xff]  }
 0x2fc   : > { %5942 = vmatpush1.bf16.msra.mxu1 %v18050_v56  ;;  %5505 = vmatprep.subr.bf16.mxu0 %v18055_v42  ;;  %v18094_v56 = vld [vmem:[%s28564_s3 + $0xb8c] ss:$16 sps:$4 sm:$0xff]   ;;  %v18089_v42 = vld [vmem:[%s28564_s3 + $0xb80] ss:$16 sps:$4 sm:$0xff]  }
 0x2fd   : > { %5483 = vmatmul.mubr.bf16.gmra.mrb[140].mxu0 %v21958_v53  ;;  %5943 = vmatprep.subr.bf16.mxu1 %v18058_v21  ;;  %v18092_v21 = vld [vmem:[%s28564_s3 + $0xb88] ss:$16 sps:$4 sm:$0xff]  }
 0x2fe   : > { %5921 = vmatmul.mubr.bf16.gmra.mrb[140].mxu1 %v21958_v53  ;;  %5525 = vmatprep.mubr.bf16.mxu0 %v21758_v14 }
 0x2ff   : > { %5506 = vmatpush1.bf16.msra.mxu0 %v18053_v41  ;;  %5963 = vmatprep.mubr.bf16.mxu1 %v21758_v14  ;;  %v18097_v41 = vld [vmem:[%s28564_s3 + $0xba4] ss:$16 sps:$4 sm:$0xff]  }
 0x300   : > { %5944 = vmatpush1.bf16.msra.mxu1 %v18056_v2  ;;  %5507 = vmatprep.subr.bf16.mxu0 %v18061_v38  ;;  %v18100_v2 = vld [vmem:[%s28564_s3 + $0xbac] ss:$16 sps:$4 sm:$0xff]   ;;  %v18095_v38 = vld [vmem:[%s28564_s3 + $0xba0] ss:$16 sps:$4 sm:$0xff]  }
 0x301   : > { %5945 = vmatprep.subr.bf16.mxu1 %v18064_v25  ;;  %v18098_v25 = vld [vmem:[%s28564_s3 + $0xba8] ss:$16 sps:$4 sm:$0xff]  }
 0x303   : > { %5508 = vmatpush1.bf16.msra.mxu0 %v18059_v0  ;;  %v18103_v0 = vld [vmem:[%s28564_s3 + $0xbc4] ss:$16 sps:$4 sm:$0xff]  }
 0x304   : > { %5946 = vmatpush1.bf16.msra.mxu1 %v18062_v32  ;;  %5509 = vmatprep.subr.bf16.mxu0 %v18067_v51  ;;  %v18106_v32 = vld [vmem:[%s28564_s3 + $0xbcc] ss:$16 sps:$4 sm:$0xff]   ;;  %v18101_v51 = vld [vmem:[%s28564_s3 + $0xbc0] ss:$16 sps:$4 sm:$0xff]  }
 0x305   : > { %5947 = vmatprep.subr.bf16.mxu1 %v18070_v29  ;;  %v18104_v29 = vld [vmem:[%s28564_s3 + $0xbc8] ss:$16 sps:$4 sm:$0xff]  }
 0x307   : > { %5510 = vmatpush1.bf16.msra.mxu0 %v18065_v31  ;;  %v18109_v31 = vld [vmem:[%s28564_s3 + $0xbe4] ss:$16 sps:$4 sm:$0xff]  }
 0x308   : > { %5948 = vmatpush1.bf16.msra.mxu1 %v18068_v62  ;;  %5511 = vmatprep.subr.bf16.mxu0 %v18073_v12  ;;  %v18112_v62 = vld [vmem:[%s28564_s3 + $0xbec] ss:$16 sps:$4 sm:$0xff]   ;;  %v18107_v12 = vld [vmem:[%s28564_s3 + $0xbe0] ss:$16 sps:$4 sm:$0xff]  }
 0x309   : > { %5949 = vmatprep.subr.bf16.mxu1 %v18076_v30  ;;  %v18110_v30 = vld [vmem:[%s28564_s3 + $0xbe8] ss:$16 sps:$4 sm:$0xff]  }
 0x30b   : > { %5512 = vmatpush1.bf16.msra.mxu0 %v18071_v18  ;;  %v18115_v18 = vld [vmem:[%s28564_s3 + $0xc04] ss:$16 sps:$4 sm:$0xff]  }
 0x30c   : > { %5950 = vmatpush1.bf16.msra.mxu1 %v18074_v36  ;;  %5513 = vmatprep.subr.bf16.mxu0 %v18079_v55  ;;  %v18118_v36 = vld [vmem:[%s28564_s3 + $0xc0c] ss:$16 sps:$4 sm:$0xff]   ;;  %v18113_v55 = vld [vmem:[%s28564_s3 + $0xc00] ss:$16 sps:$4 sm:$0xff]  }
 0x30d   : > { %5951 = vmatprep.subr.bf16.mxu1 %v18082_v61  ;;  %v18116_v61 = vld [vmem:[%s28564_s3 + $0xc08] ss:$16 sps:$4 sm:$0xff]  }
 0x30f   : > { %5514 = vmatpush1.bf16.msra.mxu0 %v18077_v5  ;;  %v18121_v5 = vld [vmem:[%s28564_s3 + $0xc24] ss:$16 sps:$4 sm:$0xff]  }
 0x310   : > { %5952 = vmatpush1.bf16.msra.mxu1 %v18080_v10  ;;  %5515 = vmatprep.subr.bf16.mxu0 %v18085_v17  ;;  %v29075_v10 = vld [vmem:[#allocation57_spill] sm:$0xff] }
 0x311   : > { %5953 = vmatprep.subr.bf16.mxu1 %v18088_v4  ;;  %v18124_v17 = vld [vmem:[%s28564_s3 + $0xc2c] ss:$16 sps:$4 sm:$0xff]  }
 0x312   : > { %v29076_v4 = vld [vmem:[#allocation59_spill] sm:$0xff] }
 0x313   : > { %5516 = vmatpush1.bf16.msra.mxu0 %v18083_v3  ;;  %v18119_v3 = vld [vmem:[%s28564_s3 + $0xc20] ss:$16 sps:$4 sm:$0xff]  }
 0x314   : > { %5954 = vmatpush1.bf16.msra.mxu1 %v18086_v8  ;;  %5517 = vmatprep.subr.bf16.mxu0 %v18091_v59  ;;  %v18122_v8 = vld [vmem:[%s28564_s3 + $0xc28] ss:$16 sps:$4 sm:$0xff]   ;;  %v18127_v59 = vld [vmem:[%s28564_s3 + $0xc44] ss:$16 sps:$4 sm:$0xff]  }
 0x315   : > { %5955 = vmatprep.subr.bf16.mxu1 %v18094_v56  ;;  %v18130_v56 = vld [vmem:[%s28564_s3 + $0xc4c] ss:$16 sps:$4 sm:$0xff]  }
 0x317   : > { %5518 = vmatpush1.bf16.msra.mxu0 %v18089_v42  ;;  %v18125_v42 = vld [vmem:[%s28564_s3 + $0xc40] ss:$16 sps:$4 sm:$0xff]  }
 0x318   : > { %5956 = vmatpush1.bf16.msra.mxu1 %v18092_v21  ;;  %5519 = vmatprep.subr.bf16.mxu0 %v18097_v41  ;;  %v18128_v21 = vld [vmem:[%s28564_s3 + $0xc48] ss:$16 sps:$4 sm:$0xff]   ;;  %v18133_v41 = vld [vmem:[%s28564_s3 + $0xc64] ss:$16 sps:$4 sm:$0xff]  }
 0x319   : > { %5957 = vmatprep.subr.bf16.mxu1 %v18100_v2  ;;  %v29077_v2 = vld [vmem:[#allocation18_spill] sm:$0xff] }
 0x31b   : > { %5520 = vmatpush1.bf16.msra.mxu0 %v18095_v38  ;;  %v18136_v38 = vld [vmem:[%s28564_s3 + $0xc6c] ss:$16 sps:$4 sm:$0xff]  }
 0x31c   : > { %5958 = vmatpush1.bf16.msra.mxu1 %v18098_v25  ;;  %5521 = vmatprep.subr.bf16.mxu0 %v18103_v0  ;;  %v29078_v25 = vld [vmem:[#allocation61_spill] sm:$0xff]  ;;  %v18131_v0 = vld [vmem:[%s28564_s3 + $0xc60] ss:$16 sps:$4 sm:$0xff]  }
 0x31d   : > { %5959 = vmatprep.subr.bf16.mxu1 %v18106_v32  ;;  %v18134_v32 = vld [vmem:[%s28564_s3 + $0xc68] ss:$16 sps:$4 sm:$0xff]  }
 0x31f   : > { %5522 = vmatpush1.bf16.msra.mxu0 %v18101_v51  ;;  %v18139_v51 = vld [vmem:[%s28564_s3 + $0xc84] ss:$16 sps:$4 sm:$0xff]  }
 0x320   : > { %5960 = vmatpush1.bf16.msra.mxu1 %v18104_v29  ;;  %5523 = vmatprep.subr.bf16.mxu0 %v18109_v31  ;;  %v18142_v29 = vld [vmem:[%s28564_s3 + $0xc8c] ss:$16 sps:$4 sm:$0xff]   ;;  %v18137_v31 = vld [vmem:[%s28564_s3 + $0xc80] ss:$16 sps:$4 sm:$0xff]  }
 0x321   : > { %5961 = vmatprep.subr.bf16.mxu1 %v18112_v62  ;;  %v18140_v62 = vld [vmem:[%s28564_s3 + $0xc88] ss:$16 sps:$4 sm:$0xff]  }
 0x323   : > { %5524 = vmatpush1.bf16.msra.mxu0 %v18107_v12  ;;  %v18145_v12 = vld [vmem:[%s28564_s3 + $0xca4] ss:$16 sps:$4 sm:$0xff]  }
 0x324   : > { %5962 = vmatpush1.bf16.msra.mxu1 %v18110_v30  ;;  %8309 = vmatprep.subr.bf16.mxu0 %v18115_v18  ;;  %v29079_v30 = vld [vmem:[#allocation20_spill] sm:$0xff]  ;;  %v18148_v18 = vld [vmem:[%s28564_s3 + $0xcac] ss:$16 sps:$4 sm:$0xff]  }
 0x325   : > { %8747 = vmatprep.subr.bf16.mxu1 %v18118_v36  ;;  %v29080_v36 = vld [vmem:[#allocation64_spill] sm:$0xff] }
 0x326   : > { %5526 = vmatmul.mubr.bf16.vlgmr.msra.gmra.mrb[128].mxu0 %v29075_v10 }
 0x327   : > { %5964 = vmatmul.mubr.bf16.vlgmr.msra.gmra.mrb[128].mxu1 %v29075_v10  ;;  %5535 = vmatprep.mubr.bf16.mxu0 %v29076_v4 }
 0x328   : > { %5973 = vmatprep.mubr.bf16.mxu1 %v29076_v4  ;;  %8310 = vmatpush1.bf16.msra.mxu0 %v18113_v55  ;;  %v18143_v55 = vld [vmem:[%s28564_s3 + $0xca0] ss:$16 sps:$4 sm:$0xff]  }
 0x329   : > { %8748 = vmatpush1.bf16.msra.mxu1 %v18116_v61  ;;  %8311 = vmatprep.subr.bf16.mxu0 %v18121_v5  ;;  %v18146_v61 = vld [vmem:[%s28564_s3 + $0xca8] ss:$16 sps:$4 sm:$0xff]   ;;  %v18151_v5 = vld [vmem:[%s28564_s3 + $0xcc4] ss:$16 sps:$4 sm:$0xff]  }
 0x32a   : > { %8749 = vmatprep.subr.bf16.mxu1 %v18124_v17  ;;  %v18154_v17 = vld [vmem:[%s28564_s3 + $0xccc] ss:$16 sps:$4 sm:$0xff]  }
 0x32c   : > { %8312 = vmatpush1.bf16.msra.mxu0 %v18119_v3  ;;  %v18149_v3 = vld [vmem:[%s28564_s3 + $0xcc0] ss:$16 sps:$4 sm:$0xff]  }
 0x32d   : > { %8750 = vmatpush1.bf16.msra.mxu1 %v18122_v8  ;;  %8313 = vmatprep.subr.bf16.mxu0 %v18127_v59  ;;  %v18152_v8 = vld [vmem:[%s28564_s3 + $0xcc8] ss:$16 sps:$4 sm:$0xff]   ;;  %v18157_v59 = vld [vmem:[%s28564_s3 + $0xce4] ss:$16 sps:$4 sm:$0xff]  }
 0x32e   : > { %5536 = vmatmul.mubr.bf16.gmra.mrb[132].mxu0 %v29077_v2  ;;  %8751 = vmatprep.subr.bf16.mxu1 %v18130_v56  ;;  %v29081_v56 = vld [vmem:[#allocation63_spill] sm:$0xff] }
 0x32f   : > { %5974 = vmatmul.mubr.bf16.gmra.mrb[132].mxu1 %v29077_v2  ;;  %5545 = vmatprep.mubr.bf16.mxu0 %v29078_v25 }
 0x330   : > { %5983 = vmatprep.mubr.bf16.mxu1 %v29078_v25  ;;  %8314 = vmatpush1.bf16.msra.mxu0 %v18125_v42  ;;  %v18160_v42 = vld [vmem:[%s28564_s3 + $0xcec] ss:$16 sps:$4 sm:$0xff]  }
 0x331   : > { %8752 = vmatpush1.bf16.msra.mxu1 %v18128_v21  ;;  %8315 = vmatprep.subr.bf16.mxu0 %v18133_v41  ;;  %v29082_v21 = vld [vmem:[#allocation56_spill] sm:$0xff] }
 0x332   : > { %8753 = vmatprep.subr.bf16.mxu1 %v18136_v38  ;;  %v18155_v41 = vld [vmem:[%s28564_s3 + $0xce0] ss:$16 sps:$4 sm:$0xff]   ;;  %v18158_v38 = vld [vmem:[%s28564_s3 + $0xce8] ss:$16 sps:$4 sm:$0xff]  }
 0x334   : > { %8316 = vmatpush1.bf16.msra.mxu0 %v18131_v0  ;;  %v18163_v0 = vld [vmem:[%s28564_s3 + $0xd04] ss:$16 sps:$4 sm:$0xff]  }
 0x335   : > { %8754 = vmatpush1.bf16.msra.mxu1 %v18134_v32  ;;  %8317 = vmatprep.subr.bf16.mxu0 %v18139_v51  ;;  %v18166_v32 = vld [vmem:[%s28564_s3 + $0xd0c] ss:$16 sps:$4 sm:$0xff]   ;;  %v18161_v51 = vld [vmem:[%s28564_s3 + $0xd00] ss:$16 sps:$4 sm:$0xff]  }
 0x336   : > { %5546 = vmatmul.mubr.bf16.gmra.mrb[136].mxu0 %v29079_v30  ;;  %8755 = vmatprep.subr.bf16.mxu1 %v18142_v29  ;;  %v18164_v29 = vld [vmem:[%s28564_s3 + $0xd08] ss:$16 sps:$4 sm:$0xff]  }
 0x337   : > { %5984 = vmatmul.mubr.bf16.gmra.mrb[136].mxu1 %v29079_v30  ;;  %5555 = vmatprep.mubr.bf16.mxu0 %v29080_v36 }
 0x338   : > { %5993 = vmatprep.mubr.bf16.mxu1 %v29080_v36  ;;  %8318 = vmatpush1.bf16.msra.mxu0 %v18137_v31  ;;  %v18169_v31 = vld [vmem:[%s28564_s3 + $0xd24] ss:$16 sps:$4 sm:$0xff]  }
 0x339   : > { %8756 = vmatpush1.bf16.msra.mxu1 %v18140_v62  ;;  %8319 = vmatprep.subr.bf16.mxu0 %v18145_v12  ;;  %v18172_v62 = vld [vmem:[%s28564_s3 + $0xd2c] ss:$16 sps:$4 sm:$0xff]   ;;  %v18167_v12 = vld [vmem:[%s28564_s3 + $0xd20] ss:$16 sps:$4 sm:$0xff]  }
 0x33a   : > { %8757 = vmatprep.subr.bf16.mxu1 %v18148_v18  ;;  %v18170_v18 = vld [vmem:[%s28564_s3 + $0xd28] ss:$16 sps:$4 sm:$0xff]  }
 0x33c   : > { %8320 = vmatpush1.bf16.msra.mxu0 %v18143_v55  ;;  %v18175_v55 = vld [vmem:[%s28564_s3 + $0xd44] ss:$16 sps:$4 sm:$0xff]  }
 0x33d   : > { %8758 = vmatpush1.bf16.msra.mxu1 %v18146_v61  ;;  %8321 = vmatprep.subr.bf16.mxu0 %v18151_v5  ;;  %v18178_v61 = vld [vmem:[%s28564_s3 + $0xd4c] ss:$16 sps:$4 sm:$0xff]   ;;  %v18173_v5 = vld [vmem:[%s28564_s3 + $0xd40] ss:$16 sps:$4 sm:$0xff]  }
 0x33e   : > { %5556 = vmatmul.mubr.bf16.gmra.mrb[140].mxu0 %v29081_v56  ;;  %8759 = vmatprep.subr.bf16.mxu1 %v18154_v17  ;;  %v18176_v17 = vld [vmem:[%s28564_s3 + $0xd48] ss:$16 sps:$4 sm:$0xff]  }
 0x33f   : > { %5994 = vmatmul.mubr.bf16.gmra.mrb[140].mxu1 %v29081_v56  ;;  %8341 = vmatprep.mubr.bf16.mxu0 %v29082_v21 }
 0x340   : > { %8322 = vmatpush1.bf16.msra.mxu0 %v18149_v3  ;;  %8779 = vmatprep.mubr.bf16.mxu1 %v29082_v21  ;;  %v18181_v3 = vld [vmem:[%s28564_s3 + $0xd64] ss:$16 sps:$4 sm:$0xff]  }
 0x341   : > { %8760 = vmatpush1.bf16.msra.mxu1 %v18152_v8  ;;  %8323 = vmatprep.subr.bf16.mxu0 %v18157_v59  ;;  %v18184_v8 = vld [vmem:[%s28564_s3 + $0xd6c] ss:$16 sps:$4 sm:$0xff]   ;;  %v18179_v59 = vld [vmem:[%s28564_s3 + $0xd60] ss:$16 sps:$4 sm:$0xff]   ;;  %v18187_v21 = vld [vmem:[%s28564_s3 + $0xd84] ss:$16 sps:$4 sm:$0xff]  }
 0x342   : > { %8761 = vmatprep.subr.bf16.mxu1 %v18160_v42  ;;  %v18182_v42 = vld [vmem:[%s28564_s3 + $0xd68] ss:$16 sps:$4 sm:$0xff]  }
 0x344   : > { %8324 = vmatpush1.bf16.msra.mxu0 %v18155_v41  ;;  %v18190_v41 = vld [vmem:[%s28564_s3 + $0xd8c] ss:$16 sps:$4 sm:$0xff]  }
 0x345   : > { %8762 = vmatpush1.bf16.msra.mxu1 %v18158_v38  ;;  %8325 = vmatprep.subr.bf16.mxu0 %v18163_v0  ;;  %v18185_v38 = vld [vmem:[%s28564_s3 + $0xd80] ss:$16 sps:$4 sm:$0xff]   ;;  %v18188_v0 = vld [vmem:[%s28564_s3 + $0xd88] ss:$16 sps:$4 sm:$0xff]  }
 0x346   : > { %8763 = vmatprep.subr.bf16.mxu1 %v18166_v32  ;;  %v18193_v32 = vld [vmem:[%s28564_s3 + $0xda4] ss:$16 sps:$4 sm:$0xff]  }
 0x348   : > { %8326 = vmatpush1.bf16.msra.mxu0 %v18161_v51  ;;  %v18196_v51 = vld [vmem:[%s28564_s3 + $0xdac] ss:$16 sps:$4 sm:$0xff]  }
 0x349   : > { %8764 = vmatpush1.bf16.msra.mxu1 %v18164_v29  ;;  %8327 = vmatprep.subr.bf16.mxu0 %v18169_v31  ;;  %v18191_v29 = vld [vmem:[%s28564_s3 + $0xda0] ss:$16 sps:$4 sm:$0xff]   ;;  %v18194_v31 = vld [vmem:[%s28564_s3 + $0xda8] ss:$16 sps:$4 sm:$0xff]  }
 0x34a   : > { %8765 = vmatprep.subr.bf16.mxu1 %v18172_v62  ;;  %v18199_v62 = vld [vmem:[%s28564_s3 + $0xdc4] ss:$16 sps:$4 sm:$0xff]  }
 0x34c   : > { %8328 = vmatpush1.bf16.msra.mxu0 %v18167_v12  ;;  %v18202_v12 = vld [vmem:[%s28564_s3 + $0xdcc] ss:$16 sps:$4 sm:$0xff]  }
 0x34d   : > { %8766 = vmatpush1.bf16.msra.mxu1 %v18170_v18  ;;  %8329 = vmatprep.subr.bf16.mxu0 %v18175_v55  ;;  %v18197_v18 = vld [vmem:[%s28564_s3 + $0xdc0] ss:$16 sps:$4 sm:$0xff]   ;;  %v18200_v55 = vld [vmem:[%s28564_s3 + $0xdc8] ss:$16 sps:$4 sm:$0xff]  }
 0x34e   : > { %8767 = vmatprep.subr.bf16.mxu1 %v18178_v61  ;;  %v18205_v61 = vld [vmem:[%s28564_s3 + $0xde4] ss:$16 sps:$4 sm:$0xff]  }
 0x350   : > { %8330 = vmatpush1.bf16.msra.mxu0 %v18173_v5  ;;  %v18208_v5 = vld [vmem:[%s28564_s3 + $0xdec] ss:$16 sps:$4 sm:$0xff]  }
 0x351   : > { %8768 = vmatpush1.bf16.msra.mxu1 %v18176_v17  ;;  %8331 = vmatprep.subr.bf16.mxu0 %v18181_v3  ;;  %v18203_v17 = vld [vmem:[%s28564_s3 + $0xde0] ss:$16 sps:$4 sm:$0xff]   ;;  %v18206_v3 = vld [vmem:[%s28564_s3 + $0xde8] ss:$16 sps:$4 sm:$0xff]  }
 0x352   : > { %8769 = vmatprep.subr.bf16.mxu1 %v18184_v8  ;;  %v18211_v8 = vld [vmem:[%s28564_s3 + $0xe04] ss:$16 sps:$4 sm:$0xff]  }
 0x354   : > { %8332 = vmatpush1.bf16.msra.mxu0 %v18179_v59  ;;  %v18214_v59 = vld [vmem:[%s28564_s3 + $0xe0c] ss:$16 sps:$4 sm:$0xff]  }
 0x355   : > { %8770 = vmatpush1.bf16.msra.mxu1 %v18182_v42  ;;  %8333 = vmatprep.subr.bf16.mxu0 %v18187_v21  ;;  %v18209_v42 = vld [vmem:[%s28564_s3 + $0xe00] ss:$16 sps:$4 sm:$0xff]   ;;  %v18212_v21 = vld [vmem:[%s28564_s3 + $0xe08] ss:$16 sps:$4 sm:$0xff]  }
 0x356   : > { %8771 = vmatprep.subr.bf16.mxu1 %v18190_v41  ;;  %v18217_v41 = vld [vmem:[%s28564_s3 + $0xe24] ss:$16 sps:$4 sm:$0xff]  }
 0x358   : > { %8334 = vmatpush1.bf16.msra.mxu0 %v18185_v38  ;;  %v29083_v38 = vld [vmem:[#allocation15_spill] sm:$0xff] }
 0x359   : > { %8772 = vmatpush1.bf16.msra.mxu1 %v18188_v0  ;;  %8335 = vmatprep.subr.bf16.mxu0 %v18193_v32  ;;  %v18220_v0 = vld [vmem:[%s28564_s3 + $0xe2c] ss:$16 sps:$4 sm:$0xff]   ;;  %v29084_v32 = vld [vmem:[#allocation58_spill] sm:$0xff] }
 0x35a   : > { %8773 = vmatprep.subr.bf16.mxu1 %v18196_v51  ;;  %v18215_v51 = vld [vmem:[%s28564_s3 + $0xe20] ss:$16 sps:$4 sm:$0xff]  }
 0x35c   : > { %8336 = vmatpush1.bf16.msra.mxu0 %v18191_v29  ;;  %v18218_v29 = vld [vmem:[%s28564_s3 + $0xe28] ss:$16 sps:$4 sm:$0xff]  }
 0x35d   : > { %8774 = vmatpush1.bf16.msra.mxu1 %v18194_v31  ;;  %8337 = vmatprep.subr.bf16.mxu0 %v18199_v62  ;;  %v18223_v31 = vld [vmem:[%s28564_s3 + $0xe44] ss:$16 sps:$4 sm:$0xff]   ;;  %v18226_v62 = vld [vmem:[%s28564_s3 + $0xe4c] ss:$16 sps:$4 sm:$0xff]  }
 0x35e   : > { %8775 = vmatprep.subr.bf16.mxu1 %v18202_v12  ;;  %v18221_v12 = vld [vmem:[%s28564_s3 + $0xe40] ss:$16 sps:$4 sm:$0xff]  }
 0x360   : > { %8338 = vmatpush1.bf16.msra.mxu0 %v18197_v18  ;;  %v18224_v18 = vld [vmem:[%s28564_s3 + $0xe48] ss:$16 sps:$4 sm:$0xff]  }
 0x361   : > { %8776 = vmatpush1.bf16.msra.mxu1 %v18200_v55  ;;  %8339 = vmatprep.subr.bf16.mxu0 %v18205_v61  ;;  %v18229_v55 = vld [vmem:[%s28564_s3 + $0xe64] ss:$16 sps:$4 sm:$0xff]   ;;  %v29085_v61 = vld [vmem:[#allocation17_spill] sm:$0xff] }
 0x362   : > { %8777 = vmatprep.subr.bf16.mxu1 %v18208_v5  ;;  %v18232_v5 = vld [vmem:[%s28564_s3 + $0xe6c] ss:$16 sps:$4 sm:$0xff]  }
 0x364   : > { %8340 = vmatpush1.bf16.msra.mxu0 %v18203_v17  ;;  %v29086_v17 = vld [vmem:[#allocation60_spill] sm:$0xff] }
 0x365   : > { %8778 = vmatpush1.bf16.msra.mxu1 %v18206_v3  ;;  %8382 = vmatprep.subr.bf16.mxu0 %v18211_v8  ;;  %v18227_v3 = vld [vmem:[%s28564_s3 + $0xe60] ss:$16 sps:$4 sm:$0xff]   ;;  %v18230_v8 = vld [vmem:[%s28564_s3 + $0xe68] ss:$16 sps:$4 sm:$0xff]  }
 0x366   : > { %8820 = vmatprep.subr.bf16.mxu1 %v18214_v59  ;;  %v18235_v59 = vld [vmem:[%s28564_s3 + $0xe84] ss:$16 sps:$4 sm:$0xff]  }
 0x367   : > { %8342 = vmatmul.mubr.bf16.vlgmr.msra.gmra.mrb[144].mxu0 %v29083_v38 }
 0x368   : > { %8780 = vmatmul.mubr.bf16.vlgmr.msra.gmra.mrb[144].mxu1 %v29083_v38  ;;  %8351 = vmatprep.mubr.bf16.mxu0 %v29084_v32  ;;  %v18241_v38 = vld [vmem:[%s28564_s3 + $0xea4] ss:$16 sps:$4 sm:$0xff]  }
 0x369   : > { %8383 = vmatpush1.bf16.msra.mxu0 %v18209_v42  ;;  %8789 = vmatprep.mubr.bf16.mxu1 %v29084_v32  ;;  %v18238_v42 = vld [vmem:[%s28564_s3 + $0xe8c] ss:$16 sps:$4 sm:$0xff]  }
 0x36a   : > { %8821 = vmatpush1.bf16.msra.mxu1 %v18212_v21  ;;  %8384 = vmatprep.subr.bf16.mxu0 %v18217_v41  ;;  %v18233_v21 = vld [vmem:[%s28564_s3 + $0xe80] ss:$16 sps:$4 sm:$0xff]   ;;  %v18236_v41 = vld [vmem:[%s28564_s3 + $0xe88] ss:$16 sps:$4 sm:$0xff]   ;;  %v18244_v32 = vld [vmem:[%s28564_s3 + $0xeac] ss:$16 sps:$4 sm:$0xff]  }
 0x36b   : > { %8822 = vmatprep.subr.bf16.mxu1 %v18220_v0  ;;  %v29087_v0 = vld [vmem:[#allocation19_spill] sm:$0xff] }
 0x36d   : > { %8385 = vmatpush1.bf16.msra.mxu0 %v18215_v51  ;;  %v29088_v51 = vld [vmem:[#allocation62_spill] sm:$0xff] }
 0x36e   : > { %8823 = vmatpush1.bf16.msra.mxu1 %v18218_v29  ;;  %8386 = vmatprep.subr.bf16.mxu0 %v18223_v31  ;;  %v18239_v29 = vld [vmem:[%s28564_s3 + $0xea0] ss:$16 sps:$4 sm:$0xff]   ;;  %v18242_v31 = vld [vmem:[%s28564_s3 + $0xea8] ss:$16 sps:$4 sm:$0xff]  }
 0x36f   : > { %8352 = vmatmul.mubr.bf16.gmra.mrb[148].mxu0 %v29085_v61  ;;  %8824 = vmatprep.subr.bf16.mxu1 %v18226_v62  ;;  %v18247_v62 = vld [vmem:[%s28564_s3 + $0xec4] ss:$16 sps:$4 sm:$0xff]  }
 0x370   : > { %8790 = vmatmul.mubr.bf16.gmra.mrb[148].mxu1 %v29085_v61  ;;  %8361 = vmatprep.mubr.bf16.mxu0 %v29086_v17  ;;  %v18253_v61 = vld [vmem:[%s28564_s3 + $0xee4] ss:$16 sps:$4 sm:$0xff]  }
 0x371   : > { %8387 = vmatpush1.bf16.msra.mxu0 %v18221_v12  ;;  %8799 = vmatprep.mubr.bf16.mxu1 %v29086_v17  ;;  %v18250_v12 = vld [vmem:[%s28564_s3 + $0xecc] ss:$16 sps:$4 sm:$0xff]  }
 0x372   : > { %8825 = vmatpush1.bf16.msra.mxu1 %v18224_v18  ;;  %8388 = vmatprep.subr.bf16.mxu0 %v18229_v55  ;;  %v18245_v18 = vld [vmem:[%s28564_s3 + $0xec0] ss:$16 sps:$4 sm:$0xff]   ;;  %v18248_v55 = vld [vmem:[%s28564_s3 + $0xec8] ss:$16 sps:$4 sm:$0xff]   ;;  %v18256_v17 = vld [vmem:[%s28564_s3 + $0xeec] ss:$16 sps:$4 sm:$0xff]  }
 0x373   : > { %8826 = vmatprep.subr.bf16.mxu1 %v18232_v5  ;;  %v29089_v5 = vld [vmem:[#allocation21_spill] sm:$0xff] }
 0x375   : > { %8389 = vmatpush1.bf16.msra.mxu0 %v18227_v3  ;;  %v29090_v3 = vld [vmem:[#allocation16_spill] sm:$0xff] }
 0x376   : > { %8827 = vmatpush1.bf16.msra.mxu1 %v18230_v8  ;;  %8390 = vmatprep.subr.bf16.mxu0 %v18235_v59  ;;  %v18251_v8 = vld [vmem:[%s28564_s3 + $0xee0] ss:$16 sps:$4 sm:$0xff]   ;;  %v18254_v59 = vld [vmem:[%s28564_s3 + $0xee8] ss:$16 sps:$4 sm:$0xff]  }
 0x377   : > { %8362 = vmatmul.mubr.bf16.gmra.mrb[152].mxu0 %v29087_v0  ;;  %8828 = vmatprep.subr.bf16.mxu1 %v18238_v42  ;;  %v18259_v42 = vld [vmem:[%s28564_s3 + $0xf04] ss:$16 sps:$4 sm:$0xff]  }
 0x378   : > { %8800 = vmatmul.mubr.bf16.gmra.mrb[152].mxu1 %v29087_v0  ;;  %8371 = vmatprep.mubr.bf16.mxu0 %v29088_v51  ;;  %v18265_v0 = vld [vmem:[%s28564_s3 + $0xf24] ss:$16 sps:$4 sm:$0xff]  }
 0x379   : > { %8391 = vmatpush1.bf16.msra.mxu0 %v18233_v21  ;;  %8809 = vmatprep.mubr.bf16.mxu1 %v29088_v51  ;;  %v18262_v21 = vld [vmem:[%s28564_s3 + $0xf0c] ss:$16 sps:$4 sm:$0xff]   ;;  %v18263_v51 = vld [vmem:[%s28564_s3 + $0xf20] ss:$16 sps:$4 sm:$0xff]  }
 0x37a   : > { %8829 = vmatpush1.bf16.msra.mxu1 %v18236_v41  ;;  %8392 = vmatprep.subr.bf16.mxu0 %v18241_v38  ;;  %v18257_v41 = vld [vmem:[%s28564_s3 + $0xf00] ss:$16 sps:$4 sm:$0xff]   ;;  %v18260_v38 = vld [vmem:[%s28564_s3 + $0xf08] ss:$16 sps:$4 sm:$0xff]  }
 0x37b   : > { %8830 = vmatprep.subr.bf16.mxu1 %v18244_v32  ;;  %v18268_v32 = vld [vmem:[%s28564_s3 + $0xf2c] ss:$16 sps:$4 sm:$0xff]  }
 0x37d   : > { %8393 = vmatpush1.bf16.msra.mxu0 %v18239_v29  ;;  %v18266_v29 = vld [vmem:[%s28564_s3 + $0xf28] ss:$16 sps:$4 sm:$0xff]  }
 0x37e   : > { %8831 = vmatpush1.bf16.msra.mxu1 %v18242_v31  ;;  %8394 = vmatprep.subr.bf16.mxu0 %v18247_v62  ;;  %v18271_v31 = vld [vmem:[%s28564_s3 + $0xf44] ss:$16 sps:$4 sm:$0xff]   ;;  %v18274_v62 = vld [vmem:[%s28564_s3 + $0xf4c] ss:$16 sps:$4 sm:$0xff]  }
 0x37f   : > { %8372 = vmatmul.mubr.bf16.gmra.mrb[156].mxu0 %v29089_v5  ;;  %8832 = vmatprep.subr.bf16.mxu1 %v18250_v12  ;;  %v18269_v12 = vld [vmem:[%s28564_s3 + $0xf40] ss:$16 sps:$4 sm:$0xff]  }
 0x380   : > { %8810 = vmatmul.mubr.bf16.gmra.mrb[156].mxu1 %v29089_v5  ;;  %8414 = vmatprep.mubr.bf16.mxu0 %v29090_v3  ;;  %v18275_v5 = vld [vmem:[%s28564_s3 + $0xf60] ss:$16 sps:$4 sm:$0xff]  }
 0x381   : > { %8395 = vmatpush1.bf16.msra.mxu0 %v18245_v18  ;;  %8852 = vmatprep.mubr.bf16.mxu1 %v29090_v3  ;;  %v18272_v18 = vld [vmem:[%s28564_s3 + $0xf48] ss:$16 sps:$4 sm:$0xff]   ;;  %v18283_v3 = vld [vmem:[%s28564_s3 + $0xf84] ss:$16 sps:$4 sm:$0xff]  }
 0x382   : > { %8833 = vmatpush1.bf16.msra.mxu1 %v18248_v55  ;;  %8396 = vmatprep.subr.bf16.mxu0 %v18253_v61  ;;  %v18277_v55 = vld [vmem:[%s28564_s3 + $0xf64] ss:$16 sps:$4 sm:$0xff]   ;;  %v18280_v61 = vld [vmem:[%s28564_s3 + $0xf6c] ss:$16 sps:$4 sm:$0xff]  }
 0x383   : > { %8834 = vmatprep.subr.bf16.mxu1 %v18256_v17  ;;  %v18278_v17 = vld [vmem:[%s28564_s3 + $0xf68] ss:$16 sps:$4 sm:$0xff]  }
 0x385   : > { %8397 = vmatpush1.bf16.msra.mxu0 %v18251_v8  ;;  %v18286_v8 = vld [vmem:[%s28564_s3 + $0xf8c] ss:$16 sps:$4 sm:$0xff]  }
 0x386   : > { %8835 = vmatpush1.bf16.msra.mxu1 %v18254_v59  ;;  %8398 = vmatprep.subr.bf16.mxu0 %v18259_v42  ;;  %v18281_v59 = vld [vmem:[%s28564_s3 + $0xf80] ss:$16 sps:$4 sm:$0xff]   ;;  %v18284_v42 = vld [vmem:[%s28564_s3 + $0xf88] ss:$16 sps:$4 sm:$0xff]  }
 0x387   : > { %8836 = vmatprep.subr.bf16.mxu1 %v18262_v21  ;;  %v18289_v21 = vld [vmem:[%s28564_s3 + $0xfa4] ss:$16 sps:$4 sm:$0xff]  }
 0x389   : > { %8399 = vmatpush1.bf16.msra.mxu0 %v18257_v41  ;;  %v18292_v41 = vld [vmem:[%s28564_s3 + $0xfac] ss:$16 sps:$4 sm:$0xff]  }
 0x38a   : > { %8837 = vmatpush1.bf16.msra.mxu1 %v18260_v38  ;;  %8400 = vmatprep.subr.bf16.mxu0 %v18265_v0  ;;  %v18287_v38 = vld [vmem:[%s28564_s3 + $0xfa0] ss:$16 sps:$4 sm:$0xff]   ;;  %v18290_v0 = vld [vmem:[%s28564_s3 + $0xfa8] ss:$16 sps:$4 sm:$0xff]  }
 0x38b   : > { %8838 = vmatprep.subr.bf16.mxu1 %v18268_v32  ;;  %v18295_v32 = vld [vmem:[%s28564_s3 + $0xfc4] ss:$16 sps:$4 sm:$0xff]  }
 0x38d   : > { %8401 = vmatpush1.bf16.msra.mxu0 %v18263_v51  ;;  %v18298_v51 = vld [vmem:[%s28564_s3 + $0xfcc] ss:$16 sps:$4 sm:$0xff]  }
 0x38e   : > { %8839 = vmatpush1.bf16.msra.mxu1 %v18266_v29  ;;  %8402 = vmatprep.subr.bf16.mxu0 %v18271_v31  ;;  %v18293_v29 = vld [vmem:[%s28564_s3 + $0xfc0] ss:$16 sps:$4 sm:$0xff]   ;;  %v18296_v31 = vld [vmem:[%s28564_s3 + $0xfc8] ss:$16 sps:$4 sm:$0xff]  }
 0x38f   : > { %8840 = vmatprep.subr.bf16.mxu1 %v18274_v62  ;;  %v18301_v62 = vld [vmem:[%s28564_s3 + $0xfe4] ss:$16 sps:$4 sm:$0xff]  }
 0x391   : > { %8403 = vmatpush1.bf16.msra.mxu0 %v18269_v12  ;;  %v18304_v12 = vld [vmem:[%s28564_s3 + $0xfec] ss:$16 sps:$4 sm:$0xff]  }
 0x392   : > { %8841 = vmatpush1.bf16.msra.mxu1 %v18272_v18  ;;  %8404 = vmatprep.subr.bf16.mxu0 %v18277_v55  ;;  %v18299_v18 = vld [vmem:[%s28564_s3 + $0xfe0] ss:$16 sps:$4 sm:$0xff]   ;;  %v18302_v55 = vld [vmem:[%s28564_s3 + $0xfe8] ss:$16 sps:$4 sm:$0xff]  }
 0x393   : > { %8842 = vmatprep.subr.bf16.mxu1 %v18280_v61  ;;  %v18307_v61 = vld [vmem:[%s28564_s3 + $0x1004] ss:$16 sps:$4 sm:$0xff]  }
 0x395   : > { %8405 = vmatpush1.bf16.msra.mxu0 %v18275_v5  ;;  %v18310_v5 = vld [vmem:[%s28564_s3 + $0x100c] ss:$16 sps:$4 sm:$0xff]  }
 0x396   : > { %8843 = vmatpush1.bf16.msra.mxu1 %v18278_v17  ;;  %8406 = vmatprep.subr.bf16.mxu0 %v18283_v3  ;;  %v18305_v17 = vld [vmem:[%s28564_s3 + $0x1000] ss:$16 sps:$4 sm:$0xff]   ;;  %v18308_v3 = vld [vmem:[%s28564_s3 + $0x1008] ss:$16 sps:$4 sm:$0xff]  }
 0x397   : > { %8844 = vmatprep.subr.bf16.mxu1 %v18286_v8  ;;  %v18313_v8 = vld [vmem:[%s28564_s3 + $0x1024] ss:$16 sps:$4 sm:$0xff]  }
 0x399   : > { %8407 = vmatpush1.bf16.msra.mxu0 %v18281_v59  ;;  %v18316_v59 = vld [vmem:[%s28564_s3 + $0x102c] ss:$16 sps:$4 sm:$0xff]  }
 0x39a   : > { %8845 = vmatpush1.bf16.msra.mxu1 %v18284_v42  ;;  %8408 = vmatprep.subr.bf16.mxu0 %v18289_v21  ;;  %v18311_v42 = vld [vmem:[%s28564_s3 + $0x1020] ss:$16 sps:$4 sm:$0xff]   ;;  %v18314_v21 = vld [vmem:[%s28564_s3 + $0x1028] ss:$16 sps:$4 sm:$0xff]  }
 0x39b   : > { %8846 = vmatprep.subr.bf16.mxu1 %v18292_v41  ;;  %v18319_v41 = vld [vmem:[%s28564_s3 + $0x1044] ss:$16 sps:$4 sm:$0xff]  }
 0x39d   : > { %8409 = vmatpush1.bf16.msra.mxu0 %v18287_v38  ;;  %v18320_v38 = vld [vmem:[%s28564_s3 + $0x1048] ss:$16 sps:$4 sm:$0xff]  }
 0x39e   : > { %8847 = vmatpush1.bf16.msra.mxu1 %v18290_v0  ;;  %8410 = vmatprep.subr.bf16.mxu0 %v18295_v32  ;;  %v18325_v0 = vld [vmem:[%s28564_s3 + $0x1064] ss:$16 sps:$4 sm:$0xff]   ;;  %v18328_v32 = vld [vmem:[%s28564_s3 + $0x106c] ss:$16 sps:$4 sm:$0xff]  }
 0x39f   : > { %8848 = vmatprep.subr.bf16.mxu1 %v18298_v51  ;;  %v18323_v51 = vld [vmem:[%s28564_s3 + $0x1060] ss:$16 sps:$4 sm:$0xff]  }
 0x3a1   : > { %8411 = vmatpush1.bf16.msra.mxu0 %v18293_v29  ;;  %v18326_v29 = vld [vmem:[%s28564_s3 + $0x1068] ss:$16 sps:$4 sm:$0xff]  }
 0x3a2   : > { %8849 = vmatpush1.bf16.msra.mxu1 %v18296_v31  ;;  %8412 = vmatprep.subr.bf16.mxu0 %v18301_v62  ;;  %v18331_v31 = vld [vmem:[%s28564_s3 + $0x1084] ss:$16 sps:$4 sm:$0xff]   ;;  %v18332_v62 = vld [vmem:[%s28564_s3 + $0x1088] ss:$16 sps:$4 sm:$0xff]  }
 0x3a3   : > { %8850 = vmatprep.subr.bf16.mxu1 %v18304_v12  ;;  %v18337_v12 = vld [vmem:[%s28564_s3 + $0x10a4] ss:$16 sps:$4 sm:$0xff]  }
 0x3a5   : > { %8413 = vmatpush1.bf16.msra.mxu0 %v18299_v18  ;;  %v18340_v18 = vld [vmem:[%s28564_s3 + $0x10ac] ss:$16 sps:$4 sm:$0xff]  }
 0x3a6   : > { %8851 = vmatpush1.bf16.msra.mxu1 %v18302_v55  ;;  %8455 = vmatprep.subr.bf16.mxu0 %v18307_v61  ;;  %v18335_v55 = vld [vmem:[%s28564_s3 + $0x10a0] ss:$16 sps:$4 sm:$0xff]   ;;  %v18338_v61 = vld [vmem:[%s28564_s3 + $0x10a8] ss:$16 sps:$4 sm:$0xff]  }
 0x3a7   : > { %8893 = vmatprep.subr.bf16.mxu1 %v18310_v5  ;;  %v18343_v5 = vld [vmem:[%s28564_s3 + $0x10c4] ss:$16 sps:$4 sm:$0xff]  }
 0x3a8   : > { %8415 = vmatmul.mubr.bf16.vlgmr.msra.gmra.mrb[144].mxu0 %v21698_v13 }
 0x3a9   : > { %8853 = vmatmul.mubr.bf16.vlgmr.msra.gmra.mrb[144].mxu1 %v21698_v13  ;;  %8424 = vmatprep.mubr.bf16.mxu0 %v21776_v28  ;;  %v18322_v13 = vld [vmem:[%s28564_s3 + $0x104c] ss:$16 sps:$4 sm:$0xff]  }
 0x3aa   : > { %8456 = vmatpush1.bf16.msra.mxu0 %v18305_v17  ;;  %8862 = vmatprep.mubr.bf16.mxu1 %v21776_v28  ;;  %v18317_v28 = vld [vmem:[%s28564_s3 + $0x1040] ss:$16 sps:$4 sm:$0xff]   ;;  %v18344_v17 = vld [vmem:[%s28564_s3 + $0x10c8] ss:$16 sps:$4 sm:$0xff]  }
 0x3ab   : > { %8894 = vmatpush1.bf16.msra.mxu1 %v18308_v3  ;;  %8457 = vmatprep.subr.bf16.mxu0 %v18313_v8  ;;  %v18349_v3 = vld [vmem:[%s28564_s3 + $0x10e4] ss:$16 sps:$4 sm:$0xff]   ;;  %v18352_v8 = vld [vmem:[%s28564_s3 + $0x10ec] ss:$16 sps:$4 sm:$0xff]  }
 0x3ac   : > { %8895 = vmatprep.subr.bf16.mxu1 %v18316_v59  ;;  %v18347_v59 = vld [vmem:[%s28564_s3 + $0x10e0] ss:$16 sps:$4 sm:$0xff]  }
 0x3ae   : > { %8458 = vmatpush1.bf16.msra.mxu0 %v18311_v42  ;;  %v18350_v42 = vld [vmem:[%s28564_s3 + $0x10e8] ss:$16 sps:$4 sm:$0xff]  }
 0x3af   : > { %8896 = vmatpush1.bf16.msra.mxu1 %v18314_v21  ;;  %8459 = vmatprep.subr.bf16.mxu0 %v18319_v41  ;;  %v18355_v21 = vld [vmem:[%s28564_s3 + $0x1104] ss:$16 sps:$4 sm:$0xff]   ;;  %v18353_v41 = vld [vmem:[%s28564_s3 + $0x1100] ss:$16 sps:$4 sm:$0xff]  }
 0x3b0   : > { %8425 = vmatmul.mubr.bf16.gmra.mrb[148].mxu0 %v21767_v35  ;;  %8897 = vmatprep.subr.bf16.mxu1 %v18322_v13  ;;  %v18356_v13 = vld [vmem:[%s28564_s3 + $0x1108] ss:$16 sps:$4 sm:$0xff]  }
 0x3b1   : > { %8863 = vmatmul.mubr.bf16.gmra.mrb[148].mxu1 %v21767_v35  ;;  %8434 = vmatprep.mubr.bf16.mxu0 %v21845_v6  ;;  %v18334_v35 = vld [vmem:[%s28564_s3 + $0x108c] ss:$16 sps:$4 sm:$0xff]  }
 0x3b2   : > { %8460 = vmatpush1.bf16.msra.mxu0 %v18317_v28  ;;  %8872 = vmatprep.mubr.bf16.mxu1 %v21845_v6  ;;  %v18329_v6 = vld [vmem:[%s28564_s3 + $0x1080] ss:$16 sps:$4 sm:$0xff]   ;;  %v18361_v28 = vld [vmem:[%s28564_s3 + $0x1124] ss:$16 sps:$4 sm:$0xff]  }
 0x3b3   : > { %8898 = vmatpush1.bf16.msra.mxu1 %v18320_v38  ;;  %8461 = vmatprep.subr.bf16.mxu0 %v18325_v0  ;;  %v18364_v38 = vld [vmem:[%s28564_s3 + $0x112c] ss:$16 sps:$4 sm:$0xff]   ;;  %v18359_v0 = vld [vmem:[%s28564_s3 + $0x1120] ss:$16 sps:$4 sm:$0xff]  }
 0x3b4   : > { %8899 = vmatprep.subr.bf16.mxu1 %v18328_v32  ;;  %v18362_v32 = vld [vmem:[%s28564_s3 + $0x1128] ss:$16 sps:$4 sm:$0xff]  }
 0x3b6   : > { %8462 = vmatpush1.bf16.msra.mxu0 %v18323_v51  ;;  %v18367_v51 = vld [vmem:[%s28564_s3 + $0x1144] ss:$16 sps:$4 sm:$0xff]  }
 0x3b7   : > { %8900 = vmatpush1.bf16.msra.mxu1 %v18326_v29  ;;  %8463 = vmatprep.subr.bf16.mxu0 %v18331_v31  ;;  %v18370_v29 = vld [vmem:[%s28564_s3 + $0x114c] ss:$16 sps:$4 sm:$0xff]   ;;  %v18365_v31 = vld [vmem:[%s28564_s3 + $0x1140] ss:$16 sps:$4 sm:$0xff]  }
 0x3b8   : > { %8435 = vmatmul.mubr.bf16.gmra.mrb[152].mxu0 %v21836_v43  ;;  %8901 = vmatprep.subr.bf16.mxu1 %v18334_v35  ;;  %v18368_v35 = vld [vmem:[%s28564_s3 + $0x1148] ss:$16 sps:$4 sm:$0xff]  }
 0x3b9   : > { %8873 = vmatmul.mubr.bf16.gmra.mrb[152].mxu1 %v21836_v43  ;;  %8444 = vmatprep.mubr.bf16.mxu0 %v21917_v57  ;;  %v18346_v43 = vld [vmem:[%s28564_s3 + $0x10cc] ss:$16 sps:$4 sm:$0xff]  }
 0x3ba   : > { %8464 = vmatpush1.bf16.msra.mxu0 %v18329_v6  ;;  %8882 = vmatprep.mubr.bf16.mxu1 %v21917_v57  ;;  %v18341_v57 = vld [vmem:[%s28564_s3 + $0x10c0] ss:$16 sps:$4 sm:$0xff]   ;;  %v18373_v6 = vld [vmem:[%s28564_s3 + $0x1164] ss:$16 sps:$4 sm:$0xff]  }
 0x3bb   : > { %8902 = vmatpush1.bf16.msra.mxu1 %v18332_v62  ;;  %8465 = vmatprep.subr.bf16.mxu0 %v18337_v12  ;;  %v18376_v62 = vld [vmem:[%s28564_s3 + $0x116c] ss:$16 sps:$4 sm:$0xff]   ;;  %v18371_v12 = vld [vmem:[%s28564_s3 + $0x1160] ss:$16 sps:$4 sm:$0xff]  }
 0x3bc   : > { %8903 = vmatprep.subr.bf16.mxu1 %v18340_v18  ;;  %v18374_v18 = vld [vmem:[%s28564_s3 + $0x1168] ss:$16 sps:$4 sm:$0xff]  }
 0x3be   : > { %8466 = vmatpush1.bf16.msra.mxu0 %v18335_v55  ;;  %v18379_v55 = vld [vmem:[%s28564_s3 + $0x1184] ss:$16 sps:$4 sm:$0xff]  }
 0x3bf   : > { %8904 = vmatpush1.bf16.msra.mxu1 %v18338_v61  ;;  %8467 = vmatprep.subr.bf16.mxu0 %v18343_v5  ;;  %v18382_v61 = vld [vmem:[%s28564_s3 + $0x118c] ss:$16 sps:$4 sm:$0xff]   ;;  %v18377_v5 = vld [vmem:[%s28564_s3 + $0x1180] ss:$16 sps:$4 sm:$0xff]  }
 0x3c0   : > { %8445 = vmatmul.mubr.bf16.gmra.mrb[156].mxu0 %v21908_v44  ;;  %8905 = vmatprep.subr.bf16.mxu1 %v18346_v43  ;;  %v18380_v43 = vld [vmem:[%s28564_s3 + $0x1188] ss:$16 sps:$4 sm:$0xff]  }
 0x3c1   : > { %8883 = vmatmul.mubr.bf16.gmra.mrb[156].mxu1 %v21908_v44  ;;  %8487 = vmatprep.mubr.bf16.mxu0 %v21990_v52  ;;  %v18358_v44 = vld [vmem:[%s28564_s3 + $0x110c] ss:$16 sps:$4 sm:$0xff]  }
 0x3c2   : > { %8468 = vmatpush1.bf16.msra.mxu0 %v18341_v57  ;;  %8925 = vmatprep.mubr.bf16.mxu1 %v21990_v52  ;;  %v18385_v57 = vld [vmem:[%s28564_s3 + $0x11a4] ss:$16 sps:$4 sm:$0xff]  }
 0x3c3   : > { %8906 = vmatpush1.bf16.msra.mxu1 %v18344_v17  ;;  %8469 = vmatprep.subr.bf16.mxu0 %v18349_v3  ;;  %v18388_v17 = vld [vmem:[%s28564_s3 + $0x11ac] ss:$16 sps:$4 sm:$0xff]   ;;  %v18383_v3 = vld [vmem:[%s28564_s3 + $0x11a0] ss:$16 sps:$4 sm:$0xff]  }
 0x3c4   : > { %8907 = vmatprep.subr.bf16.mxu1 %v18352_v8  ;;  %v18386_v8 = vld [vmem:[%s28564_s3 + $0x11a8] ss:$16 sps:$4 sm:$0xff]  }
 0x3c6   : > { %8470 = vmatpush1.bf16.msra.mxu0 %v18347_v59  ;;  %v18391_v59 = vld [vmem:[%s28564_s3 + $0x11c4] ss:$16 sps:$4 sm:$0xff]  }
 0x3c7   : > { %8908 = vmatpush1.bf16.msra.mxu1 %v18350_v42  ;;  %8471 = vmatprep.subr.bf16.mxu0 %v18355_v21  ;;  %v18394_v42 = vld [vmem:[%s28564_s3 + $0x11cc] ss:$16 sps:$4 sm:$0xff]   ;;  %v18389_v21 = vld [vmem:[%s28564_s3 + $0x11c0] ss:$16 sps:$4 sm:$0xff]  }
 0x3c8   : > { %8909 = vmatprep.subr.bf16.mxu1 %v18358_v44  ;;  %v18392_v44 = vld [vmem:[%s28564_s3 + $0x11c8] ss:$16 sps:$4 sm:$0xff]  }
 0x3ca   : > { %8472 = vmatpush1.bf16.msra.mxu0 %v18353_v41  ;;  %v18397_v41 = vld [vmem:[%s28564_s3 + $0x11e4] ss:$16 sps:$4 sm:$0xff]  }
 0x3cb   : > { %8910 = vmatpush1.bf16.msra.mxu1 %v18356_v13  ;;  %8473 = vmatprep.subr.bf16.mxu0 %v18361_v28  ;;  %v18400_v13 = vld [vmem:[%s28564_s3 + $0x11ec] ss:$16 sps:$4 sm:$0xff]   ;;  %v18395_v28 = vld [vmem:[%s28564_s3 + $0x11e0] ss:$16 sps:$4 sm:$0xff]  }
 0x3cc   : > { %8911 = vmatprep.subr.bf16.mxu1 %v18364_v38  ;;  %v18398_v38 = vld [vmem:[%s28564_s3 + $0x11e8] ss:$16 sps:$4 sm:$0xff]  }
 0x3ce   : > { %8474 = vmatpush1.bf16.msra.mxu0 %v18359_v0  ;;  %v18403_v0 = vld [vmem:[%s28564_s3 + $0x1204] ss:$16 sps:$4 sm:$0xff]  }
 0x3cf   : > { %8912 = vmatpush1.bf16.msra.mxu1 %v18362_v32  ;;  %8475 = vmatprep.subr.bf16.mxu0 %v18367_v51  ;;  %v18406_v32 = vld [vmem:[%s28564_s3 + $0x120c] ss:$16 sps:$4 sm:$0xff]   ;;  %v18401_v51 = vld [vmem:[%s28564_s3 + $0x1200] ss:$16 sps:$4 sm:$0xff]  }
 0x3d0   : > { %8913 = vmatprep.subr.bf16.mxu1 %v18370_v29  ;;  %v18404_v29 = vld [vmem:[%s28564_s3 + $0x1208] ss:$16 sps:$4 sm:$0xff]  }
 0x3d2   : > { %8476 = vmatpush1.bf16.msra.mxu0 %v18365_v31  ;;  %v18409_v31 = vld [vmem:[%s28564_s3 + $0x1224] ss:$16 sps:$4 sm:$0xff]  }
 0x3d3   : > { %8914 = vmatpush1.bf16.msra.mxu1 %v18368_v35  ;;  %8477 = vmatprep.subr.bf16.mxu0 %v18373_v6  ;;  %v18412_v35 = vld [vmem:[%s28564_s3 + $0x122c] ss:$16 sps:$4 sm:$0xff]   ;;  %v18407_v6 = vld [vmem:[%s28564_s3 + $0x1220] ss:$16 sps:$4 sm:$0xff]  }
 0x3d4   : > { %8915 = vmatprep.subr.bf16.mxu1 %v18376_v62  ;;  %v18410_v62 = vld [vmem:[%s28564_s3 + $0x1228] ss:$16 sps:$4 sm:$0xff]  }
 0x3d6   : > { %8478 = vmatpush1.bf16.msra.mxu0 %v18371_v12  ;;  %v18415_v12 = vld [vmem:[%s28564_s3 + $0x1244] ss:$16 sps:$4 sm:$0xff]  }
 0x3d7   : > { %8916 = vmatpush1.bf16.msra.mxu1 %v18374_v18  ;;  %8479 = vmatprep.subr.bf16.mxu0 %v18379_v55  ;;  %v18418_v18 = vld [vmem:[%s28564_s3 + $0x124c] ss:$16 sps:$4 sm:$0xff]   ;;  %v18413_v55 = vld [vmem:[%s28564_s3 + $0x1240] ss:$16 sps:$4 sm:$0xff]  }
 0x3d8   : > { %8917 = vmatprep.subr.bf16.mxu1 %v18382_v61  ;;  %v18416_v61 = vld [vmem:[%s28564_s3 + $0x1248] ss:$16 sps:$4 sm:$0xff]  }
 0x3da   : > { %8480 = vmatpush1.bf16.msra.mxu0 %v18377_v5  ;;  %v18421_v5 = vld [vmem:[%s28564_s3 + $0x1264] ss:$16 sps:$4 sm:$0xff]  }
 0x3db   : > { %8918 = vmatpush1.bf16.msra.mxu1 %v18380_v43  ;;  %8481 = vmatprep.subr.bf16.mxu0 %v18385_v57  ;;  %v18424_v43 = vld [vmem:[%s28564_s3 + $0x126c] ss:$16 sps:$4 sm:$0xff]   ;;  %v18419_v57 = vld [vmem:[%s28564_s3 + $0x1260] ss:$16 sps:$4 sm:$0xff]  }
 0x3dc   : > { %8919 = vmatprep.subr.bf16.mxu1 %v18388_v17  ;;  %v18422_v17 = vld [vmem:[%s28564_s3 + $0x1268] ss:$16 sps:$4 sm:$0xff]  }
 0x3de   : > { %8482 = vmatpush1.bf16.msra.mxu0 %v18383_v3  ;;  %v18427_v3 = vld [vmem:[%s28564_s3 + $0x1284] ss:$16 sps:$4 sm:$0xff]  }
 0x3df   : > { %8920 = vmatpush1.bf16.msra.mxu1 %v18386_v8  ;;  %8483 = vmatprep.subr.bf16.mxu0 %v18391_v59  ;;  %v18430_v8 = vld [vmem:[%s28564_s3 + $0x128c] ss:$16 sps:$4 sm:$0xff]   ;;  %v18425_v59 = vld [vmem:[%s28564_s3 + $0x1280] ss:$16 sps:$4 sm:$0xff]  }
 0x3e0   : > { %8921 = vmatprep.subr.bf16.mxu1 %v18394_v42  ;;  %v18428_v42 = vld [vmem:[%s28564_s3 + $0x1288] ss:$16 sps:$4 sm:$0xff]  }
 0x3e2   : > { %8484 = vmatpush1.bf16.msra.mxu0 %v18389_v21  ;;  %v18433_v21 = vld [vmem:[%s28564_s3 + $0x12a4] ss:$16 sps:$4 sm:$0xff]  }
 0x3e3   : > { %8922 = vmatpush1.bf16.msra.mxu1 %v18392_v44  ;;  %8485 = vmatprep.subr.bf16.mxu0 %v18397_v41  ;;  %v18436_v41 = vld [vmem:[%s28564_s3 + $0x12ac] ss:$16 sps:$4 sm:$0xff]  }
 0x3e4   : > { %8923 = vmatprep.subr.bf16.mxu1 %v18400_v13 }
 0x3e6   : > { %8486 = vmatpush1.bf16.msra.mxu0 %v18395_v28 }
 0x3e7   : > { %8924 = vmatpush1.bf16.msra.mxu1 %v18398_v38  ;;  %8528 = vmatprep.subr.bf16.mxu0 %v18403_v0  ;;  %v18431_v0 = vld [vmem:[%s28564_s3 + $0x12a0] ss:$16 sps:$4 sm:$0xff]  }
 0x3e8   : > { %8966 = vmatprep.subr.bf16.mxu1 %v18406_v32 }
 0x3e9   : > { %8488 = vmatmul.mubr.bf16.vlgmr.msra.gmra.mrb[144].mxu0 %v21977_v1 }
 0x3ea   : > { %8926 = vmatmul.mubr.bf16.vlgmr.msra.gmra.mrb[144].mxu1 %v21977_v1  ;;  %8497 = vmatprep.mubr.bf16.mxu0 %v22068_v37 }
 0x3eb   : > { %8529 = vmatpush1.bf16.msra.mxu0 %v18401_v51  ;;  %8935 = vmatprep.mubr.bf16.mxu1 %v22068_v37  ;;  %v18434_v51 = vld [vmem:[%s28564_s3 + $0x12a8] ss:$16 sps:$4 sm:$0xff]  }
 0x3ec   : > { %8967 = vmatpush1.bf16.msra.mxu1 %v18404_v29  ;;  %8530 = vmatprep.subr.bf16.mxu0 %v18409_v31 }
 0x3ed   : > { %8968 = vmatprep.subr.bf16.mxu1 %v18412_v35  ;;  %v18439_v35 = vld [vmem:[%s28564_s3 + $0x12c4] ss:$16 sps:$4 sm:$0xff]  }
 0x3ef   : > { %8531 = vmatpush1.bf16.msra.mxu0 %v18407_v6 }
 0x3f0   : > { %8969 = vmatpush1.bf16.msra.mxu1 %v18410_v62  ;;  %8532 = vmatprep.subr.bf16.mxu0 %v18415_v12  ;;  %v18442_v62 = vld [vmem:[%s28564_s3 + $0x12cc] ss:$16 sps:$4 sm:$0xff]   ;;  %v18437_v12 = vld [vmem:[%s28564_s3 + $0x12c0] ss:$16 sps:$4 sm:$0xff]  }
 0x3f1   : > { %8498 = vmatmul.mubr.bf16.gmra.mrb[148].mxu0 %v22047_v27  ;;  %8970 = vmatprep.subr.bf16.mxu1 %v18418_v18  ;;  %v18440_v18 = vld [vmem:[%s28564_s3 + $0x12c8] ss:$16 sps:$4 sm:$0xff]  }
 0x3f2   : > { %8936 = vmatmul.mubr.bf16.gmra.mrb[148].mxu1 %v22047_v27  ;;  %8507 = vmatprep.mubr.bf16.mxu0 %v22130_v60 }
 0x3f3   : > { %8533 = vmatpush1.bf16.msra.mxu0 %v18413_v55  ;;  %8945 = vmatprep.mubr.bf16.mxu1 %v22130_v60  ;;  %v18445_v55 = vld [vmem:[%s28564_s3 + $0x12e4] ss:$16 sps:$4 sm:$0xff]  }
 0x3f4   : > { %8971 = vmatpush1.bf16.msra.mxu1 %v18416_v61  ;;  %8534 = vmatprep.subr.bf16.mxu0 %v18421_v5  ;;  %v18448_v5 = vld [vmem:[%s28564_s3 + $0x12ec] ss:$16 sps:$4 sm:$0xff]  }
 0x3f5   : > { %8972 = vmatprep.subr.bf16.mxu1 %v18424_v43 }
 0x3f7   : > { %8535 = vmatpush1.bf16.msra.mxu0 %v18419_v57 }
 0x3f8   : > { %8973 = vmatpush1.bf16.msra.mxu1 %v18422_v17  ;;  %8536 = vmatprep.subr.bf16.mxu0 %v18427_v3  ;;  %v18443_v3 = vld [vmem:[%s28564_s3 + $0x12e0] ss:$16 sps:$4 sm:$0xff]  }
 0x3f9   : > { %8508 = vmatmul.mubr.bf16.gmra.mrb[152].mxu0 %v22110_v7  ;;  %8974 = vmatprep.subr.bf16.mxu1 %v18430_v8  ;;  %v23727_v44 = vpop.f32.mrb[128].mxu0 }
 0x3fa   : > { %29091 = vst [vmem:[#allocation30_spill] sm:$0xff] %v23727_v44  ;;  %8946 = vmatmul.mubr.bf16.gmra.mrb[152].mxu1 %v22110_v7  ;;  %8517 = vmatprep.mubr.bf16.mxu0 %v22187_v33  ;;  %v23734_v13 = vpop.f32.mrb[128].mxu1  ;;  %v23736_v28 = vpop.f32.mrb[129].mxu0  ;;  %v19519_v44 = vld [vmem:[%s28564_s3 + $0x6a4] ss:$16 sps:$4 sm:$0xff]  }
 0x3fb   : > { %29092 = vst [vmem:[#allocation72_spill] sm:$0xff] %v23736_v28  ;;  %8537 = vmatpush1.bf16.msra.mxu0 %v18425_v59  ;;  %8955 = vmatprep.mubr.bf16.mxu1 %v22187_v33  ;;  %v23739_v38 = vpop.f32.mrb[129].mxu1  ;;  %v23744_v32 = vpop.f32.mrb[130].mxu0  ;;  %v18446_v59 = vld [vmem:[%s28564_s3 + $0x12e8] ss:$16 sps:$4 sm:$0xff]  }
 0x3fc   : > { %8975 = vmatpush1.bf16.msra.mxu1 %v18428_v42  ;;  %8538 = vmatprep.subr.bf16.mxu0 %v18433_v21  ;;  %v23749_v29 = vpop.f32.mrb[130].mxu1  ;;  %v23751_v31 = vpop.f32.mrb[131].mxu0  ;;  %v19520_v28 = vld [vmem:[%s28564_s3 + $0x6ac] ss:$16 sps:$4 sm:$0xff]  }
 0x3fd   : > { %8976 = vmatprep.subr.bf16.mxu1 %v18436_v41  ;;  %v23756_v6 = vpop.f32.mrb[131].mxu1  ;;  %v18451_v41 = vld [vmem:[%s28564_s3 + $0x1304] ss:$16 sps:$4 sm:$0xff]  }
 0x3fe   : > { %29093 = vst [vmem:[#allocation31_spill] sm:$0xff] %v23756_v6 }
 0x3ff   : > { %8539 = vmatpush1.bf16.msra.mxu0 %v18431_v0 }
 0x400   : > { %8977 = vmatpush1.bf16.msra.mxu1 %v18434_v51  ;;  %8540 = vmatprep.subr.bf16.mxu0 %v18439_v35  ;;  %v18454_v51 = vld [vmem:[%s28564_s3 + $0x130c] ss:$16 sps:$4 sm:$0xff]   ;;  %v18449_v35 = vld [vmem:[%s28564_s3 + $0x1300] ss:$16 sps:$4 sm:$0xff]  }
 0x401   : > { %8518 = vmatmul.mubr.bf16.gmra.mrb[156].mxu0 %v22169_v40  ;;  %8978 = vmatprep.subr.bf16.mxu1 %v18442_v62  ;;  %v23771_v61 = vpop.f32.mrb[132].mxu0  ;;  %v18452_v62 = vld [vmem:[%s28564_s3 + $0x1308] ss:$16 sps:$4 sm:$0xff]  }
 0x402   : > { %29094 = vst [vmem:[#allocation73_spill] sm:$0xff] %v23771_v61  ;;  %8956 = vmatmul.mubr.bf16.gmra.mrb[156].mxu1 %v22169_v40  ;;  %8560 = vmatprep.mubr.bf16.mxu0 %v22005_v48  ;;  %v23778_v43 = vpop.f32.mrb[132].mxu1  ;;  %v23780_v57 = vpop.f32.mrb[133].mxu0  ;;  %v19527_v61 = vld [vmem:[%s28564_s3 + $0x6e4] ss:$16 sps:$4 sm:$0xff]  }
 0x403   : > { %29095 = vst [vmem:[#allocation32_spill] sm:$0xff] %v23780_v57  ;;  %8541 = vmatpush1.bf16.msra.mxu0 %v18437_v12  ;;  %8998 = vmatprep.mubr.bf16.mxu1 %v22005_v48  ;;  %v23783_v17 = vpop.f32.mrb[133].mxu1  ;;  %v23788_v8 = vpop.f32.mrb[134].mxu0  ;;  %v18457_v12 = vld [vmem:[%s28564_s3 + $0x1324] ss:$16 sps:$4 sm:$0xff]  }
 0x404   : > { %8979 = vmatpush1.bf16.msra.mxu1 %v18440_v18  ;;  %8542 = vmatprep.subr.bf16.mxu0 %v18445_v55  ;;  %v23793_v42 = vpop.f32.mrb[134].mxu1  ;;  %v23795_v21 = vpop.f32.mrb[135].mxu0  ;;  %v18460_v55 = vld [vmem:[%s28564_s3 + $0x132c] ss:$16 sps:$4 sm:$0xff]  }
 0x405   : > { %29096 = vst [vmem:[#allocation74_spill] sm:$0xff] %v23795_v21  ;;  %8980 = vmatprep.subr.bf16.mxu1 %v18448_v5  ;;  %v23800_v0 = vpop.f32.mrb[135].mxu1  ;;  %v19528_v57 = vld [vmem:[%s28564_s3 + $0x6ec] ss:$16 sps:$4 sm:$0xff]  }
 0x406   : > { %29097 = vst [vmem:[#allocation33_spill] sm:$0xff] %v23800_v0 }
 0x407   : > { %8543 = vmatpush1.bf16.msra.mxu0 %v18443_v3 }
 0x408   : > { %8981 = vmatpush1.bf16.msra.mxu1 %v18446_v59  ;;  %8544 = vmatprep.subr.bf16.mxu0 %v18451_v41  ;;  %v18455_v41 = vld [vmem:[%s28564_s3 + $0x1320] ss:$16 sps:$4 sm:$0xff]  }
 0x409   : > { %8982 = vmatprep.subr.bf16.mxu1 %v18454_v51  ;;  %v23814_v18 = vpop.f32.mrb[136].mxu0  ;;  %v18458_v51 = vld [vmem:[%s28564_s3 + $0x1328] ss:$16 sps:$4 sm:$0xff]  }
 0x40a   : > { %v23819_v5 = vpop.f32.mrb[136].mxu1  ;;  %v23821_v3 = vpop.f32.mrb[137].mxu0 }
 0x40b   : > { %29098 = vst [vmem:[#allocation75_spill] sm:$0xff] %v23821_v3  ;;  %8545 = vmatpush1.bf16.msra.mxu0 %v18449_v35  ;;  %v23823_v59 = vpop.f32.mrb[137].mxu1  ;;  %v23828_v50 = vpop.f32.mrb[138].mxu0  ;;  %v18463_v35 = vld [vmem:[%s28564_s3 + $0x1344] ss:$16 sps:$4 sm:$0xff]  }
 0x40c   : > { %29099 = vst [vmem:[#allocation34_spill] sm:$0xff] %v23823_v59  ;;  %8983 = vmatpush1.bf16.msra.mxu1 %v18452_v62  ;;  %8546 = vmatprep.subr.bf16.mxu0 %v18457_v12  ;;  %v23833_v39 = vpop.f32.mrb[138].mxu1  ;;  %v23835_v45 = vpop.f32.mrb[139].mxu0  ;;  %v18466_v62 = vld [vmem:[%s28564_s3 + $0x134c] ss:$16 sps:$4 sm:$0xff]  }
 0x40d   : > { %29100 = vst [vmem:[#allocation76_spill] sm:$0xff] %v23833_v39  ;;  %29101 = vst [vmem:[#allocation35_spill] sm:$0xff] %v23835_v45  ;;  %8984 = vmatprep.subr.bf16.mxu1 %v18460_v55  ;;  %v23840_v46 = vpop.f32.mrb[139].mxu1  ;;  %v18461_v12 = vld [vmem:[%s28564_s3 + $0x1340] ss:$16 sps:$4 sm:$0xff]  }
 0x40e   : > { %29102 = vst [vmem:[#allocation77_spill] sm:$0xff] %v23840_v46  ;;  %v18469_v55 = vld [vmem:[%s28564_s3 + $0x1364] ss:$16 sps:$4 sm:$0xff]   ;;  %v19536_v3 = vld [vmem:[%s28564_s3 + $0x72c] ss:$16 sps:$4 sm:$0xff]  }
 0x40f   : > { %8547 = vmatpush1.bf16.msra.mxu0 %v18455_v41  ;;  %v18472_v41 = vld [vmem:[%s28564_s3 + $0x136c] ss:$16 sps:$4 sm:$0xff]  }
 0x410   : > { %8985 = vmatpush1.bf16.msra.mxu1 %v18458_v51  ;;  %8548 = vmatprep.subr.bf16.mxu0 %v18463_v35  ;;  %v18467_v35 = vld [vmem:[%s28564_s3 + $0x1360] ss:$16 sps:$4 sm:$0xff]   ;;  %v19540_v59 = vld [vmem:[%s28564_s3 + $0x74c] ss:$16 sps:$4 sm:$0xff]  }
 0x411   : > { %8986 = vmatprep.subr.bf16.mxu1 %v18466_v62  ;;  %v23854_v54 = vpop.f32.mrb[140].mxu0  ;;  %v18470_v62 = vld [vmem:[%s28564_s3 + $0x1368] ss:$16 sps:$4 sm:$0xff]  }
 0x412   : > { %29103 = vst [vmem:[#allocation36_spill] sm:$0xff] %v23854_v54  ;;  %v23859_v46 = vpop.f32.mrb[140].mxu1  ;;  %v23861_v45 = vpop.f32.mrb[141].mxu0 }
 0x413   : > { %29104 = vst [vmem:[#allocation78_spill] sm:$0xff] %v23859_v46  ;;  %29105 = vst [vmem:[#allocation37_spill] sm:$0xff] %v23861_v45  ;;  %8549 = vmatpush1.bf16.msra.mxu0 %v18461_v12  ;;  %v23863_v51 = vpop.f32.mrb[141].mxu1  ;;  %v23868_v39 = vpop.f32.mrb[142].mxu0  ;;  %v18475_v12 = vld [vmem:[%s28564_s3 + $0x1384] ss:$16 sps:$4 sm:$0xff]  }
 0x414   : > { %29106 = vst [vmem:[#allocation79_spill] sm:$0xff] %v23863_v51  ;;  %8987 = vmatpush1.bf16.msra.mxu1 %v18464_v9  ;;  %8550 = vmatprep.subr.bf16.mxu0 %v18469_v55  ;;  %v23873_v54 = vpop.f32.mrb[142].mxu1  ;;  %v23875_v46 = vpop.f32.mrb[143].mxu0  ;;  %v18478_v9 = vld [vmem:[%s28564_s3 + $0x138c] ss:$16 sps:$4 sm:$0xff]  }
 0x415   : > { %29107 = vst [vmem:[#allocation80_spill] sm:$0xff] %v23875_v46  ;;  %8988 = vmatprep.subr.bf16.mxu1 %v18472_v41  ;;  %v23880_v51 = vpop.f32.mrb[143].mxu1  ;;  %v18473_v55 = vld [vmem:[%s28564_s3 + $0x1380] ss:$16 sps:$4 sm:$0xff]   ;;  %v18476_v46 = vld [vmem:[%s28564_s3 + $0x1388] ss:$16 sps:$4 sm:$0xff]  }
 0x416   : > { %29108 = vst [vmem:[#allocation39_spill] sm:$0xff] %v23880_v51  ;;  %v18481_v41 = vld [vmem:[%s28564_s3 + $0x13a4] ss:$16 sps:$4 sm:$0xff]   ;;  %v18484_v51 = vld [vmem:[%s28564_s3 + $0x13ac] ss:$16 sps:$4 sm:$0xff]  }
 0x417   : > { %8551 = vmatpush1.bf16.msra.mxu0 %v18467_v35  ;;  %v18479_v35 = vld [vmem:[%s28564_s3 + $0x13a0] ss:$16 sps:$4 sm:$0xff]   ;;  %v19544_v45 = vld [vmem:[%s28564_s3 + $0x76c] ss:$16 sps:$4 sm:$0xff]  }
 0x418   : > { %8989 = vmatpush1.bf16.msra.mxu1 %v18470_v62  ;;  %8552 = vmatprep.subr.bf16.mxu0 %v18475_v12  ;;  %v18482_v62 = vld [vmem:[%s28564_s3 + $0x13a8] ss:$16 sps:$4 sm:$0xff]   ;;  %v18487_v12 = vld [vmem:[%s28564_s3 + $0x13c4] ss:$16 sps:$4 sm:$0xff]  }
 0x419   : > { %8990 = vmatprep.subr.bf16.mxu1 %v18478_v9  ;;  %v18490_v9 = vld [vmem:[%s28564_s3 + $0x13cc] ss:$16 sps:$4 sm:$0xff]  }
 0x41b   : > { %8553 = vmatpush1.bf16.msra.mxu0 %v18473_v55  ;;  %v18485_v55 = vld [vmem:[%s28564_s3 + $0x13c0] ss:$16 sps:$4 sm:$0xff]  }
 0x41c   : > { %8991 = vmatpush1.bf16.msra.mxu1 %v18476_v46  ;;  %8554 = vmatprep.subr.bf16.mxu0 %v18481_v41  ;;  %v18488_v46 = vld [vmem:[%s28564_s3 + $0x13c8] ss:$16 sps:$4 sm:$0xff]   ;;  %v18493_v41 = vld [vmem:[%s28564_s3 + $0x13e4] ss:$16 sps:$4 sm:$0xff]  }
 0x41d   : > { %8992 = vmatprep.subr.bf16.mxu1 %v18484_v51  ;;  %v18496_v51 = vld [vmem:[%s28564_s3 + $0x13ec] ss:$16 sps:$4 sm:$0xff]  }
 0x41f   : > { %8555 = vmatpush1.bf16.msra.mxu0 %v18479_v35  ;;  %v18491_v35 = vld [vmem:[%s28564_s3 + $0x13e0] ss:$16 sps:$4 sm:$0xff]  }
 0x420   : > { %8993 = vmatpush1.bf16.msra.mxu1 %v18482_v62  ;;  %8556 = vmatprep.subr.bf16.mxu0 %v18487_v12  ;;  %v18494_v62 = vld [vmem:[%s28564_s3 + $0x13e8] ss:$16 sps:$4 sm:$0xff]   ;;  %v18499_v12 = vld [vmem:[%s28564_s3 + $0x1404] ss:$16 sps:$4 sm:$0xff]  }
 0x421   : > { %8994 = vmatprep.subr.bf16.mxu1 %v18490_v9  ;;  %v18502_v9 = vld [vmem:[%s28564_s3 + $0x140c] ss:$16 sps:$4 sm:$0xff]  }
 0x423   : > { %8557 = vmatpush1.bf16.msra.mxu0 %v18485_v55  ;;  %v18497_v55 = vld [vmem:[%s28564_s3 + $0x1400] ss:$16 sps:$4 sm:$0xff]  }
 0x424   : > { %8995 = vmatpush1.bf16.msra.mxu1 %v18488_v46  ;;  %8558 = vmatprep.subr.bf16.mxu0 %v18493_v41  ;;  %v18500_v46 = vld [vmem:[%s28564_s3 + $0x1408] ss:$16 sps:$4 sm:$0xff]   ;;  %v18505_v41 = vld [vmem:[%s28564_s3 + $0x1424] ss:$16 sps:$4 sm:$0xff]  }
 0x425   : > { %8996 = vmatprep.subr.bf16.mxu1 %v18496_v51  ;;  %v18508_v51 = vld [vmem:[%s28564_s3 + $0x142c] ss:$16 sps:$4 sm:$0xff]  }
 0x427   : > { %8559 = vmatpush1.bf16.msra.mxu0 %v18491_v35  ;;  %v18503_v35 = vld [vmem:[%s28564_s3 + $0x1420] ss:$16 sps:$4 sm:$0xff]  }
 0x428   : > { %8997 = vmatpush1.bf16.msra.mxu1 %v18494_v62  ;;  %8601 = vmatprep.subr.bf16.mxu0 %v18499_v12  ;;  %v18506_v62 = vld [vmem:[%s28564_s3 + $0x1428] ss:$16 sps:$4 sm:$0xff]   ;;  %v18511_v12 = vld [vmem:[%s28564_s3 + $0x1444] ss:$16 sps:$4 sm:$0xff]  }
 0x429   : > { %9039 = vmatprep.subr.bf16.mxu1 %v18502_v9  ;;  %v18514_v9 = vld [vmem:[%s28564_s3 + $0x144c] ss:$16 sps:$4 sm:$0xff]  }
 0x42a   : > { %8561 = vmatmul.mubr.bf16.vlgmr.msra.gmra.mrb[144].mxu0 %v21979_v23 }
 0x42b   : > { %8999 = vmatmul.mubr.bf16.vlgmr.msra.gmra.mrb[144].mxu1 %v21979_v23  ;;  %8570 = vmatprep.mubr.bf16.mxu0 %v22070_v49 }
 0x42c   : > { %8602 = vmatpush1.bf16.msra.mxu0 %v18497_v55  ;;  %9008 = vmatprep.mubr.bf16.mxu1 %v22070_v49  ;;  %v18509_v55 = vld [vmem:[%s28564_s3 + $0x1440] ss:$16 sps:$4 sm:$0xff]  }
 0x42d   : > { %9040 = vmatpush1.bf16.msra.mxu1 %v18500_v46  ;;  %8603 = vmatprep.subr.bf16.mxu0 %v18505_v41  ;;  %v18512_v46 = vld [vmem:[%s28564_s3 + $0x1448] ss:$16 sps:$4 sm:$0xff]   ;;  %v18517_v41 = vld [vmem:[%s28564_s3 + $0x1464] ss:$16 sps:$4 sm:$0xff]  }
 0x42e   : > { %9041 = vmatprep.subr.bf16.mxu1 %v18508_v51  ;;  %v18520_v51 = vld [vmem:[%s28564_s3 + $0x146c] ss:$16 sps:$4 sm:$0xff]  }
 0x430   : > { %8604 = vmatpush1.bf16.msra.mxu0 %v18503_v35  ;;  %v18515_v35 = vld [vmem:[%s28564_s3 + $0x1460] ss:$16 sps:$4 sm:$0xff]  }
 0x431   : > { %9042 = vmatpush1.bf16.msra.mxu1 %v18506_v62  ;;  %8605 = vmatprep.subr.bf16.mxu0 %v18511_v12  ;;  %v18518_v62 = vld [vmem:[%s28564_s3 + $0x1468] ss:$16 sps:$4 sm:$0xff]   ;;  %v18523_v12 = vld [vmem:[%s28564_s3 + $0x1484] ss:$16 sps:$4 sm:$0xff]  }
 0x432   : > { %8571 = vmatmul.mubr.bf16.gmra.mrb[148].mxu0 %v22049_v58  ;;  %9043 = vmatprep.subr.bf16.mxu1 %v18514_v9  ;;  %v18526_v9 = vld [vmem:[%s28564_s3 + $0x148c] ss:$16 sps:$4 sm:$0xff]  }
 0x433   : > { %9009 = vmatmul.mubr.bf16.gmra.mrb[148].mxu1 %v22049_v58  ;;  %8580 = vmatprep.mubr.bf16.mxu0 %v22132_v22 }
 0x434   : > { %8606 = vmatpush1.bf16.msra.mxu0 %v18509_v55  ;;  %9018 = vmatprep.mubr.bf16.mxu1 %v22132_v22  ;;  %v18521_v55 = vld [vmem:[%s28564_s3 + $0x1480] ss:$16 sps:$4 sm:$0xff]  }
 0x435   : > { %9044 = vmatpush1.bf16.msra.mxu1 %v18512_v46  ;;  %8607 = vmatprep.subr.bf16.mxu0 %v18517_v41  ;;  %v18524_v46 = vld [vmem:[%s28564_s3 + $0x1488] ss:$16 sps:$4 sm:$0xff]   ;;  %v18529_v41 = vld [vmem:[%s28564_s3 + $0x14a4] ss:$16 sps:$4 sm:$0xff]  }
 0x436   : > { %9045 = vmatprep.subr.bf16.mxu1 %v18520_v51  ;;  %v18532_v51 = vld [vmem:[%s28564_s3 + $0x14ac] ss:$16 sps:$4 sm:$0xff]  }
 0x438   : > { %8608 = vmatpush1.bf16.msra.mxu0 %v18515_v35  ;;  %v18527_v35 = vld [vmem:[%s28564_s3 + $0x14a0] ss:$16 sps:$4 sm:$0xff]  }
 0x439   : > { %9046 = vmatpush1.bf16.msra.mxu1 %v18518_v62  ;;  %8609 = vmatprep.subr.bf16.mxu0 %v18523_v12  ;;  %v18530_v62 = vld [vmem:[%s28564_s3 + $0x14a8] ss:$16 sps:$4 sm:$0xff]   ;;  %v18535_v12 = vld [vmem:[%s28564_s3 + $0x14c4] ss:$16 sps:$4 sm:$0xff]  }
 0x43a   : > { %8581 = vmatmul.mubr.bf16.gmra.mrb[152].mxu0 %v22112_v47  ;;  %9047 = vmatprep.subr.bf16.mxu1 %v18526_v9  ;;  %v18538_v9 = vld [vmem:[%s28564_s3 + $0x14cc] ss:$16 sps:$4 sm:$0xff]  }
 0x43b   : > { %9019 = vmatmul.mubr.bf16.gmra.mrb[152].mxu1 %v22112_v47  ;;  %8590 = vmatprep.mubr.bf16.mxu0 %v22191_v34 }
 0x43c   : > { %8610 = vmatpush1.bf16.msra.mxu0 %v18521_v55  ;;  %9028 = vmatprep.mubr.bf16.mxu1 %v22191_v34  ;;  %v18533_v55 = vld [vmem:[%s28564_s3 + $0x14c0] ss:$16 sps:$4 sm:$0xff]  }
 0x43d   : > { %9048 = vmatpush1.bf16.msra.mxu1 %v18524_v46  ;;  %8611 = vmatprep.subr.bf16.mxu0 %v18529_v41  ;;  %v18536_v46 = vld [vmem:[%s28564_s3 + $0x14c8] ss:$16 sps:$4 sm:$0xff]   ;;  %v18541_v41 = vld [vmem:[%s28564_s3 + $0x14e4] ss:$16 sps:$4 sm:$0xff]  }
 0x43e   : > { %9049 = vmatprep.subr.bf16.mxu1 %v18532_v51  ;;  %v18544_v51 = vld [vmem:[%s28564_s3 + $0x14ec] ss:$16 sps:$4 sm:$0xff]  }
 0x440   : > { %8612 = vmatpush1.bf16.msra.mxu0 %v18527_v35  ;;  %v18539_v35 = vld [vmem:[%s28564_s3 + $0x14e0] ss:$16 sps:$4 sm:$0xff]  }
 0x441   : > { %9050 = vmatpush1.bf16.msra.mxu1 %v18530_v62  ;;  %8613 = vmatprep.subr.bf16.mxu0 %v18535_v12  ;;  %v18542_v62 = vld [vmem:[%s28564_s3 + $0x14e8] ss:$16 sps:$4 sm:$0xff]   ;;  %v18547_v12 = vld [vmem:[%s28564_s3 + $0x1504] ss:$16 sps:$4 sm:$0xff]  }
 0x442   : > { %8591 = vmatmul.mubr.bf16.gmra.mrb[156].mxu0 %v22171_v20  ;;  %9051 = vmatprep.subr.bf16.mxu1 %v18538_v9  ;;  %v18550_v9 = vld [vmem:[%s28564_s3 + $0x150c] ss:$16 sps:$4 sm:$0xff]  }
 0x443   : > { %9029 = vmatmul.mubr.bf16.gmra.mrb[156].mxu1 %v22171_v20  ;;  %8633 = vmatprep.mubr.bf16.mxu0 %v21756_v11 }
 0x444   : > { %8614 = vmatpush1.bf16.msra.mxu0 %v18533_v55  ;;  %9071 = vmatprep.mubr.bf16.mxu1 %v21756_v11  ;;  %v18545_v55 = vld [vmem:[%s28564_s3 + $0x1500] ss:$16 sps:$4 sm:$0xff]  }
 0x445   : > { %9052 = vmatpush1.bf16.msra.mxu1 %v18536_v46  ;;  %8615 = vmatprep.subr.bf16.mxu0 %v18541_v41  ;;  %v18548_v46 = vld [vmem:[%s28564_s3 + $0x1508] ss:$16 sps:$4 sm:$0xff]   ;;  %v18553_v41 = vld [vmem:[%s28564_s3 + $0x1524] ss:$16 sps:$4 sm:$0xff]  }
 0x446   : > { %9053 = vmatprep.subr.bf16.mxu1 %v18544_v51  ;;  %v18556_v51 = vld [vmem:[%s28564_s3 + $0x152c] ss:$16 sps:$4 sm:$0xff]  }
 0x448   : > { %8616 = vmatpush1.bf16.msra.mxu0 %v18539_v35  ;;  %v18551_v35 = vld [vmem:[%s28564_s3 + $0x1520] ss:$16 sps:$4 sm:$0xff]  }
 0x449   : > { %9054 = vmatpush1.bf16.msra.mxu1 %v18542_v62  ;;  %8617 = vmatprep.subr.bf16.mxu0 %v18547_v12  ;;  %v18554_v62 = vld [vmem:[%s28564_s3 + $0x1528] ss:$16 sps:$4 sm:$0xff]   ;;  %v18559_v12 = vld [vmem:[%s28564_s3 + $0x1544] ss:$16 sps:$4 sm:$0xff]  }
 0x44a   : > { %9055 = vmatprep.subr.bf16.mxu1 %v18550_v9  ;;  %v18562_v9 = vld [vmem:[%s28564_s3 + $0x154c] ss:$16 sps:$4 sm:$0xff]  }
 0x44c   : > { %8618 = vmatpush1.bf16.msra.mxu0 %v18545_v55  ;;  %v18557_v55 = vld [vmem:[%s28564_s3 + $0x1540] ss:$16 sps:$4 sm:$0xff]  }
 0x44d   : > { %9056 = vmatpush1.bf16.msra.mxu1 %v18548_v46  ;;  %8619 = vmatprep.subr.bf16.mxu0 %v18553_v41  ;;  %v18560_v46 = vld [vmem:[%s28564_s3 + $0x1548] ss:$16 sps:$4 sm:$0xff]   ;;  %v18565_v41 = vld [vmem:[%s28564_s3 + $0x1564] ss:$16 sps:$4 sm:$0xff]  }
 0x44e   : > { %9057 = vmatprep.subr.bf16.mxu1 %v18556_v51  ;;  %v18568_v51 = vld [vmem:[%s28564_s3 + $0x156c] ss:$16 sps:$4 sm:$0xff]  }
 0x450   : > { %8620 = vmatpush1.bf16.msra.mxu0 %v18551_v35  ;;  %v18563_v35 = vld [vmem:[%s28564_s3 + $0x1560] ss:$16 sps:$4 sm:$0xff]  }
 0x451   : > { %9058 = vmatpush1.bf16.msra.mxu1 %v18554_v62  ;;  %8621 = vmatprep.subr.bf16.mxu0 %v18559_v12  ;;  %v18566_v62 = vld [vmem:[%s28564_s3 + $0x1568] ss:$16 sps:$4 sm:$0xff]   ;;  %v18571_v12 = vld [vmem:[%s28564_s3 + $0x1584] ss:$16 sps:$4 sm:$0xff]  }
 0x452   : > { %9059 = vmatprep.subr.bf16.mxu1 %v18562_v9  ;;  %v18574_v9 = vld [vmem:[%s28564_s3 + $0x158c] ss:$16 sps:$4 sm:$0xff]  }
 0x454   : > { %8622 = vmatpush1.bf16.msra.mxu0 %v18557_v55  ;;  %v18569_v55 = vld [vmem:[%s28564_s3 + $0x1580] ss:$16 sps:$4 sm:$0xff]  }
 0x455   : > { %9060 = vmatpush1.bf16.msra.mxu1 %v18560_v46  ;;  %8623 = vmatprep.subr.bf16.mxu0 %v18565_v41  ;;  %v18572_v46 = vld [vmem:[%s28564_s3 + $0x1588] ss:$16 sps:$4 sm:$0xff]   ;;  %v18577_v41 = vld [vmem:[%s28564_s3 + $0x15a4] ss:$16 sps:$4 sm:$0xff]  }
 0x456   : > { %9061 = vmatprep.subr.bf16.mxu1 %v18568_v51  ;;  %v18580_v51 = vld [vmem:[%s28564_s3 + $0x15ac] ss:$16 sps:$4 sm:$0xff]  }
 0x458   : > { %8624 = vmatpush1.bf16.msra.mxu0 %v18563_v35  ;;  %v18575_v35 = vld [vmem:[%s28564_s3 + $0x15a0] ss:$16 sps:$4 sm:$0xff]  }
 0x459   : > { %9062 = vmatpush1.bf16.msra.mxu1 %v18566_v62  ;;  %8625 = vmatprep.subr.bf16.mxu0 %v18571_v12  ;;  %v18578_v62 = vld [vmem:[%s28564_s3 + $0x15a8] ss:$16 sps:$4 sm:$0xff]   ;;  %v18583_v12 = vld [vmem:[%s28564_s3 + $0x15c4] ss:$16 sps:$4 sm:$0xff]  }
 0x45a   : > { %9063 = vmatprep.subr.bf16.mxu1 %v18574_v9  ;;  %v18586_v9 = vld [vmem:[%s28564_s3 + $0x15cc] ss:$16 sps:$4 sm:$0xff]  }
 0x45c   : > { %8626 = vmatpush1.bf16.msra.mxu0 %v18569_v55  ;;  %v18581_v55 = vld [vmem:[%s28564_s3 + $0x15c0] ss:$16 sps:$4 sm:$0xff]  }
 0x45d   : > { %9064 = vmatpush1.bf16.msra.mxu1 %v18572_v46  ;;  %8627 = vmatprep.subr.bf16.mxu0 %v18577_v41  ;;  %v18584_v46 = vld [vmem:[%s28564_s3 + $0x15c8] ss:$16 sps:$4 sm:$0xff]   ;;  %v18589_v41 = vld [vmem:[%s28564_s3 + $0x15e4] ss:$16 sps:$4 sm:$0xff]  }
 0x45e   : > { %9065 = vmatprep.subr.bf16.mxu1 %v18580_v51  ;;  %v18592_v51 = vld [vmem:[%s28564_s3 + $0x15ec] ss:$16 sps:$4 sm:$0xff]  }
 0x460   : > { %8628 = vmatpush1.bf16.msra.mxu0 %v18575_v35  ;;  %v18587_v35 = vld [vmem:[%s28564_s3 + $0x15e0] ss:$16 sps:$4 sm:$0xff]  }
 0x461   : > { %9066 = vmatpush1.bf16.msra.mxu1 %v18578_v62  ;;  %8629 = vmatprep.subr.bf16.mxu0 %v18583_v12  ;;  %v18590_v62 = vld [vmem:[%s28564_s3 + $0x15e8] ss:$16 sps:$4 sm:$0xff]   ;;  %v18595_v12 = vld [vmem:[%s28564_s3 + $0x1604] ss:$16 sps:$4 sm:$0xff]  }
 0x462   : > { %9067 = vmatprep.subr.bf16.mxu1 %v18586_v9  ;;  %v18598_v9 = vld [vmem:[%s28564_s3 + $0x160c] ss:$16 sps:$4 sm:$0xff]  }
 0x464   : > { %8630 = vmatpush1.bf16.msra.mxu0 %v18581_v55  ;;  %v18593_v55 = vld [vmem:[%s28564_s3 + $0x1600] ss:$16 sps:$4 sm:$0xff]  }
 0x465   : > { %9068 = vmatpush1.bf16.msra.mxu1 %v18584_v46  ;;  %8631 = vmatprep.subr.bf16.mxu0 %v18589_v41  ;;  %v18596_v46 = vld [vmem:[%s28564_s3 + $0x1608] ss:$16 sps:$4 sm:$0xff]   ;;  %v18601_v41 = vld [vmem:[%s28564_s3 + $0x1624] ss:$16 sps:$4 sm:$0xff]  }
 0x466   : > { %9069 = vmatprep.subr.bf16.mxu1 %v18592_v51  ;;  %v18604_v51 = vld [vmem:[%s28564_s3 + $0x162c] ss:$16 sps:$4 sm:$0xff]  }
 0x468   : > { %8632 = vmatpush1.bf16.msra.mxu0 %v18587_v35  ;;  %v18599_v35 = vld [vmem:[%s28564_s3 + $0x1620] ss:$16 sps:$4 sm:$0xff]  }
 0x469   : > { %9070 = vmatpush1.bf16.msra.mxu1 %v18590_v62  ;;  %8674 = vmatprep.subr.bf16.mxu0 %v18595_v12  ;;  %v18602_v62 = vld [vmem:[%s28564_s3 + $0x1628] ss:$16 sps:$4 sm:$0xff]   ;;  %v18607_v12 = vld [vmem:[%s28564_s3 + $0x1644] ss:$16 sps:$4 sm:$0xff]  }
 0x46a   : > { %9112 = vmatprep.subr.bf16.mxu1 %v18598_v9  ;;  %v18610_v9 = vld [vmem:[%s28564_s3 + $0x164c] ss:$16 sps:$4 sm:$0xff]  }
 0x46b   : > { %8634 = vmatmul.mubr.bf16.vlgmr.msra.gmra.mrb[144].mxu0 %v21747_v63 }
 0x46c   : > { %9072 = vmatmul.mubr.bf16.vlgmr.msra.gmra.mrb[144].mxu1 %v21747_v63  ;;  %8643 = vmatprep.mubr.bf16.mxu0 %v21825_v15 }
 0x46d   : > { %8675 = vmatpush1.bf16.msra.mxu0 %v18593_v55  ;;  %9081 = vmatprep.mubr.bf16.mxu1 %v21825_v15  ;;  %v18605_v55 = vld [vmem:[%s28564_s3 + $0x1640] ss:$16 sps:$4 sm:$0xff]  }
 0x46e   : > { %9113 = vmatpush1.bf16.msra.mxu1 %v18596_v46  ;;  %8676 = vmatprep.subr.bf16.mxu0 %v18601_v41  ;;  %v18608_v46 = vld [vmem:[%s28564_s3 + $0x1648] ss:$16 sps:$4 sm:$0xff]   ;;  %v18613_v41 = vld [vmem:[%s28564_s3 + $0x1664] ss:$16 sps:$4 sm:$0xff]  }
 0x46f   : > { %9114 = vmatprep.subr.bf16.mxu1 %v18604_v51  ;;  %v18616_v51 = vld [vmem:[%s28564_s3 + $0x166c] ss:$16 sps:$4 sm:$0xff]  }
 0x471   : > { %8677 = vmatpush1.bf16.msra.mxu0 %v18599_v35  ;;  %v18611_v35 = vld [vmem:[%s28564_s3 + $0x1660] ss:$16 sps:$4 sm:$0xff]  }
 0x472   : > { %9115 = vmatpush1.bf16.msra.mxu1 %v18602_v62  ;;  %8678 = vmatprep.subr.bf16.mxu0 %v18607_v12  ;;  %v18614_v62 = vld [vmem:[%s28564_s3 + $0x1668] ss:$16 sps:$4 sm:$0xff]   ;;  %v18619_v12 = vld [vmem:[%s28564_s3 + $0x1684] ss:$16 sps:$4 sm:$0xff]  }
 0x473   : > { %8644 = vmatmul.mubr.bf16.gmra.mrb[148].mxu0 %v21818_v24  ;;  %9116 = vmatprep.subr.bf16.mxu1 %v18610_v9  ;;  %v18622_v9 = vld [vmem:[%s28564_s3 + $0x168c] ss:$16 sps:$4 sm:$0xff]  }
 0x474   : > { %9082 = vmatmul.mubr.bf16.gmra.mrb[148].mxu1 %v21818_v24  ;;  %8653 = vmatprep.mubr.bf16.mxu0 %v21897_v16 }
 0x475   : > { %8679 = vmatpush1.bf16.msra.mxu0 %v18605_v55  ;;  %9091 = vmatprep.mubr.bf16.mxu1 %v21897_v16  ;;  %v18617_v55 = vld [vmem:[%s28564_s3 + $0x1680] ss:$16 sps:$4 sm:$0xff]  }
 0x476   : > { %9117 = vmatpush1.bf16.msra.mxu1 %v18608_v46  ;;  %8680 = vmatprep.subr.bf16.mxu0 %v18613_v41  ;;  %v18620_v46 = vld [vmem:[%s28564_s3 + $0x1688] ss:$16 sps:$4 sm:$0xff]   ;;  %v18625_v41 = vld [vmem:[%s28564_s3 + $0x16a4] ss:$16 sps:$4 sm:$0xff]  }
 0x477   : > { %9118 = vmatprep.subr.bf16.mxu1 %v18616_v51  ;;  %v18628_v51 = vld [vmem:[%s28564_s3 + $0x16ac] ss:$16 sps:$4 sm:$0xff]  }
 0x479   : > { %8681 = vmatpush1.bf16.msra.mxu0 %v18611_v35  ;;  %v18623_v35 = vld [vmem:[%s28564_s3 + $0x16a0] ss:$16 sps:$4 sm:$0xff]  }
 0x47a   : > { %9119 = vmatpush1.bf16.msra.mxu1 %v18614_v62  ;;  %8682 = vmatprep.subr.bf16.mxu0 %v18619_v12  ;;  %v18626_v62 = vld [vmem:[%s28564_s3 + $0x16a8] ss:$16 sps:$4 sm:$0xff]   ;;  %v18631_v12 = vld [vmem:[%s28564_s3 + $0x16c4] ss:$16 sps:$4 sm:$0xff]  }
 0x47b   : > { %8654 = vmatmul.mubr.bf16.gmra.mrb[152].mxu0 %v21889_v19  ;;  %9120 = vmatprep.subr.bf16.mxu1 %v18622_v9  ;;  %v18634_v9 = vld [vmem:[%s28564_s3 + $0x16cc] ss:$16 sps:$4 sm:$0xff]  }
 0x47c   : > { %9092 = vmatmul.mubr.bf16.gmra.mrb[152].mxu1 %v21889_v19  ;;  %8663 = vmatprep.mubr.bf16.mxu0 %v21966_v26 }
 0x47d   : > { %8683 = vmatpush1.bf16.msra.mxu0 %v18617_v55  ;;  %9101 = vmatprep.mubr.bf16.mxu1 %v21966_v26  ;;  %v18629_v55 = vld [vmem:[%s28564_s3 + $0x16c0] ss:$16 sps:$4 sm:$0xff]  }
 0x47e   : > { %9121 = vmatpush1.bf16.msra.mxu1 %v18620_v46  ;;  %8684 = vmatprep.subr.bf16.mxu0 %v18625_v41  ;;  %v18632_v46 = vld [vmem:[%s28564_s3 + $0x16c8] ss:$16 sps:$4 sm:$0xff]   ;;  %v18637_v41 = vld [vmem:[%s28564_s3 + $0x16e4] ss:$16 sps:$4 sm:$0xff]  }
 0x47f   : > { %9122 = vmatprep.subr.bf16.mxu1 %v18628_v51  ;;  %v18640_v51 = vld [vmem:[%s28564_s3 + $0x16ec] ss:$16 sps:$4 sm:$0xff]  }
 0x481   : > { %8685 = vmatpush1.bf16.msra.mxu0 %v18623_v35  ;;  %v18635_v35 = vld [vmem:[%s28564_s3 + $0x16e0] ss:$16 sps:$4 sm:$0xff]  }
 0x482   : > { %9123 = vmatpush1.bf16.msra.mxu1 %v18626_v62  ;;  %8686 = vmatprep.subr.bf16.mxu0 %v18631_v12  ;;  %v18638_v62 = vld [vmem:[%s28564_s3 + $0x16e8] ss:$16 sps:$4 sm:$0xff]   ;;  %v18643_v12 = vld [vmem:[%s28564_s3 + $0x1704] ss:$16 sps:$4 sm:$0xff]  }
 0x483   : > { %8664 = vmatmul.mubr.bf16.gmra.mrb[156].mxu0 %v21958_v53  ;;  %9124 = vmatprep.subr.bf16.mxu1 %v18634_v9  ;;  %v18646_v9 = vld [vmem:[%s28564_s3 + $0x170c] ss:$16 sps:$4 sm:$0xff]  }
 0x484   : > { %9102 = vmatmul.mubr.bf16.gmra.mrb[156].mxu1 %v21958_v53  ;;  %8706 = vmatprep.mubr.bf16.mxu0 %v21758_v14 }
 0x485   : > { %8687 = vmatpush1.bf16.msra.mxu0 %v18629_v55  ;;  %9144 = vmatprep.mubr.bf16.mxu1 %v21758_v14  ;;  %v18641_v55 = vld [vmem:[%s28564_s3 + $0x1700] ss:$16 sps:$4 sm:$0xff]  }
 0x486   : > { %9125 = vmatpush1.bf16.msra.mxu1 %v18632_v46  ;;  %8688 = vmatprep.subr.bf16.mxu0 %v18637_v41  ;;  %v18644_v46 = vld [vmem:[%s28564_s3 + $0x1708] ss:$16 sps:$4 sm:$0xff]   ;;  %v18649_v41 = vld [vmem:[%s28564_s3 + $0x1724] ss:$16 sps:$4 sm:$0xff]  }
 0x487   : > { %9126 = vmatprep.subr.bf16.mxu1 %v18640_v51  ;;  %v18652_v51 = vld [vmem:[%s28564_s3 + $0x172c] ss:$16 sps:$4 sm:$0xff]  }
 0x489   : > { %8689 = vmatpush1.bf16.msra.mxu0 %v18635_v35  ;;  %v18647_v35 = vld [vmem:[%s28564_s3 + $0x1720] ss:$16 sps:$4 sm:$0xff]  }
 0x48a   : > { %9127 = vmatpush1.bf16.msra.mxu1 %v18638_v62  ;;  %8690 = vmatprep.subr.bf16.mxu0 %v18643_v12  ;;  %v18650_v62 = vld [vmem:[%s28564_s3 + $0x1728] ss:$16 sps:$4 sm:$0xff]   ;;  %v18655_v12 = vld [vmem:[%s28564_s3 + $0x1744] ss:$16 sps:$4 sm:$0xff]  }
 0x48b   : > { %9128 = vmatprep.subr.bf16.mxu1 %v18646_v9  ;;  %v18658_v9 = vld [vmem:[%s28564_s3 + $0x174c] ss:$16 sps:$4 sm:$0xff]  }
 0x48d   : > { %8691 = vmatpush1.bf16.msra.mxu0 %v18641_v55  ;;  %v18653_v55 = vld [vmem:[%s28564_s3 + $0x1740] ss:$16 sps:$4 sm:$0xff]  }
 0x48e   : > { %9129 = vmatpush1.bf16.msra.mxu1 %v18644_v46  ;;  %8692 = vmatprep.subr.bf16.mxu0 %v18649_v41  ;;  %v18656_v46 = vld [vmem:[%s28564_s3 + $0x1748] ss:$16 sps:$4 sm:$0xff]   ;;  %v18661_v41 = vld [vmem:[%s28564_s3 + $0x1764] ss:$16 sps:$4 sm:$0xff]  }
 0x48f   : > { %9130 = vmatprep.subr.bf16.mxu1 %v18652_v51  ;;  %v18664_v51 = vld [vmem:[%s28564_s3 + $0x176c] ss:$16 sps:$4 sm:$0xff]  }
 0x491   : > { %8693 = vmatpush1.bf16.msra.mxu0 %v18647_v35  ;;  %v18659_v35 = vld [vmem:[%s28564_s3 + $0x1760] ss:$16 sps:$4 sm:$0xff]  }
 0x492   : > { %9131 = vmatpush1.bf16.msra.mxu1 %v18650_v62  ;;  %8694 = vmatprep.subr.bf16.mxu0 %v18655_v12  ;;  %v18662_v62 = vld [vmem:[%s28564_s3 + $0x1768] ss:$16 sps:$4 sm:$0xff]   ;;  %v18667_v12 = vld [vmem:[%s28564_s3 + $0x1784] ss:$16 sps:$4 sm:$0xff]  }
 0x493   : > { %9132 = vmatprep.subr.bf16.mxu1 %v18658_v9  ;;  %v18670_v9 = vld [vmem:[%s28564_s3 + $0x178c] ss:$16 sps:$4 sm:$0xff]  }
 0x495   : > { %8695 = vmatpush1.bf16.msra.mxu0 %v18653_v55  ;;  %v18665_v55 = vld [vmem:[%s28564_s3 + $0x1780] ss:$16 sps:$4 sm:$0xff]  }
 0x496   : > { %9133 = vmatpush1.bf16.msra.mxu1 %v18656_v46  ;;  %8696 = vmatprep.subr.bf16.mxu0 %v18661_v41  ;;  %v18668_v46 = vld [vmem:[%s28564_s3 + $0x1788] ss:$16 sps:$4 sm:$0xff]   ;;  %v18673_v41 = vld [vmem:[%s28564_s3 + $0x17a4] ss:$16 sps:$4 sm:$0xff]  }
 0x497   : > { %9134 = vmatprep.subr.bf16.mxu1 %v18664_v51  ;;  %v18676_v51 = vld [vmem:[%s28564_s3 + $0x17ac] ss:$16 sps:$4 sm:$0xff]  }
 0x499   : > { %8697 = vmatpush1.bf16.msra.mxu0 %v18659_v35  ;;  %v18671_v35 = vld [vmem:[%s28564_s3 + $0x17a0] ss:$16 sps:$4 sm:$0xff]  }
 0x49a   : > { %9135 = vmatpush1.bf16.msra.mxu1 %v18662_v62  ;;  %8698 = vmatprep.subr.bf16.mxu0 %v18667_v12  ;;  %v18674_v62 = vld [vmem:[%s28564_s3 + $0x17a8] ss:$16 sps:$4 sm:$0xff]   ;;  %v18679_v12 = vld [vmem:[%s28564_s3 + $0x17c4] ss:$16 sps:$4 sm:$0xff]  }
 0x49b   : > { %9136 = vmatprep.subr.bf16.mxu1 %v18670_v9  ;;  %v18682_v9 = vld [vmem:[%s28564_s3 + $0x17cc] ss:$16 sps:$4 sm:$0xff]  }
 0x49d   : > { %8699 = vmatpush1.bf16.msra.mxu0 %v18665_v55  ;;  %v18677_v55 = vld [vmem:[%s28564_s3 + $0x17c0] ss:$16 sps:$4 sm:$0xff]  }
 0x49e   : > { %9137 = vmatpush1.bf16.msra.mxu1 %v18668_v46  ;;  %8700 = vmatprep.subr.bf16.mxu0 %v18673_v41  ;;  %v18680_v46 = vld [vmem:[%s28564_s3 + $0x17c8] ss:$16 sps:$4 sm:$0xff]   ;;  %v18685_v41 = vld [vmem:[%s28564_s3 + $0x17e4] ss:$16 sps:$4 sm:$0xff]  }
 0x49f   : > { %9138 = vmatprep.subr.bf16.mxu1 %v18676_v51  ;;  %v18688_v51 = vld [vmem:[%s28564_s3 + $0x17ec] ss:$16 sps:$4 sm:$0xff]  }
 0x4a1   : > { %8701 = vmatpush1.bf16.msra.mxu0 %v18671_v35  ;;  %v18683_v35 = vld [vmem:[%s28564_s3 + $0x17e0] ss:$16 sps:$4 sm:$0xff]  }
 0x4a2   : > { %9139 = vmatpush1.bf16.msra.mxu1 %v18674_v62  ;;  %8702 = vmatprep.subr.bf16.mxu0 %v18679_v12  ;;  %v18686_v62 = vld [vmem:[%s28564_s3 + $0x17e8] ss:$16 sps:$4 sm:$0xff]   ;;  %v19307_v12 = vld [vmem:[%s28564_s3 + $0x4] ss:$16 sps:$4 sm:$0xff]  }
 0x4a3   : > { %9140 = vmatprep.subr.bf16.mxu1 %v18682_v9  ;;  %v19308_v9 = vld [vmem:[%s28564_s3 + $0xc] ss:$16 sps:$4 sm:$0xff]  }
 0x4a5   : > { %8703 = vmatpush1.bf16.msra.mxu0 %v18677_v55  ;;  %v19309_v55 = vld [vmem:[%s28564_s3] ss:$16 sps:$4 sm:$0xff]  }
 0x4a6   : > { %9141 = vmatpush1.bf16.msra.mxu1 %v18680_v46  ;;  %8704 = vmatprep.subr.bf16.mxu0 %v18685_v41  ;;  %v19310_v46 = vld [vmem:[%s28564_s3 + $0x8] ss:$16 sps:$4 sm:$0xff]   ;;  %v19311_v41 = vld [vmem:[%s28564_s3 + $0x24] ss:$16 sps:$4 sm:$0xff]  }
 0x4a7   : > { %9142 = vmatprep.subr.bf16.mxu1 %v18688_v51  ;;  %v19312_v51 = vld [vmem:[%s28564_s3 + $0x2c] ss:$16 sps:$4 sm:$0xff]  }
 0x4a9   : > { %8705 = vmatpush1.bf16.msra.mxu0 %v18683_v35  ;;  %v19313_v35 = vld [vmem:[%s28564_s3 + $0x20] ss:$16 sps:$4 sm:$0xff]  }
 0x4aa   : > { %9143 = vmatpush1.bf16.msra.mxu1 %v18686_v62  ;;  %9313 = vmatprep.subr.bf16.mxu0 %v19307_v12  ;;  %v19314_v62 = vld [vmem:[%s28564_s3 + $0x28] ss:$16 sps:$4 sm:$0xff]   ;;  %v19315_v12 = vld [vmem:[%s28564_s3 + $0x44] ss:$16 sps:$4 sm:$0xff]  }
 0x4ab   : > { %9751 = vmatprep.subr.bf16.mxu1 %v19308_v9  ;;  %v19316_v9 = vld [vmem:[%s28564_s3 + $0x4c] ss:$16 sps:$4 sm:$0xff]  }
 0x4ac   : > { %8707 = vmatmul.mubr.bf16.vlgmr.msra.gmra.mrb[144].mxu0 %v29075_v10 }
 0x4ad   : > { %9145 = vmatmul.mubr.bf16.vlgmr.msra.gmra.mrb[144].mxu1 %v29075_v10  ;;  %8716 = vmatprep.mubr.bf16.mxu0 %v29076_v4 }
 0x4ae   : > { %9154 = vmatprep.mubr.bf16.mxu1 %v29076_v4  ;;  %9314 = vmatpush1.bf16.msra.mxu0 %v19309_v55  ;;  %v19317_v55 = vld [vmem:[%s28564_s3 + $0x40] ss:$16 sps:$4 sm:$0xff]  }
 0x4af   : > { %9752 = vmatpush1.bf16.msra.mxu1 %v19310_v46  ;;  %9315 = vmatprep.subr.bf16.mxu0 %v19311_v41  ;;  %v19318_v46 = vld [vmem:[%s28564_s3 + $0x48] ss:$16 sps:$4 sm:$0xff]   ;;  %v19319_v41 = vld [vmem:[%s28564_s3 + $0x64] ss:$16 sps:$4 sm:$0xff]  }
 0x4b0   : > { %9753 = vmatprep.subr.bf16.mxu1 %v19312_v51  ;;  %v19320_v51 = vld [vmem:[%s28564_s3 + $0x6c] ss:$16 sps:$4 sm:$0xff]  }
 0x4b2   : > { %9316 = vmatpush1.bf16.msra.mxu0 %v19313_v35  ;;  %v19321_v35 = vld [vmem:[%s28564_s3 + $0x60] ss:$16 sps:$4 sm:$0xff]  }
 0x4b3   : > { %9754 = vmatpush1.bf16.msra.mxu1 %v19314_v62  ;;  %9317 = vmatprep.subr.bf16.mxu0 %v19315_v12  ;;  %v19322_v62 = vld [vmem:[%s28564_s3 + $0x68] ss:$16 sps:$4 sm:$0xff]   ;;  %v19323_v12 = vld [vmem:[%s28564_s3 + $0x84] ss:$16 sps:$4 sm:$0xff]  }
 0x4b4   : > { %8717 = vmatmul.mubr.bf16.gmra.mrb[148].mxu0 %v29077_v2  ;;  %9755 = vmatprep.subr.bf16.mxu1 %v19316_v9  ;;  %v19324_v9 = vld [vmem:[%s28564_s3 + $0x8c] ss:$16 sps:$4 sm:$0xff]  }
 0x4b5   : > { %9155 = vmatmul.mubr.bf16.gmra.mrb[148].mxu1 %v29077_v2  ;;  %8726 = vmatprep.mubr.bf16.mxu0 %v29078_v25 }
 0x4b6   : > { %9164 = vmatprep.mubr.bf16.mxu1 %v29078_v25  ;;  %9318 = vmatpush1.bf16.msra.mxu0 %v19317_v55  ;;  %v19325_v55 = vld [vmem:[%s28564_s3 + $0x80] ss:$16 sps:$4 sm:$0xff]  }
 0x4b7   : > { %9756 = vmatpush1.bf16.msra.mxu1 %v19318_v46  ;;  %9319 = vmatprep.subr.bf16.mxu0 %v19319_v41  ;;  %v19326_v46 = vld [vmem:[%s28564_s3 + $0x88] ss:$16 sps:$4 sm:$0xff]   ;;  %v19327_v41 = vld [vmem:[%s28564_s3 + $0xa4] ss:$16 sps:$4 sm:$0xff]  }
 0x4b8   : > { %9757 = vmatprep.subr.bf16.mxu1 %v19320_v51  ;;  %v19328_v51 = vld [vmem:[%s28564_s3 + $0xac] ss:$16 sps:$4 sm:$0xff]  }
 0x4ba   : > { %9320 = vmatpush1.bf16.msra.mxu0 %v19321_v35  ;;  %v19329_v35 = vld [vmem:[%s28564_s3 + $0xa0] ss:$16 sps:$4 sm:$0xff]  }
 0x4bb   : > { %9758 = vmatpush1.bf16.msra.mxu1 %v19322_v62  ;;  %9321 = vmatprep.subr.bf16.mxu0 %v19323_v12  ;;  %v19330_v62 = vld [vmem:[%s28564_s3 + $0xa8] ss:$16 sps:$4 sm:$0xff]   ;;  %v19331_v12 = vld [vmem:[%s28564_s3 + $0xc4] ss:$16 sps:$4 sm:$0xff]  }
 0x4bc   : > { %8727 = vmatmul.mubr.bf16.gmra.mrb[152].mxu0 %v29079_v30  ;;  %9759 = vmatprep.subr.bf16.mxu1 %v19324_v9  ;;  %v19332_v9 = vld [vmem:[%s28564_s3 + $0xcc] ss:$16 sps:$4 sm:$0xff]  }
 0x4bd   : > { %9165 = vmatmul.mubr.bf16.gmra.mrb[152].mxu1 %v29079_v30  ;;  %8736 = vmatprep.mubr.bf16.mxu0 %v29080_v36 }
 0x4be   : > { %9174 = vmatprep.mubr.bf16.mxu1 %v29080_v36  ;;  %9322 = vmatpush1.bf16.msra.mxu0 %v19325_v55  ;;  %v19333_v55 = vld [vmem:[%s28564_s3 + $0xc0] ss:$16 sps:$4 sm:$0xff]  }
 0x4bf   : > { %9760 = vmatpush1.bf16.msra.mxu1 %v19326_v46  ;;  %9323 = vmatprep.subr.bf16.mxu0 %v19327_v41  ;;  %v19334_v46 = vld [vmem:[%s28564_s3 + $0xc8] ss:$16 sps:$4 sm:$0xff]   ;;  %v19335_v41 = vld [vmem:[%s28564_s3 + $0xe4] ss:$16 sps:$4 sm:$0xff]  }
 0x4c0   : > { %9761 = vmatprep.subr.bf16.mxu1 %v19328_v51  ;;  %v19336_v51 = vld [vmem:[%s28564_s3 + $0xec] ss:$16 sps:$4 sm:$0xff]  }
 0x4c2   : > { %9324 = vmatpush1.bf16.msra.mxu0 %v19329_v35  ;;  %v19337_v35 = vld [vmem:[%s28564_s3 + $0xe0] ss:$16 sps:$4 sm:$0xff]  }
 0x4c3   : > { %9762 = vmatpush1.bf16.msra.mxu1 %v19330_v62  ;;  %9325 = vmatprep.subr.bf16.mxu0 %v19331_v12  ;;  %v19338_v62 = vld [vmem:[%s28564_s3 + $0xe8] ss:$16 sps:$4 sm:$0xff]   ;;  %v19339_v12 = vld [vmem:[%s28564_s3 + $0x104] ss:$16 sps:$4 sm:$0xff]  }
 0x4c4   : > { %8737 = vmatmul.mubr.bf16.gmra.mrb[156].mxu0 %v29081_v56  ;;  %9763 = vmatprep.subr.bf16.mxu1 %v19332_v9  ;;  %v19340_v9 = vld [vmem:[%s28564_s3 + $0x10c] ss:$16 sps:$4 sm:$0xff]  }
 0x4c5   : > { %9175 = vmatmul.mubr.bf16.gmra.mrb[156].mxu1 %v29081_v56  ;;  %9345 = vmatprep.mubr.bf16.mxu0 %v21990_v52 }
 0x4c6   : > { %9326 = vmatpush1.bf16.msra.mxu0 %v19333_v55  ;;  %9783 = vmatprep.mubr.bf16.mxu1 %v21990_v52  ;;  %v19341_v55 = vld [vmem:[%s28564_s3 + $0x100] ss:$16 sps:$4 sm:$0xff]  }
 0x4c7   : > { %9764 = vmatpush1.bf16.msra.mxu1 %v19334_v46  ;;  %9327 = vmatprep.subr.bf16.mxu0 %v19335_v41  ;;  %v19342_v46 = vld [vmem:[%s28564_s3 + $0x108] ss:$16 sps:$4 sm:$0xff]   ;;  %v19343_v41 = vld [vmem:[%s28564_s3 + $0x124] ss:$16 sps:$4 sm:$0xff]  }
 0x4c8   : > { %9765 = vmatprep.subr.bf16.mxu1 %v19336_v51  ;;  %v19344_v51 = vld [vmem:[%s28564_s3 + $0x12c] ss:$16 sps:$4 sm:$0xff]  }
 0x4ca   : > { %9328 = vmatpush1.bf16.msra.mxu0 %v19337_v35  ;;  %v19345_v35 = vld [vmem:[%s28564_s3 + $0x120] ss:$16 sps:$4 sm:$0xff]  }
 0x4cb   : > { %9766 = vmatpush1.bf16.msra.mxu1 %v19338_v62  ;;  %9329 = vmatprep.subr.bf16.mxu0 %v19339_v12  ;;  %v19346_v62 = vld [vmem:[%s28564_s3 + $0x128] ss:$16 sps:$4 sm:$0xff]   ;;  %v19347_v12 = vld [vmem:[%s28564_s3 + $0x144] ss:$16 sps:$4 sm:$0xff]  }
 0x4cc   : > { %9767 = vmatprep.subr.bf16.mxu1 %v19340_v9  ;;  %v19348_v9 = vld [vmem:[%s28564_s3 + $0x14c] ss:$16 sps:$4 sm:$0xff]  }
 0x4ce   : > { %9330 = vmatpush1.bf16.msra.mxu0 %v19341_v55  ;;  %v19349_v55 = vld [vmem:[%s28564_s3 + $0x140] ss:$16 sps:$4 sm:$0xff]  }
 0x4cf   : > { %9768 = vmatpush1.bf16.msra.mxu1 %v19342_v46  ;;  %9331 = vmatprep.subr.bf16.mxu0 %v19343_v41  ;;  %v19350_v46 = vld [vmem:[%s28564_s3 + $0x148] ss:$16 sps:$4 sm:$0xff]   ;;  %v19351_v41 = vld [vmem:[%s28564_s3 + $0x164] ss:$16 sps:$4 sm:$0xff]  }
 0x4d0   : > { %9769 = vmatprep.subr.bf16.mxu1 %v19344_v51  ;;  %v19352_v51 = vld [vmem:[%s28564_s3 + $0x16c] ss:$16 sps:$4 sm:$0xff]  }
 0x4d2   : > { %9332 = vmatpush1.bf16.msra.mxu0 %v19345_v35  ;;  %v19353_v35 = vld [vmem:[%s28564_s3 + $0x160] ss:$16 sps:$4 sm:$0xff]  }
 0x4d3   : > { %9770 = vmatpush1.bf16.msra.mxu1 %v19346_v62  ;;  %9333 = vmatprep.subr.bf16.mxu0 %v19347_v12  ;;  %v19354_v62 = vld [vmem:[%s28564_s3 + $0x168] ss:$16 sps:$4 sm:$0xff]   ;;  %v19355_v12 = vld [vmem:[%s28564_s3 + $0x184] ss:$16 sps:$4 sm:$0xff]  }
 0x4d4   : > { %9771 = vmatprep.subr.bf16.mxu1 %v19348_v9  ;;  %v19356_v9 = vld [vmem:[%s28564_s3 + $0x18c] ss:$16 sps:$4 sm:$0xff]  }
 0x4d6   : > { %9334 = vmatpush1.bf16.msra.mxu0 %v19349_v55  ;;  %v19357_v55 = vld [vmem:[%s28564_s3 + $0x180] ss:$16 sps:$4 sm:$0xff]  }
 0x4d7   : > { %9772 = vmatpush1.bf16.msra.mxu1 %v19350_v46  ;;  %9335 = vmatprep.subr.bf16.mxu0 %v19351_v41  ;;  %v19358_v46 = vld [vmem:[%s28564_s3 + $0x188] ss:$16 sps:$4 sm:$0xff]   ;;  %v19359_v41 = vld [vmem:[%s28564_s3 + $0x1a4] ss:$16 sps:$4 sm:$0xff]  }
 0x4d8   : > { %9773 = vmatprep.subr.bf16.mxu1 %v19352_v51  ;;  %v19360_v51 = vld [vmem:[%s28564_s3 + $0x1ac] ss:$16 sps:$4 sm:$0xff]  }
 0x4da   : > { %9336 = vmatpush1.bf16.msra.mxu0 %v19353_v35  ;;  %v19361_v35 = vld [vmem:[%s28564_s3 + $0x1a0] ss:$16 sps:$4 sm:$0xff]  }
 0x4db   : > { %9774 = vmatpush1.bf16.msra.mxu1 %v19354_v62  ;;  %9337 = vmatprep.subr.bf16.mxu0 %v19355_v12  ;;  %v19362_v62 = vld [vmem:[%s28564_s3 + $0x1a8] ss:$16 sps:$4 sm:$0xff]   ;;  %v19363_v12 = vld [vmem:[%s28564_s3 + $0x1c4] ss:$16 sps:$4 sm:$0xff]  }
 0x4dc   : > { %9775 = vmatprep.subr.bf16.mxu1 %v19356_v9  ;;  %v19364_v9 = vld [vmem:[%s28564_s3 + $0x1cc] ss:$16 sps:$4 sm:$0xff]  }
 0x4de   : > { %9338 = vmatpush1.bf16.msra.mxu0 %v19357_v55  ;;  %v19365_v55 = vld [vmem:[%s28564_s3 + $0x1c0] ss:$16 sps:$4 sm:$0xff]  }
 0x4df   : > { %9776 = vmatpush1.bf16.msra.mxu1 %v19358_v46  ;;  %9339 = vmatprep.subr.bf16.mxu0 %v19359_v41  ;;  %v19366_v46 = vld [vmem:[%s28564_s3 + $0x1c8] ss:$16 sps:$4 sm:$0xff]   ;;  %v19367_v41 = vld [vmem:[%s28564_s3 + $0x1e4] ss:$16 sps:$4 sm:$0xff]  }
 0x4e0   : > { %9777 = vmatprep.subr.bf16.mxu1 %v19360_v51  ;;  %v19368_v51 = vld [vmem:[%s28564_s3 + $0x1ec] ss:$16 sps:$4 sm:$0xff]  }
 0x4e2   : > { %9340 = vmatpush1.bf16.msra.mxu0 %v19361_v35  ;;  %v19369_v35 = vld [vmem:[%s28564_s3 + $0x1e0] ss:$16 sps:$4 sm:$0xff]  }
 0x4e3   : > { %9778 = vmatpush1.bf16.msra.mxu1 %v19362_v62  ;;  %9341 = vmatprep.subr.bf16.mxu0 %v19363_v12  ;;  %v19370_v62 = vld [vmem:[%s28564_s3 + $0x1e8] ss:$16 sps:$4 sm:$0xff]   ;;  %v19371_v12 = vld [vmem:[%s28564_s3 + $0x204] ss:$16 sps:$4 sm:$0xff]  }
 0x4e4   : > { %9779 = vmatprep.subr.bf16.mxu1 %v19364_v9  ;;  %v19372_v9 = vld [vmem:[%s28564_s3 + $0x20c] ss:$16 sps:$4 sm:$0xff]  }
 0x4e6   : > { %9342 = vmatpush1.bf16.msra.mxu0 %v19365_v55  ;;  %v19373_v55 = vld [vmem:[%s28564_s3 + $0x200] ss:$16 sps:$4 sm:$0xff]  }
 0x4e7   : > { %9780 = vmatpush1.bf16.msra.mxu1 %v19366_v46  ;;  %9343 = vmatprep.subr.bf16.mxu0 %v19367_v41  ;;  %v19374_v46 = vld [vmem:[%s28564_s3 + $0x208] ss:$16 sps:$4 sm:$0xff]   ;;  %v19375_v41 = vld [vmem:[%s28564_s3 + $0x224] ss:$16 sps:$4 sm:$0xff]  }
 0x4e8   : > { %9781 = vmatprep.subr.bf16.mxu1 %v19368_v51  ;;  %v19376_v51 = vld [vmem:[%s28564_s3 + $0x22c] ss:$16 sps:$4 sm:$0xff]  }
 0x4ea   : > { %9344 = vmatpush1.bf16.msra.mxu0 %v19369_v35  ;;  %v19377_v35 = vld [vmem:[%s28564_s3 + $0x220] ss:$16 sps:$4 sm:$0xff]  }
 0x4eb   : > { %9782 = vmatpush1.bf16.msra.mxu1 %v19370_v62  ;;  %9386 = vmatprep.subr.bf16.mxu0 %v19371_v12  ;;  %v19378_v62 = vld [vmem:[%s28564_s3 + $0x228] ss:$16 sps:$4 sm:$0xff]   ;;  %v19379_v12 = vld [vmem:[%s28564_s3 + $0x244] ss:$16 sps:$4 sm:$0xff]  }
 0x4ec   : > { %9824 = vmatprep.subr.bf16.mxu1 %v19372_v9  ;;  %v19380_v9 = vld [vmem:[%s28564_s3 + $0x24c] ss:$16 sps:$4 sm:$0xff]  }
 0x4ed   : > { %9346 = vmatmul.mubr.bf16.vlgmr.msra.gmra.mrb[160].mxu0 %v21977_v1 }
 0x4ee   : > { %9784 = vmatmul.mubr.bf16.vlgmr.msra.gmra.mrb[160].mxu1 %v21977_v1  ;;  %9355 = vmatprep.mubr.bf16.mxu0 %v22068_v37 }
 0x4ef   : > { %9387 = vmatpush1.bf16.msra.mxu0 %v19373_v55  ;;  %9793 = vmatprep.mubr.bf16.mxu1 %v22068_v37  ;;  %v19381_v55 = vld [vmem:[%s28564_s3 + $0x240] ss:$16 sps:$4 sm:$0xff]  }
 0x4f0   : > { %9825 = vmatpush1.bf16.msra.mxu1 %v19374_v46  ;;  %9388 = vmatprep.subr.bf16.mxu0 %v19375_v41  ;;  %v19382_v46 = vld [vmem:[%s28564_s3 + $0x248] ss:$16 sps:$4 sm:$0xff]   ;;  %v19383_v41 = vld [vmem:[%s28564_s3 + $0x264] ss:$16 sps:$4 sm:$0xff]  }
 0x4f1   : > { %9826 = vmatprep.subr.bf16.mxu1 %v19376_v51  ;;  %v19384_v51 = vld [vmem:[%s28564_s3 + $0x26c] ss:$16 sps:$4 sm:$0xff]  }
 0x4f3   : > { %9389 = vmatpush1.bf16.msra.mxu0 %v19377_v35  ;;  %v19385_v35 = vld [vmem:[%s28564_s3 + $0x260] ss:$16 sps:$4 sm:$0xff]  }
 0x4f4   : > { %9827 = vmatpush1.bf16.msra.mxu1 %v19378_v62  ;;  %9390 = vmatprep.subr.bf16.mxu0 %v19379_v12  ;;  %v19386_v62 = vld [vmem:[%s28564_s3 + $0x268] ss:$16 sps:$4 sm:$0xff]   ;;  %v19387_v12 = vld [vmem:[%s28564_s3 + $0x284] ss:$16 sps:$4 sm:$0xff]  }
 0x4f5   : > { %9356 = vmatmul.mubr.bf16.gmra.mrb[164].mxu0 %v22047_v27  ;;  %9828 = vmatprep.subr.bf16.mxu1 %v19380_v9  ;;  %v19388_v9 = vld [vmem:[%s28564_s3 + $0x28c] ss:$16 sps:$4 sm:$0xff]  }
 0x4f6   : > { %9794 = vmatmul.mubr.bf16.gmra.mrb[164].mxu1 %v22047_v27  ;;  %9365 = vmatprep.mubr.bf16.mxu0 %v22130_v60 }
 0x4f7   : > { %9391 = vmatpush1.bf16.msra.mxu0 %v19381_v55  ;;  %9803 = vmatprep.mubr.bf16.mxu1 %v22130_v60  ;;  %v19389_v55 = vld [vmem:[%s28564_s3 + $0x280] ss:$16 sps:$4 sm:$0xff]  }
 0x4f8   : > { %9829 = vmatpush1.bf16.msra.mxu1 %v19382_v46  ;;  %9392 = vmatprep.subr.bf16.mxu0 %v19383_v41  ;;  %v19390_v46 = vld [vmem:[%s28564_s3 + $0x288] ss:$16 sps:$4 sm:$0xff]   ;;  %v19391_v41 = vld [vmem:[%s28564_s3 + $0x2a4] ss:$16 sps:$4 sm:$0xff]  }
 0x4f9   : > { %9830 = vmatprep.subr.bf16.mxu1 %v19384_v51  ;;  %v19392_v51 = vld [vmem:[%s28564_s3 + $0x2ac] ss:$16 sps:$4 sm:$0xff]  }
 0x4fb   : > { %9393 = vmatpush1.bf16.msra.mxu0 %v19385_v35  ;;  %v19393_v35 = vld [vmem:[%s28564_s3 + $0x2a0] ss:$16 sps:$4 sm:$0xff]  }
 0x4fc   : > { %9831 = vmatpush1.bf16.msra.mxu1 %v19386_v62  ;;  %9394 = vmatprep.subr.bf16.mxu0 %v19387_v12  ;;  %v19394_v62 = vld [vmem:[%s28564_s3 + $0x2a8] ss:$16 sps:$4 sm:$0xff]   ;;  %v19395_v12 = vld [vmem:[%s28564_s3 + $0x2c4] ss:$16 sps:$4 sm:$0xff]  }
 0x4fd   : > { %9366 = vmatmul.mubr.bf16.gmra.mrb[168].mxu0 %v22110_v7  ;;  %9832 = vmatprep.subr.bf16.mxu1 %v19388_v9  ;;  %v19396_v9 = vld [vmem:[%s28564_s3 + $0x2cc] ss:$16 sps:$4 sm:$0xff]  }
 0x4fe   : > { %9804 = vmatmul.mubr.bf16.gmra.mrb[168].mxu1 %v22110_v7  ;;  %9375 = vmatprep.mubr.bf16.mxu0 %v22187_v33 }
 0x4ff   : > { %9395 = vmatpush1.bf16.msra.mxu0 %v19389_v55  ;;  %9813 = vmatprep.mubr.bf16.mxu1 %v22187_v33  ;;  %v19397_v55 = vld [vmem:[%s28564_s3 + $0x2c0] ss:$16 sps:$4 sm:$0xff]  }
 0x500   : > { %9833 = vmatpush1.bf16.msra.mxu1 %v19390_v46  ;;  %9396 = vmatprep.subr.bf16.mxu0 %v19391_v41  ;;  %v19398_v46 = vld [vmem:[%s28564_s3 + $0x2c8] ss:$16 sps:$4 sm:$0xff]   ;;  %v19399_v41 = vld [vmem:[%s28564_s3 + $0x2e4] ss:$16 sps:$4 sm:$0xff]  }
 0x501   : > { %9834 = vmatprep.subr.bf16.mxu1 %v19392_v51  ;;  %v19400_v51 = vld [vmem:[%s28564_s3 + $0x2ec] ss:$16 sps:$4 sm:$0xff]  }
 0x503   : > { %9397 = vmatpush1.bf16.msra.mxu0 %v19393_v35  ;;  %v19401_v35 = vld [vmem:[%s28564_s3 + $0x2e0] ss:$16 sps:$4 sm:$0xff]  }
 0x504   : > { %9835 = vmatpush1.bf16.msra.mxu1 %v19394_v62  ;;  %9398 = vmatprep.subr.bf16.mxu0 %v19395_v12  ;;  %v19402_v62 = vld [vmem:[%s28564_s3 + $0x2e8] ss:$16 sps:$4 sm:$0xff]   ;;  %v19403_v12 = vld [vmem:[%s28564_s3 + $0x304] ss:$16 sps:$4 sm:$0xff]  }
 0x505   : > { %9376 = vmatmul.mubr.bf16.gmra.mrb[172].mxu0 %v22169_v40  ;;  %9836 = vmatprep.subr.bf16.mxu1 %v19396_v9  ;;  %v19404_v9 = vld [vmem:[%s28564_s3 + $0x30c] ss:$16 sps:$4 sm:$0xff]  }
 0x506   : > { %9814 = vmatmul.mubr.bf16.gmra.mrb[172].mxu1 %v22169_v40  ;;  %9418 = vmatprep.mubr.bf16.mxu0 %v22005_v48 }
 0x507   : > { %9399 = vmatpush1.bf16.msra.mxu0 %v19397_v55  ;;  %9856 = vmatprep.mubr.bf16.mxu1 %v22005_v48  ;;  %v19405_v55 = vld [vmem:[%s28564_s3 + $0x300] ss:$16 sps:$4 sm:$0xff]  }
 0x508   : > { %9837 = vmatpush1.bf16.msra.mxu1 %v19398_v46  ;;  %9400 = vmatprep.subr.bf16.mxu0 %v19399_v41  ;;  %v19406_v46 = vld [vmem:[%s28564_s3 + $0x308] ss:$16 sps:$4 sm:$0xff]   ;;  %v19407_v41 = vld [vmem:[%s28564_s3 + $0x324] ss:$16 sps:$4 sm:$0xff]  }
 0x509   : > { %9838 = vmatprep.subr.bf16.mxu1 %v19400_v51  ;;  %v19408_v51 = vld [vmem:[%s28564_s3 + $0x32c] ss:$16 sps:$4 sm:$0xff]  }
 0x50b   : > { %9401 = vmatpush1.bf16.msra.mxu0 %v19401_v35  ;;  %v19409_v35 = vld [vmem:[%s28564_s3 + $0x320] ss:$16 sps:$4 sm:$0xff]  }
 0x50c   : > { %9839 = vmatpush1.bf16.msra.mxu1 %v19402_v62  ;;  %9402 = vmatprep.subr.bf16.mxu0 %v19403_v12  ;;  %v19410_v62 = vld [vmem:[%s28564_s3 + $0x328] ss:$16 sps:$4 sm:$0xff]   ;;  %v19411_v12 = vld [vmem:[%s28564_s3 + $0x344] ss:$16 sps:$4 sm:$0xff]  }
 0x50d   : > { %9840 = vmatprep.subr.bf16.mxu1 %v19404_v9  ;;  %v19412_v9 = vld [vmem:[%s28564_s3 + $0x34c] ss:$16 sps:$4 sm:$0xff]  }
 0x50f   : > { %9403 = vmatpush1.bf16.msra.mxu0 %v19405_v55  ;;  %v19413_v55 = vld [vmem:[%s28564_s3 + $0x340] ss:$16 sps:$4 sm:$0xff]  }
 0x510   : > { %9841 = vmatpush1.bf16.msra.mxu1 %v19406_v46  ;;  %9404 = vmatprep.subr.bf16.mxu0 %v19407_v41  ;;  %v19414_v46 = vld [vmem:[%s28564_s3 + $0x348] ss:$16 sps:$4 sm:$0xff]   ;;  %v19415_v41 = vld [vmem:[%s28564_s3 + $0x364] ss:$16 sps:$4 sm:$0xff]  }
 0x511   : > { %9842 = vmatprep.subr.bf16.mxu1 %v19408_v51  ;;  %v19416_v51 = vld [vmem:[%s28564_s3 + $0x36c] ss:$16 sps:$4 sm:$0xff]  }
 0x513   : > { %9405 = vmatpush1.bf16.msra.mxu0 %v19409_v35  ;;  %v19417_v35 = vld [vmem:[%s28564_s3 + $0x360] ss:$16 sps:$4 sm:$0xff]  }
 0x514   : > { %9843 = vmatpush1.bf16.msra.mxu1 %v19410_v62  ;;  %9406 = vmatprep.subr.bf16.mxu0 %v19411_v12  ;;  %v19418_v62 = vld [vmem:[%s28564_s3 + $0x368] ss:$16 sps:$4 sm:$0xff]   ;;  %v19419_v12 = vld [vmem:[%s28564_s3 + $0x384] ss:$16 sps:$4 sm:$0xff]  }
 0x515   : > { %9844 = vmatprep.subr.bf16.mxu1 %v19412_v9  ;;  %v19420_v9 = vld [vmem:[%s28564_s3 + $0x38c] ss:$16 sps:$4 sm:$0xff]  }
 0x517   : > { %9407 = vmatpush1.bf16.msra.mxu0 %v19413_v55  ;;  %v19421_v55 = vld [vmem:[%s28564_s3 + $0x380] ss:$16 sps:$4 sm:$0xff]  }
 0x518   : > { %9845 = vmatpush1.bf16.msra.mxu1 %v19414_v46  ;;  %9408 = vmatprep.subr.bf16.mxu0 %v19415_v41  ;;  %v19422_v46 = vld [vmem:[%s28564_s3 + $0x388] ss:$16 sps:$4 sm:$0xff]   ;;  %v19423_v41 = vld [vmem:[%s28564_s3 + $0x3a4] ss:$16 sps:$4 sm:$0xff]  }
 0x519   : > { %9846 = vmatprep.subr.bf16.mxu1 %v19416_v51  ;;  %v19424_v51 = vld [vmem:[%s28564_s3 + $0x3ac] ss:$16 sps:$4 sm:$0xff]  }
 0x51b   : > { %9409 = vmatpush1.bf16.msra.mxu0 %v19417_v35  ;;  %v19425_v35 = vld [vmem:[%s28564_s3 + $0x3a0] ss:$16 sps:$4 sm:$0xff]  }
 0x51c   : > { %9847 = vmatpush1.bf16.msra.mxu1 %v19418_v62  ;;  %9410 = vmatprep.subr.bf16.mxu0 %v19419_v12  ;;  %v19426_v62 = vld [vmem:[%s28564_s3 + $0x3a8] ss:$16 sps:$4 sm:$0xff]   ;;  %v19427_v12 = vld [vmem:[%s28564_s3 + $0x3c4] ss:$16 sps:$4 sm:$0xff]  }
 0x51d   : > { %9848 = vmatprep.subr.bf16.mxu1 %v19420_v9  ;;  %v19428_v9 = vld [vmem:[%s28564_s3 + $0x3cc] ss:$16 sps:$4 sm:$0xff]  }
 0x51f   : > { %9411 = vmatpush1.bf16.msra.mxu0 %v19421_v55  ;;  %v19429_v55 = vld [vmem:[%s28564_s3 + $0x3c0] ss:$16 sps:$4 sm:$0xff]  }
 0x520   : > { %9849 = vmatpush1.bf16.msra.mxu1 %v19422_v46  ;;  %9412 = vmatprep.subr.bf16.mxu0 %v19423_v41  ;;  %v19430_v46 = vld [vmem:[%s28564_s3 + $0x3c8] ss:$16 sps:$4 sm:$0xff]   ;;  %v19431_v41 = vld [vmem:[%s28564_s3 + $0x3e4] ss:$16 sps:$4 sm:$0xff]  }
 0x521   : > { %9850 = vmatprep.subr.bf16.mxu1 %v19424_v51  ;;  %v19432_v51 = vld [vmem:[%s28564_s3 + $0x3ec] ss:$16 sps:$4 sm:$0xff]  }
 0x523   : > { %9413 = vmatpush1.bf16.msra.mxu0 %v19425_v35  ;;  %v19433_v35 = vld [vmem:[%s28564_s3 + $0x3e0] ss:$16 sps:$4 sm:$0xff]  }
 0x524   : > { %9851 = vmatpush1.bf16.msra.mxu1 %v19426_v62  ;;  %9414 = vmatprep.subr.bf16.mxu0 %v19427_v12  ;;  %v19434_v62 = vld [vmem:[%s28564_s3 + $0x3e8] ss:$16 sps:$4 sm:$0xff]   ;;  %v19435_v12 = vld [vmem:[%s28564_s3 + $0x404] ss:$16 sps:$4 sm:$0xff]  }
 0x525   : > { %9852 = vmatprep.subr.bf16.mxu1 %v19428_v9  ;;  %v19436_v9 = vld [vmem:[%s28564_s3 + $0x40c] ss:$16 sps:$4 sm:$0xff]  }
 0x527   : > { %9415 = vmatpush1.bf16.msra.mxu0 %v19429_v55  ;;  %v19437_v55 = vld [vmem:[%s28564_s3 + $0x400] ss:$16 sps:$4 sm:$0xff]  }
 0x528   : > { %9853 = vmatpush1.bf16.msra.mxu1 %v19430_v46  ;;  %9416 = vmatprep.subr.bf16.mxu0 %v19431_v41  ;;  %v19438_v46 = vld [vmem:[%s28564_s3 + $0x408] ss:$16 sps:$4 sm:$0xff]   ;;  %v19439_v41 = vld [vmem:[%s28564_s3 + $0x424] ss:$16 sps:$4 sm:$0xff]  }
 0x529   : > { %9854 = vmatprep.subr.bf16.mxu1 %v19432_v51  ;;  %v19440_v51 = vld [vmem:[%s28564_s3 + $0x42c] ss:$16 sps:$4 sm:$0xff]  }
 0x52b   : > { %9417 = vmatpush1.bf16.msra.mxu0 %v19433_v35  ;;  %v19441_v35 = vld [vmem:[%s28564_s3 + $0x420] ss:$16 sps:$4 sm:$0xff]  }
 0x52c   : > { %9855 = vmatpush1.bf16.msra.mxu1 %v19434_v62  ;;  %9459 = vmatprep.subr.bf16.mxu0 %v19435_v12  ;;  %v19442_v62 = vld [vmem:[%s28564_s3 + $0x428] ss:$16 sps:$4 sm:$0xff]   ;;  %v19443_v12 = vld [vmem:[%s28564_s3 + $0x444] ss:$16 sps:$4 sm:$0xff]  }
 0x52d   : > { %9897 = vmatprep.subr.bf16.mxu1 %v19436_v9  ;;  %v19444_v9 = vld [vmem:[%s28564_s3 + $0x44c] ss:$16 sps:$4 sm:$0xff]  }
 0x52e   : > { %9419 = vmatmul.mubr.bf16.vlgmr.msra.gmra.mrb[160].mxu0 %v21979_v23 }
 0x52f   : > { %9857 = vmatmul.mubr.bf16.vlgmr.msra.gmra.mrb[160].mxu1 %v21979_v23  ;;  %9428 = vmatprep.mubr.bf16.mxu0 %v22070_v49 }
 0x530   : > { %9460 = vmatpush1.bf16.msra.mxu0 %v19437_v55  ;;  %9866 = vmatprep.mubr.bf16.mxu1 %v22070_v49  ;;  %v19445_v55 = vld [vmem:[%s28564_s3 + $0x440] ss:$16 sps:$4 sm:$0xff]  }
 0x531   : > { %9898 = vmatpush1.bf16.msra.mxu1 %v19438_v46  ;;  %9461 = vmatprep.subr.bf16.mxu0 %v19439_v41  ;;  %v19446_v46 = vld [vmem:[%s28564_s3 + $0x448] ss:$16 sps:$4 sm:$0xff]   ;;  %v19447_v41 = vld [vmem:[%s28564_s3 + $0x464] ss:$16 sps:$4 sm:$0xff]  }
 0x532   : > { %9899 = vmatprep.subr.bf16.mxu1 %v19440_v51  ;;  %v19448_v51 = vld [vmem:[%s28564_s3 + $0x46c] ss:$16 sps:$4 sm:$0xff]  }
 0x534   : > { %9462 = vmatpush1.bf16.msra.mxu0 %v19441_v35  ;;  %v19449_v35 = vld [vmem:[%s28564_s3 + $0x460] ss:$16 sps:$4 sm:$0xff]  }
 0x535   : > { %9900 = vmatpush1.bf16.msra.mxu1 %v19442_v62  ;;  %9463 = vmatprep.subr.bf16.mxu0 %v19443_v12  ;;  %v19450_v62 = vld [vmem:[%s28564_s3 + $0x468] ss:$16 sps:$4 sm:$0xff]   ;;  %v19451_v12 = vld [vmem:[%s28564_s3 + $0x484] ss:$16 sps:$4 sm:$0xff]  }
 0x536   : > { %9429 = vmatmul.mubr.bf16.gmra.mrb[164].mxu0 %v22049_v58  ;;  %9901 = vmatprep.subr.bf16.mxu1 %v19444_v9  ;;  %v19452_v9 = vld [vmem:[%s28564_s3 + $0x48c] ss:$16 sps:$4 sm:$0xff]  }
 0x537   : > { %9867 = vmatmul.mubr.bf16.gmra.mrb[164].mxu1 %v22049_v58  ;;  %9438 = vmatprep.mubr.bf16.mxu0 %v22132_v22 }
 0x538   : > { %9464 = vmatpush1.bf16.msra.mxu0 %v19445_v55  ;;  %9876 = vmatprep.mubr.bf16.mxu1 %v22132_v22  ;;  %v19453_v55 = vld [vmem:[%s28564_s3 + $0x480] ss:$16 sps:$4 sm:$0xff]  }
 0x539   : > { %9902 = vmatpush1.bf16.msra.mxu1 %v19446_v46  ;;  %9465 = vmatprep.subr.bf16.mxu0 %v19447_v41  ;;  %v19454_v46 = vld [vmem:[%s28564_s3 + $0x488] ss:$16 sps:$4 sm:$0xff]   ;;  %v19455_v41 = vld [vmem:[%s28564_s3 + $0x4a4] ss:$16 sps:$4 sm:$0xff]  }
 0x53a   : > { %9903 = vmatprep.subr.bf16.mxu1 %v19448_v51  ;;  %v19456_v51 = vld [vmem:[%s28564_s3 + $0x4ac] ss:$16 sps:$4 sm:$0xff]  }
 0x53c   : > { %9466 = vmatpush1.bf16.msra.mxu0 %v19449_v35  ;;  %v19457_v35 = vld [vmem:[%s28564_s3 + $0x4a0] ss:$16 sps:$4 sm:$0xff]  }
 0x53d   : > { %9904 = vmatpush1.bf16.msra.mxu1 %v19450_v62  ;;  %9467 = vmatprep.subr.bf16.mxu0 %v19451_v12  ;;  %v19458_v62 = vld [vmem:[%s28564_s3 + $0x4a8] ss:$16 sps:$4 sm:$0xff]   ;;  %v19459_v12 = vld [vmem:[%s28564_s3 + $0x4c4] ss:$16 sps:$4 sm:$0xff]  }
 0x53e   : > { %9439 = vmatmul.mubr.bf16.gmra.mrb[168].mxu0 %v22112_v47  ;;  %9905 = vmatprep.subr.bf16.mxu1 %v19452_v9  ;;  %v19460_v9 = vld [vmem:[%s28564_s3 + $0x4cc] ss:$16 sps:$4 sm:$0xff]  }
 0x53f   : > { %9877 = vmatmul.mubr.bf16.gmra.mrb[168].mxu1 %v22112_v47  ;;  %9448 = vmatprep.mubr.bf16.mxu0 %v22191_v34 }
 0x540   : > { %9468 = vmatpush1.bf16.msra.mxu0 %v19453_v55  ;;  %9886 = vmatprep.mubr.bf16.mxu1 %v22191_v34  ;;  %v19461_v55 = vld [vmem:[%s28564_s3 + $0x4c0] ss:$16 sps:$4 sm:$0xff]  }
 0x541   : > { %9906 = vmatpush1.bf16.msra.mxu1 %v19454_v46  ;;  %9469 = vmatprep.subr.bf16.mxu0 %v19455_v41  ;;  %v19462_v46 = vld [vmem:[%s28564_s3 + $0x4c8] ss:$16 sps:$4 sm:$0xff]   ;;  %v19463_v41 = vld [vmem:[%s28564_s3 + $0x4e4] ss:$16 sps:$4 sm:$0xff]  }
 0x542   : > { %9907 = vmatprep.subr.bf16.mxu1 %v19456_v51  ;;  %v19464_v51 = vld [vmem:[%s28564_s3 + $0x4ec] ss:$16 sps:$4 sm:$0xff]  }
 0x544   : > { %9470 = vmatpush1.bf16.msra.mxu0 %v19457_v35  ;;  %v19465_v35 = vld [vmem:[%s28564_s3 + $0x4e0] ss:$16 sps:$4 sm:$0xff]  }
 0x545   : > { %9908 = vmatpush1.bf16.msra.mxu1 %v19458_v62  ;;  %9471 = vmatprep.subr.bf16.mxu0 %v19459_v12  ;;  %v19466_v62 = vld [vmem:[%s28564_s3 + $0x4e8] ss:$16 sps:$4 sm:$0xff]   ;;  %v19467_v12 = vld [vmem:[%s28564_s3 + $0x504] ss:$16 sps:$4 sm:$0xff]  }
 0x546   : > { %9449 = vmatmul.mubr.bf16.gmra.mrb[172].mxu0 %v22171_v20  ;;  %9909 = vmatprep.subr.bf16.mxu1 %v19460_v9  ;;  %v19468_v9 = vld [vmem:[%s28564_s3 + $0x50c] ss:$16 sps:$4 sm:$0xff]  }
 0x547   : > { %9887 = vmatmul.mubr.bf16.gmra.mrb[172].mxu1 %v22171_v20  ;;  %9491 = vmatprep.mubr.bf16.mxu0 %v21756_v11 }
 0x548   : > { %9472 = vmatpush1.bf16.msra.mxu0 %v19461_v55  ;;  %9929 = vmatprep.mubr.bf16.mxu1 %v21756_v11  ;;  %v19469_v55 = vld [vmem:[%s28564_s3 + $0x500] ss:$16 sps:$4 sm:$0xff]  }
 0x549   : > { %9910 = vmatpush1.bf16.msra.mxu1 %v19462_v46  ;;  %9473 = vmatprep.subr.bf16.mxu0 %v19463_v41  ;;  %v19470_v46 = vld [vmem:[%s28564_s3 + $0x508] ss:$16 sps:$4 sm:$0xff]   ;;  %v19471_v41 = vld [vmem:[%s28564_s3 + $0x524] ss:$16 sps:$4 sm:$0xff]  }
 0x54a   : > { %9911 = vmatprep.subr.bf16.mxu1 %v19464_v51  ;;  %v19472_v51 = vld [vmem:[%s28564_s3 + $0x52c] ss:$16 sps:$4 sm:$0xff]  }
 0x54c   : > { %9474 = vmatpush1.bf16.msra.mxu0 %v19465_v35  ;;  %v19473_v35 = vld [vmem:[%s28564_s3 + $0x520] ss:$16 sps:$4 sm:$0xff]  }
 0x54d   : > { %9912 = vmatpush1.bf16.msra.mxu1 %v19466_v62  ;;  %9475 = vmatprep.subr.bf16.mxu0 %v19467_v12  ;;  %v19474_v62 = vld [vmem:[%s28564_s3 + $0x528] ss:$16 sps:$4 sm:$0xff]   ;;  %v19475_v12 = vld [vmem:[%s28564_s3 + $0x544] ss:$16 sps:$4 sm:$0xff]  }
 0x54e   : > { %9913 = vmatprep.subr.bf16.mxu1 %v19468_v9  ;;  %v19476_v9 = vld [vmem:[%s28564_s3 + $0x54c] ss:$16 sps:$4 sm:$0xff]  }
 0x550   : > { %9476 = vmatpush1.bf16.msra.mxu0 %v19469_v55  ;;  %v19477_v55 = vld [vmem:[%s28564_s3 + $0x540] ss:$16 sps:$4 sm:$0xff]  }
 0x551   : > { %9914 = vmatpush1.bf16.msra.mxu1 %v19470_v46  ;;  %9477 = vmatprep.subr.bf16.mxu0 %v19471_v41  ;;  %v19478_v46 = vld [vmem:[%s28564_s3 + $0x548] ss:$16 sps:$4 sm:$0xff]   ;;  %v19479_v41 = vld [vmem:[%s28564_s3 + $0x564] ss:$16 sps:$4 sm:$0xff]  }
 0x552   : > { %9915 = vmatprep.subr.bf16.mxu1 %v19472_v51  ;;  %v19480_v51 = vld [vmem:[%s28564_s3 + $0x56c] ss:$16 sps:$4 sm:$0xff]  }
 0x554   : > { %9478 = vmatpush1.bf16.msra.mxu0 %v19473_v35  ;;  %v19481_v35 = vld [vmem:[%s28564_s3 + $0x560] ss:$16 sps:$4 sm:$0xff]  }
 0x555   : > { %9916 = vmatpush1.bf16.msra.mxu1 %v19474_v62  ;;  %9479 = vmatprep.subr.bf16.mxu0 %v19475_v12  ;;  %v19482_v62 = vld [vmem:[%s28564_s3 + $0x568] ss:$16 sps:$4 sm:$0xff]   ;;  %v19483_v12 = vld [vmem:[%s28564_s3 + $0x584] ss:$16 sps:$4 sm:$0xff]  }
 0x556   : > { %9917 = vmatprep.subr.bf16.mxu1 %v19476_v9  ;;  %v19484_v9 = vld [vmem:[%s28564_s3 + $0x58c] ss:$16 sps:$4 sm:$0xff]  }
 0x558   : > { %9480 = vmatpush1.bf16.msra.mxu0 %v19477_v55  ;;  %v19485_v55 = vld [vmem:[%s28564_s3 + $0x580] ss:$16 sps:$4 sm:$0xff]  }
 0x559   : > { %9918 = vmatpush1.bf16.msra.mxu1 %v19478_v46  ;;  %9481 = vmatprep.subr.bf16.mxu0 %v19479_v41  ;;  %v19486_v46 = vld [vmem:[%s28564_s3 + $0x588] ss:$16 sps:$4 sm:$0xff]   ;;  %v19487_v41 = vld [vmem:[%s28564_s3 + $0x5a4] ss:$16 sps:$4 sm:$0xff]  }
 0x55a   : > { %9919 = vmatprep.subr.bf16.mxu1 %v19480_v51  ;;  %v19488_v51 = vld [vmem:[%s28564_s3 + $0x5ac] ss:$16 sps:$4 sm:$0xff]  }
 0x55c   : > { %9482 = vmatpush1.bf16.msra.mxu0 %v19481_v35  ;;  %v19489_v35 = vld [vmem:[%s28564_s3 + $0x5a0] ss:$16 sps:$4 sm:$0xff]  }
 0x55d   : > { %9920 = vmatpush1.bf16.msra.mxu1 %v19482_v62  ;;  %9483 = vmatprep.subr.bf16.mxu0 %v19483_v12  ;;  %v19490_v62 = vld [vmem:[%s28564_s3 + $0x5a8] ss:$16 sps:$4 sm:$0xff]   ;;  %v19491_v12 = vld [vmem:[%s28564_s3 + $0x5c4] ss:$16 sps:$4 sm:$0xff]  }
 0x55e   : > { %9921 = vmatprep.subr.bf16.mxu1 %v19484_v9  ;;  %v19492_v9 = vld [vmem:[%s28564_s3 + $0x5cc] ss:$16 sps:$4 sm:$0xff]  }
 0x560   : > { %9484 = vmatpush1.bf16.msra.mxu0 %v19485_v55  ;;  %v19493_v55 = vld [vmem:[%s28564_s3 + $0x5c0] ss:$16 sps:$4 sm:$0xff]  }
 0x561   : > { %9922 = vmatpush1.bf16.msra.mxu1 %v19486_v46  ;;  %9485 = vmatprep.subr.bf16.mxu0 %v19487_v41  ;;  %v19494_v46 = vld [vmem:[%s28564_s3 + $0x5c8] ss:$16 sps:$4 sm:$0xff]   ;;  %v19495_v41 = vld [vmem:[%s28564_s3 + $0x5e4] ss:$16 sps:$4 sm:$0xff]  }
 0x562   : > { %9923 = vmatprep.subr.bf16.mxu1 %v19488_v51  ;;  %v19496_v51 = vld [vmem:[%s28564_s3 + $0x5ec] ss:$16 sps:$4 sm:$0xff]  }
 0x564   : > { %9486 = vmatpush1.bf16.msra.mxu0 %v19489_v35  ;;  %v19497_v35 = vld [vmem:[%s28564_s3 + $0x5e0] ss:$16 sps:$4 sm:$0xff]  }
 0x565   : > { %9924 = vmatpush1.bf16.msra.mxu1 %v19490_v62  ;;  %9487 = vmatprep.subr.bf16.mxu0 %v19491_v12  ;;  %v19498_v62 = vld [vmem:[%s28564_s3 + $0x5e8] ss:$16 sps:$4 sm:$0xff]   ;;  %v19499_v12 = vld [vmem:[%s28564_s3 + $0x604] ss:$16 sps:$4 sm:$0xff]  }
 0x566   : > { %9925 = vmatprep.subr.bf16.mxu1 %v19492_v9  ;;  %v19500_v9 = vld [vmem:[%s28564_s3 + $0x60c] ss:$16 sps:$4 sm:$0xff]  }
 0x568   : > { %9488 = vmatpush1.bf16.msra.mxu0 %v19493_v55  ;;  %v19501_v55 = vld [vmem:[%s28564_s3 + $0x600] ss:$16 sps:$4 sm:$0xff]  }
 0x569   : > { %9926 = vmatpush1.bf16.msra.mxu1 %v19494_v46  ;;  %9489 = vmatprep.subr.bf16.mxu0 %v19495_v41  ;;  %v19502_v46 = vld [vmem:[%s28564_s3 + $0x608] ss:$16 sps:$4 sm:$0xff]   ;;  %v19503_v41 = vld [vmem:[%s28564_s3 + $0x624] ss:$16 sps:$4 sm:$0xff]  }
 0x56a   : > { %9927 = vmatprep.subr.bf16.mxu1 %v19496_v51  ;;  %v19504_v51 = vld [vmem:[%s28564_s3 + $0x62c] ss:$16 sps:$4 sm:$0xff]  }
 0x56c   : > { %9490 = vmatpush1.bf16.msra.mxu0 %v19497_v35  ;;  %v19505_v35 = vld [vmem:[%s28564_s3 + $0x620] ss:$16 sps:$4 sm:$0xff]  }
 0x56d   : > { %9928 = vmatpush1.bf16.msra.mxu1 %v19498_v62  ;;  %9532 = vmatprep.subr.bf16.mxu0 %v19499_v12  ;;  %v19506_v62 = vld [vmem:[%s28564_s3 + $0x628] ss:$16 sps:$4 sm:$0xff]   ;;  %v19507_v12 = vld [vmem:[%s28564_s3 + $0x644] ss:$16 sps:$4 sm:$0xff]  }
 0x56e   : > { %9970 = vmatprep.subr.bf16.mxu1 %v19500_v9  ;;  %v19508_v9 = vld [vmem:[%s28564_s3 + $0x64c] ss:$16 sps:$4 sm:$0xff]  }
 0x56f   : > { %9492 = vmatmul.mubr.bf16.vlgmr.msra.gmra.mrb[160].mxu0 %v21747_v63 }
 0x570   : > { %9930 = vmatmul.mubr.bf16.vlgmr.msra.gmra.mrb[160].mxu1 %v21747_v63  ;;  %9501 = vmatprep.mubr.bf16.mxu0 %v21825_v15 }
 0x571   : > { %9533 = vmatpush1.bf16.msra.mxu0 %v19501_v55  ;;  %9939 = vmatprep.mubr.bf16.mxu1 %v21825_v15  ;;  %v19509_v55 = vld [vmem:[%s28564_s3 + $0x640] ss:$16 sps:$4 sm:$0xff]  }
 0x572   : > { %9971 = vmatpush1.bf16.msra.mxu1 %v19502_v46  ;;  %9534 = vmatprep.subr.bf16.mxu0 %v19503_v41  ;;  %v19510_v46 = vld [vmem:[%s28564_s3 + $0x648] ss:$16 sps:$4 sm:$0xff]   ;;  %v19511_v41 = vld [vmem:[%s28564_s3 + $0x664] ss:$16 sps:$4 sm:$0xff]  }
 0x573   : > { %9972 = vmatprep.subr.bf16.mxu1 %v19504_v51  ;;  %v19512_v51 = vld [vmem:[%s28564_s3 + $0x66c] ss:$16 sps:$4 sm:$0xff]  }
 0x575   : > { %9535 = vmatpush1.bf16.msra.mxu0 %v19505_v35  ;;  %v19513_v35 = vld [vmem:[%s28564_s3 + $0x660] ss:$16 sps:$4 sm:$0xff]  }
 0x576   : > { %9973 = vmatpush1.bf16.msra.mxu1 %v19506_v62  ;;  %9536 = vmatprep.subr.bf16.mxu0 %v19507_v12  ;;  %v19514_v62 = vld [vmem:[%s28564_s3 + $0x668] ss:$16 sps:$4 sm:$0xff]   ;;  %v19515_v12 = vld [vmem:[%s28564_s3 + $0x684] ss:$16 sps:$4 sm:$0xff]  }
 0x577   : > { %9502 = vmatmul.mubr.bf16.gmra.mrb[164].mxu0 %v21818_v24  ;;  %9974 = vmatprep.subr.bf16.mxu1 %v19508_v9  ;;  %v19516_v9 = vld [vmem:[%s28564_s3 + $0x68c] ss:$16 sps:$4 sm:$0xff]  }
 0x578   : > { %9940 = vmatmul.mubr.bf16.gmra.mrb[164].mxu1 %v21818_v24  ;;  %9511 = vmatprep.mubr.bf16.mxu0 %v21897_v16 }
 0x579   : > { %9537 = vmatpush1.bf16.msra.mxu0 %v19509_v55  ;;  %9949 = vmatprep.mubr.bf16.mxu1 %v21897_v16 }
 0x57a   : > { %9975 = vmatpush1.bf16.msra.mxu1 %v19510_v46  ;;  %9538 = vmatprep.subr.bf16.mxu0 %v19511_v41 }
 0x57b   : > { %9976 = vmatprep.subr.bf16.mxu1 %v19512_v51 }
 0x57d   : > { %9539 = vmatpush1.bf16.msra.mxu0 %v19513_v35  ;;  %v19517_v35 = vld [vmem:[%s28564_s3 + $0x680] ss:$16 sps:$4 sm:$0xff]  }
 0x57e   : > { %9977 = vmatpush1.bf16.msra.mxu1 %v19514_v62  ;;  %9540 = vmatprep.subr.bf16.mxu0 %v19515_v12  ;;  %v19521_v12 = vld [vmem:[%s28564_s3 + $0x6a0] ss:$16 sps:$4 sm:$0xff]  }
 0x57f   : > { %9512 = vmatmul.mubr.bf16.gmra.mrb[168].mxu0 %v21889_v19  ;;  %9978 = vmatprep.subr.bf16.mxu1 %v19516_v9  ;;  %v25030_v55 = vpop.f32.mrb[144].mxu0 }
 0x580   : > { %29109 = vst [vmem:[#allocation81_spill] sm:$0xff] %v25030_v55  ;;  %9950 = vmatmul.mubr.bf16.gmra.mrb[168].mxu1 %v21889_v19  ;;  %9521 = vmatprep.mubr.bf16.mxu0 %v21966_v26  ;;  %v25036_v41 = vpop.f32.mrb[144].mxu1  ;;  %v25038_v51 = vpop.f32.mrb[145].mxu0  ;;  %v19518_v55 = vld [vmem:[%s28564_s3 + $0x688] ss:$16 sps:$4 sm:$0xff]  }
 0x581   : > { %29110 = vst [vmem:[#allocation40_spill] sm:$0xff] %v25038_v51  ;;  %9541 = vmatpush1.bf16.msra.mxu0 %v19517_v35  ;;  %9959 = vmatprep.mubr.bf16.mxu1 %v21966_v26  ;;  %v25048_v9 = vpop.f32.mrb[145].mxu1  ;;  %v25050_v46 = vpop.f32.mrb[146].mxu0 }
 0x582   : > { %29111 = vst [vmem:[#allocation38_spill] sm:$0xff] %v25048_v9  ;;  %9979 = vmatpush1.bf16.msra.mxu1 %v19518_v55  ;;  %9542 = vmatprep.subr.bf16.mxu0 %v19519_v44  ;;  %v25062_v62 = vpop.f32.mrb[146].mxu1  ;;  %v25064_v51 = vpop.f32.mrb[147].mxu0  ;;  %v19523_v55 = vld [vmem:[%s28564_s3 + $0x6c4] ss:$16 sps:$4 sm:$0xff]  }
 0x583   : > { %9980 = vmatprep.subr.bf16.mxu1 %v19520_v28  ;;  %v25073_v9 = vpop.f32.mrb[147].mxu1  ;;  %v19522_v28 = vld [vmem:[%s28564_s3 + $0x6a8] ss:$16 sps:$4 sm:$0xff]   ;;  %v19524_v44 = vld [vmem:[%s28564_s3 + $0x6cc] ss:$16 sps:$4 sm:$0xff]  }
 0x584   : > { %29112 = vst [vmem:[#allocation41_spill] sm:$0xff] %v25073_v9 }
 0x585   : > { %9543 = vmatpush1.bf16.msra.mxu0 %v19521_v12 }
 0x586   : > { %9981 = vmatpush1.bf16.msra.mxu1 %v19522_v28  ;;  %9544 = vmatprep.subr.bf16.mxu0 %v19523_v55  ;;  %v19525_v55 = vld [vmem:[%s28564_s3 + $0x6c0] ss:$16 sps:$4 sm:$0xff]  }
 0x587   : > { %9522 = vmatmul.mubr.bf16.gmra.mrb[172].mxu0 %v21958_v53  ;;  %9982 = vmatprep.subr.bf16.mxu1 %v19524_v44  ;;  %v25090_v35 = vpop.f32.mrb[148].mxu0 }
 0x588   : > { %29113 = vst [vmem:[#allocation82_spill] sm:$0xff] %v25090_v35  ;;  %9960 = vmatmul.mubr.bf16.gmra.mrb[172].mxu1 %v21958_v53  ;;  %9564 = vmatprep.mubr.bf16.mxu0 %v21758_v14  ;;  %v25096_v28 = vpop.f32.mrb[148].mxu1  ;;  %v25098_v9 = vpop.f32.mrb[149].mxu0  ;;  %v19526_v35 = vld [vmem:[%s28564_s3 + $0x6c8] ss:$16 sps:$4 sm:$0xff]  }
 0x589   : > { %29114 = vst [vmem:[#allocation42_spill] sm:$0xff] %v25098_v9  ;;  %9545 = vmatpush1.bf16.msra.mxu0 %v19525_v55  ;;  %10002 = vmatprep.mubr.bf16.mxu1 %v21758_v14  ;;  %v25108_v6 = vpop.f32.mrb[149].mxu1  ;;  %v25110_v12 = vpop.f32.mrb[150].mxu0  ;;  %v19529_v53 = vld [vmem:[%s28564_s3 + $0x6e0] ss:$16 sps:$4 sm:$0xff]  }
 0x58a   : > { %29115 = vst [vmem:[#allocation4_spill] sm:$0xff] %v25108_v6  ;;  %9983 = vmatpush1.bf16.msra.mxu1 %v19526_v35  ;;  %9546 = vmatprep.subr.bf16.mxu0 %v19527_v61  ;;  %v25122_v44 = vpop.f32.mrb[150].mxu1  ;;  %v25124_v9 = vpop.f32.mrb[151].mxu0  ;;  %v19531_v35 = vld [vmem:[%s28564_s3 + $0x704] ss:$16 sps:$4 sm:$0xff]  }
 0x58b   : > { %29116 = vst [vmem:[#allocation43_spill] sm:$0xff] %v25124_v9  ;;  %9984 = vmatprep.subr.bf16.mxu1 %v19528_v57  ;;  %v25133_v6 = vpop.f32.mrb[151].mxu1  ;;  %v19530_v57 = vld [vmem:[%s28564_s3 + $0x6e8] ss:$16 sps:$4 sm:$0xff]   ;;  %v19532_v55 = vld [vmem:[%s28564_s3 + $0x70c] ss:$16 sps:$4 sm:$0xff]  }
 0x58c   : > { %29117 = vst [vmem:[#allocation44_spill] sm:$0xff] %v25133_v6 }
 0x58d   : > { %9547 = vmatpush1.bf16.msra.mxu0 %v19529_v53  ;;  %v19534_v53 = vld [vmem:[%s28564_s3 + $0x708] ss:$16 sps:$4 sm:$0xff]  }
 0x58e   : > { %9985 = vmatpush1.bf16.msra.mxu1 %v19530_v57  ;;  %9548 = vmatprep.subr.bf16.mxu0 %v19531_v35  ;;  %v19533_v57 = vld [vmem:[%s28564_s3 + $0x700] ss:$16 sps:$4 sm:$0xff]  }
 0x58f   : > { %9986 = vmatprep.subr.bf16.mxu1 %v19532_v55  ;;  %v25149_v61 = vpop.f32.mrb[152].mxu0 }
 0x590   : > { %29118 = vst [vmem:[#allocation5_spill] sm:$0xff] %v25149_v61  ;;  %v25153_v6 = vpop.f32.mrb[152].mxu1  ;;  %v25155_v0 = vpop.f32.mrb[153].mxu0  ;;  %v19539_v61 = vld [vmem:[%s28564_s3 + $0x744] ss:$16 sps:$4 sm:$0xff]  }
 0x591   : > { %29119 = vst [vmem:[#allocation45_spill] sm:$0xff] %v25153_v6  ;;  %29120 = vst [vmem:[#allocation6_spill] sm:$0xff] %v25155_v0  ;;  %9549 = vmatpush1.bf16.msra.mxu0 %v19533_v57  ;;  %v25164_v9 = vpop.f32.mrb[153].mxu1  ;;  %v25166_v21 = vpop.f32.mrb[154].mxu0  ;;  %v19535_v57 = vld [vmem:[%s28564_s3 + $0x724] ss:$16 sps:$4 sm:$0xff]  }
 0x592   : > { %29121 = vst [vmem:[#allocation46_spill] sm:$0xff] %v25164_v9  ;;  %29122 = vst [vmem:[#allocation47_spill] sm:$0xff] %v25166_v21  ;;  %9987 = vmatpush1.bf16.msra.mxu1 %v19534_v53  ;;  %9550 = vmatprep.subr.bf16.mxu0 %v19535_v57  ;;  %v25178_v35 = vpop.f32.mrb[154].mxu1  ;;  %v25180_v0 = vpop.f32.mrb[155].mxu0  ;;  %v19537_v21 = vld [vmem:[%s28564_s3 + $0x720] ss:$16 sps:$4 sm:$0xff]  }
 0x593   : > { %29123 = vst [vmem:[#allocation7_spill] sm:$0xff] %v25178_v35  ;;  %29124 = vst [vmem:[#allocation48_spill] sm:$0xff] %v25180_v0  ;;  %9988 = vmatprep.subr.bf16.mxu1 %v19536_v3  ;;  %v25189_v6 = vpop.f32.mrb[155].mxu1  ;;  %v19538_v3 = vld [vmem:[%s28564_s3 + $0x728] ss:$16 sps:$4 sm:$0xff]  }
 0x594   : > { %29127 = vst [vmem:[#allocation8_spill] sm:$0xff] %v25189_v6  ;;  %v29136_v6 = vld [vmem:[#allocation80_spill] sm:$0xff] }
 0x595   : > { %9551 = vmatpush1.bf16.msra.mxu0 %v19537_v21  ;;  %v19542_v21 = vld [vmem:[%s28564_s3 + $0x748] ss:$16 sps:$4 sm:$0xff]  }
 0x596   : > { %9989 = vmatpush1.bf16.msra.mxu1 %v19538_v3  ;;  %9552 = vmatprep.subr.bf16.mxu0 %v19539_v61  ;;  %v19541_v3 = vld [vmem:[%s28564_s3 + $0x740] ss:$16 sps:$4 sm:$0xff]  }
 0x597   : > { %9990 = vmatprep.subr.bf16.mxu1 %v19540_v59  ;;  %v25205_v55 = vpop.f32.mrb[156].mxu0  ;;  %v29132_v61 = vld [vmem:[#allocation78_spill] sm:$0xff] }
 0x598   : > { %29129 = vst [vmem:[#allocation49_spill] sm:$0xff] %v25205_v55  ;;  %v25209_v57 = vpop.f32.mrb[156].mxu1  ;;  %v25211_v0 = vpop.f32.mrb[157].mxu0  ;;  %v19549_v59 = vld [vmem:[%s28564_s3 + $0x780] ss:$16 sps:$4 sm:$0xff]  }
 0x599   : > { %29131 = vst [vmem:[#allocation9_spill] sm:$0xff] %v25211_v0  ;;  %9553 = vmatpush1.bf16.msra.mxu0 %v19541_v3  ;;  %v25220_v35 = vpop.f32.mrb[157].mxu1  ;;  %v25222_v53 = vpop.f32.mrb[158].mxu0  ;;  %v19543_v3 = vld [vmem:[%s28564_s3 + $0x764] ss:$16 sps:$4 sm:$0xff]  }
 0x59a   : > { %29133 = vst [vmem:[#allocation10_spill] sm:$0xff] %v25220_v35  ;;  %29134 = vst [vmem:[#allocation51_spill] sm:$0xff] %v25222_v53  ;;  %9991 = vmatpush1.bf16.msra.mxu1 %v19542_v21  ;;  %9554 = vmatprep.subr.bf16.mxu0 %v19543_v3  ;;  %v25234_v9 = vpop.f32.mrb[158].mxu1  ;;  %v25236_v0 = vpop.f32.mrb[159].mxu0  ;;  %v29137_v3 = vld [vmem:[#allocation39_spill] sm:$0xff] }
 0x59b   : > { %9992 = vmatprep.subr.bf16.mxu1 %v19544_v45  ;;  %v25245_v55 = vpop.f32.mrb[159].mxu1  ;;  %v19545_v53 = vld [vmem:[%s28564_s3 + $0x760] ss:$16 sps:$4 sm:$0xff]   ;;  %v19546_v45 = vld [vmem:[%s28564_s3 + $0x768] ss:$16 sps:$4 sm:$0xff]  }
 0x59c   : > { %v19547_v21 = vld [vmem:[%s28564_s3 + $0x784] ss:$16 sps:$4 sm:$0xff]   ;;  %v19548_v35 = vld [vmem:[%s28564_s3 + $0x78c] ss:$16 sps:$4 sm:$0xff]  }
 0x59d   : > { %9555 = vmatpush1.bf16.msra.mxu0 %v19545_v53  ;;  %v19550_v53 = vld [vmem:[%s28564_s3 + $0x788] ss:$16 sps:$4 sm:$0xff]  }
 0x59e   : > { %9993 = vmatpush1.bf16.msra.mxu1 %v19546_v45  ;;  %9556 = vmatprep.subr.bf16.mxu0 %v19547_v21  ;;  %v19551_v45 = vld [vmem:[%s28564_s3 + $0x7a4] ss:$16 sps:$4 sm:$0xff]   ;;  %v19552_v21 = vld [vmem:[%s28564_s3 + $0x7ac] ss:$16 sps:$4 sm:$0xff]  }
 0x59f   : > { %9994 = vmatprep.subr.bf16.mxu1 %v19548_v35  ;;  %v19553_v35 = vld [vmem:[%s28564_s3 + $0x7a0] ss:$16 sps:$4 sm:$0xff]  }
 0x5a1   : > { %9557 = vmatpush1.bf16.msra.mxu0 %v19549_v59  ;;  %v19554_v59 = vld [vmem:[%s28564_s3 + $0x7a8] ss:$16 sps:$4 sm:$0xff]  }
 0x5a2   : > { %9995 = vmatpush1.bf16.msra.mxu1 %v19550_v53  ;;  %9558 = vmatprep.subr.bf16.mxu0 %v19551_v45  ;;  %v19555_v53 = vld [vmem:[%s28564_s3 + $0x7c4] ss:$16 sps:$4 sm:$0xff]   ;;  %v19556_v45 = vld [vmem:[%s28564_s3 + $0x7cc] ss:$16 sps:$4 sm:$0xff]  }
 0x5a3   : > { %9996 = vmatprep.subr.bf16.mxu1 %v19552_v21  ;;  %v19557_v21 = vld [vmem:[%s28564_s3 + $0x7c0] ss:$16 sps:$4 sm:$0xff]  }
 0x5a5   : > { %9559 = vmatpush1.bf16.msra.mxu0 %v19553_v35  ;;  %v19558_v35 = vld [vmem:[%s28564_s3 + $0x7c8] ss:$16 sps:$4 sm:$0xff]  }
 0x5a6   : > { %9997 = vmatpush1.bf16.msra.mxu1 %v19554_v59  ;;  %9560 = vmatprep.subr.bf16.mxu0 %v19555_v53  ;;  %v19559_v59 = vld [vmem:[%s28564_s3 + $0x7e4] ss:$16 sps:$4 sm:$0xff]   ;;  %v19560_v53 = vld [vmem:[%s28564_s3 + $0x7ec] ss:$16 sps:$4 sm:$0xff]  }
 0x5a7   : > { %9998 = vmatprep.subr.bf16.mxu1 %v19556_v45  ;;  %v19561_v45 = vld [vmem:[%s28564_s3 + $0x7e0] ss:$16 sps:$4 sm:$0xff]  }
 0x5a9   : > { %9561 = vmatpush1.bf16.msra.mxu0 %v19557_v21  ;;  %v19562_v21 = vld [vmem:[%s28564_s3 + $0x7e8] ss:$16 sps:$4 sm:$0xff]  }
 0x5aa   : > { %9999 = vmatpush1.bf16.msra.mxu1 %v19558_v35  ;;  %9562 = vmatprep.subr.bf16.mxu0 %v19559_v59  ;;  %v19563_v35 = vld [vmem:[%s28564_s3 + $0x804] ss:$16 sps:$4 sm:$0xff]   ;;  %v19564_v59 = vld [vmem:[%s28564_s3 + $0x80c] ss:$16 sps:$4 sm:$0xff]  }
 0x5ab   : > { %10000 = vmatprep.subr.bf16.mxu1 %v19560_v53  ;;  %v19565_v53 = vld [vmem:[%s28564_s3 + $0x800] ss:$16 sps:$4 sm:$0xff]  }
 0x5ad   : > { %9563 = vmatpush1.bf16.msra.mxu0 %v19561_v45  ;;  %v19566_v45 = vld [vmem:[%s28564_s3 + $0x808] ss:$16 sps:$4 sm:$0xff]  }
 0x5ae   : > { %10001 = vmatpush1.bf16.msra.mxu1 %v19562_v21  ;;  %9605 = vmatprep.subr.bf16.mxu0 %v19563_v35  ;;  %v19567_v21 = vld [vmem:[%s28564_s3 + $0x824] ss:$16 sps:$4 sm:$0xff]   ;;  %v19568_v35 = vld [vmem:[%s28564_s3 + $0x82c] ss:$16 sps:$4 sm:$0xff]  }
 0x5af   : > { %10043 = vmatprep.subr.bf16.mxu1 %v19564_v59  ;;  %v19569_v59 = vld [vmem:[%s28564_s3 + $0x820] ss:$16 sps:$4 sm:$0xff]  }
 0x5b0   : > { %9565 = vmatmul.mubr.bf16.vlgmr.msra.gmra.mrb[160].mxu0 %v29075_v10 }
 0x5b1   : > { %10003 = vmatmul.mubr.bf16.vlgmr.msra.gmra.mrb[160].mxu1 %v29075_v10  ;;  %9574 = vmatprep.mubr.bf16.mxu0 %v29076_v4 }
 0x5b2   : > { %9606 = vmatpush1.bf16.msra.mxu0 %v19565_v53  ;;  %10012 = vmatprep.mubr.bf16.mxu1 %v29076_v4  ;;  %v19570_v53 = vld [vmem:[%s28564_s3 + $0x828] ss:$16 sps:$4 sm:$0xff]  }
 0x5b3   : > { %10044 = vmatpush1.bf16.msra.mxu1 %v19566_v45  ;;  %9607 = vmatprep.subr.bf16.mxu0 %v19567_v21  ;;  %v19571_v45 = vld [vmem:[%s28564_s3 + $0x844] ss:$16 sps:$4 sm:$0xff]   ;;  %v19572_v21 = vld [vmem:[%s28564_s3 + $0x84c] ss:$16 sps:$4 sm:$0xff]  }
 0x5b4   : > { %10045 = vmatprep.subr.bf16.mxu1 %v19568_v35  ;;  %v19573_v35 = vld [vmem:[%s28564_s3 + $0x840] ss:$16 sps:$4 sm:$0xff]  }
 0x5b6   : > { %9608 = vmatpush1.bf16.msra.mxu0 %v19569_v59  ;;  %v19574_v59 = vld [vmem:[%s28564_s3 + $0x848] ss:$16 sps:$4 sm:$0xff]  }
 0x5b7   : > { %10046 = vmatpush1.bf16.msra.mxu1 %v19570_v53  ;;  %9609 = vmatprep.subr.bf16.mxu0 %v19571_v45  ;;  %v19575_v53 = vld [vmem:[%s28564_s3 + $0x864] ss:$16 sps:$4 sm:$0xff]   ;;  %v19576_v45 = vld [vmem:[%s28564_s3 + $0x86c] ss:$16 sps:$4 sm:$0xff]  }
 0x5b8   : > { %9575 = vmatmul.mubr.bf16.gmra.mrb[164].mxu0 %v29077_v2  ;;  %10047 = vmatprep.subr.bf16.mxu1 %v19572_v21  ;;  %v19577_v21 = vld [vmem:[%s28564_s3 + $0x860] ss:$16 sps:$4 sm:$0xff]  }
 0x5b9   : > { %10013 = vmatmul.mubr.bf16.gmra.mrb[164].mxu1 %v29077_v2  ;;  %9584 = vmatprep.mubr.bf16.mxu0 %v29078_v25 }
 0x5ba   : > { %9610 = vmatpush1.bf16.msra.mxu0 %v19573_v35  ;;  %10022 = vmatprep.mubr.bf16.mxu1 %v29078_v25  ;;  %v19578_v35 = vld [vmem:[%s28564_s3 + $0x868] ss:$16 sps:$4 sm:$0xff]  }
 0x5bb   : > { %10048 = vmatpush1.bf16.msra.mxu1 %v19574_v59  ;;  %9611 = vmatprep.subr.bf16.mxu0 %v19575_v53  ;;  %v19579_v59 = vld [vmem:[%s28564_s3 + $0x884] ss:$16 sps:$4 sm:$0xff]   ;;  %v19580_v53 = vld [vmem:[%s28564_s3 + $0x88c] ss:$16 sps:$4 sm:$0xff]  }
 0x5bc   : > { %10049 = vmatprep.subr.bf16.mxu1 %v19576_v45  ;;  %v19581_v45 = vld [vmem:[%s28564_s3 + $0x880] ss:$16 sps:$4 sm:$0xff]  }
 0x5be   : > { %9612 = vmatpush1.bf16.msra.mxu0 %v19577_v21  ;;  %v19582_v21 = vld [vmem:[%s28564_s3 + $0x888] ss:$16 sps:$4 sm:$0xff]  }
 0x5bf   : > { %10050 = vmatpush1.bf16.msra.mxu1 %v19578_v35  ;;  %9613 = vmatprep.subr.bf16.mxu0 %v19579_v59  ;;  %v19583_v35 = vld [vmem:[%s28564_s3 + $0x8a4] ss:$16 sps:$4 sm:$0xff]   ;;  %v19584_v59 = vld [vmem:[%s28564_s3 + $0x8ac] ss:$16 sps:$4 sm:$0xff]  }
 0x5c0   : > { %9585 = vmatmul.mubr.bf16.gmra.mrb[168].mxu0 %v29079_v30  ;;  %10051 = vmatprep.subr.bf16.mxu1 %v19580_v53  ;;  %v19585_v53 = vld [vmem:[%s28564_s3 + $0x8a0] ss:$16 sps:$4 sm:$0xff]  }
 0x5c1   : > { %10023 = vmatmul.mubr.bf16.gmra.mrb[168].mxu1 %v29079_v30  ;;  %9594 = vmatprep.mubr.bf16.mxu0 %v29080_v36 }
 0x5c2   : > { %9614 = vmatpush1.bf16.msra.mxu0 %v19581_v45  ;;  %10032 = vmatprep.mubr.bf16.mxu1 %v29080_v36  ;;  %v19586_v45 = vld [vmem:[%s28564_s3 + $0x8a8] ss:$16 sps:$4 sm:$0xff]  }
 0x5c3   : > { %10052 = vmatpush1.bf16.msra.mxu1 %v19582_v21  ;;  %9615 = vmatprep.subr.bf16.mxu0 %v19583_v35  ;;  %v19587_v21 = vld [vmem:[%s28564_s3 + $0x8c4] ss:$16 sps:$4 sm:$0xff]   ;;  %v19588_v35 = vld [vmem:[%s28564_s3 + $0x8cc] ss:$16 sps:$4 sm:$0xff]  }
 0x5c4   : > { %10053 = vmatprep.subr.bf16.mxu1 %v19584_v59  ;;  %v29138_v59 = vld [vmem:[#allocation24_spill] sm:$0xff] }
 0x5c6   : > { %9616 = vmatpush1.bf16.msra.mxu0 %v19585_v53  ;;  %v19589_v53 = vld [vmem:[%s28564_s3 + $0x8c0] ss:$16 sps:$4 sm:$0xff]  }
 0x5c7   : > { %10054 = vmatpush1.bf16.msra.mxu1 %v19586_v45  ;;  %9617 = vmatprep.subr.bf16.mxu0 %v19587_v21  ;;  %v19590_v45 = vld [vmem:[%s28564_s3 + $0x8c8] ss:$16 sps:$4 sm:$0xff]   ;;  %v19591_v21 = vld [vmem:[%s28564_s3 + $0x8e4] ss:$16 sps:$4 sm:$0xff]  }
 0x5c8   : > { %9595 = vmatmul.mubr.bf16.gmra.mrb[172].mxu0 %v29081_v56  ;;  %10055 = vmatprep.subr.bf16.mxu1 %v19588_v35  ;;  %v19592_v35 = vld [vmem:[%s28564_s3 + $0x8ec] ss:$16 sps:$4 sm:$0xff]  }
 0x5c9   : > { %10033 = vmatmul.mubr.bf16.gmra.mrb[172].mxu1 %v29081_v56  ;;  %9637 = vmatprep.mubr.bf16.mxu0 %v29138_v59  ;;  %v29144_v56 = vld [vmem:[#allocation29_spill] sm:$0xff] }
 0x5ca   : > { %9618 = vmatpush1.bf16.msra.mxu0 %v19589_v53  ;;  %10075 = vmatprep.mubr.bf16.mxu1 %v29138_v59  ;;  %v19593_v53 = vld [vmem:[%s28564_s3 + $0x8e0] ss:$16 sps:$4 sm:$0xff]   ;;  %v19594_v59 = vld [vmem:[%s28564_s3 + $0x8e8] ss:$16 sps:$4 sm:$0xff]  }
 0x5cb   : > { %10056 = vmatpush1.bf16.msra.mxu1 %v19590_v45  ;;  %9619 = vmatprep.subr.bf16.mxu0 %v19591_v21  ;;  %v19595_v45 = vld [vmem:[%s28564_s3 + $0x904] ss:$16 sps:$4 sm:$0xff]   ;;  %v19596_v21 = vld [vmem:[%s28564_s3 + $0x90c] ss:$16 sps:$4 sm:$0xff]  }
 0x5cc   : > { %10057 = vmatprep.subr.bf16.mxu1 %v19592_v35  ;;  %v19597_v35 = vld [vmem:[%s28564_s3 + $0x900] ss:$16 sps:$4 sm:$0xff]  }
 0x5ce   : > { %9620 = vmatpush1.bf16.msra.mxu0 %v19593_v53  ;;  %v19598_v53 = vld [vmem:[%s28564_s3 + $0x908] ss:$16 sps:$4 sm:$0xff]  }
 0x5cf   : > { %10058 = vmatpush1.bf16.msra.mxu1 %v19594_v59  ;;  %9621 = vmatprep.subr.bf16.mxu0 %v19595_v45  ;;  %v19599_v59 = vld [vmem:[%s28564_s3 + $0x924] ss:$16 sps:$4 sm:$0xff]   ;;  %v19600_v45 = vld [vmem:[%s28564_s3 + $0x92c] ss:$16 sps:$4 sm:$0xff]  }
 0x5d0   : > { %10059 = vmatprep.subr.bf16.mxu1 %v19596_v21  ;;  %v19601_v21 = vld [vmem:[%s28564_s3 + $0x920] ss:$16 sps:$4 sm:$0xff]  }
 0x5d2   : > { %9622 = vmatpush1.bf16.msra.mxu0 %v19597_v35  ;;  %v19602_v35 = vld [vmem:[%s28564_s3 + $0x928] ss:$16 sps:$4 sm:$0xff]  }
 0x5d3   : > { %10060 = vmatpush1.bf16.msra.mxu1 %v19598_v53  ;;  %9623 = vmatprep.subr.bf16.mxu0 %v19599_v59  ;;  %v19603_v53 = vld [vmem:[%s28564_s3 + $0x944] ss:$16 sps:$4 sm:$0xff]   ;;  %v19604_v59 = vld [vmem:[%s28564_s3 + $0x94c] ss:$16 sps:$4 sm:$0xff]  }
 0x5d4   : > { %10061 = vmatprep.subr.bf16.mxu1 %v19600_v45  ;;  %v19605_v45 = vld [vmem:[%s28564_s3 + $0x940] ss:$16 sps:$4 sm:$0xff]  }
 0x5d6   : > { %9624 = vmatpush1.bf16.msra.mxu0 %v19601_v21  ;;  %v19606_v21 = vld [vmem:[%s28564_s3 + $0x948] ss:$16 sps:$4 sm:$0xff]  }
 0x5d7   : > { %10062 = vmatpush1.bf16.msra.mxu1 %v19602_v35  ;;  %9625 = vmatprep.subr.bf16.mxu0 %v19603_v53  ;;  %v19607_v35 = vld [vmem:[%s28564_s3 + $0x964] ss:$16 sps:$4 sm:$0xff]   ;;  %v19608_v53 = vld [vmem:[%s28564_s3 + $0x96c] ss:$16 sps:$4 sm:$0xff]  }
 0x5d8   : > { %10063 = vmatprep.subr.bf16.mxu1 %v19604_v59  ;;  %v19609_v59 = vld [vmem:[%s28564_s3 + $0x960] ss:$16 sps:$4 sm:$0xff]  }
 0x5da   : > { %9626 = vmatpush1.bf16.msra.mxu0 %v19605_v45  ;;  %v19610_v45 = vld [vmem:[%s28564_s3 + $0x968] ss:$16 sps:$4 sm:$0xff]  }
 0x5db   : > { %10064 = vmatpush1.bf16.msra.mxu1 %v19606_v21  ;;  %9627 = vmatprep.subr.bf16.mxu0 %v19607_v35  ;;  %v19611_v21 = vld [vmem:[%s28564_s3 + $0x984] ss:$16 sps:$4 sm:$0xff]   ;;  %v19612_v35 = vld [vmem:[%s28564_s3 + $0x98c] ss:$16 sps:$4 sm:$0xff]  }
 0x5dc   : > { %10065 = vmatprep.subr.bf16.mxu1 %v19608_v53  ;;  %v19613_v53 = vld [vmem:[%s28564_s3 + $0x980] ss:$16 sps:$4 sm:$0xff]  }
 0x5de   : > { %9628 = vmatpush1.bf16.msra.mxu0 %v19609_v59  ;;  %v19614_v59 = vld [vmem:[%s28564_s3 + $0x988] ss:$16 sps:$4 sm:$0xff]  }
 0x5df   : > { %10066 = vmatpush1.bf16.msra.mxu1 %v19610_v45  ;;  %9629 = vmatprep.subr.bf16.mxu0 %v19611_v21  ;;  %v19615_v45 = vld [vmem:[%s28564_s3 + $0x9a4] ss:$16 sps:$4 sm:$0xff]   ;;  %v19616_v21 = vld [vmem:[%s28564_s3 + $0x9ac] ss:$16 sps:$4 sm:$0xff]  }
 0x5e0   : > { %10067 = vmatprep.subr.bf16.mxu1 %v19612_v35  ;;  %v19617_v35 = vld [vmem:[%s28564_s3 + $0x9a0] ss:$16 sps:$4 sm:$0xff]  }
 0x5e2   : > { %9630 = vmatpush1.bf16.msra.mxu0 %v19613_v53  ;;  %v19618_v53 = vld [vmem:[%s28564_s3 + $0x9a8] ss:$16 sps:$4 sm:$0xff]  }
 0x5e3   : > { %10068 = vmatpush1.bf16.msra.mxu1 %v19614_v59  ;;  %9631 = vmatprep.subr.bf16.mxu0 %v19615_v45  ;;  %v19619_v59 = vld [vmem:[%s28564_s3 + $0x9c4] ss:$16 sps:$4 sm:$0xff]   ;;  %v19620_v45 = vld [vmem:[%s28564_s3 + $0x9cc] ss:$16 sps:$4 sm:$0xff]  }
 0x5e4   : > { %10069 = vmatprep.subr.bf16.mxu1 %v19616_v21  ;;  %v19621_v21 = vld [vmem:[%s28564_s3 + $0x9c0] ss:$16 sps:$4 sm:$0xff]  }
 0x5e6   : > { %9632 = vmatpush1.bf16.msra.mxu0 %v19617_v35  ;;  %v19622_v35 = vld [vmem:[%s28564_s3 + $0x9c8] ss:$16 sps:$4 sm:$0xff]  }
 0x5e7   : > { %10070 = vmatpush1.bf16.msra.mxu1 %v19618_v53  ;;  %9633 = vmatprep.subr.bf16.mxu0 %v19619_v59  ;;  %v19623_v53 = vld [vmem:[%s28564_s3 + $0x9e4] ss:$16 sps:$4 sm:$0xff]   ;;  %v19624_v59 = vld [vmem:[%s28564_s3 + $0x9ec] ss:$16 sps:$4 sm:$0xff]  }
 0x5e8   : > { %10071 = vmatprep.subr.bf16.mxu1 %v19620_v45  ;;  %v19625_v45 = vld [vmem:[%s28564_s3 + $0x9e0] ss:$16 sps:$4 sm:$0xff]  }
 0x5ea   : > { %9634 = vmatpush1.bf16.msra.mxu0 %v19621_v21  ;;  %v19626_v21 = vld [vmem:[%s28564_s3 + $0x9e8] ss:$16 sps:$4 sm:$0xff]  }
 0x5eb   : > { %10072 = vmatpush1.bf16.msra.mxu1 %v19622_v35  ;;  %9635 = vmatprep.subr.bf16.mxu0 %v19623_v53  ;;  %v19627_v35 = vld [vmem:[%s28564_s3 + $0xa04] ss:$16 sps:$4 sm:$0xff]   ;;  %v19628_v53 = vld [vmem:[%s28564_s3 + $0xa0c] ss:$16 sps:$4 sm:$0xff]  }
 0x5ec   : > { %10073 = vmatprep.subr.bf16.mxu1 %v19624_v59  ;;  %v29139_v59 = vld [vmem:[#allocation23_spill] sm:$0xff] }
 0x5ee   : > { %9636 = vmatpush1.bf16.msra.mxu0 %v19625_v45  ;;  %v29140_v45 = vld [vmem:[#allocation26_spill] sm:$0xff] }
 0x5ef   : > { %10074 = vmatpush1.bf16.msra.mxu1 %v19626_v21  ;;  %9678 = vmatprep.subr.bf16.mxu0 %v19627_v35  ;;  %v19629_v21 = vld [vmem:[%s28564_s3 + $0xa00] ss:$16 sps:$4 sm:$0xff]   ;;  %v19630_v35 = vld [vmem:[%s28564_s3 + $0xa08] ss:$16 sps:$4 sm:$0xff]  }
 0x5f0   : > { %10116 = vmatprep.subr.bf16.mxu1 %v19628_v53  ;;  %v19631_v53 = vld [vmem:[%s28564_s3 + $0xa24] ss:$16 sps:$4 sm:$0xff]  }
 0x5f1   : > { %9638 = vmatmul.mubr.bf16.vlgmr.msra.gmra.mrb[160].mxu0 %v29139_v59 }
 0x5f2   : > { %10076 = vmatmul.mubr.bf16.vlgmr.msra.gmra.mrb[160].mxu1 %v29139_v59  ;;  %9647 = vmatprep.mubr.bf16.mxu0 %v29140_v45  ;;  %v19632_v59 = vld [vmem:[%s28564_s3 + $0xa2c] ss:$16 sps:$4 sm:$0xff]  }
 0x5f3   : > { %9679 = vmatpush1.bf16.msra.mxu0 %v19629_v21  ;;  %10085 = vmatprep.mubr.bf16.mxu1 %v29140_v45  ;;  %v19633_v21 = vld [vmem:[%s28564_s3 + $0xa20] ss:$16 sps:$4 sm:$0xff]   ;;  %v19634_v45 = vld [vmem:[%s28564_s3 + $0xa28] ss:$16 sps:$4 sm:$0xff]  }
 0x5f4   : > { %10117 = vmatpush1.bf16.msra.mxu1 %v19630_v35  ;;  %9680 = vmatprep.subr.bf16.mxu0 %v19631_v53  ;;  %v19635_v35 = vld [vmem:[%s28564_s3 + $0xa44] ss:$16 sps:$4 sm:$0xff]   ;;  %v29141_v53 = vld [vmem:[#allocation25_spill] sm:$0xff] }
 0x5f5   : > { %10118 = vmatprep.subr.bf16.mxu1 %v19632_v59  ;;  %v19636_v59 = vld [vmem:[%s28564_s3 + $0xa4c] ss:$16 sps:$4 sm:$0xff]  }
 0x5f7   : > { %9681 = vmatpush1.bf16.msra.mxu0 %v19633_v21  ;;  %v29142_v21 = vld [vmem:[#allocation28_spill] sm:$0xff] }
 0x5f8   : > { %10119 = vmatpush1.bf16.msra.mxu1 %v19634_v45  ;;  %9682 = vmatprep.subr.bf16.mxu0 %v19635_v35  ;;  %v19637_v45 = vld [vmem:[%s28564_s3 + $0xa40] ss:$16 sps:$4 sm:$0xff]   ;;  %v19638_v35 = vld [vmem:[%s28564_s3 + $0xa48] ss:$16 sps:$4 sm:$0xff]  }
 0x5f9   : > { %9648 = vmatmul.mubr.bf16.gmra.mrb[164].mxu0 %v29141_v53  ;;  %10120 = vmatprep.subr.bf16.mxu1 %v19636_v59  ;;  %v19639_v59 = vld [vmem:[%s28564_s3 + $0xa64] ss:$16 sps:$4 sm:$0xff]  }
 0x5fa   : > { %10086 = vmatmul.mubr.bf16.gmra.mrb[164].mxu1 %v29141_v53  ;;  %9657 = vmatprep.mubr.bf16.mxu0 %v29142_v21  ;;  %v19640_v53 = vld [vmem:[%s28564_s3 + $0xa6c] ss:$16 sps:$4 sm:$0xff]  }
 0x5fb   : > { %9683 = vmatpush1.bf16.msra.mxu0 %v19637_v45  ;;  %10095 = vmatprep.mubr.bf16.mxu1 %v29142_v21  ;;  %v19641_v45 = vld [vmem:[%s28564_s3 + $0xa60] ss:$16 sps:$4 sm:$0xff]   ;;  %v19642_v21 = vld [vmem:[%s28564_s3 + $0xa68] ss:$16 sps:$4 sm:$0xff]  }
 0x5fc   : > { %10121 = vmatpush1.bf16.msra.mxu1 %v19638_v35  ;;  %9684 = vmatprep.subr.bf16.mxu0 %v19639_v59  ;;  %v19643_v35 = vld [vmem:[%s28564_s3 + $0xa84] ss:$16 sps:$4 sm:$0xff]   ;;  %v29143_v59 = vmov 0  }
 0x5fd   : > { %10122 = vmatprep.subr.bf16.mxu1 %v19640_v53  ;;  %v25572_v36 = vcombine.high %v29144_v56, %v29143_v59  ;;  %v29146_v53 = vld [vmem:[#allocation27_spill] sm:$0xff] }
 0x5ff   : > { %9685 = vmatpush1.bf16.msra.mxu0 %v19641_v45  ;;  %29145 = vst [vmem:[#allocation11_spill] sm:$0xff] %v25572_v36  ;;  %v19644_v45 = vld [vmem:[%s28564_s3 + $0xa8c] ss:$16 sps:$4 sm:$0xff]  }
 0x600   : > { %10123 = vmatpush1.bf16.msra.mxu1 %v19642_v21  ;;  %9686 = vmatprep.subr.bf16.mxu0 %v19643_v35  ;;  %v19645_v21 = vld [vmem:[%s28564_s3 + $0xa80] ss:$16 sps:$4 sm:$0xff]   ;;  %v19646_v35 = vld [vmem:[%s28564_s3 + $0xa88] ss:$16 sps:$4 sm:$0xff]  }
 0x601   : > { %9658 = vmatmul.mubr.bf16.gmra.mrb[168].mxu0 %v29146_v53  ;;  %10124 = vmatprep.subr.bf16.mxu1 %v19644_v45  ;;  %v19647_v45 = vld [vmem:[%s28564_s3 + $0xaa4] ss:$16 sps:$4 sm:$0xff]  }
 0x602   : > { %10096 = vmatmul.mubr.bf16.gmra.mrb[168].mxu1 %v29146_v53  ;;  %9667 = vmatprep.mubr.bf16.mxu0 %v25572_v36  ;;  %v19648_v53 = vld [vmem:[%s28564_s3 + $0xaac] ss:$16 sps:$4 sm:$0xff]  }
 0x603   : > { %9687 = vmatpush1.bf16.msra.mxu0 %v19645_v21  ;;  %10105 = vmatprep.mubr.bf16.mxu1 %v25572_v36  ;;  %v19649_v21 = vld [vmem:[%s28564_s3 + $0xaa0] ss:$16 sps:$4 sm:$0xff]   ;;  %v25598_v36 = vcombine.low %v29144_v56, %v29143_v59 }
 0x604   : > { %10125 = vmatpush1.bf16.msra.mxu1 %v19646_v35  ;;  %9688 = vmatprep.subr.bf16.mxu0 %v19647_v45  ;;  %v19650_v35 = vld [vmem:[%s28564_s3 + $0xaa8] ss:$16 sps:$4 sm:$0xff]   ;;  %v19651_v45 = vld [vmem:[%s28564_s3 + $0xac4] ss:$16 sps:$4 sm:$0xff]  }
 0x605   : > { %10126 = vmatprep.subr.bf16.mxu1 %v19648_v53  ;;  %29147 = vst [vmem:[#allocation52_spill] sm:$0xff] %v25598_v36  ;;  %v19652_v53 = vld [vmem:[%s28564_s3 + $0xacc] ss:$16 sps:$4 sm:$0xff]   ;;  %v29148_v56 = vld [vmem:[#allocation66_spill] sm:$0xff] }
 0x607   : > { %9689 = vmatpush1.bf16.msra.mxu0 %v19649_v21  ;;  %v19653_v21 = vld [vmem:[%s28564_s3 + $0xac0] ss:$16 sps:$4 sm:$0xff]  }
 0x608   : > { %10127 = vmatpush1.bf16.msra.mxu1 %v19650_v35  ;;  %9690 = vmatprep.subr.bf16.mxu0 %v19651_v45  ;;  %v19654_v35 = vld [vmem:[%s28564_s3 + $0xac8] ss:$16 sps:$4 sm:$0xff]   ;;  %v19655_v45 = vld [vmem:[%s28564_s3 + $0xae4] ss:$16 sps:$4 sm:$0xff]  }
 0x609   : > { %9668 = vmatmul.mubr.bf16.gmra.mrb[172].mxu0 %v25598_v36  ;;  %10128 = vmatprep.subr.bf16.mxu1 %v19652_v53  ;;  %v19656_v53 = vld [vmem:[%s28564_s3 + $0xaec] ss:$16 sps:$4 sm:$0xff]  }
 0x60a   : > { %10106 = vmatmul.mubr.bf16.gmra.mrb[172].mxu1 %v25598_v36  ;;  %9710 = vmatprep.mubr.bf16.mxu0 %v29148_v56 }
 0x60b   : > { %9691 = vmatpush1.bf16.msra.mxu0 %v19653_v21  ;;  %10148 = vmatprep.mubr.bf16.mxu1 %v29148_v56  ;;  %v19657_v21 = vld [vmem:[%s28564_s3 + $0xae0] ss:$16 sps:$4 sm:$0xff]   ;;  %v19658_v56 = vld [vmem:[%s28564_s3 + $0xae8] ss:$16 sps:$4 sm:$0xff]  }
 0x60c   : > { %10129 = vmatpush1.bf16.msra.mxu1 %v19654_v35  ;;  %9692 = vmatprep.subr.bf16.mxu0 %v19655_v45  ;;  %v19659_v35 = vld [vmem:[%s28564_s3 + $0xb04] ss:$16 sps:$4 sm:$0xff]   ;;  %v19660_v45 = vld [vmem:[%s28564_s3 + $0xb0c] ss:$16 sps:$4 sm:$0xff]  }
 0x60d   : > { %10130 = vmatprep.subr.bf16.mxu1 %v19656_v53  ;;  %v19661_v53 = vld [vmem:[%s28564_s3 + $0xb00] ss:$16 sps:$4 sm:$0xff]  }
 0x60f   : > { %9693 = vmatpush1.bf16.msra.mxu0 %v19657_v21  ;;  %v19662_v21 = vld [vmem:[%s28564_s3 + $0xb08] ss:$16 sps:$4 sm:$0xff]  }
 0x610   : > { %10131 = vmatpush1.bf16.msra.mxu1 %v19658_v56  ;;  %9694 = vmatprep.subr.bf16.mxu0 %v19659_v35  ;;  %v19663_v56 = vld [vmem:[%s28564_s3 + $0xb24] ss:$16 sps:$4 sm:$0xff]   ;;  %v19664_v35 = vld [vmem:[%s28564_s3 + $0xb2c] ss:$16 sps:$4 sm:$0xff]  }
 0x611   : > { %10132 = vmatprep.subr.bf16.mxu1 %v19660_v45  ;;  %v19665_v45 = vld [vmem:[%s28564_s3 + $0xb20] ss:$16 sps:$4 sm:$0xff]  }
 0x613   : > { %9695 = vmatpush1.bf16.msra.mxu0 %v19661_v53  ;;  %v19666_v53 = vld [vmem:[%s28564_s3 + $0xb28] ss:$16 sps:$4 sm:$0xff]  }
 0x614   : > { %10133 = vmatpush1.bf16.msra.mxu1 %v19662_v21  ;;  %9696 = vmatprep.subr.bf16.mxu0 %v19663_v56  ;;  %v19667_v21 = vld [vmem:[%s28564_s3 + $0xb44] ss:$16 sps:$4 sm:$0xff]   ;;  %v19668_v56 = vld [vmem:[%s28564_s3 + $0xb4c] ss:$16 sps:$4 sm:$0xff]  }
 0x615   : > { %10134 = vmatprep.subr.bf16.mxu1 %v19664_v35  ;;  %v19669_v35 = vld [vmem:[%s28564_s3 + $0xb40] ss:$16 sps:$4 sm:$0xff]  }
 0x617   : > { %9697 = vmatpush1.bf16.msra.mxu0 %v19665_v45  ;;  %v19670_v45 = vld [vmem:[%s28564_s3 + $0xb48] ss:$16 sps:$4 sm:$0xff]  }
 0x618   : > { %10135 = vmatpush1.bf16.msra.mxu1 %v19666_v53  ;;  %9698 = vmatprep.subr.bf16.mxu0 %v19667_v21  ;;  %v19671_v53 = vld [vmem:[%s28564_s3 + $0xb64] ss:$16 sps:$4 sm:$0xff]   ;;  %v19672_v21 = vld [vmem:[%s28564_s3 + $0xb6c] ss:$16 sps:$4 sm:$0xff]  }
 0x619   : > { %10136 = vmatprep.subr.bf16.mxu1 %v19668_v56  ;;  %v19673_v56 = vld [vmem:[%s28564_s3 + $0xb60] ss:$16 sps:$4 sm:$0xff]  }
 0x61b   : > { %9699 = vmatpush1.bf16.msra.mxu0 %v19669_v35  ;;  %v19674_v35 = vld [vmem:[%s28564_s3 + $0xb68] ss:$16 sps:$4 sm:$0xff]  }
 0x61c   : > { %10137 = vmatpush1.bf16.msra.mxu1 %v19670_v45  ;;  %9700 = vmatprep.subr.bf16.mxu0 %v19671_v53  ;;  %v19675_v45 = vld [vmem:[%s28564_s3 + $0xb84] ss:$16 sps:$4 sm:$0xff]   ;;  %v19676_v53 = vld [vmem:[%s28564_s3 + $0xb8c] ss:$16 sps:$4 sm:$0xff]  }
 0x61d   : > { %10138 = vmatprep.subr.bf16.mxu1 %v19672_v21  ;;  %v19677_v21 = vld [vmem:[%s28564_s3 + $0xb80] ss:$16 sps:$4 sm:$0xff]  }
 0x61f   : > { %9701 = vmatpush1.bf16.msra.mxu0 %v19673_v56  ;;  %v19678_v56 = vld [vmem:[%s28564_s3 + $0xb88] ss:$16 sps:$4 sm:$0xff]  }
 0x620   : > { %10139 = vmatpush1.bf16.msra.mxu1 %v19674_v35  ;;  %9702 = vmatprep.subr.bf16.mxu0 %v19675_v45  ;;  %v19679_v35 = vld [vmem:[%s28564_s3 + $0xba4] ss:$16 sps:$4 sm:$0xff]   ;;  %v19680_v45 = vld [vmem:[%s28564_s3 + $0xbac] ss:$16 sps:$4 sm:$0xff]  }
 0x621   : > { %10140 = vmatprep.subr.bf16.mxu1 %v19676_v53  ;;  %v19681_v53 = vld [vmem:[%s28564_s3 + $0xba0] ss:$16 sps:$4 sm:$0xff]  }
 0x623   : > { %9703 = vmatpush1.bf16.msra.mxu0 %v19677_v21  ;;  %v19682_v21 = vld [vmem:[%s28564_s3 + $0xba8] ss:$16 sps:$4 sm:$0xff]  }
 0x624   : > { %10141 = vmatpush1.bf16.msra.mxu1 %v19678_v56  ;;  %9704 = vmatprep.subr.bf16.mxu0 %v19679_v35  ;;  %v19683_v56 = vld [vmem:[%s28564_s3 + $0xbc4] ss:$16 sps:$4 sm:$0xff]   ;;  %v19684_v35 = vld [vmem:[%s28564_s3 + $0xbcc] ss:$16 sps:$4 sm:$0xff]  }
 0x625   : > { %10142 = vmatprep.subr.bf16.mxu1 %v19680_v45  ;;  %v19685_v45 = vld [vmem:[%s28564_s3 + $0xbc0] ss:$16 sps:$4 sm:$0xff]  }
 0x627   : > { %9705 = vmatpush1.bf16.msra.mxu0 %v19681_v53  ;;  %v19686_v53 = vld [vmem:[%s28564_s3 + $0xbc8] ss:$16 sps:$4 sm:$0xff]  }
 0x628   : > { %10143 = vmatpush1.bf16.msra.mxu1 %v19682_v21  ;;  %9706 = vmatprep.subr.bf16.mxu0 %v19683_v56  ;;  %v19687_v21 = vld [vmem:[%s28564_s3 + $0xbe4] ss:$16 sps:$4 sm:$0xff]   ;;  %v19688_v56 = vld [vmem:[%s28564_s3 + $0xbec] ss:$16 sps:$4 sm:$0xff]  }
 0x629   : > { %10144 = vmatprep.subr.bf16.mxu1 %v19684_v35  ;;  %v19689_v35 = vld [vmem:[%s28564_s3 + $0xbe0] ss:$16 sps:$4 sm:$0xff]  }
 0x62b   : > { %9707 = vmatpush1.bf16.msra.mxu0 %v19685_v45  ;;  %v19690_v45 = vld [vmem:[%s28564_s3 + $0xbe8] ss:$16 sps:$4 sm:$0xff]  }
 0x62c   : > { %10145 = vmatpush1.bf16.msra.mxu1 %v19686_v53  ;;  %9708 = vmatprep.subr.bf16.mxu0 %v19687_v21  ;;  %v19691_v53 = vld [vmem:[%s28564_s3 + $0xc04] ss:$16 sps:$4 sm:$0xff]   ;;  %v19692_v21 = vld [vmem:[%s28564_s3 + $0xc0c] ss:$16 sps:$4 sm:$0xff]  }
 0x62d   : > { %10146 = vmatprep.subr.bf16.mxu1 %v19688_v56  ;;  %v29149_v56 = vld [vmem:[#allocation65_spill] sm:$0xff] }
 0x62f   : > { %9709 = vmatpush1.bf16.msra.mxu0 %v19689_v35  ;;  %v29150_v35 = vld [vmem:[#allocation68_spill] sm:$0xff] }
 0x630   : > { %10147 = vmatpush1.bf16.msra.mxu1 %v19690_v45  ;;  %10221 = vmatprep.subr.bf16.mxu0 %v19691_v53  ;;  %v19693_v45 = vld [vmem:[%s28564_s3 + $0xc00] ss:$16 sps:$4 sm:$0xff]   ;;  %v19694_v53 = vld [vmem:[%s28564_s3 + $0xc08] ss:$16 sps:$4 sm:$0xff]  }
 0x631   : > { %10659 = vmatprep.subr.bf16.mxu1 %v19692_v21  ;;  %v19695_v21 = vld [vmem:[%s28564_s3 + $0xc24] ss:$16 sps:$4 sm:$0xff]  }
 0x632   : > { %9711 = vmatmul.mubr.bf16.vlgmr.msra.gmra.mrb[160].mxu0 %v29149_v56 }
 0x633   : > { %10149 = vmatmul.mubr.bf16.vlgmr.msra.gmra.mrb[160].mxu1 %v29149_v56  ;;  %9720 = vmatprep.mubr.bf16.mxu0 %v29150_v35  ;;  %v19696_v56 = vld [vmem:[%s28564_s3 + $0xc2c] ss:$16 sps:$4 sm:$0xff]  }
 0x634   : > { %10158 = vmatprep.mubr.bf16.mxu1 %v29150_v35  ;;  %10222 = vmatpush1.bf16.msra.mxu0 %v19693_v45  ;;  %v19697_v35 = vld [vmem:[%s28564_s3 + $0xc20] ss:$16 sps:$4 sm:$0xff]   ;;  %v19698_v45 = vld [vmem:[%s28564_s3 + $0xc28] ss:$16 sps:$4 sm:$0xff]  }
 0x635   : > { %10660 = vmatpush1.bf16.msra.mxu1 %v19694_v53  ;;  %10223 = vmatprep.subr.bf16.mxu0 %v19695_v21  ;;  %v19699_v53 = vld [vmem:[%s28564_s3 + $0xc44] ss:$16 sps:$4 sm:$0xff]   ;;  %v29151_v21 = vld [vmem:[#allocation67_spill] sm:$0xff] }
 0x636   : > { %10661 = vmatprep.subr.bf16.mxu1 %v19696_v56  ;;  %v19700_v56 = vld [vmem:[%s28564_s3 + $0xc4c] ss:$16 sps:$4 sm:$0xff]  }
 0x638   : > { %10224 = vmatpush1.bf16.msra.mxu0 %v19697_v35  ;;  %v29152_v35 = vld [vmem:[#allocation70_spill] sm:$0xff] }
 0x639   : > { %10662 = vmatpush1.bf16.msra.mxu1 %v19698_v45  ;;  %10225 = vmatprep.subr.bf16.mxu0 %v19699_v53  ;;  %v19701_v45 = vld [vmem:[%s28564_s3 + $0xc40] ss:$16 sps:$4 sm:$0xff]   ;;  %v19702_v53 = vld [vmem:[%s28564_s3 + $0xc48] ss:$16 sps:$4 sm:$0xff]  }
 0x63a   : > { %9721 = vmatmul.mubr.bf16.gmra.mrb[164].mxu0 %v29151_v21  ;;  %10663 = vmatprep.subr.bf16.mxu1 %v19700_v56  ;;  %v19703_v56 = vld [vmem:[%s28564_s3 + $0xc64] ss:$16 sps:$4 sm:$0xff]  }
 0x63b   : > { %10159 = vmatmul.mubr.bf16.gmra.mrb[164].mxu1 %v29151_v21  ;;  %9730 = vmatprep.mubr.bf16.mxu0 %v29152_v35  ;;  %v19704_v21 = vld [vmem:[%s28564_s3 + $0xc6c] ss:$16 sps:$4 sm:$0xff]  }
 0x63c   : > { %10168 = vmatprep.mubr.bf16.mxu1 %v29152_v35  ;;  %10226 = vmatpush1.bf16.msra.mxu0 %v19701_v45  ;;  %v19705_v35 = vld [vmem:[%s28564_s3 + $0xc60] ss:$16 sps:$4 sm:$0xff]   ;;  %v19706_v45 = vld [vmem:[%s28564_s3 + $0xc68] ss:$16 sps:$4 sm:$0xff]  }
 0x63d   : > { %10664 = vmatpush1.bf16.msra.mxu1 %v19702_v53  ;;  %10227 = vmatprep.subr.bf16.mxu0 %v19703_v56  ;;  %v19707_v53 = vld [vmem:[%s28564_s3 + $0xc84] ss:$16 sps:$4 sm:$0xff]   ;;  %v29153_v56 = vld [vmem:[#allocation71_spill] sm:$0xff] }
 0x63e   : > { %10665 = vmatprep.subr.bf16.mxu1 %v19704_v21  ;;  %v25788_v36 = vcombine.high %v29153_v56, %v29143_v59  ;;  %v29155_v21 = vld [vmem:[#allocation69_spill] sm:$0xff] }
 0x640   : > { %10228 = vmatpush1.bf16.msra.mxu0 %v19705_v35  ;;  %29154 = vst [vmem:[#allocation12_spill] sm:$0xff] %v25788_v36  ;;  %v19708_v35 = vld [vmem:[%s28564_s3 + $0xc8c] ss:$16 sps:$4 sm:$0xff]  }
 0x641   : > { %10666 = vmatpush1.bf16.msra.mxu1 %v19706_v45  ;;  %10229 = vmatprep.subr.bf16.mxu0 %v19707_v53  ;;  %v19709_v45 = vld [vmem:[%s28564_s3 + $0xc80] ss:$16 sps:$4 sm:$0xff]   ;;  %v19710_v53 = vld [vmem:[%s28564_s3 + $0xc88] ss:$16 sps:$4 sm:$0xff]  }
 0x642   : > { %9731 = vmatmul.mubr.bf16.gmra.mrb[168].mxu0 %v29155_v21  ;;  %10667 = vmatprep.subr.bf16.mxu1 %v19708_v35  ;;  %v19711_v35 = vld [vmem:[%s28564_s3 + $0xca4] ss:$16 sps:$4 sm:$0xff]  }
 0x643   : > { %10169 = vmatmul.mubr.bf16.gmra.mrb[168].mxu1 %v29155_v21  ;;  %9740 = vmatprep.mubr.bf16.mxu0 %v25788_v36  ;;  %v19712_v21 = vld [vmem:[%s28564_s3 + $0xcac] ss:$16 sps:$4 sm:$0xff]  }
 0x644   : > { %10178 = vmatprep.mubr.bf16.mxu1 %v25788_v36  ;;  %10230 = vmatpush1.bf16.msra.mxu0 %v19709_v45  ;;  %v19713_v36 = vld [vmem:[%s28564_s3 + $0xca0] ss:$16 sps:$4 sm:$0xff]   ;;  %v25814_v45 = vcombine.low %v29153_v56, %v29143_v59  ;;  %v19718_v56 = vld [vmem:[%s28564_s3 + $0xcc8] ss:$16 sps:$4 sm:$0xff]  }
 0x645   : > { %10668 = vmatpush1.bf16.msra.mxu1 %v19710_v53  ;;  %10231 = vmatprep.subr.bf16.mxu0 %v19711_v35  ;;  %v19714_v53 = vld [vmem:[%s28564_s3 + $0xca8] ss:$16 sps:$4 sm:$0xff]   ;;  %v19715_v35 = vld [vmem:[%s28564_s3 + $0xcc4] ss:$16 sps:$4 sm:$0xff]   ;;  %v19717_v59 = vld [vmem:[%s28564_s3 + $0xcc0] ss:$16 sps:$4 sm:$0xff]  }
 0x646   : > { %10669 = vmatprep.subr.bf16.mxu1 %v19712_v21  ;;  %v19719_v21 = vld [vmem:[%s28564_s3 + $0xce4] ss:$16 sps:$4 sm:$0xff]  }
 0x648   : > { %10232 = vmatpush1.bf16.msra.mxu0 %v19713_v36  ;;  %v19716_v36 = vld [vmem:[%s28564_s3 + $0xccc] ss:$16 sps:$4 sm:$0xff]  }
 0x649   : > { %10670 = vmatpush1.bf16.msra.mxu1 %v19714_v53  ;;  %10233 = vmatprep.subr.bf16.mxu0 %v19715_v35  ;;  %v19720_v53 = vld [vmem:[%s28564_s3 + $0xcec] ss:$16 sps:$4 sm:$0xff]   ;;  %v19721_v35 = vld [vmem:[%s28564_s3 + $0xce0] ss:$16 sps:$4 sm:$0xff]  }
 0x64a   : > { %9741 = vmatmul.mubr.bf16.gmra.mrb[172].mxu0 %v25814_v45  ;;  %10671 = vmatprep.subr.bf16.mxu1 %v19716_v36  ;;  %v19723_v36 = vld [vmem:[%s28564_s3 + $0xd04] ss:$16 sps:$4 sm:$0xff]  }
 0x64b   : > { %10179 = vmatmul.mubr.bf16.gmra.mrb[172].mxu1 %v25814_v45  ;;  %10253 = vmatprep.mubr.bf16.mxu0 %v21990_v52 }
 0x64c   : > { %10234 = vmatpush1.bf16.msra.mxu0 %v19717_v59  ;;  %10691 = vmatprep.mubr.bf16.mxu1 %v21990_v52  ;;  %v19722_v52 = vld [vmem:[%s28564_s3 + $0xce8] ss:$16 sps:$4 sm:$0xff]   ;;  %v19724_v59 = vld [vmem:[%s28564_s3 + $0xd0c] ss:$16 sps:$4 sm:$0xff]  }
 0x64d   : > { %10672 = vmatpush1.bf16.msra.mxu1 %v19718_v56  ;;  %10235 = vmatprep.subr.bf16.mxu0 %v19719_v21  ;;  %v19725_v56 = vld [vmem:[%s28564_s3 + $0xd00] ss:$16 sps:$4 sm:$0xff]   ;;  %v19726_v21 = vld [vmem:[%s28564_s3 + $0xd08] ss:$16 sps:$4 sm:$0xff]  }
 0x64e   : > { %10673 = vmatprep.subr.bf16.mxu1 %v19720_v53  ;;  %v19727_v53 = vld [vmem:[%s28564_s3 + $0xd24] ss:$16 sps:$4 sm:$0xff]  }
 0x650   : > { %10236 = vmatpush1.bf16.msra.mxu0 %v19721_v35  ;;  %v19728_v35 = vld [vmem:[%s28564_s3 + $0xd2c] ss:$16 sps:$4 sm:$0xff]  }
 0x651   : > { %10674 = vmatpush1.bf16.msra.mxu1 %v19722_v52  ;;  %10237 = vmatprep.subr.bf16.mxu0 %v19723_v36  ;;  %v19729_v52 = vld [vmem:[%s28564_s3 + $0xd20] ss:$16 sps:$4 sm:$0xff]   ;;  %v19730_v36 = vld [vmem:[%s28564_s3 + $0xd28] ss:$16 sps:$4 sm:$0xff]  }
 0x652   : > { %10675 = vmatprep.subr.bf16.mxu1 %v19724_v59  ;;  %v19731_v59 = vld [vmem:[%s28564_s3 + $0xd44] ss:$16 sps:$4 sm:$0xff]  }
 0x654   : > { %10238 = vmatpush1.bf16.msra.mxu0 %v19725_v56  ;;  %v19732_v56 = vld [vmem:[%s28564_s3 + $0xd4c] ss:$16 sps:$4 sm:$0xff]  }
 0x655   : > { %10676 = vmatpush1.bf16.msra.mxu1 %v19726_v21  ;;  %10239 = vmatprep.subr.bf16.mxu0 %v19727_v53  ;;  %v19733_v21 = vld [vmem:[%s28564_s3 + $0xd40] ss:$16 sps:$4 sm:$0xff]   ;;  %v19734_v53 = vld [vmem:[%s28564_s3 + $0xd48] ss:$16 sps:$4 sm:$0xff]  }
 0x656   : > { %10677 = vmatprep.subr.bf16.mxu1 %v19728_v35  ;;  %v19735_v35 = vld [vmem:[%s28564_s3 + $0xd64] ss:$16 sps:$4 sm:$0xff]  }
 0x658   : > { %10240 = vmatpush1.bf16.msra.mxu0 %v19729_v52  ;;  %v19736_v52 = vld [vmem:[%s28564_s3 + $0xd6c] ss:$16 sps:$4 sm:$0xff]  }
 0x659   : > { %10678 = vmatpush1.bf16.msra.mxu1 %v19730_v36  ;;  %10241 = vmatprep.subr.bf16.mxu0 %v19731_v59  ;;  %v19737_v36 = vld [vmem:[%s28564_s3 + $0xd60] ss:$16 sps:$4 sm:$0xff]   ;;  %v19738_v59 = vld [vmem:[%s28564_s3 + $0xd68] ss:$16 sps:$4 sm:$0xff]  }
 0x65a   : > { %10679 = vmatprep.subr.bf16.mxu1 %v19732_v56  ;;  %v19739_v56 = vld [vmem:[%s28564_s3 + $0xd84] ss:$16 sps:$4 sm:$0xff]  }
 0x65c   : > { %10242 = vmatpush1.bf16.msra.mxu0 %v19733_v21  ;;  %v19740_v21 = vld [vmem:[%s28564_s3 + $0xd8c] ss:$16 sps:$4 sm:$0xff]  }
 0x65d   : > { %10680 = vmatpush1.bf16.msra.mxu1 %v19734_v53  ;;  %10243 = vmatprep.subr.bf16.mxu0 %v19735_v35  ;;  %v19741_v53 = vld [vmem:[%s28564_s3 + $0xd80] ss:$16 sps:$4 sm:$0xff]   ;;  %v19742_v35 = vld [vmem:[%s28564_s3 + $0xd88] ss:$16 sps:$4 sm:$0xff]  }
 0x65e   : > { %10681 = vmatprep.subr.bf16.mxu1 %v19736_v52  ;;  %v19743_v52 = vld [vmem:[%s28564_s3 + $0xda4] ss:$16 sps:$4 sm:$0xff]  }
 0x660   : > { %10244 = vmatpush1.bf16.msra.mxu0 %v19737_v36  ;;  %v19744_v36 = vld [vmem:[%s28564_s3 + $0xdac] ss:$16 sps:$4 sm:$0xff]  }
 0x661   : > { %10682 = vmatpush1.bf16.msra.mxu1 %v19738_v59  ;;  %10245 = vmatprep.subr.bf16.mxu0 %v19739_v56  ;;  %v19745_v59 = vld [vmem:[%s28564_s3 + $0xda0] ss:$16 sps:$4 sm:$0xff]   ;;  %v19746_v56 = vld [vmem:[%s28564_s3 + $0xda8] ss:$16 sps:$4 sm:$0xff]  }
 0x662   : > { %10683 = vmatprep.subr.bf16.mxu1 %v19740_v21  ;;  %v19747_v21 = vld [vmem:[%s28564_s3 + $0xdc4] ss:$16 sps:$4 sm:$0xff]  }
 0x664   : > { %10246 = vmatpush1.bf16.msra.mxu0 %v19741_v53  ;;  %v19748_v53 = vld [vmem:[%s28564_s3 + $0xdcc] ss:$16 sps:$4 sm:$0xff]  }
 0x665   : > { %10684 = vmatpush1.bf16.msra.mxu1 %v19742_v35  ;;  %10247 = vmatprep.subr.bf16.mxu0 %v19743_v52  ;;  %v19749_v35 = vld [vmem:[%s28564_s3 + $0xdc0] ss:$16 sps:$4 sm:$0xff]   ;;  %v19750_v52 = vld [vmem:[%s28564_s3 + $0xdc8] ss:$16 sps:$4 sm:$0xff]  }
 0x666   : > { %10685 = vmatprep.subr.bf16.mxu1 %v19744_v36  ;;  %v19751_v36 = vld [vmem:[%s28564_s3 + $0xde4] ss:$16 sps:$4 sm:$0xff]  }
 0x668   : > { %10248 = vmatpush1.bf16.msra.mxu0 %v19745_v59  ;;  %v19752_v59 = vld [vmem:[%s28564_s3 + $0xdec] ss:$16 sps:$4 sm:$0xff]  }
 0x669   : > { %10686 = vmatpush1.bf16.msra.mxu1 %v19746_v56  ;;  %10249 = vmatprep.subr.bf16.mxu0 %v19747_v21  ;;  %v19753_v56 = vld [vmem:[%s28564_s3 + $0xde0] ss:$16 sps:$4 sm:$0xff]   ;;  %v19754_v21 = vld [vmem:[%s28564_s3 + $0xde8] ss:$16 sps:$4 sm:$0xff]  }
 0x66a   : > { %10687 = vmatprep.subr.bf16.mxu1 %v19748_v53  ;;  %v19755_v53 = vld [vmem:[%s28564_s3 + $0xe04] ss:$16 sps:$4 sm:$0xff]  }
 0x66c   : > { %10250 = vmatpush1.bf16.msra.mxu0 %v19749_v35  ;;  %v19756_v35 = vld [vmem:[%s28564_s3 + $0xe0c] ss:$16 sps:$4 sm:$0xff]  }
 0x66d   : > { %10688 = vmatpush1.bf16.msra.mxu1 %v19750_v52  ;;  %10251 = vmatprep.subr.bf16.mxu0 %v19751_v36  ;;  %v19757_v52 = vld [vmem:[%s28564_s3 + $0xe00] ss:$16 sps:$4 sm:$0xff]   ;;  %v19758_v36 = vld [vmem:[%s28564_s3 + $0xe08] ss:$16 sps:$4 sm:$0xff]  }
 0x66e   : > { %10689 = vmatprep.subr.bf16.mxu1 %v19752_v59  ;;  %v19759_v59 = vld [vmem:[%s28564_s3 + $0xe24] ss:$16 sps:$4 sm:$0xff]  }
 0x670   : > { %10252 = vmatpush1.bf16.msra.mxu0 %v19753_v56  ;;  %v19761_v56 = vld [vmem:[%s28564_s3 + $0xe20] ss:$16 sps:$4 sm:$0xff]  }
 0x671   : > { %10690 = vmatpush1.bf16.msra.mxu1 %v19754_v21  ;;  %10294 = vmatprep.subr.bf16.mxu0 %v19755_v53  ;;  %v19763_v21 = vld [vmem:[%s28564_s3 + $0xe44] ss:$16 sps:$4 sm:$0xff]   ;;  %v19764_v53 = vld [vmem:[%s28564_s3 + $0xe4c] ss:$16 sps:$4 sm:$0xff]  }
 0x672   : > { %10732 = vmatprep.subr.bf16.mxu1 %v19756_v35  ;;  %v19765_v35 = vld [vmem:[%s28564_s3 + $0xe40] ss:$16 sps:$4 sm:$0xff]  }
 0x673   : > { %10254 = vmatmul.mubr.bf16.vlgmr.msra.gmra.mrb[176].mxu0 %v21977_v1 }
 0x674   : > { %10692 = vmatmul.mubr.bf16.vlgmr.msra.gmra.mrb[176].mxu1 %v21977_v1  ;;  %10263 = vmatprep.mubr.bf16.mxu0 %v22068_v37  ;;  %v19760_v1 = vld [vmem:[%s28564_s3 + $0xe2c] ss:$16 sps:$4 sm:$0xff]  }
 0x675   : > { %10295 = vmatpush1.bf16.msra.mxu0 %v19757_v52  ;;  %10701 = vmatprep.mubr.bf16.mxu1 %v22068_v37  ;;  %v19762_v37 = vld [vmem:[%s28564_s3 + $0xe28] ss:$16 sps:$4 sm:$0xff]  }
 0x676   : > { %10733 = vmatpush1.bf16.msra.mxu1 %v19758_v36  ;;  %10296 = vmatprep.subr.bf16.mxu0 %v19759_v59  ;;  %v19766_v52 = vld [vmem:[%s28564_s3 + $0xe48] ss:$16 sps:$4 sm:$0xff]   ;;  %v19767_v36 = vld [vmem:[%s28564_s3 + $0xe64] ss:$16 sps:$4 sm:$0xff]   ;;  %v19769_v59 = vld [vmem:[%s28564_s3 + $0xe60] ss:$16 sps:$4 sm:$0xff]  }
 0x677   : > { %10734 = vmatprep.subr.bf16.mxu1 %v19760_v1  ;;  %v19771_v1 = vld [vmem:[%s28564_s3 + $0xe84] ss:$16 sps:$4 sm:$0xff]  }
 0x679   : > { %10297 = vmatpush1.bf16.msra.mxu0 %v19761_v56  ;;  %v19772_v56 = vld [vmem:[%s28564_s3 + $0xe8c] ss:$16 sps:$4 sm:$0xff]  }
 0x67a   : > { %10735 = vmatpush1.bf16.msra.mxu1 %v19762_v37  ;;  %10298 = vmatprep.subr.bf16.mxu0 %v19763_v21  ;;  %v19773_v37 = vld [vmem:[%s28564_s3 + $0xe80] ss:$16 sps:$4 sm:$0xff]   ;;  %v19774_v21 = vld [vmem:[%s28564_s3 + $0xe88] ss:$16 sps:$4 sm:$0xff]  }
 0x67b   : > { %10264 = vmatmul.mubr.bf16.gmra.mrb[180].mxu0 %v22047_v27  ;;  %10736 = vmatprep.subr.bf16.mxu1 %v19764_v53  ;;  %v19775_v53 = vld [vmem:[%s28564_s3 + $0xea4] ss:$16 sps:$4 sm:$0xff]  }
 0x67c   : > { %10702 = vmatmul.mubr.bf16.gmra.mrb[180].mxu1 %v22047_v27  ;;  %10273 = vmatprep.mubr.bf16.mxu0 %v22130_v60  ;;  %v19768_v27 = vld [vmem:[%s28564_s3 + $0xe6c] ss:$16 sps:$4 sm:$0xff]  }
 0x67d   : > { %10299 = vmatpush1.bf16.msra.mxu0 %v19765_v35  ;;  %10711 = vmatprep.mubr.bf16.mxu1 %v22130_v60  ;;  %v19770_v60 = vld [vmem:[%s28564_s3 + $0xe68] ss:$16 sps:$4 sm:$0xff]   ;;  %v19777_v35 = vld [vmem:[%s28564_s3 + $0xea0] ss:$16 sps:$4 sm:$0xff]  }
 0x67e   : > { %10737 = vmatpush1.bf16.msra.mxu1 %v19766_v52  ;;  %10300 = vmatprep.subr.bf16.mxu0 %v19767_v36  ;;  %v19779_v52 = vld [vmem:[%s28564_s3 + $0xec4] ss:$16 sps:$4 sm:$0xff]   ;;  %v19780_v36 = vld [vmem:[%s28564_s3 + $0xecc] ss:$16 sps:$4 sm:$0xff]  }
 0x67f   : > { %10738 = vmatprep.subr.bf16.mxu1 %v19768_v27  ;;  %v19781_v27 = vld [vmem:[%s28564_s3 + $0xec0] ss:$16 sps:$4 sm:$0xff]  }
 0x681   : > { %10301 = vmatpush1.bf16.msra.mxu0 %v19769_v59  ;;  %v19782_v59 = vld [vmem:[%s28564_s3 + $0xec8] ss:$16 sps:$4 sm:$0xff]  }
 0x682   : > { %10739 = vmatpush1.bf16.msra.mxu1 %v19770_v60  ;;  %10302 = vmatprep.subr.bf16.mxu0 %v19771_v1  ;;  %v19783_v60 = vld [vmem:[%s28564_s3 + $0xee4] ss:$16 sps:$4 sm:$0xff]   ;;  %v19785_v1 = vld [vmem:[%s28564_s3 + $0xee0] ss:$16 sps:$4 sm:$0xff]  }
 0x683   : > { %10274 = vmatmul.mubr.bf16.gmra.mrb[184].mxu0 %v22110_v7  ;;  %10740 = vmatprep.subr.bf16.mxu1 %v19772_v56  ;;  %v19787_v56 = vld [vmem:[%s28564_s3 + $0xf04] ss:$16 sps:$4 sm:$0xff]  }
 0x684   : > { %10712 = vmatmul.mubr.bf16.gmra.mrb[184].mxu1 %v22110_v7  ;;  %10283 = vmatprep.mubr.bf16.mxu0 %v22187_v33  ;;  %v19776_v7 = vld [vmem:[%s28564_s3 + $0xeac] ss:$16 sps:$4 sm:$0xff]  }
 0x685   : > { %10303 = vmatpush1.bf16.msra.mxu0 %v19773_v37  ;;  %10721 = vmatprep.mubr.bf16.mxu1 %v22187_v33  ;;  %v19778_v33 = vld [vmem:[%s28564_s3 + $0xea8] ss:$16 sps:$4 sm:$0xff]   ;;  %v19788_v37 = vld [vmem:[%s28564_s3 + $0xf0c] ss:$16 sps:$4 sm:$0xff]  }
 0x686   : > { %10741 = vmatpush1.bf16.msra.mxu1 %v19774_v21  ;;  %10304 = vmatprep.subr.bf16.mxu0 %v19775_v53  ;;  %v19789_v21 = vld [vmem:[%s28564_s3 + $0xf00] ss:$16 sps:$4 sm:$0xff]   ;;  %v19790_v53 = vld [vmem:[%s28564_s3 + $0xf08] ss:$16 sps:$4 sm:$0xff]  }
 0x687   : > { %10742 = vmatprep.subr.bf16.mxu1 %v19776_v7  ;;  %v19791_v7 = vld [vmem:[%s28564_s3 + $0xf24] ss:$16 sps:$4 sm:$0xff]  }
 0x689   : > { %10305 = vmatpush1.bf16.msra.mxu0 %v19777_v35  ;;  %v19792_v35 = vld [vmem:[%s28564_s3 + $0xf2c] ss:$16 sps:$4 sm:$0xff]  }
 0x68a   : > { %10743 = vmatpush1.bf16.msra.mxu1 %v19778_v33  ;;  %10306 = vmatprep.subr.bf16.mxu0 %v19779_v52  ;;  %v19793_v33 = vld [vmem:[%s28564_s3 + $0xf20] ss:$16 sps:$4 sm:$0xff]   ;;  %v19794_v52 = vld [vmem:[%s28564_s3 + $0xf28] ss:$16 sps:$4 sm:$0xff]  }
 0x68b   : > { %10284 = vmatmul.mubr.bf16.gmra.mrb[188].mxu0 %v22169_v40  ;;  %10744 = vmatprep.subr.bf16.mxu1 %v19780_v36  ;;  %v19795_v36 = vld [vmem:[%s28564_s3 + $0xf44] ss:$16 sps:$4 sm:$0xff]  }
 0x68c   : > { %10722 = vmatmul.mubr.bf16.gmra.mrb[188].mxu1 %v22169_v40  ;;  %10326 = vmatprep.mubr.bf16.mxu0 %v22005_v48  ;;  %v19784_v40 = vld [vmem:[%s28564_s3 + $0xeec] ss:$16 sps:$4 sm:$0xff]  }
 0x68d   : > { %10307 = vmatpush1.bf16.msra.mxu0 %v19781_v27  ;;  %10764 = vmatprep.mubr.bf16.mxu1 %v22005_v48  ;;  %v19786_v48 = vld [vmem:[%s28564_s3 + $0xee8] ss:$16 sps:$4 sm:$0xff]   ;;  %v19796_v27 = vld [vmem:[%s28564_s3 + $0xf4c] ss:$16 sps:$4 sm:$0xff]  }
 0x68e   : > { %10745 = vmatpush1.bf16.msra.mxu1 %v19782_v59  ;;  %10308 = vmatprep.subr.bf16.mxu0 %v19783_v60  ;;  %v19797_v59 = vld [vmem:[%s28564_s3 + $0xf40] ss:$16 sps:$4 sm:$0xff]   ;;  %v19798_v60 = vld [vmem:[%s28564_s3 + $0xf48] ss:$16 sps:$4 sm:$0xff]  }
 0x68f   : > { %10746 = vmatprep.subr.bf16.mxu1 %v19784_v40  ;;  %v19799_v40 = vld [vmem:[%s28564_s3 + $0xf64] ss:$16 sps:$4 sm:$0xff]  }
 0x691   : > { %10309 = vmatpush1.bf16.msra.mxu0 %v19785_v1  ;;  %v19800_v1 = vld [vmem:[%s28564_s3 + $0xf6c] ss:$16 sps:$4 sm:$0xff]  }
 0x692   : > { %10747 = vmatpush1.bf16.msra.mxu1 %v19786_v48  ;;  %10310 = vmatprep.subr.bf16.mxu0 %v19787_v56  ;;  %v19801_v48 = vld [vmem:[%s28564_s3 + $0xf60] ss:$16 sps:$4 sm:$0xff]   ;;  %v19802_v56 = vld [vmem:[%s28564_s3 + $0xf68] ss:$16 sps:$4 sm:$0xff]  }
 0x693   : > { %10748 = vmatprep.subr.bf16.mxu1 %v19788_v37  ;;  %v19803_v37 = vld [vmem:[%s28564_s3 + $0xf84] ss:$16 sps:$4 sm:$0xff]  }
 0x695   : > { %10311 = vmatpush1.bf16.msra.mxu0 %v19789_v21  ;;  %v19804_v21 = vld [vmem:[%s28564_s3 + $0xf8c] ss:$16 sps:$4 sm:$0xff]  }
 0x696   : > { %10749 = vmatpush1.bf16.msra.mxu1 %v19790_v53  ;;  %10312 = vmatprep.subr.bf16.mxu0 %v19791_v7  ;;  %v19805_v53 = vld [vmem:[%s28564_s3 + $0xf80] ss:$16 sps:$4 sm:$0xff]   ;;  %v19806_v7 = vld [vmem:[%s28564_s3 + $0xf88] ss:$16 sps:$4 sm:$0xff]  }
 0x697   : > { %10750 = vmatprep.subr.bf16.mxu1 %v19792_v35  ;;  %v19807_v35 = vld [vmem:[%s28564_s3 + $0xfa4] ss:$16 sps:$4 sm:$0xff]  }
 0x699   : > { %10313 = vmatpush1.bf16.msra.mxu0 %v19793_v33  ;;  %v19808_v33 = vld [vmem:[%s28564_s3 + $0xfac] ss:$16 sps:$4 sm:$0xff]  }
 0x69a   : > { %10751 = vmatpush1.bf16.msra.mxu1 %v19794_v52  ;;  %10314 = vmatprep.subr.bf16.mxu0 %v19795_v36  ;;  %v19809_v52 = vld [vmem:[%s28564_s3 + $0xfa0] ss:$16 sps:$4 sm:$0xff]   ;;  %v19810_v36 = vld [vmem:[%s28564_s3 + $0xfa8] ss:$16 sps:$4 sm:$0xff]  }
 0x69b   : > { %10752 = vmatprep.subr.bf16.mxu1 %v19796_v27  ;;  %v19811_v27 = vld [vmem:[%s28564_s3 + $0xfc4] ss:$16 sps:$4 sm:$0xff]  }
 0x69d   : > { %10315 = vmatpush1.bf16.msra.mxu0 %v19797_v59  ;;  %v19812_v59 = vld [vmem:[%s28564_s3 + $0xfcc] ss:$16 sps:$4 sm:$0xff]  }
 0x69e   : > { %10753 = vmatpush1.bf16.msra.mxu1 %v19798_v60  ;;  %10316 = vmatprep.subr.bf16.mxu0 %v19799_v40  ;;  %v19813_v60 = vld [vmem:[%s28564_s3 + $0xfc0] ss:$16 sps:$4 sm:$0xff]   ;;  %v19814_v40 = vld [vmem:[%s28564_s3 + $0xfc8] ss:$16 sps:$4 sm:$0xff]  }
 0x69f   : > { %10754 = vmatprep.subr.bf16.mxu1 %v19800_v1  ;;  %v19815_v1 = vld [vmem:[%s28564_s3 + $0xfe4] ss:$16 sps:$4 sm:$0xff]  }
 0x6a1   : > { %10317 = vmatpush1.bf16.msra.mxu0 %v19801_v48  ;;  %v19816_v48 = vld [vmem:[%s28564_s3 + $0xfec] ss:$16 sps:$4 sm:$0xff]  }
 0x6a2   : > { %10755 = vmatpush1.bf16.msra.mxu1 %v19802_v56  ;;  %10318 = vmatprep.subr.bf16.mxu0 %v19803_v37  ;;  %v19817_v56 = vld [vmem:[%s28564_s3 + $0xfe0] ss:$16 sps:$4 sm:$0xff]   ;;  %v19818_v37 = vld [vmem:[%s28564_s3 + $0xfe8] ss:$16 sps:$4 sm:$0xff]  }
 0x6a3   : > { %10756 = vmatprep.subr.bf16.mxu1 %v19804_v21  ;;  %v19819_v21 = vld [vmem:[%s28564_s3 + $0x1004] ss:$16 sps:$4 sm:$0xff]  }
 0x6a5   : > { %10319 = vmatpush1.bf16.msra.mxu0 %v19805_v53  ;;  %v19820_v53 = vld [vmem:[%s28564_s3 + $0x100c] ss:$16 sps:$4 sm:$0xff]  }
 0x6a6   : > { %10757 = vmatpush1.bf16.msra.mxu1 %v19806_v7  ;;  %10320 = vmatprep.subr.bf16.mxu0 %v19807_v35  ;;  %v19821_v7 = vld [vmem:[%s28564_s3 + $0x1000] ss:$16 sps:$4 sm:$0xff]   ;;  %v19822_v35 = vld [vmem:[%s28564_s3 + $0x1008] ss:$16 sps:$4 sm:$0xff]  }
 0x6a7   : > { %10758 = vmatprep.subr.bf16.mxu1 %v19808_v33  ;;  %v19823_v33 = vld [vmem:[%s28564_s3 + $0x1024] ss:$16 sps:$4 sm:$0xff]  }
 0x6a9   : > { %10321 = vmatpush1.bf16.msra.mxu0 %v19809_v52  ;;  %v19825_v52 = vld [vmem:[%s28564_s3 + $0x1020] ss:$16 sps:$4 sm:$0xff]  }
 0x6aa   : > { %10759 = vmatpush1.bf16.msra.mxu1 %v19810_v36  ;;  %10322 = vmatprep.subr.bf16.mxu0 %v19811_v27  ;;  %v19827_v36 = vld [vmem:[%s28564_s3 + $0x1044] ss:$16 sps:$4 sm:$0xff]   ;;  %v19828_v27 = vld [vmem:[%s28564_s3 + $0x104c] ss:$16 sps:$4 sm:$0xff]  }
 0x6ab   : > { %10760 = vmatprep.subr.bf16.mxu1 %v19812_v59  ;;  %v19829_v59 = vld [vmem:[%s28564_s3 + $0x1040] ss:$16 sps:$4 sm:$0xff]  }
 0x6ad   : > { %10323 = vmatpush1.bf16.msra.mxu0 %v19813_v60  ;;  %v19830_v60 = vld [vmem:[%s28564_s3 + $0x1048] ss:$16 sps:$4 sm:$0xff]  }
 0x6ae   : > { %10761 = vmatpush1.bf16.msra.mxu1 %v19814_v40  ;;  %10324 = vmatprep.subr.bf16.mxu0 %v19815_v1  ;;  %v19831_v40 = vld [vmem:[%s28564_s3 + $0x1064] ss:$16 sps:$4 sm:$0xff]   ;;  %v19833_v1 = vld [vmem:[%s28564_s3 + $0x1060] ss:$16 sps:$4 sm:$0xff]  }
 0x6af   : > { %10762 = vmatprep.subr.bf16.mxu1 %v19816_v48  ;;  %v19835_v48 = vld [vmem:[%s28564_s3 + $0x1084] ss:$16 sps:$4 sm:$0xff]  }
 0x6b1   : > { %10325 = vmatpush1.bf16.msra.mxu0 %v19817_v56  ;;  %v19836_v56 = vld [vmem:[%s28564_s3 + $0x108c] ss:$16 sps:$4 sm:$0xff]  }
 0x6b2   : > { %10763 = vmatpush1.bf16.msra.mxu1 %v19818_v37  ;;  %10367 = vmatprep.subr.bf16.mxu0 %v19819_v21  ;;  %v19837_v37 = vld [vmem:[%s28564_s3 + $0x1080] ss:$16 sps:$4 sm:$0xff]   ;;  %v19838_v21 = vld [vmem:[%s28564_s3 + $0x1088] ss:$16 sps:$4 sm:$0xff]  }
 0x6b3   : > { %10805 = vmatprep.subr.bf16.mxu1 %v19820_v53  ;;  %v19839_v53 = vld [vmem:[%s28564_s3 + $0x10a4] ss:$16 sps:$4 sm:$0xff]  }
 0x6b4   : > { %10327 = vmatmul.mubr.bf16.vlgmr.msra.gmra.mrb[176].mxu0 %v21979_v23 }
 0x6b5   : > { %10765 = vmatmul.mubr.bf16.vlgmr.msra.gmra.mrb[176].mxu1 %v21979_v23  ;;  %10336 = vmatprep.mubr.bf16.mxu0 %v22070_v49  ;;  %v19824_v23 = vld [vmem:[%s28564_s3 + $0x102c] ss:$16 sps:$4 sm:$0xff]  }
 0x6b6   : > { %10368 = vmatpush1.bf16.msra.mxu0 %v19821_v7  ;;  %10774 = vmatprep.mubr.bf16.mxu1 %v22070_v49  ;;  %v19826_v49 = vld [vmem:[%s28564_s3 + $0x1028] ss:$16 sps:$4 sm:$0xff]   ;;  %v19841_v7 = vld [vmem:[%s28564_s3 + $0x10a0] ss:$16 sps:$4 sm:$0xff]  }
 0x6b7   : > { %10806 = vmatpush1.bf16.msra.mxu1 %v19822_v35  ;;  %10369 = vmatprep.subr.bf16.mxu0 %v19823_v33  ;;  %v19843_v35 = vld [vmem:[%s28564_s3 + $0x10c4] ss:$16 sps:$4 sm:$0xff]   ;;  %v19844_v33 = vld [vmem:[%s28564_s3 + $0x10cc] ss:$16 sps:$4 sm:$0xff]  }
 0x6b8   : > { %10807 = vmatprep.subr.bf16.mxu1 %v19824_v23  ;;  %v19845_v23 = vld [vmem:[%s28564_s3 + $0x10c0] ss:$16 sps:$4 sm:$0xff]  }
 0x6ba   : > { %10370 = vmatpush1.bf16.msra.mxu0 %v19825_v52  ;;  %v19846_v52 = vld [vmem:[%s28564_s3 + $0x10c8] ss:$16 sps:$4 sm:$0xff]  }
 0x6bb   : > { %10808 = vmatpush1.bf16.msra.mxu1 %v19826_v49  ;;  %10371 = vmatprep.subr.bf16.mxu0 %v19827_v36  ;;  %v19847_v49 = vld [vmem:[%s28564_s3 + $0x10e4] ss:$16 sps:$4 sm:$0xff]   ;;  %v19849_v36 = vld [vmem:[%s28564_s3 + $0x10e0] ss:$16 sps:$4 sm:$0xff]  }
 0x6bc   : > { %10337 = vmatmul.mubr.bf16.gmra.mrb[180].mxu0 %v22049_v58  ;;  %10809 = vmatprep.subr.bf16.mxu1 %v19828_v27  ;;  %v19851_v27 = vld [vmem:[%s28564_s3 + $0x1104] ss:$16 sps:$4 sm:$0xff]  }
 0x6bd   : > { %10775 = vmatmul.mubr.bf16.gmra.mrb[180].mxu1 %v22049_v58  ;;  %10346 = vmatprep.mubr.bf16.mxu0 %v22132_v22  ;;  %v19832_v58 = vld [vmem:[%s28564_s3 + $0x106c] ss:$16 sps:$4 sm:$0xff]  }
 0x6be   : > { %10372 = vmatpush1.bf16.msra.mxu0 %v19829_v59  ;;  %10784 = vmatprep.mubr.bf16.mxu1 %v22132_v22  ;;  %v19834_v22 = vld [vmem:[%s28564_s3 + $0x1068] ss:$16 sps:$4 sm:$0xff]   ;;  %v19852_v59 = vld [vmem:[%s28564_s3 + $0x110c] ss:$16 sps:$4 sm:$0xff]  }
 0x6bf   : > { %10810 = vmatpush1.bf16.msra.mxu1 %v19830_v60  ;;  %10373 = vmatprep.subr.bf16.mxu0 %v19831_v40  ;;  %v19853_v60 = vld [vmem:[%s28564_s3 + $0x1100] ss:$16 sps:$4 sm:$0xff]   ;;  %v19854_v40 = vld [vmem:[%s28564_s3 + $0x1108] ss:$16 sps:$4 sm:$0xff]  }
 0x6c0   : > { %10811 = vmatprep.subr.bf16.mxu1 %v19832_v58  ;;  %v19855_v58 = vld [vmem:[%s28564_s3 + $0x1124] ss:$16 sps:$4 sm:$0xff]  }
 0x6c2   : > { %10374 = vmatpush1.bf16.msra.mxu0 %v19833_v1  ;;  %v19856_v1 = vld [vmem:[%s28564_s3 + $0x112c] ss:$16 sps:$4 sm:$0xff]  }
 0x6c3   : > { %10812 = vmatpush1.bf16.msra.mxu1 %v19834_v22  ;;  %10375 = vmatprep.subr.bf16.mxu0 %v19835_v48  ;;  %v19857_v22 = vld [vmem:[%s28564_s3 + $0x1120] ss:$16 sps:$4 sm:$0xff]   ;;  %v19858_v48 = vld [vmem:[%s28564_s3 + $0x1128] ss:$16 sps:$4 sm:$0xff]  }
 0x6c4   : > { %10347 = vmatmul.mubr.bf16.gmra.mrb[184].mxu0 %v22112_v47  ;;  %10813 = vmatprep.subr.bf16.mxu1 %v19836_v56  ;;  %v19859_v56 = vld [vmem:[%s28564_s3 + $0x1144] ss:$16 sps:$4 sm:$0xff]  }
 0x6c5   : > { %10785 = vmatmul.mubr.bf16.gmra.mrb[184].mxu1 %v22112_v47  ;;  %10356 = vmatprep.mubr.bf16.mxu0 %v22191_v34  ;;  %v19840_v47 = vld [vmem:[%s28564_s3 + $0x10ac] ss:$16 sps:$4 sm:$0xff]  }
 0x6c6   : > { %10376 = vmatpush1.bf16.msra.mxu0 %v19837_v37  ;;  %10794 = vmatprep.mubr.bf16.mxu1 %v22191_v34  ;;  %v19842_v34 = vld [vmem:[%s28564_s3 + $0x10a8] ss:$16 sps:$4 sm:$0xff]   ;;  %v19860_v37 = vld [vmem:[%s28564_s3 + $0x114c] ss:$16 sps:$4 sm:$0xff]  }
 0x6c7   : > { %10814 = vmatpush1.bf16.msra.mxu1 %v19838_v21  ;;  %10377 = vmatprep.subr.bf16.mxu0 %v19839_v53  ;;  %v19861_v21 = vld [vmem:[%s28564_s3 + $0x1140] ss:$16 sps:$4 sm:$0xff]   ;;  %v19862_v53 = vld [vmem:[%s28564_s3 + $0x1148] ss:$16 sps:$4 sm:$0xff]  }
 0x6c8   : > { %10815 = vmatprep.subr.bf16.mxu1 %v19840_v47  ;;  %v19863_v47 = vld [vmem:[%s28564_s3 + $0x1164] ss:$16 sps:$4 sm:$0xff]  }
 0x6ca   : > { %10378 = vmatpush1.bf16.msra.mxu0 %v19841_v7  ;;  %v19864_v7 = vld [vmem:[%s28564_s3 + $0x116c] ss:$16 sps:$4 sm:$0xff]  }
 0x6cb   : > { %10816 = vmatpush1.bf16.msra.mxu1 %v19842_v34  ;;  %10379 = vmatprep.subr.bf16.mxu0 %v19843_v35  ;;  %v19865_v34 = vld [vmem:[%s28564_s3 + $0x1160] ss:$16 sps:$4 sm:$0xff]   ;;  %v19866_v35 = vld [vmem:[%s28564_s3 + $0x1168] ss:$16 sps:$4 sm:$0xff]  }
 0x6cc   : > { %10357 = vmatmul.mubr.bf16.gmra.mrb[188].mxu0 %v22171_v20  ;;  %10817 = vmatprep.subr.bf16.mxu1 %v19844_v33  ;;  %v19867_v33 = vld [vmem:[%s28564_s3 + $0x1184] ss:$16 sps:$4 sm:$0xff]  }
 0x6cd   : > { %10795 = vmatmul.mubr.bf16.gmra.mrb[188].mxu1 %v22171_v20  ;;  %10399 = vmatprep.mubr.bf16.mxu0 %v21756_v11  ;;  %v19848_v20 = vld [vmem:[%s28564_s3 + $0x10ec] ss:$16 sps:$4 sm:$0xff]  }
 0x6ce   : > { %10380 = vmatpush1.bf16.msra.mxu0 %v19845_v23  ;;  %10837 = vmatprep.mubr.bf16.mxu1 %v21756_v11  ;;  %v19850_v11 = vld [vmem:[%s28564_s3 + $0x10e8] ss:$16 sps:$4 sm:$0xff]   ;;  %v19868_v23 = vld [vmem:[%s28564_s3 + $0x118c] ss:$16 sps:$4 sm:$0xff]  }
 0x6cf   : > { %10818 = vmatpush1.bf16.msra.mxu1 %v19846_v52  ;;  %10381 = vmatprep.subr.bf16.mxu0 %v19847_v49  ;;  %v19869_v52 = vld [vmem:[%s28564_s3 + $0x1180] ss:$16 sps:$4 sm:$0xff]   ;;  %v19870_v49 = vld [vmem:[%s28564_s3 + $0x1188] ss:$16 sps:$4 sm:$0xff]  }
 0x6d0   : > { %10819 = vmatprep.subr.bf16.mxu1 %v19848_v20  ;;  %v19871_v20 = vld [vmem:[%s28564_s3 + $0x11a4] ss:$16 sps:$4 sm:$0xff]  }
 0x6d2   : > { %10382 = vmatpush1.bf16.msra.mxu0 %v19849_v36  ;;  %v19872_v36 = vld [vmem:[%s28564_s3 + $0x11ac] ss:$16 sps:$4 sm:$0xff]  }
 0x6d3   : > { %10820 = vmatpush1.bf16.msra.mxu1 %v19850_v11  ;;  %10383 = vmatprep.subr.bf16.mxu0 %v19851_v27  ;;  %v19873_v11 = vld [vmem:[%s28564_s3 + $0x11a0] ss:$16 sps:$4 sm:$0xff]   ;;  %v19874_v27 = vld [vmem:[%s28564_s3 + $0x11a8] ss:$16 sps:$4 sm:$0xff]  }
 0x6d4   : > { %10821 = vmatprep.subr.bf16.mxu1 %v19852_v59  ;;  %v19875_v59 = vld [vmem:[%s28564_s3 + $0x11c4] ss:$16 sps:$4 sm:$0xff]  }
 0x6d6   : > { %10384 = vmatpush1.bf16.msra.mxu0 %v19853_v60  ;;  %v19876_v60 = vld [vmem:[%s28564_s3 + $0x11cc] ss:$16 sps:$4 sm:$0xff]  }
 0x6d7   : > { %10822 = vmatpush1.bf16.msra.mxu1 %v19854_v40  ;;  %10385 = vmatprep.subr.bf16.mxu0 %v19855_v58  ;;  %v19877_v40 = vld [vmem:[%s28564_s3 + $0x11c0] ss:$16 sps:$4 sm:$0xff]   ;;  %v19878_v58 = vld [vmem:[%s28564_s3 + $0x11c8] ss:$16 sps:$4 sm:$0xff]  }
 0x6d8   : > { %10823 = vmatprep.subr.bf16.mxu1 %v19856_v1  ;;  %v19879_v1 = vld [vmem:[%s28564_s3 + $0x11e4] ss:$16 sps:$4 sm:$0xff]  }
 0x6da   : > { %10386 = vmatpush1.bf16.msra.mxu0 %v19857_v22  ;;  %v19880_v22 = vld [vmem:[%s28564_s3 + $0x11ec] ss:$16 sps:$4 sm:$0xff]  }
 0x6db   : > { %10824 = vmatpush1.bf16.msra.mxu1 %v19858_v48  ;;  %10387 = vmatprep.subr.bf16.mxu0 %v19859_v56  ;;  %v19881_v48 = vld [vmem:[%s28564_s3 + $0x11e0] ss:$16 sps:$4 sm:$0xff]   ;;  %v19882_v56 = vld [vmem:[%s28564_s3 + $0x11e8] ss:$16 sps:$4 sm:$0xff]  }
 0x6dc   : > { %10825 = vmatprep.subr.bf16.mxu1 %v19860_v37  ;;  %v19883_v37 = vld [vmem:[%s28564_s3 + $0x1204] ss:$16 sps:$4 sm:$0xff]  }
 0x6de   : > { %10388 = vmatpush1.bf16.msra.mxu0 %v19861_v21  ;;  %v19884_v21 = vld [vmem:[%s28564_s3 + $0x120c] ss:$16 sps:$4 sm:$0xff]  }
 0x6df   : > { %10826 = vmatpush1.bf16.msra.mxu1 %v19862_v53  ;;  %10389 = vmatprep.subr.bf16.mxu0 %v19863_v47  ;;  %v19885_v53 = vld [vmem:[%s28564_s3 + $0x1200] ss:$16 sps:$4 sm:$0xff]   ;;  %v19886_v47 = vld [vmem:[%s28564_s3 + $0x1208] ss:$16 sps:$4 sm:$0xff]  }
 0x6e0   : > { %10827 = vmatprep.subr.bf16.mxu1 %v19864_v7  ;;  %v19887_v7 = vld [vmem:[%s28564_s3 + $0x1224] ss:$16 sps:$4 sm:$0xff]  }
 0x6e2   : > { %10390 = vmatpush1.bf16.msra.mxu0 %v19865_v34  ;;  %v19889_v34 = vld [vmem:[%s28564_s3 + $0x1220] ss:$16 sps:$4 sm:$0xff]  }
 0x6e3   : > { %10828 = vmatpush1.bf16.msra.mxu1 %v19866_v35  ;;  %10391 = vmatprep.subr.bf16.mxu0 %v19867_v33  ;;  %v19891_v35 = vld [vmem:[%s28564_s3 + $0x1244] ss:$16 sps:$4 sm:$0xff]   ;;  %v19892_v33 = vld [vmem:[%s28564_s3 + $0x124c] ss:$16 sps:$4 sm:$0xff]  }
 0x6e4   : > { %10829 = vmatprep.subr.bf16.mxu1 %v19868_v23  ;;  %v19893_v23 = vld [vmem:[%s28564_s3 + $0x1240] ss:$16 sps:$4 sm:$0xff]  }
 0x6e6   : > { %10392 = vmatpush1.bf16.msra.mxu0 %v19869_v52  ;;  %v19894_v52 = vld [vmem:[%s28564_s3 + $0x1248] ss:$16 sps:$4 sm:$0xff]  }
 0x6e7   : > { %10830 = vmatpush1.bf16.msra.mxu1 %v19870_v49  ;;  %10393 = vmatprep.subr.bf16.mxu0 %v19871_v20  ;;  %v19895_v49 = vld [vmem:[%s28564_s3 + $0x1264] ss:$16 sps:$4 sm:$0xff]   ;;  %v19897_v20 = vld [vmem:[%s28564_s3 + $0x1260] ss:$16 sps:$4 sm:$0xff]  }
 0x6e8   : > { %10831 = vmatprep.subr.bf16.mxu1 %v19872_v36  ;;  %v19899_v36 = vld [vmem:[%s28564_s3 + $0x1284] ss:$16 sps:$4 sm:$0xff]  }
 0x6ea   : > { %10394 = vmatpush1.bf16.msra.mxu0 %v19873_v11  ;;  %v19900_v11 = vld [vmem:[%s28564_s3 + $0x128c] ss:$16 sps:$4 sm:$0xff]  }
 0x6eb   : > { %10832 = vmatpush1.bf16.msra.mxu1 %v19874_v27  ;;  %10395 = vmatprep.subr.bf16.mxu0 %v19875_v59  ;;  %v29156_v59 = vld [vmem:[#allocation30_spill] sm:$0xff] }
 0x6ec   : > { %10833 = vmatprep.subr.bf16.mxu1 %v19876_v60  ;;  %v29157_v60 = vld [vmem:[#allocation81_spill] sm:$0xff] }
 0x6ee   : > { %10396 = vmatpush1.bf16.msra.mxu0 %v19877_v40  ;;  %v29158_v40 = vmax.f32 %v29156_v59, %v29157_v60  ;;  %v19905_v59 = vld [vmem:[%s28564_s3 + $0x12a0] ss:$16 sps:$4 sm:$0xff]  }
 0x6ef   : > { %10834 = vmatpush1.bf16.msra.mxu1 %v19878_v58  ;;  %10397 = vmatprep.subr.bf16.mxu0 %v19879_v1 }
 0x6f0   : > { %10835 = vmatprep.subr.bf16.mxu1 %v19880_v22 }
 0x6f2   : > { %10398 = vmatpush1.bf16.msra.mxu0 %v19881_v48  ;;  %v19901_v48 = vld [vmem:[%s28564_s3 + $0x1280] ss:$16 sps:$4 sm:$0xff]  }
 0x6f3   : > { %10836 = vmatpush1.bf16.msra.mxu1 %v19882_v56  ;;  %10440 = vmatprep.subr.bf16.mxu0 %v19883_v37  ;;  %v29159_v56 = vmax.f32 %v23734_v13, %v25036_v41  ;;  %v29160_v37 = vld [vmem:[#allocation72_spill] sm:$0xff]  ;;  %v29165_v41 = vmax.f32 %v23744_v32, %v25050_v46  ;;  %v29168_v46 = vld [vmem:[#allocation31_spill] sm:$0xff] }
 0x6f4   : > { %10878 = vmatprep.subr.bf16.mxu1 %v19884_v21  ;;  %v29161_v21 = vld [vmem:[#allocation40_spill] sm:$0xff] }
 0x6f5   : > { %10400 = vmatmul.mubr.bf16.vlgmr.msra.gmra.mrb[176].mxu0 %v21747_v63  ;;  %v19903_v13 = vld [vmem:[%s28564_s3 + $0x12a4] ss:$16 sps:$4 sm:$0xff]  }
 0x6f6   : > { %10838 = vmatmul.mubr.bf16.vlgmr.msra.gmra.mrb[176].mxu1 %v21747_v63  ;;  %10409 = vmatprep.mubr.bf16.mxu0 %v21825_v15  ;;  %v19888_v63 = vld [vmem:[%s28564_s3 + $0x122c] ss:$16 sps:$4 sm:$0xff]  }
 0x6f7   : > { %10441 = vmatpush1.bf16.msra.mxu0 %v19885_v53  ;;  %10847 = vmatprep.mubr.bf16.mxu1 %v21825_v15  ;;  %v19890_v15 = vld [vmem:[%s28564_s3 + $0x1228] ss:$16 sps:$4 sm:$0xff]   ;;  %v29162_v53 = vmax.f32 %v29160_v37, %v29161_v21  ;;  %v19909_v21 = vld [vmem:[%s28564_s3 + $0x12c0] ss:$16 sps:$4 sm:$0xff]  }
 0x6f8   : > { %10879 = vmatpush1.bf16.msra.mxu1 %v19886_v47  ;;  %10442 = vmatprep.subr.bf16.mxu0 %v19887_v7 }
 0x6f9   : > { %10880 = vmatprep.subr.bf16.mxu1 %v19888_v63 }
 0x6fb   : > { %10443 = vmatpush1.bf16.msra.mxu0 %v19889_v34  ;;  %v19902_v34 = vld [vmem:[%s28564_s3 + $0x1288] ss:$16 sps:$4 sm:$0xff]  }
 0x6fc   : > { %10881 = vmatpush1.bf16.msra.mxu1 %v19890_v15  ;;  %10444 = vmatprep.subr.bf16.mxu0 %v19891_v35  ;;  %v29163_v15 = vld [vmem:[#allocation38_spill] sm:$0xff] }
 0x6fd   : > { %10410 = vmatmul.mubr.bf16.gmra.mrb[180].mxu0 %v21818_v24  ;;  %10882 = vmatprep.subr.bf16.mxu1 %v19892_v33 }
 0x6fe   : > { %10848 = vmatmul.mubr.bf16.gmra.mrb[180].mxu1 %v21818_v24  ;;  %10419 = vmatprep.mubr.bf16.mxu0 %v21897_v16  ;;  %v19896_v24 = vld [vmem:[%s28564_s3 + $0x126c] ss:$16 sps:$4 sm:$0xff]  }
 0x6ff   : > { %10445 = vmatpush1.bf16.msra.mxu0 %v19893_v23  ;;  %10857 = vmatprep.mubr.bf16.mxu1 %v21897_v16  ;;  %v19898_v16 = vld [vmem:[%s28564_s3 + $0x1268] ss:$16 sps:$4 sm:$0xff]  }
 0x700   : > { %10883 = vmatpush1.bf16.msra.mxu1 %v19894_v52  ;;  %10446 = vmatprep.subr.bf16.mxu0 %v19895_v49  ;;  %v19904_v49 = vld [vmem:[%s28564_s3 + $0x12ac] ss:$16 sps:$4 sm:$0xff]  }
 0x701   : > { %10884 = vmatprep.subr.bf16.mxu1 %v19896_v24 }
 0x703   : > { %10447 = vmatpush1.bf16.msra.mxu0 %v19897_v20  ;;  %v29167_v20 = vmax.f32 %v23751_v31, %v25064_v51  ;;  %v19907_v31 = vld [vmem:[%s28564_s3 + $0x12c4] ss:$16 sps:$4 sm:$0xff]  }
 0x704   : > { %10885 = vmatpush1.bf16.msra.mxu1 %v19898_v16  ;;  %10448 = vmatprep.subr.bf16.mxu0 %v19899_v36  ;;  %v29169_v36 = vld [vmem:[#allocation41_spill] sm:$0xff]  ;;  %v29171_v51 = vld [vmem:[#allocation22_spill] sm:$0xff] }
 0x705   : > { %10420 = vmatmul.mubr.bf16.gmra.mrb[184].mxu0 %v21889_v19  ;;  %10886 = vmatprep.subr.bf16.mxu1 %v19900_v11  ;;  %v9712_v27 = vpop.f32.mrb[160].mxu0  ;;  %v29170_v11 = vmax.f32 %v29168_v46, %v29169_v36  ;;  %v19912_v46 = vld [vmem:[%s28564_s3 + $0x12ec] ss:$16 sps:$4 sm:$0xff]  }
 0x706   : > { %10858 = vmatmul.mubr.bf16.gmra.mrb[184].mxu1 %v21889_v19  ;;  %10429 = vmatprep.mubr.bf16.mxu0 %v21966_v26  ;;  %v26427_v58 = vmax.f32 %v29158_v40, %v9712_v27  ;;  %v10150_v1 = vpop.f32.mrb[160].mxu1  ;;  %v9714_v22 = vpop.f32.mrb[161].mxu0  ;;  %v29172_v40 = vld [vmem:[#allocation73_spill] sm:$0xff] }
 0x707   : > { %10449 = vmatpush1.bf16.msra.mxu0 %v19901_v48  ;;  %10867 = vmatprep.mubr.bf16.mxu1 %v21966_v26  ;;  %v26436_v19 = vmax.f32 %v29159_v56, %v10150_v1  ;;  %v26441_v47 = vmax.f32 %v29162_v53, %v9714_v22  ;;  %v10152_v7 = vpop.f32.mrb[161].mxu1  ;;  %v9716_v63 = vpop.f32.mrb[162].mxu0  ;;  %v29164_v26 = vmax.f32 %v23739_v38, %v29163_v15  ;;  %v29173_v1 = vld [vmem:[#allocation82_spill] sm:$0xff] }
 0x708   : > { %10887 = vmatpush1.bf16.msra.mxu1 %v19902_v34  ;;  %10450 = vmatprep.subr.bf16.mxu0 %v19903_v13  ;;  %v26457_v33 = vmax.f32 %v29165_v41, %v9716_v63  ;;  %v10154_v23 = vpop.f32.mrb[162].mxu1  ;;  %v9718_v52 = vpop.f32.mrb[163].mxu0  ;;  %v29166_v38 = vmax.f32 %v23749_v29, %v25062_v62  ;;  %v19906_v29 = vld [vmem:[%s28564_s3 + $0x12a8] ss:$16 sps:$4 sm:$0xff]   ;;  %v19908_v62 = vld [vmem:[%s28564_s3 + $0x12cc] ss:$16 sps:$4 sm:$0xff]   ;;  %v29174_v22 = vmax.f32 %v29172_v40, %v29173_v1 }
 0x709   : > { %v26449_v35 = vmax.f32 %v29164_v26, %v10152_v7  ;;  %10888 = vmatprep.subr.bf16.mxu1 %v19904_v49  ;;  %v26470_v16 = vmax.f32 %v29167_v20, %v9718_v52  ;;  %v10156_v32 = vpop.f32.mrb[163].mxu1  ;;  %v29175_v53 = vmax.f32 %v23778_v43, %v25096_v28  ;;  %v29176_v63 = vld [vmem:[#allocation32_spill] sm:$0xff]  ;;  %v29177_v34 = vld [vmem:[#allocation42_spill] sm:$0xff]  ;;  %v29181_v28 = vmax.f32 %v23788_v8, %v25110_v12  ;;  %v29186_v12 = vld [vmem:[#allocation33_spill] sm:$0xff] }
 0x70a   : > { %v26465_v24 = vmax.f32 %v29166_v38, %v10154_v23  ;;  %v26475_v27 = vmax.f32 %v29170_v11, %v10156_v32  ;;  %v29178_v15 = vmax.f32 %v29176_v63, %v29177_v34  ;;  %v19910_v23 = vld [vmem:[%s28564_s3 + $0x12c8] ss:$16 sps:$4 sm:$0xff]   ;;  %v29179_v52 = vld [vmem:[#allocation4_spill] sm:$0xff]  ;;  %v29183_v11 = vld [vmem:[#allocation74_spill] sm:$0xff] }
 0x70b   : > { %10451 = vmatpush1.bf16.msra.mxu0 %v19905_v59  ;;  %v19911_v43 = vld [vmem:[%s28564_s3 + $0x12e4] ss:$16 sps:$4 sm:$0xff]   ;;  %v29184_v59 = vld [vmem:[#allocation43_spill] sm:$0xff]  ;;  %v19913_v40 = vld [vmem:[%s28564_s3 + $0x12e0] ss:$16 sps:$4 sm:$0xff]  }
 0x70c   : > { %10889 = vmatpush1.bf16.msra.mxu1 %v19906_v29  ;;  %10452 = vmatprep.subr.bf16.mxu0 %v19907_v31  ;;  %v29185_v29 = vmax.f32 %v29183_v11, %v29184_v59  ;;  %v19916_v1 = vld [vmem:[%s28564_s3 + $0x130c] ss:$16 sps:$4 sm:$0xff]   ;;  %v19917_v34 = vld [vmem:[%s28564_s3 + $0x1300] ss:$16 sps:$4 sm:$0xff]  }
 0x70d   : > { %10430 = vmatmul.mubr.bf16.gmra.mrb[188].mxu0 %v29171_v51  ;;  %10890 = vmatprep.subr.bf16.mxu1 %v19908_v62  ;;  %v9722_v60 = vpop.f32.mrb[164].mxu0  ;;  %v29199_v59 = vld [vmem:[#allocation47_spill] sm:$0xff] }
 0x70e   : > { %10868 = vmatmul.mubr.bf16.gmra.mrb[188].mxu1 %v29171_v51  ;;  %10472 = vmatprep.mubr.bf16.mxu0 %v21758_v14  ;;  %v26495_v48 = vmax.f32 %v29174_v22, %v9722_v60  ;;  %v10160_v56 = vpop.f32.mrb[164].mxu1  ;;  %v9724_v37 = vpop.f32.mrb[165].mxu0  ;;  %v29187_v51 = vld [vmem:[#allocation44_spill] sm:$0xff] }
 0x70f   : > { %10453 = vmatpush1.bf16.msra.mxu0 %v19909_v21  ;;  %10910 = vmatprep.mubr.bf16.mxu1 %v21758_v14  ;;  %v26504_v7 = vmax.f32 %v29175_v53, %v10160_v56  ;;  %v26509_v26 = vmax.f32 %v29178_v15, %v9724_v37  ;;  %v10162_v13 = vpop.f32.mrb[165].mxu1  ;;  %v9726_v41 = vpop.f32.mrb[166].mxu0  ;;  %v29180_v14 = vmax.f32 %v23783_v17, %v29179_v52  ;;  %v29189_v56 = vld [vmem:[#allocation5_spill] sm:$0xff]  ;;  %v29194_v52 = vld [vmem:[#allocation6_spill] sm:$0xff] }
 0x710   : > { %10891 = vmatpush1.bf16.msra.mxu1 %v19910_v23  ;;  %10454 = vmatprep.subr.bf16.mxu0 %v19911_v43  ;;  %v26525_v38 = vmax.f32 %v29181_v28, %v9726_v41  ;;  %v10164_v20 = vpop.f32.mrb[166].mxu1  ;;  %v9728_v32 = vpop.f32.mrb[167].mxu0  ;;  %v29182_v17 = vmax.f32 %v23793_v42, %v25122_v44  ;;  %v29188_v62 = vmax.f32 %v29186_v12, %v29187_v51  ;;  %v19914_v42 = vld [vmem:[%s28564_s3 + $0x12e8] ss:$16 sps:$4 sm:$0xff]   ;;  %v19915_v44 = vld [vmem:[%s28564_s3 + $0x1304] ss:$16 sps:$4 sm:$0xff]  }
 0x711   : > { %v26517_v49 = vmax.f32 %v29180_v14, %v10162_v13  ;;  %10892 = vmatprep.subr.bf16.mxu1 %v19912_v46  ;;  %v26538_v31 = vmax.f32 %v29185_v29, %v9728_v32  ;;  %v10166_v8 = vpop.f32.mrb[167].mxu1  ;;  %v29190_v37 = vmax.f32 %v23814_v18, %v29189_v56  ;;  %v29191_v15 = vld [vmem:[#allocation45_spill] sm:$0xff]  ;;  %v29193_v23 = vld [vmem:[#allocation75_spill] sm:$0xff]  ;;  %v29196_v32 = vld [vmem:[#allocation34_spill] sm:$0xff]  ;;  %v29200_v29 = vmax.f32 %v23828_v50, %v29199_v59 }
 0x712   : > { %v26533_v36 = vmax.f32 %v29182_v17, %v10164_v20  ;;  %v26543_v60 = vmax.f32 %v29188_v62, %v10166_v8  ;;  %v29192_v13 = vmax.f32 %v23819_v5, %v29191_v15  ;;  %v29195_v14 = vmax.f32 %v29193_v23, %v29194_v52  ;;  %v19918_v20 = vld [vmem:[%s28564_s3 + $0x1308] ss:$16 sps:$4 sm:$0xff]   ;;  %v29197_v46 = vld [vmem:[#allocation46_spill] sm:$0xff]  ;;  %v19920_v62 = vld [vmem:[%s28564_s3 + $0x132c] ss:$16 sps:$4 sm:$0xff]  }
 0x713   : > { %10455 = vmatpush1.bf16.msra.mxu0 %v19913_v40  ;;  %v29198_v17 = vmax.f32 %v29196_v32, %v29197_v46  ;;  %v19919_v5 = vld [vmem:[%s28564_s3 + $0x1324] ss:$16 sps:$4 sm:$0xff]   ;;  %v19921_v23 = vld [vmem:[%s28564_s3 + $0x1320] ss:$16 sps:$4 sm:$0xff]   ;;  %v19922_v52 = vld [vmem:[%s28564_s3 + $0x1328] ss:$16 sps:$4 sm:$0xff]  }
 0x714   : > { %10893 = vmatpush1.bf16.msra.mxu1 %v19914_v42  ;;  %10456 = vmatprep.subr.bf16.mxu0 %v19915_v44  ;;  %v29201_v40 = vld [vmem:[#allocation76_spill] sm:$0xff]  ;;  %v29202_v42 = vld [vmem:[#allocation7_spill] sm:$0xff]  ;;  %v29211_v32 = vld [vmem:[#allocation49_spill] sm:$0xff] }
 0x715   : > { %10894 = vmatprep.subr.bf16.mxu1 %v19916_v1  ;;  %v9732_v22 = vpop.f32.mrb[168].mxu0  ;;  %v29203_v44 = vmax.f32 %v29201_v40, %v29202_v42  ;;  %v29205_v56 = vld [vmem:[#allocation48_spill] sm:$0xff]  ;;  %v29215_v40 = vld [vmem:[#allocation9_spill] sm:$0xff] }
 0x716   : > { %v26560_v21 = vmax.f32 %v29190_v37, %v9732_v22  ;;  %v10170_v53 = vpop.f32.mrb[168].mxu1  ;;  %v9734_v63 = vpop.f32.mrb[169].mxu0  ;;  %v29204_v22 = vld [vmem:[#allocation35_spill] sm:$0xff] }
 0x717   : > { %10457 = vmatpush1.bf16.msra.mxu0 %v19917_v34  ;;  %v26568_v41 = vmax.f32 %v29192_v13, %v10170_v53  ;;  %v26573_v43 = vmax.f32 %v29195_v14, %v9734_v63  ;;  %v10172_v18 = vpop.f32.mrb[169].mxu1  ;;  %v9736_v28 = vpop.f32.mrb[170].mxu0  ;;  %v29206_v37 = vmax.f32 %v29204_v22, %v29205_v56  ;;  %v29207_v63 = vld [vmem:[#allocation77_spill] sm:$0xff]  ;;  %v29208_v34 = vld [vmem:[#allocation8_spill] sm:$0xff] }
 0x718   : > { %10895 = vmatpush1.bf16.msra.mxu1 %v19918_v20  ;;  %v26581_v11 = vmax.f32 %v29198_v17, %v10172_v18  ;;  %10458 = vmatprep.subr.bf16.mxu0 %v19919_v5  ;;  %v26589_v8 = vmax.f32 %v29200_v29, %v9736_v28  ;;  %v10174_v12 = vpop.f32.mrb[170].mxu1  ;;  %v9738_v51 = vpop.f32.mrb[171].mxu0  ;;  %v29209_v15 = vmax.f32 %v29207_v63, %v29208_v34  ;;  %v19923_v14 = vld [vmem:[%s28564_s3 + $0x1344] ss:$16 sps:$4 sm:$0xff]   ;;  %v19924_v18 = vld [vmem:[%s28564_s3 + $0x134c] ss:$16 sps:$4 sm:$0xff]  }
 0x719   : > { %10896 = vmatprep.subr.bf16.mxu1 %v19920_v62  ;;  %v26597_v1 = vmax.f32 %v29203_v44, %v10174_v12  ;;  %v26602_v53 = vmax.f32 %v29206_v37, %v9738_v51  ;;  %v10176_v50 = vpop.f32.mrb[171].mxu1  ;;  %v29210_v20 = vld [vmem:[#allocation36_spill] sm:$0xff]  ;;  %v29213_v12 = vmax.f32 %v29132_v61, %v25209_v57  ;;  %v29214_v62 = vld [vmem:[#allocation37_spill] sm:$0xff]  ;;  %v29218_v63 = vld [vmem:[#allocation10_spill] sm:$0xff] }
 0x71a   : > { %v26607_v13 = vmax.f32 %v29209_v15, %v10176_v50  ;;  %v29212_v46 = vmax.f32 %v29210_v20, %v29211_v32  ;;  %v19925_v29 = vld [vmem:[%s28564_s3 + $0x1340] ss:$16 sps:$4 sm:$0xff]   ;;  %v29216_v42 = vmax.f32 %v29214_v62, %v29215_v40  ;;  %v19926_v37 = vld [vmem:[%s28564_s3 + $0x1348] ss:$16 sps:$4 sm:$0xff]   ;;  %v19927_v57 = vld [vmem:[%s28564_s3 + $0x1364] ss:$16 sps:$4 sm:$0xff]   ;;  %v29222_v20 = vmax.f32 %v23873_v54, %v25234_v9 }
 0x71b   : > { %10459 = vmatpush1.bf16.msra.mxu0 %v19921_v23  ;;  %v29217_v50 = vld [vmem:[#allocation79_spill] sm:$0xff]  ;;  %v19933_v9 = vld [vmem:[%s28564_s3 + $0x1380] ss:$16 sps:$4 sm:$0xff]  }
 0x71c   : > { %10897 = vmatpush1.bf16.msra.mxu1 %v19922_v52  ;;  %10460 = vmatprep.subr.bf16.mxu0 %v19923_v14  ;;  %v29219_v34 = vmax.f32 %v29217_v50, %v29218_v63  ;;  %v29220_v61 = vld [vmem:[#allocation51_spill] sm:$0xff]  ;;  %v19937_v40 = vld [vmem:[%s28564_s3 + $0x13a0] ss:$16 sps:$4 sm:$0xff]   ;;  %v19943_v63 = vld [vmem:[%s28564_s3 + $0x13e4] ss:$16 sps:$4 sm:$0xff]  }
 0x71d   : > { %10898 = vmatprep.subr.bf16.mxu1 %v19924_v18  ;;  %v9742_v28 = vpop.f32.mrb[172].mxu0  ;;  %v29221_v23 = vmax.f32 %v23868_v39, %v29220_v61  ;;  %v19930_v54 = vld [vmem:[%s28564_s3 + $0x1368] ss:$16 sps:$4 sm:$0xff]   ;;  %v19936_v62 = vld [vmem:[%s28564_s3 + $0x13ac] ss:$16 sps:$4 sm:$0xff]  }
 0x71e   : > { %v26624_v17 = vmax.f32 %v29212_v46, %v9742_v28  ;;  %v10180_v5 = vpop.f32.mrb[172].mxu1  ;;  %v9744_v59 = vpop.f32.mrb[173].mxu0  ;;  %v19928_v28 = vld [vmem:[%s28564_s3 + $0x136c] ss:$16 sps:$4 sm:$0xff]   ;;  %v29223_v46 = vmax.f32 %v29136_v6, %v25236_v0  ;;  %v19931_v6 = vld [vmem:[%s28564_s3 + $0x1384] ss:$16 sps:$4 sm:$0xff]  }
 0x71f   : > { %10461 = vmatpush1.bf16.msra.mxu0 %v19925_v29  ;;  %v26632_v51 = vmax.f32 %v29213_v12, %v10180_v5  ;;  %v26637_v44 = vmax.f32 %v29216_v42, %v9744_v59  ;;  %v10182_v22 = vpop.f32.mrb[173].mxu1  ;;  %v9746_v56 = vpop.f32.mrb[174].mxu0  ;;  %v29224_v59 = vmax.f32 %v29137_v3, %v25245_v55  ;;  %v19929_v12 = vld [vmem:[%s28564_s3 + $0x1360] ss:$16 sps:$4 sm:$0xff]   ;;  %v19932_v0 = vld [vmem:[%s28564_s3 + $0x138c] ss:$16 sps:$4 sm:$0xff]  }
 0x720   : > { %10899 = vmatpush1.bf16.msra.mxu1 %v19926_v37  ;;  %v26645_v15 = vmax.f32 %v29219_v34, %v10182_v22  ;;  %10462 = vmatprep.subr.bf16.mxu0 %v19927_v57  ;;  %v26653_v52 = vmax.f32 %v29221_v23, %v9746_v56  ;;  %v10184_v14 = vpop.f32.mrb[174].mxu1  ;;  %v9748_v18 = vpop.f32.mrb[175].mxu0  ;;  %v19934_v55 = vld [vmem:[%s28564_s3 + $0x1388] ss:$16 sps:$4 sm:$0xff]   ;;  %v19935_v3 = vld [vmem:[%s28564_s3 + $0x13a4] ss:$16 sps:$4 sm:$0xff]  }
 0x721   : > { %10900 = vmatprep.subr.bf16.mxu1 %v19928_v28  ;;  %v26661_v32 = vmax.f32 %v29222_v20, %v10184_v14  ;;  %v26666_v5 = vmax.f32 %v29223_v46, %v9748_v18  ;;  %v10186_v39 = vpop.f32.mrb[175].mxu1  ;;  %v19938_v42 = vld [vmem:[%s28564_s3 + $0x13a8] ss:$16 sps:$4 sm:$0xff]   ;;  %v19939_v22 = vld [vmem:[%s28564_s3 + $0x13c4] ss:$16 sps:$4 sm:$0xff]  }
 0x722   : > { %v26671_v29 = vmax.f32 %v29224_v59, %v10186_v39  ;;  %v19940_v56 = vld [vmem:[%s28564_s3 + $0x13cc] ss:$16 sps:$4 sm:$0xff]   ;;  %v19941_v37 = vld [vmem:[%s28564_s3 + $0x13c0] ss:$16 sps:$4 sm:$0xff]   ;;  %v19942_v50 = vld [vmem:[%s28564_s3 + $0x13c8] ss:$16 sps:$4 sm:$0xff]  }
 0x723   : > { %10463 = vmatpush1.bf16.msra.mxu0 %v19929_v12  ;;  %v19944_v34 = vld [vmem:[%s28564_s3 + $0x13ec] ss:$16 sps:$4 sm:$0xff]   ;;  %v19945_v57 = vld [vmem:[%s28564_s3 + $0x13e0] ss:$16 sps:$4 sm:$0xff]   ;;  %v19946_v61 = vld [vmem:[%s28564_s3 + $0x13e8] ss:$16 sps:$4 sm:$0xff]  }
 0x724   : > { %10901 = vmatpush1.bf16.msra.mxu1 %v19930_v54  ;;  %10464 = vmatprep.subr.bf16.mxu0 %v19931_v6  ;;  %v19947_v23 = vld [vmem:[%s28564_s3 + $0x1404] ss:$16 sps:$4 sm:$0xff]   ;;  %v19948_v14 = vld [vmem:[%s28564_s3 + $0x140c] ss:$16 sps:$4 sm:$0xff]   ;;  %v19949_v18 = vld [vmem:[%s28564_s3 + $0x1400] ss:$16 sps:$4 sm:$0xff]  }
 0x725   : > { %10902 = vmatprep.subr.bf16.mxu1 %v19932_v0  ;;  %v19950_v28 = vld [vmem:[%s28564_s3 + $0x1408] ss:$16 sps:$4 sm:$0xff]   ;;  %v19951_v20 = vld [vmem:[%s28564_s3 + $0x1424] ss:$16 sps:$4 sm:$0xff]   ;;  %v19953_v46 = vld [vmem:[%s28564_s3 + $0x1420] ss:$16 sps:$4 sm:$0xff]  }
 0x726   : > { %v19955_v39 = vld [vmem:[%s28564_s3 + $0x1444] ss:$16 sps:$4 sm:$0xff]   ;;  %v19956_v59 = vld [vmem:[%s28564_s3 + $0x144c] ss:$16 sps:$4 sm:$0xff]   ;;  %v19957_v12 = vld [vmem:[%s28564_s3 + $0x1440] ss:$16 sps:$4 sm:$0xff]  }
 0x727   : > { %10465 = vmatpush1.bf16.msra.mxu0 %v19933_v9  ;;  %v19958_v54 = vld [vmem:[%s28564_s3 + $0x1448] ss:$16 sps:$4 sm:$0xff]   ;;  %v19959_v6 = vld [vmem:[%s28564_s3 + $0x1464] ss:$16 sps:$4 sm:$0xff]   ;;  %v19961_v0 = vld [vmem:[%s28564_s3 + $0x1460] ss:$16 sps:$4 sm:$0xff]  }
 0x728   : > { %10903 = vmatpush1.bf16.msra.mxu1 %v19934_v55  ;;  %10466 = vmatprep.subr.bf16.mxu0 %v19935_v3  ;;  %v19963_v9 = vld [vmem:[%s28564_s3 + $0x1484] ss:$16 sps:$4 sm:$0xff]   ;;  %v19964_v55 = vld [vmem:[%s28564_s3 + $0x148c] ss:$16 sps:$4 sm:$0xff]  }
 0x729   : > { %10904 = vmatprep.subr.bf16.mxu1 %v19936_v62  ;;  %v29225_v3 = vld [vmem:[#allocation64_spill] sm:$0xff] }
 0x72a   : > { %v19965_v62 = vld [vmem:[%s28564_s3 + $0x1480] ss:$16 sps:$4 sm:$0xff]  }
 0x72b   : > { %10467 = vmatpush1.bf16.msra.mxu0 %v19937_v40  ;;  %v19966_v40 = vld [vmem:[%s28564_s3 + $0x1488] ss:$16 sps:$4 sm:$0xff]  }
 0x72c   : > { %10905 = vmatpush1.bf16.msra.mxu1 %v19938_v42  ;;  %10468 = vmatprep.subr.bf16.mxu0 %v19939_v22  ;;  %v19967_v42 = vld [vmem:[%s28564_s3 + $0x14a4] ss:$16 sps:$4 sm:$0xff]   ;;  %v19969_v22 = vld [vmem:[%s28564_s3 + $0x14a0] ss:$16 sps:$4 sm:$0xff]  }
 0x72d   : > { %10906 = vmatprep.subr.bf16.mxu1 %v19940_v56  ;;  %v19970_v56 = vld [vmem:[%s28564_s3 + $0x14a8] ss:$16 sps:$4 sm:$0xff]  }
 0x72f   : > { %10469 = vmatpush1.bf16.msra.mxu0 %v19941_v37  ;;  %v19971_v37 = vld [vmem:[%s28564_s3 + $0x14c4] ss:$16 sps:$4 sm:$0xff]  }
 0x730   : > { %10907 = vmatpush1.bf16.msra.mxu1 %v19942_v50  ;;  %10470 = vmatprep.subr.bf16.mxu0 %v19943_v63  ;;  %v29226_v50 = vld [vmem:[#allocation63_spill] sm:$0xff] }
 0x731   : > { %10908 = vmatprep.subr.bf16.mxu1 %v19944_v34  ;;  %v19972_v63 = vld [vmem:[%s28564_s3 + $0x14cc] ss:$16 sps:$4 sm:$0xff]   ;;  %v29227_v34 = vld [vmem:[#allocation24_spill] sm:$0xff] }
 0x733   : > { %10471 = vmatpush1.bf16.msra.mxu0 %v19945_v57  ;;  %v19973_v57 = vld [vmem:[%s28564_s3 + $0x14c0] ss:$16 sps:$4 sm:$0xff]  }
 0x734   : > { %10909 = vmatpush1.bf16.msra.mxu1 %v19946_v61  ;;  %10513 = vmatprep.subr.bf16.mxu0 %v19947_v23  ;;  %v19974_v61 = vld [vmem:[%s28564_s3 + $0x14c8] ss:$16 sps:$4 sm:$0xff]   ;;  %v19975_v23 = vld [vmem:[%s28564_s3 + $0x14e4] ss:$16 sps:$4 sm:$0xff]  }
 0x735   : > { %10951 = vmatprep.subr.bf16.mxu1 %v19948_v14  ;;  %v19976_v14 = vld [vmem:[%s28564_s3 + $0x14ec] ss:$16 sps:$4 sm:$0xff]  }
 0x736   : > { %10473 = vmatmul.mubr.bf16.vlgmr.msra.gmra.mrb[176].mxu0 %v29075_v10 }
 0x737   : > { %10911 = vmatmul.mubr.bf16.vlgmr.msra.gmra.mrb[176].mxu1 %v29075_v10  ;;  %10482 = vmatprep.mubr.bf16.mxu0 %v29076_v4  ;;  %v19952_v10 = vld [vmem:[%s28564_s3 + $0x142c] ss:$16 sps:$4 sm:$0xff]  }
 0x738   : > { %10514 = vmatpush1.bf16.msra.mxu0 %v19949_v18  ;;  %10920 = vmatprep.mubr.bf16.mxu1 %v29076_v4  ;;  %v19954_v4 = vld [vmem:[%s28564_s3 + $0x1428] ss:$16 sps:$4 sm:$0xff]   ;;  %v19977_v18 = vld [vmem:[%s28564_s3 + $0x14e0] ss:$16 sps:$4 sm:$0xff]  }
 0x739   : > { %10952 = vmatpush1.bf16.msra.mxu1 %v19950_v28  ;;  %10515 = vmatprep.subr.bf16.mxu0 %v19951_v20  ;;  %v19978_v28 = vld [vmem:[%s28564_s3 + $0x14e8] ss:$16 sps:$4 sm:$0xff]   ;;  %v19979_v20 = vld [vmem:[%s28564_s3 + $0x1504] ss:$16 sps:$4 sm:$0xff]  }
 0x73a   : > { %10953 = vmatprep.subr.bf16.mxu1 %v19952_v10  ;;  %v19980_v10 = vld [vmem:[%s28564_s3 + $0x150c] ss:$16 sps:$4 sm:$0xff]  }
 0x73c   : > { %10516 = vmatpush1.bf16.msra.mxu0 %v19953_v46  ;;  %v19981_v46 = vld [vmem:[%s28564_s3 + $0x1500] ss:$16 sps:$4 sm:$0xff]  }
 0x73d   : > { %10954 = vmatpush1.bf16.msra.mxu1 %v19954_v4  ;;  %10517 = vmatprep.subr.bf16.mxu0 %v19955_v39  ;;  %v19982_v4 = vld [vmem:[%s28564_s3 + $0x1508] ss:$16 sps:$4 sm:$0xff]   ;;  %v19983_v39 = vld [vmem:[%s28564_s3 + $0x1524] ss:$16 sps:$4 sm:$0xff]  }
 0x73e   : > { %10483 = vmatmul.mubr.bf16.gmra.mrb[180].mxu0 %v29077_v2  ;;  %10955 = vmatprep.subr.bf16.mxu1 %v19956_v59  ;;  %v19984_v59 = vld [vmem:[%s28564_s3 + $0x152c] ss:$16 sps:$4 sm:$0xff]  }
 0x73f   : > { %10921 = vmatmul.mubr.bf16.gmra.mrb[180].mxu1 %v29077_v2  ;;  %10492 = vmatprep.mubr.bf16.mxu0 %v29078_v25  ;;  %v19960_v2 = vld [vmem:[%s28564_s3 + $0x146c] ss:$16 sps:$4 sm:$0xff]  }
 0x740   : > { %10518 = vmatpush1.bf16.msra.mxu0 %v19957_v12  ;;  %10930 = vmatprep.mubr.bf16.mxu1 %v29078_v25  ;;  %v19962_v25 = vld [vmem:[%s28564_s3 + $0x1468] ss:$16 sps:$4 sm:$0xff]   ;;  %v19985_v12 = vld [vmem:[%s28564_s3 + $0x1520] ss:$16 sps:$4 sm:$0xff]  }
 0x741   : > { %10956 = vmatpush1.bf16.msra.mxu1 %v19958_v54  ;;  %10519 = vmatprep.subr.bf16.mxu0 %v19959_v6  ;;  %v19986_v54 = vld [vmem:[%s28564_s3 + $0x1528] ss:$16 sps:$4 sm:$0xff]   ;;  %v19987_v6 = vld [vmem:[%s28564_s3 + $0x1544] ss:$16 sps:$4 sm:$0xff]  }
 0x742   : > { %10957 = vmatprep.subr.bf16.mxu1 %v19960_v2  ;;  %v19988_v2 = vld [vmem:[%s28564_s3 + $0x154c] ss:$16 sps:$4 sm:$0xff]  }
 0x744   : > { %10520 = vmatpush1.bf16.msra.mxu0 %v19961_v0  ;;  %v19989_v0 = vld [vmem:[%s28564_s3 + $0x1540] ss:$16 sps:$4 sm:$0xff]  }
 0x745   : > { %10958 = vmatpush1.bf16.msra.mxu1 %v19962_v25  ;;  %10521 = vmatprep.subr.bf16.mxu0 %v19963_v9  ;;  %v19990_v25 = vld [vmem:[%s28564_s3 + $0x1548] ss:$16 sps:$4 sm:$0xff]   ;;  %v19991_v9 = vld [vmem:[%s28564_s3 + $0x1564] ss:$16 sps:$4 sm:$0xff]  }
 0x746   : > { %10493 = vmatmul.mubr.bf16.gmra.mrb[184].mxu0 %v29079_v30  ;;  %10959 = vmatprep.subr.bf16.mxu1 %v19964_v55  ;;  %v19992_v55 = vld [vmem:[%s28564_s3 + $0x156c] ss:$16 sps:$4 sm:$0xff]  }
 0x747   : > { %10931 = vmatmul.mubr.bf16.gmra.mrb[184].mxu1 %v29079_v30  ;;  %10502 = vmatprep.mubr.bf16.mxu0 %v29225_v3  ;;  %v19968_v30 = vld [vmem:[%s28564_s3 + $0x14ac] ss:$16 sps:$4 sm:$0xff]  }
 0x748   : > { %10522 = vmatpush1.bf16.msra.mxu0 %v19965_v62  ;;  %10940 = vmatprep.mubr.bf16.mxu1 %v29225_v3  ;;  %v19993_v3 = vld [vmem:[%s28564_s3 + $0x1560] ss:$16 sps:$4 sm:$0xff]   ;;  %v19994_v62 = vld [vmem:[%s28564_s3 + $0x1568] ss:$16 sps:$4 sm:$0xff]  }
 0x749   : > { %10960 = vmatpush1.bf16.msra.mxu1 %v19966_v40  ;;  %10523 = vmatprep.subr.bf16.mxu0 %v19967_v42  ;;  %v19995_v40 = vld [vmem:[%s28564_s3 + $0x1584] ss:$16 sps:$4 sm:$0xff]   ;;  %v19996_v42 = vld [vmem:[%s28564_s3 + $0x158c] ss:$16 sps:$4 sm:$0xff]  }
 0x74a   : > { %10961 = vmatprep.subr.bf16.mxu1 %v19968_v30  ;;  %v19997_v30 = vld [vmem:[%s28564_s3 + $0x1580] ss:$16 sps:$4 sm:$0xff]  }
 0x74c   : > { %10524 = vmatpush1.bf16.msra.mxu0 %v19969_v22  ;;  %v19998_v22 = vld [vmem:[%s28564_s3 + $0x1588] ss:$16 sps:$4 sm:$0xff]  }
 0x74d   : > { %10962 = vmatpush1.bf16.msra.mxu1 %v19970_v56  ;;  %10525 = vmatprep.subr.bf16.mxu0 %v19971_v37  ;;  %v19999_v56 = vld [vmem:[%s28564_s3 + $0x15a4] ss:$16 sps:$4 sm:$0xff]   ;;  %v20000_v37 = vld [vmem:[%s28564_s3 + $0x15ac] ss:$16 sps:$4 sm:$0xff]  }
 0x74e   : > { %10503 = vmatmul.mubr.bf16.gmra.mrb[188].mxu0 %v29226_v50  ;;  %10963 = vmatprep.subr.bf16.mxu1 %v19972_v63  ;;  %v20002_v63 = vld [vmem:[%s28564_s3 + $0x15a8] ss:$16 sps:$4 sm:$0xff]  }
 0x74f   : > { %10941 = vmatmul.mubr.bf16.gmra.mrb[188].mxu1 %v29226_v50  ;;  %10545 = vmatprep.mubr.bf16.mxu0 %v29227_v34  ;;  %v20001_v50 = vld [vmem:[%s28564_s3 + $0x15a0] ss:$16 sps:$4 sm:$0xff]  }
 0x750   : > { %10526 = vmatpush1.bf16.msra.mxu0 %v19973_v57  ;;  %10983 = vmatprep.mubr.bf16.mxu1 %v29227_v34  ;;  %v20003_v34 = vld [vmem:[%s28564_s3 + $0x15c4] ss:$16 sps:$4 sm:$0xff]   ;;  %v20004_v57 = vld [vmem:[%s28564_s3 + $0x15cc] ss:$16 sps:$4 sm:$0xff]  }
 0x751   : > { %10964 = vmatpush1.bf16.msra.mxu1 %v19974_v61  ;;  %10527 = vmatprep.subr.bf16.mxu0 %v19975_v23  ;;  %v20005_v61 = vld [vmem:[%s28564_s3 + $0x15c0] ss:$16 sps:$4 sm:$0xff]   ;;  %v20006_v23 = vld [vmem:[%s28564_s3 + $0x15c8] ss:$16 sps:$4 sm:$0xff]  }
 0x752   : > { %10965 = vmatprep.subr.bf16.mxu1 %v19976_v14  ;;  %v20007_v14 = vld [vmem:[%s28564_s3 + $0x15e4] ss:$16 sps:$4 sm:$0xff]  }
 0x754   : > { %10528 = vmatpush1.bf16.msra.mxu0 %v19977_v18  ;;  %v20008_v18 = vld [vmem:[%s28564_s3 + $0x15ec] ss:$16 sps:$4 sm:$0xff]  }
 0x755   : > { %10966 = vmatpush1.bf16.msra.mxu1 %v19978_v28  ;;  %10529 = vmatprep.subr.bf16.mxu0 %v19979_v20  ;;  %v20009_v28 = vld [vmem:[%s28564_s3 + $0x15e0] ss:$16 sps:$4 sm:$0xff]   ;;  %v20010_v20 = vld [vmem:[%s28564_s3 + $0x15e8] ss:$16 sps:$4 sm:$0xff]  }
 0x756   : > { %10967 = vmatprep.subr.bf16.mxu1 %v19980_v10  ;;  %v20011_v10 = vld [vmem:[%s28564_s3 + $0x1604] ss:$16 sps:$4 sm:$0xff]  }
 0x758   : > { %10530 = vmatpush1.bf16.msra.mxu0 %v19981_v46  ;;  %v20012_v46 = vld [vmem:[%s28564_s3 + $0x160c] ss:$16 sps:$4 sm:$0xff]  }
 0x759   : > { %10968 = vmatpush1.bf16.msra.mxu1 %v19982_v4  ;;  %10531 = vmatprep.subr.bf16.mxu0 %v19983_v39  ;;  %v29228_v4 = vld [vmem:[#allocation23_spill] sm:$0xff]  ;;  %v29229_v39 = vld [vmem:[#allocation26_spill] sm:$0xff] }
 0x75a   : > { %10969 = vmatprep.subr.bf16.mxu1 %v19984_v59  ;;  %v20013_v59 = vld [vmem:[%s28564_s3 + $0x1600] ss:$16 sps:$4 sm:$0xff]  }
 0x75c   : > { %10532 = vmatpush1.bf16.msra.mxu0 %v19985_v12  ;;  %v20014_v12 = vld [vmem:[%s28564_s3 + $0x1608] ss:$16 sps:$4 sm:$0xff]  }
 0x75d   : > { %10970 = vmatpush1.bf16.msra.mxu1 %v19986_v54  ;;  %10533 = vmatprep.subr.bf16.mxu0 %v19987_v6  ;;  %v20015_v54 = vld [vmem:[%s28564_s3 + $0x1624] ss:$16 sps:$4 sm:$0xff]   ;;  %v20016_v6 = vld [vmem:[%s28564_s3 + $0x162c] ss:$16 sps:$4 sm:$0xff]  }
 0x75e   : > { %10971 = vmatprep.subr.bf16.mxu1 %v19988_v2  ;;  %v20017_v2 = vld [vmem:[%s28564_s3 + $0x1620] ss:$16 sps:$4 sm:$0xff]  }
 0x760   : > { %10534 = vmatpush1.bf16.msra.mxu0 %v19989_v0  ;;  %v20018_v0 = vld [vmem:[%s28564_s3 + $0x1628] ss:$16 sps:$4 sm:$0xff]  }
 0x761   : > { %10972 = vmatpush1.bf16.msra.mxu1 %v19990_v25  ;;  %10535 = vmatprep.subr.bf16.mxu0 %v19991_v9  ;;  %v20019_v25 = vld [vmem:[%s28564_s3 + $0x1644] ss:$16 sps:$4 sm:$0xff]   ;;  %v29230_v9 = vld [vmem:[#allocation25_spill] sm:$0xff] }
 0x762   : > { %10973 = vmatprep.subr.bf16.mxu1 %v19992_v55  ;;  %v20020_v55 = vld [vmem:[%s28564_s3 + $0x164c] ss:$16 sps:$4 sm:$0xff]  }
 0x764   : > { %10536 = vmatpush1.bf16.msra.mxu0 %v19993_v3  ;;  %v29231_v3 = vld [vmem:[#allocation28_spill] sm:$0xff] }
 0x765   : > { %10974 = vmatpush1.bf16.msra.mxu1 %v19994_v62  ;;  %10537 = vmatprep.subr.bf16.mxu0 %v19995_v40  ;;  %v20021_v62 = vld [vmem:[%s28564_s3 + $0x1640] ss:$16 sps:$4 sm:$0xff]   ;;  %v20022_v40 = vld [vmem:[%s28564_s3 + $0x1648] ss:$16 sps:$4 sm:$0xff]  }
 0x766   : > { %10975 = vmatprep.subr.bf16.mxu1 %v19996_v42  ;;  %v20023_v42 = vld [vmem:[%s28564_s3 + $0x1664] ss:$16 sps:$4 sm:$0xff]  }
 0x768   : > { %10538 = vmatpush1.bf16.msra.mxu0 %v19997_v30  ;;  %v20024_v30 = vld [vmem:[%s28564_s3 + $0x166c] ss:$16 sps:$4 sm:$0xff]  }
 0x769   : > { %10976 = vmatpush1.bf16.msra.mxu1 %v19998_v22  ;;  %10539 = vmatprep.subr.bf16.mxu0 %v19999_v56  ;;  %v20025_v22 = vld [vmem:[%s28564_s3 + $0x1660] ss:$16 sps:$4 sm:$0xff]   ;;  %v20026_v56 = vld [vmem:[%s28564_s3 + $0x1668] ss:$16 sps:$4 sm:$0xff]  }
 0x76a   : > { %10977 = vmatprep.subr.bf16.mxu1 %v20000_v37  ;;  %v20027_v37 = vld [vmem:[%s28564_s3 + $0x1684] ss:$16 sps:$4 sm:$0xff]  }
 0x76c   : > { %10540 = vmatpush1.bf16.msra.mxu0 %v20001_v50  ;;  %v29232_v50 = vld [vmem:[#allocation27_spill] sm:$0xff] }
 0x76d   : > { %10978 = vmatpush1.bf16.msra.mxu1 %v20002_v63  ;;  %10541 = vmatprep.subr.bf16.mxu0 %v20003_v34  ;;  %v20028_v63 = vld [vmem:[%s28564_s3 + $0x168c] ss:$16 sps:$4 sm:$0xff]  }
 0x76e   : > { %10979 = vmatprep.subr.bf16.mxu1 %v20004_v57  ;;  %v29233_v34 = vld [vmem:[#allocation11_spill] sm:$0xff]  ;;  %v20029_v57 = vld [vmem:[%s28564_s3 + $0x1680] ss:$16 sps:$4 sm:$0xff]  }
 0x770   : > { %10542 = vmatpush1.bf16.msra.mxu0 %v20005_v61  ;;  %v20030_v61 = vld [vmem:[%s28564_s3 + $0x1688] ss:$16 sps:$4 sm:$0xff]  }
 0x771   : > { %10980 = vmatpush1.bf16.msra.mxu1 %v20006_v23  ;;  %10543 = vmatprep.subr.bf16.mxu0 %v20007_v14  ;;  %v20031_v23 = vld [vmem:[%s28564_s3 + $0x16a4] ss:$16 sps:$4 sm:$0xff]   ;;  %v20032_v14 = vld [vmem:[%s28564_s3 + $0x16ac] ss:$16 sps:$4 sm:$0xff]  }
 0x772   : > { %10981 = vmatprep.subr.bf16.mxu1 %v20008_v18  ;;  %v20033_v18 = vld [vmem:[%s28564_s3 + $0x16a0] ss:$16 sps:$4 sm:$0xff]  }
 0x774   : > { %10544 = vmatpush1.bf16.msra.mxu0 %v20009_v28  ;;  %v20034_v28 = vld [vmem:[%s28564_s3 + $0x16a8] ss:$16 sps:$4 sm:$0xff]  }
 0x775   : > { %10982 = vmatpush1.bf16.msra.mxu1 %v20010_v20  ;;  %10586 = vmatprep.subr.bf16.mxu0 %v20011_v10  ;;  %v20035_v20 = vld [vmem:[%s28564_s3 + $0x16c4] ss:$16 sps:$4 sm:$0xff]  }
 0x776   : > { %11024 = vmatprep.subr.bf16.mxu1 %v20012_v46  ;;  %v29234_v10 = vld [vmem:[#allocation52_spill] sm:$0xff]  ;;  %v20036_v46 = vld [vmem:[%s28564_s3 + $0x16cc] ss:$16 sps:$4 sm:$0xff]  }
 0x777   : > { %10546 = vmatmul.mubr.bf16.vlgmr.msra.gmra.mrb[176].mxu0 %v29228_v4 }
 0x778   : > { %10984 = vmatmul.mubr.bf16.vlgmr.msra.gmra.mrb[176].mxu1 %v29228_v4  ;;  %10555 = vmatprep.mubr.bf16.mxu0 %v29229_v39  ;;  %v29235_v4 = vld [vmem:[#allocation66_spill] sm:$0xff] }
 0x779   : > { %10587 = vmatpush1.bf16.msra.mxu0 %v20013_v59  ;;  %10993 = vmatprep.mubr.bf16.mxu1 %v29229_v39  ;;  %v20037_v39 = vld [vmem:[%s28564_s3 + $0x16c0] ss:$16 sps:$4 sm:$0xff]   ;;  %v20038_v59 = vld [vmem:[%s28564_s3 + $0x16c8] ss:$16 sps:$4 sm:$0xff]  }
 0x77a   : > { %11025 = vmatpush1.bf16.msra.mxu1 %v20014_v12  ;;  %10588 = vmatprep.subr.bf16.mxu0 %v20015_v54  ;;  %v20039_v12 = vld [vmem:[%s28564_s3 + $0x16e4] ss:$16 sps:$4 sm:$0xff]   ;;  %v20040_v54 = vld [vmem:[%s28564_s3 + $0x16ec] ss:$16 sps:$4 sm:$0xff]  }
 0x77b   : > { %11026 = vmatprep.subr.bf16.mxu1 %v20016_v6  ;;  %v20041_v6 = vld [vmem:[%s28564_s3 + $0x16e0] ss:$16 sps:$4 sm:$0xff]  }
 0x77d   : > { %10589 = vmatpush1.bf16.msra.mxu0 %v20017_v2  ;;  %v20042_v2 = vld [vmem:[%s28564_s3 + $0x16e8] ss:$16 sps:$4 sm:$0xff]  }
 0x77e   : > { %11027 = vmatpush1.bf16.msra.mxu1 %v20018_v0  ;;  %10590 = vmatprep.subr.bf16.mxu0 %v20019_v25  ;;  %v20043_v0 = vld [vmem:[%s28564_s3 + $0x1704] ss:$16 sps:$4 sm:$0xff]   ;;  %v20044_v25 = vld [vmem:[%s28564_s3 + $0x170c] ss:$16 sps:$4 sm:$0xff]  }
 0x77f   : > { %10556 = vmatmul.mubr.bf16.gmra.mrb[180].mxu0 %v29230_v9  ;;  %11028 = vmatprep.subr.bf16.mxu1 %v20020_v55  ;;  %v20046_v55 = vld [vmem:[%s28564_s3 + $0x1708] ss:$16 sps:$4 sm:$0xff]  }
 0x780   : > { %10994 = vmatmul.mubr.bf16.gmra.mrb[180].mxu1 %v29230_v9  ;;  %10565 = vmatprep.mubr.bf16.mxu0 %v29231_v3  ;;  %v20045_v9 = vld [vmem:[%s28564_s3 + $0x1700] ss:$16 sps:$4 sm:$0xff]  }
 0x781   : > { %10591 = vmatpush1.bf16.msra.mxu0 %v20021_v62  ;;  %11003 = vmatprep.mubr.bf16.mxu1 %v29231_v3  ;;  %v20047_v3 = vld [vmem:[%s28564_s3 + $0x1724] ss:$16 sps:$4 sm:$0xff]   ;;  %v20048_v62 = vld [vmem:[%s28564_s3 + $0x172c] ss:$16 sps:$4 sm:$0xff]  }
 0x782   : > { %11029 = vmatpush1.bf16.msra.mxu1 %v20022_v40  ;;  %10592 = vmatprep.subr.bf16.mxu0 %v20023_v42  ;;  %v20049_v40 = vld [vmem:[%s28564_s3 + $0x1720] ss:$16 sps:$4 sm:$0xff]   ;;  %v20050_v42 = vld [vmem:[%s28564_s3 + $0x1728] ss:$16 sps:$4 sm:$0xff]  }
 0x783   : > { %11030 = vmatprep.subr.bf16.mxu1 %v20024_v30  ;;  %v20051_v30 = vld [vmem:[%s28564_s3 + $0x1744] ss:$16 sps:$4 sm:$0xff]  }
 0x785   : > { %10593 = vmatpush1.bf16.msra.mxu0 %v20025_v22  ;;  %v20052_v22 = vld [vmem:[%s28564_s3 + $0x174c] ss:$16 sps:$4 sm:$0xff]  }
 0x786   : > { %11031 = vmatpush1.bf16.msra.mxu1 %v20026_v56  ;;  %10594 = vmatprep.subr.bf16.mxu0 %v20027_v37  ;;  %v20053_v56 = vld [vmem:[%s28564_s3 + $0x1740] ss:$16 sps:$4 sm:$0xff]   ;;  %v20054_v37 = vld [vmem:[%s28564_s3 + $0x1748] ss:$16 sps:$4 sm:$0xff]  }
 0x787   : > { %10566 = vmatmul.mubr.bf16.gmra.mrb[184].mxu0 %v29232_v50  ;;  %11032 = vmatprep.subr.bf16.mxu1 %v20028_v63  ;;  %v20056_v63 = vld [vmem:[%s28564_s3 + $0x176c] ss:$16 sps:$4 sm:$0xff]  }
 0x788   : > { %11004 = vmatmul.mubr.bf16.gmra.mrb[184].mxu1 %v29232_v50  ;;  %10575 = vmatprep.mubr.bf16.mxu0 %v29233_v34  ;;  %v20055_v50 = vld [vmem:[%s28564_s3 + $0x1764] ss:$16 sps:$4 sm:$0xff]  }
 0x789   : > { %10595 = vmatpush1.bf16.msra.mxu0 %v20029_v57  ;;  %11013 = vmatprep.mubr.bf16.mxu1 %v29233_v34  ;;  %v20057_v34 = vld [vmem:[%s28564_s3 + $0x1760] ss:$16 sps:$4 sm:$0xff]   ;;  %v20058_v57 = vld [vmem:[%s28564_s3 + $0x1768] ss:$16 sps:$4 sm:$0xff]  }
 0x78a   : > { %11033 = vmatpush1.bf16.msra.mxu1 %v20030_v61  ;;  %10596 = vmatprep.subr.bf16.mxu0 %v20031_v23  ;;  %v20059_v61 = vld [vmem:[%s28564_s3 + $0x1784] ss:$16 sps:$4 sm:$0xff]   ;;  %v20060_v23 = vld [vmem:[%s28564_s3 + $0x178c] ss:$16 sps:$4 sm:$0xff]  }
 0x78b   : > { %11034 = vmatprep.subr.bf16.mxu1 %v20032_v14  ;;  %v20061_v14 = vld [vmem:[%s28564_s3 + $0x1780] ss:$16 sps:$4 sm:$0xff]  }
 0x78d   : > { %10597 = vmatpush1.bf16.msra.mxu0 %v20033_v18  ;;  %v20062_v18 = vld [vmem:[%s28564_s3 + $0x1788] ss:$16 sps:$4 sm:$0xff]  }
 0x78e   : > { %11035 = vmatpush1.bf16.msra.mxu1 %v20034_v28  ;;  %10598 = vmatprep.subr.bf16.mxu0 %v20035_v20  ;;  %v20063_v28 = vld [vmem:[%s28564_s3 + $0x17a4] ss:$16 sps:$4 sm:$0xff]   ;;  %v20064_v20 = vld [vmem:[%s28564_s3 + $0x17ac] ss:$16 sps:$4 sm:$0xff]  }
 0x78f   : > { %10576 = vmatmul.mubr.bf16.gmra.mrb[188].mxu0 %v29234_v10  ;;  %11036 = vmatprep.subr.bf16.mxu1 %v20036_v46  ;;  %v20066_v46 = vld [vmem:[%s28564_s3 + $0x17a8] ss:$16 sps:$4 sm:$0xff]  }
 0x790   : > { %11014 = vmatmul.mubr.bf16.gmra.mrb[188].mxu1 %v29234_v10  ;;  %10618 = vmatprep.mubr.bf16.mxu0 %v29235_v4  ;;  %v20065_v10 = vld [vmem:[%s28564_s3 + $0x17a0] ss:$16 sps:$4 sm:$0xff]  }
 0x791   : > { %10599 = vmatpush1.bf16.msra.mxu0 %v20037_v39  ;;  %11056 = vmatprep.mubr.bf16.mxu1 %v29235_v4  ;;  %v20067_v4 = vld [vmem:[%s28564_s3 + $0x17c4] ss:$16 sps:$4 sm:$0xff]   ;;  %v20068_v39 = vld [vmem:[%s28564_s3 + $0x17cc] ss:$16 sps:$4 sm:$0xff]  }
 0x792   : > { %11037 = vmatpush1.bf16.msra.mxu1 %v20038_v59  ;;  %10600 = vmatprep.subr.bf16.mxu0 %v20039_v12  ;;  %v20069_v59 = vld [vmem:[%s28564_s3 + $0x17c0] ss:$16 sps:$4 sm:$0xff]   ;;  %v20070_v12 = vld [vmem:[%s28564_s3 + $0x17c8] ss:$16 sps:$4 sm:$0xff]  }
 0x793   : > { %11038 = vmatprep.subr.bf16.mxu1 %v20040_v54  ;;  %v20071_v54 = vld [vmem:[%s28564_s3 + $0x17e4] ss:$16 sps:$4 sm:$0xff]  }
 0x795   : > { %10601 = vmatpush1.bf16.msra.mxu0 %v20041_v6  ;;  %v18691_v6 = vld [vmem:[%s28566_s5 + $0x1c4] ss:$8 sps:$4 sm:$0xff]  }
 0x796   : > { %11039 = vmatpush1.bf16.msra.mxu1 %v20042_v2  ;;  %10602 = vmatprep.subr.bf16.mxu0 %v20043_v0  ;;  %v20072_v2 = vld [vmem:[%s28564_s3 + $0x17ec] ss:$16 sps:$4 sm:$0xff]  }
 0x797   : > { %11040 = vmatprep.subr.bf16.mxu1 %v20044_v25  ;;  %v18706_v0 = vld [vmem:[%s28566_s5 + $0x2c4] ss:$8 sps:$4 sm:$0xff]   ;;  %v20073_v25 = vld [vmem:[%s28564_s3 + $0x17e0] ss:$16 sps:$4 sm:$0xff]  }
 0x799   : > { %10603 = vmatpush1.bf16.msra.mxu0 %v20045_v9  ;;  %v20074_v9 = vld [vmem:[%s28564_s3 + $0x17e8] ss:$16 sps:$4 sm:$0xff]  }
 0x79a   : > { %11041 = vmatpush1.bf16.msra.mxu1 %v20046_v55  ;;  %10604 = vmatprep.subr.bf16.mxu0 %v20047_v3  ;;  %v18689_v55 = vld [vmem:[%s28566_s5 + $0x1c0] ss:$8 sps:$4 sm:$0xff]   ;;  %v18694_v3 = vld [vmem:[%s28566_s5 + $0x1d4] ss:$8 sps:$4 sm:$0xff]  }
 0x79b   : > { %11042 = vmatprep.subr.bf16.mxu1 %v20048_v62  ;;  %v18704_v62 = vld [vmem:[%s28566_s5 + $0x2c0] ss:$8 sps:$4 sm:$0xff]  }
 0x79d   : > { %10605 = vmatpush1.bf16.msra.mxu0 %v20049_v40  ;;  %v29236_v40 = vld [vmem:[#allocation65_spill] sm:$0xff] }
 0x79e   : > { %11043 = vmatpush1.bf16.msra.mxu1 %v20050_v42  ;;  %10606 = vmatprep.subr.bf16.mxu0 %v20051_v30  ;;  %v18712_v42 = vld [vmem:[%s28566_s5 + $0x2d4] ss:$8 sps:$4 sm:$0xff]   ;;  %v29237_v30 = vld [vmem:[#allocation68_spill] sm:$0xff] }
 0x79f   : > { %11044 = vmatprep.subr.bf16.mxu1 %v20052_v22  ;;  %v18692_v22 = vld [vmem:[%s28566_s5 + $0x1d0] ss:$8 sps:$4 sm:$0xff]  }
 0x7a1   : > { %10607 = vmatpush1.bf16.msra.mxu0 %v20053_v56  ;;  %v18697_v56 = vld [vmem:[%s28566_s5 + $0x1e4] ss:$8 sps:$4 sm:$0xff]  }
 0x7a2   : > { %11045 = vmatpush1.bf16.msra.mxu1 %v20054_v37  ;;  %10608 = vmatprep.subr.bf16.mxu0 %v20055_v50  ;;  %v18710_v37 = vld [vmem:[%s28566_s5 + $0x2d0] ss:$8 sps:$4 sm:$0xff]   ;;  %v18718_v50 = vld [vmem:[%s28566_s5 + $0x2e4] ss:$8 sps:$4 sm:$0xff]  }
 0x7a3   : > { %11046 = vmatprep.subr.bf16.mxu1 %v20056_v63  ;;  %v18695_v63 = vld [vmem:[%s28566_s5 + $0x1e0] ss:$8 sps:$4 sm:$0xff]  }
 0x7a5   : > { %10609 = vmatpush1.bf16.msra.mxu0 %v20057_v34  ;;  %v18700_v34 = vld [vmem:[%s28566_s5 + $0x1f4] ss:$8 sps:$4 sm:$0xff]  }
 0x7a6   : > { %11047 = vmatpush1.bf16.msra.mxu1 %v20058_v57  ;;  %10610 = vmatprep.subr.bf16.mxu0 %v20059_v61  ;;  %v18716_v57 = vld [vmem:[%s28566_s5 + $0x2e0] ss:$8 sps:$4 sm:$0xff]   ;;  %v29238_v61 = vld [vmem:[#allocation67_spill] sm:$0xff] }
 0x7a7   : > { %11048 = vmatprep.subr.bf16.mxu1 %v20060_v23  ;;  %v18724_v23 = vld [vmem:[%s28566_s5 + $0x2f4] ss:$8 sps:$4 sm:$0xff]  }
 0x7a9   : > { %10611 = vmatpush1.bf16.msra.mxu0 %v20061_v14  ;;  %v29239_v14 = vld [vmem:[#allocation70_spill] sm:$0xff] }
 0x7aa   : > { %11049 = vmatpush1.bf16.msra.mxu1 %v20062_v18  ;;  %10612 = vmatprep.subr.bf16.mxu0 %v20063_v28  ;;  %v18698_v18 = vld [vmem:[%s28566_s5 + $0x1f0] ss:$8 sps:$4 sm:$0xff]   ;;  %v18703_v28 = vld [vmem:[%s28566_s5 + $0x204] ss:$8 sps:$4 sm:$0xff]  }
 0x7ab   : > { %11050 = vmatprep.subr.bf16.mxu1 %v20064_v20  ;;  %v18722_v20 = vld [vmem:[%s28566_s5 + $0x2f0] ss:$8 sps:$4 sm:$0xff]  }
 0x7ad   : > { %10613 = vmatpush1.bf16.msra.mxu0 %v20065_v10  ;;  %v18730_v10 = vld [vmem:[%s28566_s5 + $0x304] ss:$8 sps:$4 sm:$0xff]  }
 0x7ae   : > { %11051 = vmatpush1.bf16.msra.mxu1 %v20066_v46  ;;  %10614 = vmatprep.subr.bf16.mxu0 %v20067_v4  ;;  %v18701_v46 = vld [vmem:[%s28566_s5 + $0x200] ss:$8 sps:$4 sm:$0xff]   ;;  %v18709_v4 = vld [vmem:[%s28566_s5 + $0x214] ss:$8 sps:$4 sm:$0xff]  }
 0x7af   : > { %11052 = vmatprep.subr.bf16.mxu1 %v20068_v39  ;;  %v18728_v39 = vld [vmem:[%s28566_s5 + $0x300] ss:$8 sps:$4 sm:$0xff]  }
 0x7b1   : > { %10615 = vmatpush1.bf16.msra.mxu0 %v20069_v59  ;;  %v29240_v59 = vld [vmem:[#allocation69_spill] sm:$0xff] }
 0x7b2   : > { %11053 = vmatpush1.bf16.msra.mxu1 %v20070_v12  ;;  %10616 = vmatprep.subr.bf16.mxu0 %v20071_v54  ;;  %v18736_v12 = vld [vmem:[%s28566_s5 + $0x314] ss:$8 sps:$4 sm:$0xff]   ;;  %v29241_v54 = vld [vmem:[#allocation12_spill] sm:$0xff] }
 0x7b3   : > { %11054 = vmatprep.subr.bf16.mxu1 %v20072_v2  ;;  %v18715_v2 = vld [vmem:[%s28566_s5 + $0x224] ss:$8 sps:$4 sm:$0xff]  }
 0x7b5   : > { %10617 = vmatpush1.bf16.msra.mxu0 %v20073_v25  ;;  %v18742_v25 = vld [vmem:[%s28566_s5 + $0x324] ss:$8 sps:$4 sm:$0xff]  }
 0x7b6   : > { %11055 = vmatpush1.bf16.msra.mxu1 %v20074_v9  ;;  %11639 = vmatprep.subr.bf16.mxu0 %v18691_v6  ;;  %v18707_v6 = vld [vmem:[%s28566_s5 + $0x210] ss:$8 sps:$4 sm:$0xff]   ;;  %v18713_v9 = vld [vmem:[%s28566_s5 + $0x220] ss:$8 sps:$4 sm:$0xff]  }
 0x7b7   : > { %11680 = vmatprep.subr.bf16.mxu1 %v18706_v0  ;;  %v18734_v0 = vld [vmem:[%s28566_s5 + $0x310] ss:$8 sps:$4 sm:$0xff]  }
 0x7b8   : > { %10619 = vmatmul.mubr.bf16.vlgmr.msra.gmra.mrb[176].mxu0 %v29236_v40 }
 0x7b9   : > { %11057 = vmatmul.mubr.bf16.vlgmr.msra.gmra.mrb[176].mxu1 %v29236_v40  ;;  %10628 = vmatprep.mubr.bf16.mxu0 %v29237_v30  ;;  %v18719_v40 = vld [vmem:[%s28566_s5 + $0x230] ss:$8 sps:$4 sm:$0xff]  }
 0x7ba   : > { %11066 = vmatprep.mubr.bf16.mxu1 %v29237_v30  ;;  %11640 = vmatpush1.bf16.msra.mxu0 %v18689_v55  ;;  %v18721_v55 = vld [vmem:[%s28566_s5 + $0x234] ss:$8 sps:$4 sm:$0xff]   ;;  %v18746_v30 = vld [vmem:[%s28566_s5 + $0x330] ss:$8 sps:$4 sm:$0xff]  }
 0x7bb   : > { %11641 = vmatprep.subr.bf16.mxu0 %v18694_v3  ;;  %11681 = vmatpush1.bf16.msra.mxu1 %v18704_v62  ;;  %v18740_v3 = vld [vmem:[%s28566_s5 + $0x320] ss:$8 sps:$4 sm:$0xff]   ;;  %v18748_v62 = vld [vmem:[%s28566_s5 + $0x334] ss:$8 sps:$4 sm:$0xff]  }
 0x7bc   : > { %11682 = vmatprep.subr.bf16.mxu1 %v18712_v42  ;;  %v18727_v42 = vld [vmem:[%s28566_s5 + $0x244] ss:$8 sps:$4 sm:$0xff]  }
 0x7be   : > { %11642 = vmatpush1.bf16.msra.mxu0 %v18692_v22  ;;  %v18725_v22 = vld [vmem:[%s28566_s5 + $0x240] ss:$8 sps:$4 sm:$0xff]  }
 0x7bf   : > { %11643 = vmatprep.subr.bf16.mxu0 %v18697_v56  ;;  %11683 = vmatpush1.bf16.msra.mxu1 %v18710_v37  ;;  %v18733_v56 = vld [vmem:[%s28566_s5 + $0x254] ss:$8 sps:$4 sm:$0xff]   ;;  %v18752_v37 = vld [vmem:[%s28566_s5 + $0x340] ss:$8 sps:$4 sm:$0xff]  }
 0x7c0   : > { %10629 = vmatmul.mubr.bf16.gmra.mrb[180].mxu0 %v29238_v61  ;;  %11684 = vmatprep.subr.bf16.mxu1 %v18718_v50  ;;  %v18731_v50 = vld [vmem:[%s28566_s5 + $0x250] ss:$8 sps:$4 sm:$0xff]  }
 0x7c1   : > { %11067 = vmatmul.mubr.bf16.gmra.mrb[180].mxu1 %v29238_v61  ;;  %10638 = vmatprep.mubr.bf16.mxu0 %v29239_v14  ;;  %v18743_v61 = vld [vmem:[%s28566_s5 + $0x270] ss:$8 sps:$4 sm:$0xff]  }
 0x7c2   : > { %11076 = vmatprep.mubr.bf16.mxu1 %v29239_v14  ;;  %11644 = vmatpush1.bf16.msra.mxu0 %v18695_v63  ;;  %v18739_v63 = vld [vmem:[%s28566_s5 + $0x264] ss:$8 sps:$4 sm:$0xff]   ;;  %v18749_v14 = vld [vmem:[%s28566_s5 + $0x280] ss:$8 sps:$4 sm:$0xff]  }
 0x7c3   : > { %11645 = vmatprep.subr.bf16.mxu0 %v18700_v34  ;;  %11685 = vmatpush1.bf16.msra.mxu1 %v18716_v57  ;;  %v18737_v34 = vld [vmem:[%s28566_s5 + $0x260] ss:$8 sps:$4 sm:$0xff]   ;;  %v18745_v57 = vld [vmem:[%s28566_s5 + $0x274] ss:$8 sps:$4 sm:$0xff]  }
 0x7c4   : > { %11686 = vmatprep.subr.bf16.mxu1 %v18724_v23  ;;  %v18751_v23 = vld [vmem:[%s28566_s5 + $0x284] ss:$8 sps:$4 sm:$0xff]  }
 0x7c6   : > { %11646 = vmatpush1.bf16.msra.mxu0 %v18698_v18  ;;  %v18757_v18 = vld [vmem:[%s28566_s5 + $0x294] ss:$8 sps:$4 sm:$0xff]  }
 0x7c7   : > { %11647 = vmatprep.subr.bf16.mxu0 %v18703_v28  ;;  %11687 = vmatpush1.bf16.msra.mxu1 %v18722_v20  ;;  %v18760_v28 = vld [vmem:[%s28566_s5 + $0x354] ss:$8 sps:$4 sm:$0xff]   ;;  %v18755_v20 = vld [vmem:[%s28566_s5 + $0x290] ss:$8 sps:$4 sm:$0xff]  }
 0x7c8   : > { %10639 = vmatmul.mubr.bf16.gmra.mrb[184].mxu0 %v29240_v59  ;;  %11688 = vmatprep.subr.bf16.mxu1 %v18730_v10  ;;  %v18758_v10 = vld [vmem:[%s28566_s5 + $0x350] ss:$8 sps:$4 sm:$0xff]  }
 0x7c9   : > { %11077 = vmatmul.mubr.bf16.gmra.mrb[184].mxu1 %v29240_v59  ;;  %10648 = vmatprep.mubr.bf16.mxu0 %v29241_v54  ;;  %v18764_v59 = vld [vmem:[%s28566_s5 + $0x360] ss:$8 sps:$4 sm:$0xff]  }
 0x7ca   : > { %11086 = vmatprep.mubr.bf16.mxu1 %v29241_v54  ;;  %11648 = vmatpush1.bf16.msra.mxu0 %v18701_v46  ;;  %v18763_v46 = vld [vmem:[%s28566_s5 + $0x2a4] ss:$8 sps:$4 sm:$0xff]   ;;  %v18772_v54 = vld [vmem:[%s28566_s5 + $0x374] ss:$8 sps:$4 sm:$0xff]  }
 0x7cb   : > { %11649 = vmatprep.subr.bf16.mxu0 %v18709_v4  ;;  %11689 = vmatpush1.bf16.msra.mxu1 %v18728_v39  ;;  %v18766_v4 = vld [vmem:[%s28566_s5 + $0x364] ss:$8 sps:$4 sm:$0xff]   ;;  %v18761_v39 = vld [vmem:[%s28566_s5 + $0x2a0] ss:$8 sps:$4 sm:$0xff]  }
 0x7cc   : > { %11690 = vmatprep.subr.bf16.mxu1 %v18736_v12  ;;  %v18769_v12 = vld [vmem:[%s28566_s5 + $0x2b4] ss:$8 sps:$4 sm:$0xff]  }
 0x7ce   : > { %11650 = vmatpush1.bf16.msra.mxu0 %v18707_v6  ;;  %v18767_v6 = vld [vmem:[%s28566_s5 + $0x2b0] ss:$8 sps:$4 sm:$0xff]  }
 0x7cf   : > { %11651 = vmatprep.subr.bf16.mxu0 %v18715_v2  ;;  %11691 = vmatpush1.bf16.msra.mxu1 %v18734_v0  ;;  %v18770_v2 = vld [vmem:[%s28566_s5 + $0x370] ss:$8 sps:$4 sm:$0xff]   ;;  %v18775_v0 = vld [vmem:[%s28566_s5 + $0x4] ss:$8 sps:$4 sm:$0xff]  }
 0x7d0   : > { %10649 = vmatmul.mubr.bf16.gmra.mrb[188].mxu0 %v25814_v45  ;;  %11692 = vmatprep.subr.bf16.mxu1 %v18742_v25  ;;  %v18778_v25 = vld [vmem:[%s28566_s5 + $0x104] ss:$8 sps:$4 sm:$0xff]  }
 0x7d1   : > { %11087 = vmatmul.mubr.bf16.gmra.mrb[188].mxu1 %v25814_v45  ;;  %v18754_v45 = vld [vmem:[%s28566_s5 + $0x344] ss:$8 sps:$4 sm:$0xff]  }
 0x7d2   : > { %11652 = vmatpush1.bf16.msra.mxu0 %v18713_v9  ;;  %v11129_v9 = vld [vmem:[%s28565_s4] sm:$0xf] }
 0x7d3   : > { %11653 = vmatprep.subr.bf16.mxu0 %v18721_v55  ;;  %11693 = vmatpush1.bf16.msra.mxu1 %v18740_v3  ;;  %v29242_v55 = vld [vmem:[#allocation13_spill] sm:$0xff] }
 0x7d4   : > { %11694 = vmatprep.subr.bf16.mxu1 %v18748_v62  ;;  %v27335_v3 = vrot.slane %v11129_v9, %v29242_v55 }
 0x7d6   : > { %11654 = vmatpush1.bf16.msra.mxu0 %v18719_v40  ;;  %v29243_v40 = vld [vmem:[#allocation50_spill] sm:$0xff] }
 0x7d7   : > { %11655 = vmatprep.subr.bf16.mxu0 %v18727_v42  ;;  %11695 = vmatpush1.bf16.msra.mxu1 %v18746_v30  ;;  %v29244_v42 = vsub.s32 2, %v29243_v40 }
 0x7d8   : > { %11696 = vmatprep.subr.bf16.mxu1 %v18754_v45  ;;  %v29245_v45 = vld [vmem:[#allocation55_spill] sm:$0xff] }
 0x7d9   : > { %v27339_v30 = vrot.slane %v11129_v9, %v29244_v42 }
 0x7da   : > { %11656 = vmatpush1.bf16.msra.mxu0 %v18725_v22  ;;  %v27342_v22 = vrot.slane %v11129_v9, %v29245_v45 }
 0x7db   : > { %11657 = vmatprep.subr.bf16.mxu0 %v18733_v56  ;;  %11697 = vmatpush1.bf16.msra.mxu1 %v18752_v37 }
 0x7dc   : > { %11698 = vmatprep.subr.bf16.mxu1 %v18760_v28 }
 0x7de   : > { %11658 = vmatpush1.bf16.msra.mxu0 %v18731_v50 }
 0x7df   : > { %11659 = vmatprep.subr.bf16.mxu0 %v18739_v63  ;;  %11699 = vmatpush1.bf16.msra.mxu1 %v18758_v10  ;;  %v29246_v63 = vsub.s32 3, %v29243_v40 }
 0x7e0   : > { %11700 = vmatprep.subr.bf16.mxu1 %v18766_v4 }
 0x7e2   : > { %11660 = vmatpush1.bf16.msra.mxu0 %v18737_v34  ;;  %v27347_v34 = vrot.slane %v11129_v9, %v29246_v63 }
 0x7e3   : > { %11661 = vmatprep.subr.bf16.mxu0 %v18745_v57  ;;  %11701 = vmatpush1.bf16.msra.mxu1 %v18764_v59 }
 0x7e4   : > { %11702 = vmatprep.subr.bf16.mxu1 %v18772_v54 }
 0x7e6   : > { %11662 = vmatpush1.bf16.msra.mxu0 %v18743_v61 }
 0x7e7   : > { %11663 = vmatprep.subr.bf16.mxu0 %v18751_v23  ;;  %11703 = vmatpush1.bf16.msra.mxu1 %v18770_v2 }
 0x7e8   : > { %12004 = vmatprep.subr.bf16.mxu1 %v18775_v0 }
 0x7ea   : > { %11664 = vmatpush1.bf16.msra.mxu0 %v18749_v14 }
 0x7eb   : > { %11665 = vmatprep.subr.bf16.mxu0 %v18757_v18 }
 0x7ee   : > { %11666 = vmatpush1.bf16.msra.mxu0 %v18755_v20 }
 0x7ef   : > { %11667 = vmatprep.subr.bf16.mxu0 %v18763_v46 }
 0x7f2   : > { %11668 = vmatpush1.bf16.msra.mxu0 %v18761_v39 }
 0x7f3   : > { %11669 = vmatprep.subr.bf16.mxu0 %v18769_v12 }
 0x7f6   : > { %11670 = vmatpush1.bf16.msra.mxu0 %v18767_v6 }
 0x7f7   : > { %12045 = vmatprep.subr.bf16.mxu0 %v18778_v25 }
 0x88b   : > { %v10620_v62 = vpop.f32.mrb[176].mxu0 }
 0x88c   : > { %v11097_v56 = vmax.f32 %v26427_v58, %v10620_v62  ;;  %v11058_v37 = vpop.f32.mrb[176].mxu1  ;;  %v10622_v50 = vpop.f32.mrb[177].mxu0 }
 0x88d   : > { %v11099_v57 = vmax.f32 %v26436_v19, %v11058_v37  ;;  %v11098_v61 = vmax.f32 %v26441_v47, %v10622_v50  ;;  %v11060_v23 = vpop.f32.mrb[177].mxu1  ;;  %v10624_v14 = vpop.f32.mrb[178].mxu0 }
 0x88e   : > { %v11151_v18 = vadd.f32 %v27335_v3, %v11097_v56  ;;  %v11100_v28 = vmax.f32 %v26449_v35, %v11060_v23  ;;  %v11101_v20 = vmax.f32 %v26457_v33, %v10624_v14  ;;  %v11062_v10 = vpop.f32.mrb[178].mxu1  ;;  %v10626_v58 = vpop.f32.mrb[179].mxu0 }
 0x88f   : > { %v11153_v46 = vadd.f32 %v27339_v30, %v11099_v57  ;;  %v11152_v4 = vadd.f32 %v27342_v22, %v11098_v61  ;;  %v11103_v39 = vmax.f32 %v26465_v24, %v11062_v10  ;;  %v11102_v19 = vmax.f32 %v26470_v16, %v10626_v58  ;;  %v11064_v59 = vpop.f32.mrb[179].mxu1 }
 0x890   : > { %v11154_v47 = vadd.f32 %v27347_v34, %v11100_v28  ;;  %v11155_v12 = vadd.f32 %v27335_v3, %v11101_v20  ;;  %v11104_v54 = vmax.f32 %v26475_v27, %v11064_v59  ;;  %v11183_v6 = vmax.f32 %v11151_v18, 0.0  ;;  %v18773_v59 = vld [vmem:[%s28566_s5] ss:$8 sps:$4 sm:$0xff]  }
 0x891   : > { %v11157_v35 = vadd.f32 %v27339_v30, %v11103_v39  ;;  %v11156_v33 = vadd.f32 %v27342_v22, %v11102_v19  ;;  %v11185_v25 = vmax.f32 %v11153_v46, 0.0  ;;  %v11184_v9 = vmax.f32 %v11152_v4, 0.0 }
 0x892   : > { %v11187_v2 = vmax.f32 %v11155_v12, 0.0  ;;  %v11158_v0 = vadd.f32 %v27347_v34, %v11104_v54  ;;  %v11186_v40 = vmax.f32 %v11154_v47, 0.0 }
 0x893   : > { %v11189_v24 = vmax.f32 %v11157_v35, 0.0  ;;  %v11188_v62 = vmax.f32 %v11156_v33, 0.0  ;;  %v10630_v16 = vpop.f32.mrb[180].mxu0 }
 0x894   : > { %v27364_v42 = vpack.c.bf16 %v11187_v2, %v11183_v6  ;;  %v11190_v56 = vmax.f32 %v11158_v0, 0.0  ;;  %v11105_v37 = vmax.f32 %v26495_v48, %v10630_v16  ;;  %v11068_v27 = vpop.f32.mrb[180].mxu1  ;;  %v10632_v50 = vpop.f32.mrb[181].mxu0  ;;  %v18781_v6 = vld [vmem:[%s28566_s5 + $0x14] ss:$8 sps:$4 sm:$0xff]  }
 0x895   : > { %v27367_v63 = vpack.c.bf16 %v11189_v24, %v11185_v25  ;;  %v11216_v57 = vpack.c.bf16 %v11188_v62, %v11184_v9  ;;  %v11107_v61 = vmax.f32 %v26504_v7, %v11068_v27  ;;  %v11106_v23 = vmax.f32 %v26509_v26, %v10632_v50  ;;  %v11070_v14 = vpop.f32.mrb[181].mxu1  ;;  %v10634_v18 = vpop.f32.mrb[182].mxu0  ;;  %v18779_v27 = vld [vmem:[%s28566_s5 + $0x10] ss:$8 sps:$4 sm:$0xff]  }
 0x896   : > { %v11218_v28 = vpack.c.bf16 %v11190_v56, %v11186_v40  ;;  %v11159_v20 = vadd.f32 %v27335_v3, %v11105_v37  ;;  %v11108_v10 = vmax.f32 %v26517_v49, %v11070_v14  ;;  %v11072_v58 = vpop.f32.mrb[182].mxu1  ;;  %v10636_v46 = vpop.f32.mrb[183].mxu0  ;;  %v11109_v4 = vmax.f32 %v26525_v38, %v10634_v18 }
 0x897   : > { %v11161_v48 = vadd.f32 %v27339_v30, %v11107_v61  ;;  %v11074_v39 = vpop.f32.mrb[183].mxu1  ;;  %v11111_v26 = vmax.f32 %v26533_v36, %v11072_v58  ;;  %v11350_v47 = vrot.slane %v27367_v63, 4  ;;  %v11110_v12 = vmax.f32 %v26538_v31, %v10636_v46  ;;  %v18776_v36 = vld [vmem:[%s28566_s5 + $0x100] ss:$8 sps:$4 sm:$0xff]  }
 0x898   : > { %v11351_v19 = vrot.slane %v11218_v28, 4  ;;  %v11162_v7 = vadd.f32 %v27347_v34, %v11108_v10  ;;  %v11163_v49 = vadd.f32 %v27335_v3, %v11109_v4  ;;  %v11348_v54 = vrot.slane %v27364_v42, 4 }
 0x899   : > { %v11165_v38 = vadd.f32 %v27339_v30, %v11111_v26  ;;  %v11112_v35 = vmax.f32 %v26543_v60, %v11074_v39  ;;  %v11349_v33 = vrot.slane %v11216_v57, 4  ;;  %v11191_v2 = vmax.f32 %v11159_v20, 0.0  ;;  %v18784_v60 = vld [vmem:[%s28566_s5 + $0x114] ss:$8 sps:$4 sm:$0xff]  }
 0x89a   : > { %16027 = vmatprep.mubr.msk.bf16.mxu1 %vm11635_vm2, %v11351_v19  ;;  %v11160_v31 = vadd.f32 %v27342_v22, %v11106_v23  ;;  %v11195_v0 = vmax.f32 %v11163_v49, 0.0  ;;  %v11164_v25 = vadd.f32 %v27342_v22, %v11110_v12  ;;  %v11193_v24 = vmax.f32 %v11161_v48, 0.0 }
 0x89b   : > { %11713 = vmatmul.mubr.bf16.vlgmr.msra.gmra.mrb[192].mxu1 %v11350_v47  ;;  %v10640_v9 = vpop.f32.mrb[184].mxu0  ;;  %v11197_v62 = vmax.f32 %v11165_v38, 0.0  ;;  %v11166_v16 = vadd.f32 %v27347_v34, %v11112_v35  ;;  %11671 = vmatprep.mubr.bf16.mxu0 %v11349_v33  ;;  %v11194_v50 = vmax.f32 %v11162_v7, 0.0  ;;  %v18785_v47 = vld [vmem:[%s28566_s5 + $0x20] ss:$8 sps:$4 sm:$0xff]  }
 0x89c   : > { %12005 = vmatpush1.bf16.msra.mxu1 %v18773_v59  ;;  %v11113_v40 = vmax.f32 %v26560_v21, %v10640_v9  ;;  %v11078_v56 = vpop.f32.mrb[184].mxu1  ;;  %v10642_v37 = vpop.f32.mrb[185].mxu0  ;;  %v27403_v61 = vpack.c.bf16 %v11195_v0, %v11191_v2  ;;  %11672 = vmatmul.mubr.bf16.vlgmr.msra.gmra.mrb[192].mxu0 %v11348_v54  ;;  %v18787_v21 = vld [vmem:[%s28566_s5 + $0x24] ss:$8 sps:$4 sm:$0xff]   ;;  %v11196_v4 = vmax.f32 %v11164_v25, 0.0  ;;  %v11192_v49 = vmax.f32 %v11160_v31, 0.0 }
 0x89d   : > { %v11115_v23 = vmax.f32 %v26568_v41, %v11078_v56  ;;  %12036 = vmatprep.mubr.bf16.mxu1 %v11216_v57  ;;  %v11114_v14 = vmax.f32 %v26573_v43, %v10642_v37  ;;  %v11080_v18 = vpop.f32.mrb[185].mxu1  ;;  %v10644_v20 = vpop.f32.mrb[186].mxu0  ;;  %v27410_v10 = vpack.c.bf16 %v11197_v62, %v11193_v24  ;;  %v11198_v58 = vmax.f32 %v11166_v16, 0.0  ;;  %12046 = vmatpush1.bf16.msra.mxu0 %v18776_v36  ;;  %v18782_v43 = vld [vmem:[%s28566_s5 + $0x110] ss:$8 sps:$4 sm:$0xff]  }
 0x89e   : > { %v11167_v46 = vadd.f32 %v27335_v3, %v11113_v40  ;;  %16084 = vmatprep.mubr.msk.bf16.mxu0 %vm11635_vm2, %v11218_v28  ;;  %v11116_v48 = vmax.f32 %v26581_v11, %v11080_v18  ;;  %v11082_v41 = vpop.f32.mrb[186].mxu1  ;;  %v10646_v57 = vpop.f32.mrb[187].mxu0  ;;  %v11117_v7 = vmax.f32 %v26589_v8, %v10644_v20  ;;  %12006 = vmatprep.subr.bf16.mxu1 %v18781_v6  ;;  %v18790_v11 = vld [vmem:[%s28566_s5 + $0x124] ss:$8 sps:$4 sm:$0xff]   ;;  %v18793_v54 = vld [vmem:[%s28566_s5 + $0x34] ss:$8 sps:$4 sm:$0xff]  }
 0x89f   : > { %v11169_v39 = vadd.f32 %v27339_v30, %v11115_v23  ;;  %v27420_v19 = vadd.f32 %v27342_v22, %v11114_v14  ;;  %12047 = vmatprep.subr.bf16.mxu0 %v18784_v60  ;;  %v11084_v26 = vpop.f32.mrb[187].mxu1  ;;  %v27426_v28 = vpack.c.bf16 %v11198_v58, %v11194_v50  ;;  %v11119_v8 = vmax.f32 %v26597_v1, %v11082_v41  ;;  %v18788_v33 = vld [vmem:[%s28566_s5 + $0x120] ss:$8 sps:$4 sm:$0xff]   ;;  %v18796_v31 = vld [vmem:[%s28566_s5 + $0x134] ss:$8 sps:$4 sm:$0xff]  }
 0x8a0   : > { %v11170_v59 = vadd.f32 %v27347_v34, %v11116_v48  ;;  %12007 = vmatpush1.bf16.msra.mxu1 %v18779_v27  ;;  %v11171_v12 = vadd.f32 %v27335_v3, %v11117_v7  ;;  %v11118_v38 = vmax.f32 %v26602_v53, %v10646_v57  ;;  %v11120_v35 = vmax.f32 %v26607_v13, %v11084_v26  ;;  %v18791_v62 = vld [vmem:[%s28566_s5 + $0x30] ss:$8 sps:$4 sm:$0xff]   ;;  %v18802_v57 = vld [vmem:[%s28566_s5 + $0x144] ss:$8 sps:$4 sm:$0xff]   ;;  %v18797_v7 = vld [vmem:[%s28566_s5 + $0x40] ss:$8 sps:$4 sm:$0xff]  }
 0x8a1   : > { %12008 = vmatprep.subr.bf16.mxu1 %v18787_v21  ;;  %12048 = vmatpush1.bf16.msra.mxu0 %v18782_v43  ;;  %v11199_v36 = vmax.f32 %v11167_v46, 0.0  ;;  %v11173_v2 = vadd.f32 %v27339_v30, %v11119_v8  ;;  %v27446_v0 = vpack.c.bf16 %v11196_v4, %v11192_v49  ;;  %v11201_v53 = vmax.f32 %v11169_v39, 0.0 }
 0x8a2   : > { %v11203_v6 = vmax.f32 %v11171_v12, 0.0  ;;  %12049 = vmatprep.subr.bf16.mxu0 %v18790_v11  ;;  %v11172_v13 = vadd.f32 %v27342_v22, %v11118_v38  ;;  %v11174_v25 = vadd.f32 %v27347_v34, %v11120_v35  ;;  %v11202_v23 = vmax.f32 %v11170_v59, 0.0  ;;  %v18805_v59 = vld [vmem:[%s28566_s5 + $0x54] ss:$8 sps:$4 sm:$0xff]   ;;  %v18803_v38 = vld [vmem:[%s28566_s5 + $0x50] ss:$8 sps:$4 sm:$0xff]  }
 0x8a3   : > { %v10650_v1 = vpop.f32.mrb[188].mxu0  ;;  %v11205_v40 = vmax.f32 %v11173_v2, 0.0  ;;  %v11200_v26 = vmax.f32 %v27420_v19, 0.0 }
 0x8a4   : > { %12009 = vmatpush1.bf16.msra.mxu1 %v18785_v47  ;;  %v11121_v9 = vmax.f32 %v26624_v17, %v10650_v1  ;;  %v11088_v60 = vpop.f32.mrb[188].mxu1  ;;  %v10652_v24 = vpop.f32.mrb[189].mxu0  ;;  %v27454_v16 = vpack.c.bf16 %v11203_v6, %v11199_v36  ;;  %v18799_v17 = vld [vmem:[%s28566_s5 + $0x44] ss:$8 sps:$4 sm:$0xff]   ;;  %v11206_v14 = vmax.f32 %v11174_v25, 0.0  ;;  %v11204_v46 = vmax.f32 %v11172_v13, 0.0 }
 0x8a5   : > { %v11123_v56 = vmax.f32 %v26632_v51, %v11088_v60  ;;  %v11122_v37 = vmax.f32 %v26637_v44, %v10652_v24  ;;  %v11090_v27 = vpop.f32.mrb[189].mxu1  ;;  %v10654_v50 = vpop.f32.mrb[190].mxu0  ;;  %12010 = vmatprep.subr.bf16.mxu1 %v18793_v54  ;;  %12050 = vmatpush1.bf16.msra.mxu0 %v18788_v33  ;;  %v18794_v51 = vld [vmem:[%s28566_s5 + $0x130] ss:$8 sps:$4 sm:$0xff]   ;;  %v27466_v58 = vpack.c.bf16 %v11205_v40, %v11201_v53  ;;  %v18811_v33 = vld [vmem:[%s28566_s5 + $0x64] ss:$8 sps:$4 sm:$0xff]  }
 0x8a6   : > { %v11175_v18 = vadd.f32 %v27335_v3, %v11121_v9  ;;  %v11124_v20 = vmax.f32 %v26645_v15, %v11090_v27  ;;  %v11092_v21 = vpop.f32.mrb[190].mxu1  ;;  %v10656_v44 = vpop.f32.mrb[191].mxu0  ;;  %12051 = vmatprep.subr.bf16.mxu0 %v18796_v31  ;;  %v27473_v15 = vpack.c.bf16 %v11206_v14, %v11202_v23  ;;  %v11125_v39 = vmax.f32 %v26653_v52, %v10654_v50  ;;  %v18800_v52 = vld [vmem:[%s28566_s5 + $0x140] ss:$8 sps:$4 sm:$0xff]   ;;  %v18817_v60 = vld [vmem:[%s28566_s5 + $0x74] ss:$8 sps:$4 sm:$0xff]  }
 0x8a7   : > { %v11177_v48 = vadd.f32 %v27339_v30, %v11123_v56  ;;  %v11176_v41 = vadd.f32 %v27342_v22, %v11122_v37  ;;  %v11094_v43 = vpop.f32.mrb[191].mxu1  ;;  %v11127_v11 = vmax.f32 %v26661_v32, %v11092_v21  ;;  %v11126_v49 = vmax.f32 %v26666_v5, %v10656_v44  ;;  %v18808_v32 = vld [vmem:[%s28566_s5 + $0x154] ss:$8 sps:$4 sm:$0xff]   ;;  %v18809_v13 = vld [vmem:[%s28566_s5 + $0x60] ss:$8 sps:$4 sm:$0xff]  }
 0x8a8   : > { %v11178_v4 = vadd.f32 %v27347_v34, %v11124_v20  ;;  %12011 = vmatpush1.bf16.msra.mxu1 %v18791_v62  ;;  %v11179_v47 = vadd.f32 %v27335_v3, %v11125_v39  ;;  %v11128_v19 = vmax.f32 %v26671_v29, %v11094_v43  ;;  %v27495_v8 = vpack.c.bf16 %v11204_v46, %v11200_v26  ;;  %v18812_v24 = vld [vmem:[%s28566_s5 + $0x160] ss:$8 sps:$4 sm:$0xff]   ;;  %v18820_v62 = vld [vmem:[%s28566_s5 + $0x174] ss:$8 sps:$4 sm:$0xff]   ;;  %v18815_v40 = vld [vmem:[%s28566_s5 + $0x70] ss:$8 sps:$4 sm:$0xff]  }
 0x8a9   : > { %12012 = vmatprep.subr.bf16.mxu1 %v18799_v17  ;;  %12052 = vmatpush1.bf16.msra.mxu0 %v18794_v51  ;;  %v11181_v12 = vadd.f32 %v27339_v30, %v11127_v11  ;;  %v11207_v54 = vmax.f32 %v11175_v18, 0.0  ;;  %v11180_v5 = vadd.f32 %v27342_v22, %v11126_v49  ;;  %v11209_v35 = vmax.f32 %v11177_v48, 0.0  ;;  %v18806_v22 = vld [vmem:[%s28566_s5 + $0x150] ss:$8 sps:$4 sm:$0xff]   ;;  %v18823_v56 = vld [vmem:[%s28566_s5 + $0x84] ss:$8 sps:$4 sm:$0xff]  }
 0x8aa   : > { %12053 = vmatprep.subr.bf16.mxu0 %v18802_v57  ;;  %v11211_v3 = vmax.f32 %v11179_v47, 0.0  ;;  %v11182_v29 = vadd.f32 %v27347_v34, %v11128_v19  ;;  %v11208_v36 = vmax.f32 %v11176_v41, 0.0  ;;  %v11210_v1 = vmax.f32 %v11178_v4, 0.0  ;;  %v18814_v34 = vld [vmem:[%s28566_s5 + $0x164] ss:$8 sps:$4 sm:$0xff]  }
 0x8ab   : > { %v11213_v30 = vmax.f32 %v11181_v12, 0.0  ;;  %v11212_v2 = vmax.f32 %v11180_v5, 0.0  ;;  %v18818_v37 = vld [vmem:[%s28566_s5 + $0x170] ss:$8 sps:$4 sm:$0xff]   ;;  %v18826_v27 = vld [vmem:[%s28566_s5 + $0x184] ss:$8 sps:$4 sm:$0xff]  }
 0x8ac   : > { %12013 = vmatpush1.bf16.msra.mxu1 %v18797_v7  ;;  %v27505_v6 = vpack.c.bf16 %v11211_v3, %v11207_v54  ;;  %v11214_v53 = vmax.f32 %v11182_v29, 0.0  ;;  %v18821_v50 = vld [vmem:[%s28566_s5 + $0x80] ss:$8 sps:$4 sm:$0xff]   ;;  %v18829_v17 = vld [vmem:[%s28566_s5 + $0x94] ss:$8 sps:$4 sm:$0xff]  }
 0x8ad   : > { %12014 = vmatprep.subr.bf16.mxu1 %v18805_v59  ;;  %12054 = vmatpush1.bf16.msra.mxu0 %v18800_v52  ;;  %v27510_v31 = vpack.c.bf16 %v11213_v30, %v11209_v35  ;;  %v27518_v25 = vpack.c.bf16 %v11212_v2, %v11208_v36  ;;  %v18824_v23 = vld [vmem:[%s28566_s5 + $0x180] ss:$8 sps:$4 sm:$0xff]   ;;  %v18832_v14 = vld [vmem:[%s28566_s5 + $0x194] ss:$8 sps:$4 sm:$0xff]   ;;  %v18827_v18 = vld [vmem:[%s28566_s5 + $0x90] ss:$8 sps:$4 sm:$0xff]  }
 0x8ae   : > { %12055 = vmatprep.subr.bf16.mxu0 %v18808_v32  ;;  %v27520_v9 = vpack.c.bf16 %v11214_v53, %v11210_v1  ;;  %v18835_v20 = vld [vmem:[%s28566_s5 + $0xa4] ss:$8 sps:$4 sm:$0xff]   ;;  %v18830_v21 = vld [vmem:[%s28566_s5 + $0x190] ss:$8 sps:$4 sm:$0xff]   ;;  %v18833_v44 = vld [vmem:[%s28566_s5 + $0xa0] ss:$8 sps:$4 sm:$0xff]  }
 0x8af   : > { %v18838_v51 = vld [vmem:[%s28566_s5 + $0x1a4] ss:$8 sps:$4 sm:$0xff]   ;;  %v18841_v46 = vld [vmem:[%s28566_s5 + $0xb4] ss:$8 sps:$4 sm:$0xff]   ;;  %v18836_v48 = vld [vmem:[%s28566_s5 + $0x1a0] ss:$8 sps:$4 sm:$0xff]  }
 0x8b0   : > { %12015 = vmatpush1.bf16.msra.mxu1 %v18803_v38  ;;  %v18844_v41 = vld [vmem:[%s28566_s5 + $0x1b4] ss:$8 sps:$4 sm:$0xff]   ;;  %v18839_v43 = vld [vmem:[%s28566_s5 + $0xb0] ss:$8 sps:$4 sm:$0xff]   ;;  %v18847_v57 = vld [vmem:[%s28566_s5 + $0xc4] ss:$8 sps:$4 sm:$0xff]  }
 0x8b1   : > { %12016 = vmatprep.subr.bf16.mxu1 %v18811_v33  ;;  %12056 = vmatpush1.bf16.msra.mxu0 %v18806_v22  ;;  %v18842_v4 = vld [vmem:[%s28566_s5 + $0x1b0] ss:$8 sps:$4 sm:$0xff]   ;;  %v18850_v39 = vld [vmem:[%s28566_s5 + $0x384] ss:$8 sps:$4 sm:$0xff]   ;;  %v18845_v7 = vld [vmem:[%s28566_s5 + $0xc0] ss:$8 sps:$4 sm:$0xff]  }
 0x8b2   : > { %12057 = vmatprep.subr.bf16.mxu0 %v18814_v34  ;;  %v18853_v26 = vld [vmem:[%s28566_s5 + $0xd4] ss:$8 sps:$4 sm:$0xff]   ;;  %v18848_v11 = vld [vmem:[%s28566_s5 + $0x380] ss:$8 sps:$4 sm:$0xff]   ;;  %v18851_v47 = vld [vmem:[%s28566_s5 + $0xd0] ss:$8 sps:$4 sm:$0xff]  }
 0x8b3   : > { %v18856_v59 = vld [vmem:[%s28566_s5 + $0x394] ss:$8 sps:$4 sm:$0xff]   ;;  %v18859_v49 = vld [vmem:[%s28566_s5 + $0xe4] ss:$8 sps:$4 sm:$0xff]   ;;  %v18854_v52 = vld [vmem:[%s28566_s5 + $0x390] ss:$8 sps:$4 sm:$0xff]  }
 0x8b4   : > { %12017 = vmatpush1.bf16.msra.mxu1 %v18809_v13  ;;  %v18862_v12 = vld [vmem:[%s28566_s5 + $0x3a4] ss:$8 sps:$4 sm:$0xff]   ;;  %v18865_v19 = vld [vmem:[%s28566_s5 + $0xf4] ss:$8 sps:$4 sm:$0xff]   ;;  %v18860_v32 = vld [vmem:[%s28566_s5 + $0x3a0] ss:$8 sps:$4 sm:$0xff]  }
 0x8b5   : > { %12018 = vmatprep.subr.bf16.mxu1 %v18817_v60  ;;  %12058 = vmatpush1.bf16.msra.mxu0 %v18812_v24  ;;  %v18868_v54 = vld [vmem:[%s28566_s5 + $0x3b4] ss:$8 sps:$4 sm:$0xff]   ;;  %v18863_v3 = vld [vmem:[%s28566_s5 + $0xf0] ss:$8 sps:$4 sm:$0xff]   ;;  %v18874_v5 = vld [vmem:[%s28566_s5 + $0x484] ss:$8 sps:$4 sm:$0xff]  }
 0x8b6   : > { %12059 = vmatprep.subr.bf16.mxu0 %v18820_v62  ;;  %v18866_v38 = vld [vmem:[%s28566_s5 + $0x3b0] ss:$8 sps:$4 sm:$0xff]   ;;  %v18871_v35 = vld [vmem:[%s28566_s5 + $0x3c4] ss:$8 sps:$4 sm:$0xff]   ;;  %v18872_v30 = vld [vmem:[%s28566_s5 + $0x480] ss:$8 sps:$4 sm:$0xff]  }
 0x8b7   : > { %v18880_v29 = vld [vmem:[%s28566_s5 + $0x494] ss:$8 sps:$4 sm:$0xff]   ;;  %v18869_v33 = vld [vmem:[%s28566_s5 + $0x3c0] ss:$8 sps:$4 sm:$0xff]   ;;  %v18878_v2 = vld [vmem:[%s28566_s5 + $0x490] ss:$8 sps:$4 sm:$0xff]  }
 0x8b8   : > { %12019 = vmatpush1.bf16.msra.mxu1 %v18815_v40  ;;  %v18877_v36 = vld [vmem:[%s28566_s5 + $0x3d4] ss:$8 sps:$4 sm:$0xff]   ;;  %v18886_v22 = vld [vmem:[%s28566_s5 + $0x4a4] ss:$8 sps:$4 sm:$0xff]   ;;  %v18884_v53 = vld [vmem:[%s28566_s5 + $0x4a0] ss:$8 sps:$4 sm:$0xff]  }
 0x8b9   : > { %12020 = vmatprep.subr.bf16.mxu1 %v18823_v56  ;;  %12060 = vmatpush1.bf16.msra.mxu0 %v18818_v37  ;;  %v18883_v1 = vld [vmem:[%s28566_s5 + $0x3e4] ss:$8 sps:$4 sm:$0xff]   ;;  %v18892_v34 = vld [vmem:[%s28566_s5 + $0x4b4] ss:$8 sps:$4 sm:$0xff]   ;;  %v18881_v13 = vld [vmem:[%s28566_s5 + $0x3e0] ss:$8 sps:$4 sm:$0xff]  }
 0x8ba   : > { %12061 = vmatprep.subr.bf16.mxu0 %v18826_v27  ;;  %v18889_v60 = vld [vmem:[%s28566_s5 + $0x3f4] ss:$8 sps:$4 sm:$0xff]   ;;  %v18890_v24 = vld [vmem:[%s28566_s5 + $0x4b0] ss:$8 sps:$4 sm:$0xff]   ;;  %v18898_v62 = vld [vmem:[%s28566_s5 + $0x4c4] ss:$8 sps:$4 sm:$0xff]  }
 0x8bb   : > { %v18887_v40 = vld [vmem:[%s28566_s5 + $0x3f0] ss:$8 sps:$4 sm:$0xff]   ;;  %v18895_v56 = vld [vmem:[%s28566_s5 + $0x404] ss:$8 sps:$4 sm:$0xff]   ;;  %v18896_v37 = vld [vmem:[%s28566_s5 + $0x4c0] ss:$8 sps:$4 sm:$0xff]  }
 0x8bc   : > { %12021 = vmatpush1.bf16.msra.mxu1 %v18821_v50  ;;  %v18904_v27 = vld [vmem:[%s28566_s5 + $0x4d4] ss:$8 sps:$4 sm:$0xff]   ;;  %v18893_v50 = vld [vmem:[%s28566_s5 + $0x400] ss:$8 sps:$4 sm:$0xff]  }
 0x8bd   : > { %12022 = vmatprep.subr.bf16.mxu1 %v18829_v17  ;;  %12062 = vmatpush1.bf16.msra.mxu0 %v18824_v23  ;;  %v18901_v17 = vld [vmem:[%s28566_s5 + $0x414] ss:$8 sps:$4 sm:$0xff]   ;;  %v18902_v23 = vld [vmem:[%s28566_s5 + $0x4d0] ss:$8 sps:$4 sm:$0xff]  }
 0x8be   : > { %12063 = vmatprep.subr.bf16.mxu0 %v18832_v14  ;;  %v18910_v14 = vld [vmem:[%s28566_s5 + $0x4e4] ss:$8 sps:$4 sm:$0xff]  }
 0x8c0   : > { %12023 = vmatpush1.bf16.msra.mxu1 %v18827_v18  ;;  %v18899_v18 = vld [vmem:[%s28566_s5 + $0x410] ss:$8 sps:$4 sm:$0xff]  }
 0x8c1   : > { %12024 = vmatprep.subr.bf16.mxu1 %v18835_v20  ;;  %12064 = vmatpush1.bf16.msra.mxu0 %v18830_v21  ;;  %v18907_v20 = vld [vmem:[%s28566_s5 + $0x424] ss:$8 sps:$4 sm:$0xff]   ;;  %v18908_v21 = vld [vmem:[%s28566_s5 + $0x4e0] ss:$8 sps:$4 sm:$0xff]  }
 0x8c2   : > { %12065 = vmatprep.subr.bf16.mxu0 %v18838_v51  ;;  %v18916_v51 = vld [vmem:[%s28566_s5 + $0x4f4] ss:$8 sps:$4 sm:$0xff]  }
 0x8c4   : > { %12025 = vmatpush1.bf16.msra.mxu1 %v18833_v44  ;;  %v18905_v44 = vld [vmem:[%s28566_s5 + $0x420] ss:$8 sps:$4 sm:$0xff]  }
 0x8c5   : > { %12026 = vmatprep.subr.bf16.mxu1 %v18841_v46  ;;  %12066 = vmatpush1.bf16.msra.mxu0 %v18836_v48  ;;  %v18913_v46 = vld [vmem:[%s28566_s5 + $0x434] ss:$8 sps:$4 sm:$0xff]   ;;  %v18914_v48 = vld [vmem:[%s28566_s5 + $0x4f0] ss:$8 sps:$4 sm:$0xff]  }
 0x8c6   : > { %12067 = vmatprep.subr.bf16.mxu0 %v18844_v41  ;;  %v18922_v41 = vld [vmem:[%s28566_s5 + $0x504] ss:$8 sps:$4 sm:$0xff]  }
 0x8c8   : > { %12027 = vmatpush1.bf16.msra.mxu1 %v18839_v43  ;;  %v18911_v43 = vld [vmem:[%s28566_s5 + $0x430] ss:$8 sps:$4 sm:$0xff]  }
 0x8c9   : > { %12028 = vmatprep.subr.bf16.mxu1 %v18847_v57  ;;  %12068 = vmatpush1.bf16.msra.mxu0 %v18842_v4  ;;  %v18919_v57 = vld [vmem:[%s28566_s5 + $0x444] ss:$8 sps:$4 sm:$0xff]   ;;  %v18920_v4 = vld [vmem:[%s28566_s5 + $0x500] ss:$8 sps:$4 sm:$0xff]  }
 0x8ca   : > { %12426 = vmatprep.subr.bf16.mxu0 %v18850_v39  ;;  %v18928_v39 = vld [vmem:[%s28566_s5 + $0x514] ss:$8 sps:$4 sm:$0xff]  }
 0x8cc   : > { %12029 = vmatpush1.bf16.msra.mxu1 %v18845_v7  ;;  %12078 = vmatmul.mubr.bf16.vlgmr.msra.gmra.mrb[196].mxu0 %v27367_v63  ;;  %v18857_v63 = vld [vmem:[%s28566_s5 + $0xe0] ss:$8 sps:$4 sm:$0xff]  }
 0x8cd   : > { %12030 = vmatprep.subr.bf16.mxu1 %v18853_v26  ;;  %12427 = vmatpush1.bf16.msra.mxu0 %v18848_v11  ;;  %v18917_v7 = vld [vmem:[%s28566_s5 + $0x440] ss:$8 sps:$4 sm:$0xff]   ;;  %v18925_v26 = vld [vmem:[%s28566_s5 + $0x454] ss:$8 sps:$4 sm:$0xff]   ;;  %v18926_v11 = vld [vmem:[%s28566_s5 + $0x510] ss:$8 sps:$4 sm:$0xff]  }
 0x8ce   : > { %12458 = vmatprep.mubr.bf16.mxu0 %v27446_v0  ;;  %12428 = vmatprep.subr.bf16.mxu0 %v18856_v59  ;;  %v18934_v59 = vld [vmem:[%s28566_s5 + $0x524] ss:$8 sps:$4 sm:$0xff]  }
 0x8d0   : > { %12031 = vmatpush1.bf16.msra.mxu1 %v18851_v47  ;;  %v18923_v47 = vld [vmem:[%s28566_s5 + $0x450] ss:$8 sps:$4 sm:$0xff]  }
 0x8d1   : > { %12032 = vmatprep.subr.bf16.mxu1 %v18859_v49  ;;  %12429 = vmatpush1.bf16.msra.mxu0 %v18854_v52  ;;  %v18931_v49 = vld [vmem:[%s28566_s5 + $0x464] ss:$8 sps:$4 sm:$0xff]   ;;  %v18932_v52 = vld [vmem:[%s28566_s5 + $0x520] ss:$8 sps:$4 sm:$0xff]  }
 0x8d2   : > { %12430 = vmatprep.subr.bf16.mxu0 %v18862_v12  ;;  %v18940_v12 = vld [vmem:[%s28566_s5 + $0x534] ss:$8 sps:$4 sm:$0xff]  }
 0x8d4   : > { %12033 = vmatpush1.bf16.msra.mxu1 %v18857_v63  ;;  %v18929_v63 = vld [vmem:[%s28566_s5 + $0x460] ss:$8 sps:$4 sm:$0xff]  }
 0x8d5   : > { %12034 = vmatprep.subr.bf16.mxu1 %v18865_v19  ;;  %12431 = vmatpush1.bf16.msra.mxu0 %v18860_v32  ;;  %v18937_v19 = vld [vmem:[%s28566_s5 + $0x474] ss:$8 sps:$4 sm:$0xff]   ;;  %v18938_v32 = vld [vmem:[%s28566_s5 + $0x530] ss:$8 sps:$4 sm:$0xff]  }
 0x8d6   : > { %12432 = vmatprep.subr.bf16.mxu0 %v18868_v54  ;;  %v18943_v54 = vld [vmem:[%s28566_s5 + $0x544] ss:$8 sps:$4 sm:$0xff]  }
 0x8d8   : > { %12035 = vmatpush1.bf16.msra.mxu1 %v18863_v3  ;;  %v18935_v3 = vld [vmem:[%s28566_s5 + $0x470] ss:$8 sps:$4 sm:$0xff]  }
 0x8d9   : > { %12467 = vmatprep.subr.bf16.mxu1 %v18874_v5  ;;  %12433 = vmatpush1.bf16.msra.mxu0 %v18866_v38  ;;  %v18946_v5 = vld [vmem:[%s28566_s5 + $0x644] ss:$8 sps:$4 sm:$0xff]   ;;  %v18941_v38 = vld [vmem:[%s28566_s5 + $0x540] ss:$8 sps:$4 sm:$0xff]  }
 0x8da   : > { %12434 = vmatprep.subr.bf16.mxu0 %v18871_v35  ;;  %v18949_v35 = vld [vmem:[%s28566_s5 + $0x554] ss:$8 sps:$4 sm:$0xff]  }
 0x8db   : > { %12037 = vmatmul.mubr.bf16.vlgmr.msra.gmra.mrb[196].mxu1 %v27364_v42  ;;  %v18875_v42 = vld [vmem:[%s28566_s5 + $0x3d0] ss:$8 sps:$4 sm:$0xff]  }
 0x8dc   : > { %12468 = vmatpush1.bf16.msra.mxu1 %v18872_v30  ;;  %16197 = vmatprep.mubr.msk.bf16.mxu1 %vm11635_vm2, %v27426_v28  ;;  %v18944_v30 = vld [vmem:[%s28566_s5 + $0x640] ss:$8 sps:$4 sm:$0xff]  }
 0x8dd   : > { %12469 = vmatprep.subr.bf16.mxu1 %v18880_v29  ;;  %12435 = vmatpush1.bf16.msra.mxu0 %v18869_v33  ;;  %v12572_v29 = vrot.slane %v27446_v0, 4  ;;  %v18952_v33 = vld [vmem:[%s28566_s5 + $0x654] ss:$8 sps:$4 sm:$0xff]   ;;  %v18955_v0 = vld [vmem:[%s28566_s5 + $0x564] ss:$8 sps:$4 sm:$0xff]  }
 0x8de   : > { %12436 = vmatprep.subr.bf16.mxu0 %v18877_v36  ;;  %v12574_v36 = vrot.slane %v27426_v28, 4  ;;  %v18950_v28 = vld [vmem:[%s28566_s5 + $0x650] ss:$8 sps:$4 sm:$0xff]  }
 0x8e0   : > { %12470 = vmatpush1.bf16.msra.mxu1 %v18878_v2  ;;  %v18947_v2 = vld [vmem:[%s28566_s5 + $0x550] ss:$8 sps:$4 sm:$0xff]  }
 0x8e1   : > { %12471 = vmatprep.subr.bf16.mxu1 %v18886_v22  ;;  %12437 = vmatpush1.bf16.msra.mxu0 %v18875_v42  ;;  %v18958_v22 = vld [vmem:[%s28566_s5 + $0x664] ss:$8 sps:$4 sm:$0xff]   ;;  %v18953_v42 = vld [vmem:[%s28566_s5 + $0x560] ss:$8 sps:$4 sm:$0xff]  }
 0x8e2   : > { %12438 = vmatprep.subr.bf16.mxu0 %v18883_v1  ;;  %v18961_v1 = vld [vmem:[%s28566_s5 + $0x574] ss:$8 sps:$4 sm:$0xff]  }
 0x8e4   : > { %12472 = vmatpush1.bf16.msra.mxu1 %v18884_v53  ;;  %v18956_v53 = vld [vmem:[%s28566_s5 + $0x660] ss:$8 sps:$4 sm:$0xff]  }
 0x8e5   : > { %12473 = vmatprep.subr.bf16.mxu1 %v18892_v34  ;;  %12439 = vmatpush1.bf16.msra.mxu0 %v18881_v13  ;;  %v18964_v34 = vld [vmem:[%s28566_s5 + $0x674] ss:$8 sps:$4 sm:$0xff]   ;;  %v18959_v13 = vld [vmem:[%s28566_s5 + $0x570] ss:$8 sps:$4 sm:$0xff]  }
 0x8e6   : > { %12440 = vmatprep.subr.bf16.mxu0 %v18889_v60  ;;  %v18967_v60 = vld [vmem:[%s28566_s5 + $0x584] ss:$8 sps:$4 sm:$0xff]  }
 0x8e8   : > { %12474 = vmatpush1.bf16.msra.mxu1 %v18890_v24  ;;  %v18962_v24 = vld [vmem:[%s28566_s5 + $0x670] ss:$8 sps:$4 sm:$0xff]  }
 0x8e9   : > { %12475 = vmatprep.subr.bf16.mxu1 %v18898_v62  ;;  %12441 = vmatpush1.bf16.msra.mxu0 %v18887_v40  ;;  %v18970_v62 = vld [vmem:[%s28566_s5 + $0x684] ss:$8 sps:$4 sm:$0xff]   ;;  %v18965_v40 = vld [vmem:[%s28566_s5 + $0x580] ss:$8 sps:$4 sm:$0xff]  }
 0x8ea   : > { %12442 = vmatprep.subr.bf16.mxu0 %v18895_v56  ;;  %v18973_v56 = vld [vmem:[%s28566_s5 + $0x594] ss:$8 sps:$4 sm:$0xff]  }
 0x8ec   : > { %12476 = vmatpush1.bf16.msra.mxu1 %v18896_v37  ;;  %v18968_v37 = vld [vmem:[%s28566_s5 + $0x680] ss:$8 sps:$4 sm:$0xff]  }
 0x8ed   : > { %12477 = vmatprep.subr.bf16.mxu1 %v18904_v27  ;;  %12443 = vmatpush1.bf16.msra.mxu0 %v18893_v50  ;;  %v18976_v27 = vld [vmem:[%s28566_s5 + $0x694] ss:$8 sps:$4 sm:$0xff]   ;;  %v18971_v50 = vld [vmem:[%s28566_s5 + $0x590] ss:$8 sps:$4 sm:$0xff]  }
 0x8ee   : > { %12444 = vmatprep.subr.bf16.mxu0 %v18901_v17  ;;  %v18979_v17 = vld [vmem:[%s28566_s5 + $0x5a4] ss:$8 sps:$4 sm:$0xff]  }
 0x8f0   : > { %12478 = vmatpush1.bf16.msra.mxu1 %v18902_v23  ;;  %v18974_v23 = vld [vmem:[%s28566_s5 + $0x690] ss:$8 sps:$4 sm:$0xff]  }
 0x8f1   : > { %12479 = vmatprep.subr.bf16.mxu1 %v18910_v14  ;;  %12445 = vmatpush1.bf16.msra.mxu0 %v18899_v18  ;;  %v18982_v14 = vld [vmem:[%s28566_s5 + $0x6a4] ss:$8 sps:$4 sm:$0xff]   ;;  %v18977_v18 = vld [vmem:[%s28566_s5 + $0x5a0] ss:$8 sps:$4 sm:$0xff]  }
 0x8f2   : > { %12446 = vmatprep.subr.bf16.mxu0 %v18907_v20  ;;  %v18985_v20 = vld [vmem:[%s28566_s5 + $0x5b4] ss:$8 sps:$4 sm:$0xff]  }
 0x8f4   : > { %12480 = vmatpush1.bf16.msra.mxu1 %v18908_v21  ;;  %v18980_v21 = vld [vmem:[%s28566_s5 + $0x6a0] ss:$8 sps:$4 sm:$0xff]  }
 0x8f5   : > { %12481 = vmatprep.subr.bf16.mxu1 %v18916_v51  ;;  %12447 = vmatpush1.bf16.msra.mxu0 %v18905_v44  ;;  %v18988_v51 = vld [vmem:[%s28566_s5 + $0x6b4] ss:$8 sps:$4 sm:$0xff]   ;;  %v18983_v44 = vld [vmem:[%s28566_s5 + $0x5b0] ss:$8 sps:$4 sm:$0xff]  }
 0x8f6   : > { %12448 = vmatprep.subr.bf16.mxu0 %v18913_v46  ;;  %v18991_v46 = vld [vmem:[%s28566_s5 + $0x5c4] ss:$8 sps:$4 sm:$0xff]  }
 0x8f8   : > { %12482 = vmatpush1.bf16.msra.mxu1 %v18914_v48  ;;  %v18986_v48 = vld [vmem:[%s28566_s5 + $0x6b0] ss:$8 sps:$4 sm:$0xff]  }
 0x8f9   : > { %12483 = vmatprep.subr.bf16.mxu1 %v18922_v41  ;;  %12449 = vmatpush1.bf16.msra.mxu0 %v18911_v43  ;;  %v18994_v41 = vld [vmem:[%s28566_s5 + $0x6c4] ss:$8 sps:$4 sm:$0xff]   ;;  %v18989_v43 = vld [vmem:[%s28566_s5 + $0x5c0] ss:$8 sps:$4 sm:$0xff]  }
 0x8fa   : > { %12450 = vmatprep.subr.bf16.mxu0 %v18919_v57  ;;  %v18997_v57 = vld [vmem:[%s28566_s5 + $0x5d4] ss:$8 sps:$4 sm:$0xff]  }
 0x8fc   : > { %12484 = vmatpush1.bf16.msra.mxu1 %v18920_v4  ;;  %v18992_v4 = vld [vmem:[%s28566_s5 + $0x6c0] ss:$8 sps:$4 sm:$0xff]  }
 0x8fd   : > { %12485 = vmatprep.subr.bf16.mxu1 %v18928_v39  ;;  %12451 = vmatpush1.bf16.msra.mxu0 %v18917_v7  ;;  %v19000_v39 = vld [vmem:[%s28566_s5 + $0x6d4] ss:$8 sps:$4 sm:$0xff]   ;;  %v18995_v7 = vld [vmem:[%s28566_s5 + $0x5d0] ss:$8 sps:$4 sm:$0xff]  }
 0x8fe   : > { %12452 = vmatprep.subr.bf16.mxu0 %v18925_v26  ;;  %v19003_v26 = vld [vmem:[%s28566_s5 + $0x5e4] ss:$8 sps:$4 sm:$0xff]  }
 0x900   : > { %12486 = vmatpush1.bf16.msra.mxu1 %v18926_v11  ;;  %v18998_v11 = vld [vmem:[%s28566_s5 + $0x6d0] ss:$8 sps:$4 sm:$0xff]  }
 0x901   : > { %12487 = vmatprep.subr.bf16.mxu1 %v18934_v59  ;;  %12453 = vmatpush1.bf16.msra.mxu0 %v18923_v47  ;;  %v19006_v59 = vld [vmem:[%s28566_s5 + $0x6e4] ss:$8 sps:$4 sm:$0xff]   ;;  %v19001_v47 = vld [vmem:[%s28566_s5 + $0x5e0] ss:$8 sps:$4 sm:$0xff]  }
 0x902   : > { %12454 = vmatprep.subr.bf16.mxu0 %v18931_v49  ;;  %v19009_v49 = vld [vmem:[%s28566_s5 + $0x5f4] ss:$8 sps:$4 sm:$0xff]  }
 0x904   : > { %12488 = vmatpush1.bf16.msra.mxu1 %v18932_v52  ;;  %v19004_v52 = vld [vmem:[%s28566_s5 + $0x6e0] ss:$8 sps:$4 sm:$0xff]  }
 0x905   : > { %12489 = vmatprep.subr.bf16.mxu1 %v18940_v12  ;;  %12455 = vmatpush1.bf16.msra.mxu0 %v18929_v63  ;;  %v19012_v12 = vld [vmem:[%s28566_s5 + $0x6f4] ss:$8 sps:$4 sm:$0xff]   ;;  %v19007_v63 = vld [vmem:[%s28566_s5 + $0x5f0] ss:$8 sps:$4 sm:$0xff]  }
 0x906   : > { %12456 = vmatprep.subr.bf16.mxu0 %v18937_v19  ;;  %v19015_v19 = vld [vmem:[%s28566_s5 + $0x604] ss:$8 sps:$4 sm:$0xff]  }
 0x908   : > { %12490 = vmatpush1.bf16.msra.mxu1 %v18938_v32  ;;  %v19010_v32 = vld [vmem:[%s28566_s5 + $0x6f0] ss:$8 sps:$4 sm:$0xff]  }
 0x909   : > { %12861 = vmatprep.subr.bf16.mxu1 %v18943_v54  ;;  %12457 = vmatpush1.bf16.msra.mxu0 %v18935_v3  ;;  %v19018_v54 = vld [vmem:[%s28566_s5 + $0x704] ss:$8 sps:$4 sm:$0xff]   ;;  %v19013_v3 = vld [vmem:[%s28566_s5 + $0x600] ss:$8 sps:$4 sm:$0xff]  }
 0x90a   : > { %12902 = vmatprep.subr.bf16.mxu0 %v18946_v5  ;;  %v19021_v5 = vld [vmem:[%s28566_s5 + $0x614] ss:$8 sps:$4 sm:$0xff]  }
 0x90b   : > { %12500 = vmatmul.mubr.bf16.vlgmr.msra.gmra.mrb[200].mxu1 %v27410_v10 }
 0x90c   : > { %12862 = vmatpush1.bf16.msra.mxu1 %v18941_v38  ;;  %12893 = vmatprep.mubr.bf16.mxu1 %v12572_v29  ;;  %v19016_v38 = vld [vmem:[%s28566_s5 + $0x700] ss:$8 sps:$4 sm:$0xff]   ;;  %v19019_v29 = vld [vmem:[%s28566_s5 + $0x610] ss:$8 sps:$4 sm:$0xff]  }
 0x90d   : > { %12459 = vmatmul.mubr.bf16.vlgmr.msra.gmra.mrb[200].mxu0 %v27403_v61  ;;  %12863 = vmatprep.subr.bf16.mxu1 %v18949_v35  ;;  %v12573_v35 = vrot.slane %v27410_v10, 4  ;;  %v19022_v10 = vld [vmem:[%s28566_s5 + $0x710] ss:$8 sps:$4 sm:$0xff]  }
 0x90e   : > { %12903 = vmatpush1.bf16.msra.mxu0 %v18944_v30  ;;  %16310 = vmatprep.mubr.msk.bf16.mxu0 %vm11635_vm2, %v12574_v36  ;;  %v19024_v30 = vld [vmem:[%s28566_s5 + $0x714] ss:$8 sps:$4 sm:$0xff]   ;;  %v19030_v36 = vld [vmem:[%s28566_s5 + $0x724] ss:$8 sps:$4 sm:$0xff]  }
 0x90f   : > { %12904 = vmatprep.subr.bf16.mxu0 %v18952_v33  ;;  %v19027_v33 = vld [vmem:[%s28566_s5 + $0x624] ss:$8 sps:$4 sm:$0xff]  }
 0x910   : > { %12864 = vmatpush1.bf16.msra.mxu1 %v18947_v2  ;;  %v19025_v2 = vld [vmem:[%s28566_s5 + $0x620] ss:$8 sps:$4 sm:$0xff]  }
 0x911   : > { %12865 = vmatprep.subr.bf16.mxu1 %v18955_v0  ;;  %v19033_v0 = vld [vmem:[%s28566_s5 + $0x634] ss:$8 sps:$4 sm:$0xff]  }
 0x912   : > { %12905 = vmatpush1.bf16.msra.mxu0 %v18950_v28  ;;  %v19028_v28 = vld [vmem:[%s28566_s5 + $0x720] ss:$8 sps:$4 sm:$0xff]  }
 0x913   : > { %12906 = vmatprep.subr.bf16.mxu0 %v18958_v22  ;;  %v19036_v22 = vld [vmem:[%s28566_s5 + $0x734] ss:$8 sps:$4 sm:$0xff]  }
 0x914   : > { %12866 = vmatpush1.bf16.msra.mxu1 %v18953_v42  ;;  %v19031_v42 = vld [vmem:[%s28566_s5 + $0x630] ss:$8 sps:$4 sm:$0xff]  }
 0x915   : > { %12867 = vmatprep.subr.bf16.mxu1 %v18961_v1  ;;  %v19042_v1 = vld [vmem:[%s28566_s5 + $0x804] ss:$8 sps:$4 sm:$0xff]  }
 0x916   : > { %12907 = vmatpush1.bf16.msra.mxu0 %v18956_v53  ;;  %v19034_v53 = vld [vmem:[%s28566_s5 + $0x730] ss:$8 sps:$4 sm:$0xff]  }
 0x917   : > { %12908 = vmatprep.subr.bf16.mxu0 %v18964_v34  ;;  %v19039_v34 = vld [vmem:[%s28566_s5 + $0x744] ss:$8 sps:$4 sm:$0xff]  }
 0x918   : > { %12868 = vmatpush1.bf16.msra.mxu1 %v18959_v13  ;;  %v19040_v13 = vld [vmem:[%s28566_s5 + $0x800] ss:$8 sps:$4 sm:$0xff]  }
 0x919   : > { %12869 = vmatprep.subr.bf16.mxu1 %v18967_v60  ;;  %v12571_v60 = vrot.slane %v27403_v61, 4  ;;  %v19046_v61 = vld [vmem:[%s28566_s5 + $0x810] ss:$8 sps:$4 sm:$0xff]  }
 0x91a   : > { %12909 = vmatpush1.bf16.msra.mxu0 %v18962_v24  ;;  %v19048_v24 = vld [vmem:[%s28566_s5 + $0x814] ss:$8 sps:$4 sm:$0xff]  }
 0x91b   : > { %12910 = vmatprep.subr.bf16.mxu0 %v18970_v62  ;;  %v19037_v62 = vld [vmem:[%s28566_s5 + $0x740] ss:$8 sps:$4 sm:$0xff]  }
 0x91c   : > { %12870 = vmatpush1.bf16.msra.mxu1 %v18965_v40  ;;  %v19045_v40 = vld [vmem:[%s28566_s5 + $0x754] ss:$8 sps:$4 sm:$0xff]  }
 0x91d   : > { %12871 = vmatprep.subr.bf16.mxu1 %v18973_v56  ;;  %v19054_v56 = vld [vmem:[%s28566_s5 + $0x824] ss:$8 sps:$4 sm:$0xff]  }
 0x91e   : > { %12911 = vmatpush1.bf16.msra.mxu0 %v18968_v37  ;;  %v19043_v37 = vld [vmem:[%s28566_s5 + $0x750] ss:$8 sps:$4 sm:$0xff]  }
 0x91f   : > { %12912 = vmatprep.subr.bf16.mxu0 %v18976_v27  ;;  %v19051_v27 = vld [vmem:[%s28566_s5 + $0x764] ss:$8 sps:$4 sm:$0xff]  }
 0x920   : > { %12872 = vmatpush1.bf16.msra.mxu1 %v18971_v50  ;;  %v19052_v50 = vld [vmem:[%s28566_s5 + $0x820] ss:$8 sps:$4 sm:$0xff]  }
 0x921   : > { %12873 = vmatprep.subr.bf16.mxu1 %v18979_v17  ;;  %v19060_v17 = vld [vmem:[%s28566_s5 + $0x834] ss:$8 sps:$4 sm:$0xff]  }
 0x922   : > { %12913 = vmatpush1.bf16.msra.mxu0 %v18974_v23  ;;  %v19049_v23 = vld [vmem:[%s28566_s5 + $0x760] ss:$8 sps:$4 sm:$0xff]  }
 0x923   : > { %12914 = vmatprep.subr.bf16.mxu0 %v18982_v14  ;;  %v19057_v14 = vld [vmem:[%s28566_s5 + $0x774] ss:$8 sps:$4 sm:$0xff]  }
 0x924   : > { %12874 = vmatpush1.bf16.msra.mxu1 %v18977_v18  ;;  %v19058_v18 = vld [vmem:[%s28566_s5 + $0x830] ss:$8 sps:$4 sm:$0xff]  }
 0x925   : > { %12875 = vmatprep.subr.bf16.mxu1 %v18985_v20  ;;  %v19066_v20 = vld [vmem:[%s28566_s5 + $0x844] ss:$8 sps:$4 sm:$0xff]  }
 0x926   : > { %12915 = vmatpush1.bf16.msra.mxu0 %v18980_v21  ;;  %v19055_v21 = vld [vmem:[%s28566_s5 + $0x770] ss:$8 sps:$4 sm:$0xff]  }
 0x927   : > { %12916 = vmatprep.subr.bf16.mxu0 %v18988_v51  ;;  %v19063_v51 = vld [vmem:[%s28566_s5 + $0x784] ss:$8 sps:$4 sm:$0xff]  }
 0x928   : > { %12876 = vmatpush1.bf16.msra.mxu1 %v18983_v44  ;;  %v19064_v44 = vld [vmem:[%s28566_s5 + $0x840] ss:$8 sps:$4 sm:$0xff]  }
 0x929   : > { %12877 = vmatprep.subr.bf16.mxu1 %v18991_v46  ;;  %v19072_v46 = vld [vmem:[%s28566_s5 + $0x854] ss:$8 sps:$4 sm:$0xff]  }
 0x92a   : > { %12917 = vmatpush1.bf16.msra.mxu0 %v18986_v48  ;;  %v19061_v48 = vld [vmem:[%s28566_s5 + $0x780] ss:$8 sps:$4 sm:$0xff]  }
 0x92b   : > { %12918 = vmatprep.subr.bf16.mxu0 %v18994_v41  ;;  %v19069_v41 = vld [vmem:[%s28566_s5 + $0x794] ss:$8 sps:$4 sm:$0xff]  }
 0x92c   : > { %12878 = vmatpush1.bf16.msra.mxu1 %v18989_v43  ;;  %v19070_v43 = vld [vmem:[%s28566_s5 + $0x850] ss:$8 sps:$4 sm:$0xff]  }
 0x92d   : > { %12879 = vmatprep.subr.bf16.mxu1 %v18997_v57  ;;  %v19078_v57 = vld [vmem:[%s28566_s5 + $0x864] ss:$8 sps:$4 sm:$0xff]  }
 0x92e   : > { %12919 = vmatpush1.bf16.msra.mxu0 %v18992_v4  ;;  %v19067_v4 = vld [vmem:[%s28566_s5 + $0x790] ss:$8 sps:$4 sm:$0xff]  }
 0x92f   : > { %12920 = vmatprep.subr.bf16.mxu0 %v19000_v39  ;;  %v19075_v39 = vld [vmem:[%s28566_s5 + $0x7a4] ss:$8 sps:$4 sm:$0xff]  }
 0x930   : > { %12880 = vmatpush1.bf16.msra.mxu1 %v18995_v7  ;;  %v19076_v7 = vld [vmem:[%s28566_s5 + $0x860] ss:$8 sps:$4 sm:$0xff]  }
 0x931   : > { %12881 = vmatprep.subr.bf16.mxu1 %v19003_v26  ;;  %v19084_v26 = vld [vmem:[%s28566_s5 + $0x874] ss:$8 sps:$4 sm:$0xff]  }
 0x932   : > { %12921 = vmatpush1.bf16.msra.mxu0 %v18998_v11  ;;  %v19073_v11 = vld [vmem:[%s28566_s5 + $0x7a0] ss:$8 sps:$4 sm:$0xff]  }
 0x933   : > { %12922 = vmatprep.subr.bf16.mxu0 %v19006_v59  ;;  %v19081_v59 = vld [vmem:[%s28566_s5 + $0x7b4] ss:$8 sps:$4 sm:$0xff]  }
 0x934   : > { %12882 = vmatpush1.bf16.msra.mxu1 %v19001_v47  ;;  %v19082_v47 = vld [vmem:[%s28566_s5 + $0x870] ss:$8 sps:$4 sm:$0xff]  }
 0x935   : > { %12883 = vmatprep.subr.bf16.mxu1 %v19009_v49  ;;  %v19090_v49 = vld [vmem:[%s28566_s5 + $0x884] ss:$8 sps:$4 sm:$0xff]  }
 0x936   : > { %12923 = vmatpush1.bf16.msra.mxu0 %v19004_v52  ;;  %v19079_v52 = vld [vmem:[%s28566_s5 + $0x7b0] ss:$8 sps:$4 sm:$0xff]  }
 0x937   : > { %12924 = vmatprep.subr.bf16.mxu0 %v19012_v12  ;;  %v19087_v12 = vld [vmem:[%s28566_s5 + $0x7c4] ss:$8 sps:$4 sm:$0xff]  }
 0x938   : > { %12884 = vmatpush1.bf16.msra.mxu1 %v19007_v63  ;;  %v19088_v63 = vld [vmem:[%s28566_s5 + $0x880] ss:$8 sps:$4 sm:$0xff]  }
 0x939   : > { %12885 = vmatprep.subr.bf16.mxu1 %v19015_v19  ;;  %v19096_v19 = vld [vmem:[%s28566_s5 + $0x894] ss:$8 sps:$4 sm:$0xff]  }
 0x93a   : > { %12925 = vmatpush1.bf16.msra.mxu0 %v19010_v32  ;;  %v19085_v32 = vld [vmem:[%s28566_s5 + $0x7c0] ss:$8 sps:$4 sm:$0xff]  }
 0x93b   : > { %13285 = vmatprep.subr.bf16.mxu0 %v19018_v54  ;;  %v19093_v54 = vld [vmem:[%s28566_s5 + $0x7d4] ss:$8 sps:$4 sm:$0xff]  }
 0x93c   : > { %12886 = vmatpush1.bf16.msra.mxu1 %v19013_v3  ;;  %v19094_v3 = vld [vmem:[%s28566_s5 + $0x890] ss:$8 sps:$4 sm:$0xff]  }
 0x93d   : > { %12935 = vmatmul.mubr.bf16.vlgmr.msra.gmra.mrb[204].mxu0 %v12573_v35  ;;  %12887 = vmatprep.subr.bf16.mxu1 %v19021_v5  ;;  %v19102_v5 = vld [vmem:[%s28566_s5 + $0x8a4] ss:$8 sps:$4 sm:$0xff]   ;;  %v19091_v35 = vld [vmem:[%s28566_s5 + $0x7d0] ss:$8 sps:$4 sm:$0xff]  }
 0x93e   : > { %13286 = vmatpush1.bf16.msra.mxu0 %v19016_v38  ;;  %13317 = vmatprep.mubr.bf16.mxu0 %v27495_v8 }
 0x93f   : > { %13287 = vmatprep.subr.bf16.mxu0 %v19024_v30 }
 0x940   : > { %12888 = vmatpush1.bf16.msra.mxu1 %v19019_v29  ;;  %v19099_v29 = vld [vmem:[%s28566_s5 + $0x7e4] ss:$8 sps:$4 sm:$0xff]  }
 0x941   : > { %12889 = vmatprep.subr.bf16.mxu1 %v19027_v33 }
 0x942   : > { %13288 = vmatpush1.bf16.msra.mxu0 %v19022_v10 }
 0x943   : > { %13289 = vmatprep.subr.bf16.mxu0 %v19030_v36  ;;  %v19100_v36 = vld [vmem:[%s28566_s5 + $0x8a0] ss:$8 sps:$4 sm:$0xff]  }
 0x944   : > { %12890 = vmatpush1.bf16.msra.mxu1 %v19025_v2 }
 0x945   : > { %12891 = vmatprep.subr.bf16.mxu1 %v19033_v0 }
 0x946   : > { %13290 = vmatpush1.bf16.msra.mxu0 %v19028_v28 }
 0x947   : > { %13291 = vmatprep.subr.bf16.mxu0 %v19036_v22  ;;  %v19108_v22 = vld [vmem:[%s28566_s5 + $0x8b4] ss:$8 sps:$4 sm:$0xff]  }
 0x948   : > { %12892 = vmatpush1.bf16.msra.mxu1 %v19031_v42 }
 0x949   : > { %13326 = vmatprep.subr.bf16.mxu1 %v19042_v1 }
 0x94a   : > { %13292 = vmatpush1.bf16.msra.mxu0 %v19034_v53  ;;  %v19097_v53 = vld [vmem:[%s28566_s5 + $0x7e0] ss:$8 sps:$4 sm:$0xff]  }
 0x94b   : > { %12894 = vmatmul.mubr.bf16.vlgmr.msra.gmra.mrb[204].mxu1 %v12571_v60  ;;  %13293 = vmatprep.subr.bf16.mxu0 %v19039_v34  ;;  %v19106_v60 = vld [vmem:[%s28566_s5 + $0x8b0] ss:$8 sps:$4 sm:$0xff]  }
 0x94c   : > { %13327 = vmatpush1.bf16.msra.mxu1 %v19040_v13  ;;  %16423 = vmatprep.mubr.msk.bf16.mxu1 %vm11635_vm2, %v27473_v15  ;;  %v19105_v13 = vld [vmem:[%s28566_s5 + $0x7f4] ss:$8 sps:$4 sm:$0xff]  }
 0x94d   : > { %13328 = vmatprep.subr.bf16.mxu1 %v19048_v24  ;;  %v19111_v24 = vld [vmem:[%s28566_s5 + $0x8c4] ss:$8 sps:$4 sm:$0xff]  }
 0x94e   : > { %13294 = vmatpush1.bf16.msra.mxu0 %v19037_v62  ;;  %v19103_v62 = vld [vmem:[%s28566_s5 + $0x7f0] ss:$8 sps:$4 sm:$0xff]  }
 0x94f   : > { %13295 = vmatprep.subr.bf16.mxu0 %v19045_v40  ;;  %v19114_v40 = vld [vmem:[%s28566_s5 + $0x9c4] ss:$8 sps:$4 sm:$0xff]  }
 0x950   : > { %13329 = vmatpush1.bf16.msra.mxu1 %v19046_v61  ;;  %v19109_v61 = vld [vmem:[%s28566_s5 + $0x8c0] ss:$8 sps:$4 sm:$0xff]  }
 0x951   : > { %13330 = vmatprep.subr.bf16.mxu1 %v19054_v56  ;;  %v19117_v56 = vld [vmem:[%s28566_s5 + $0x8d4] ss:$8 sps:$4 sm:$0xff]  }
 0x952   : > { %13296 = vmatpush1.bf16.msra.mxu0 %v19043_v37  ;;  %v19112_v37 = vld [vmem:[%s28566_s5 + $0x9c0] ss:$8 sps:$4 sm:$0xff]  }
 0x953   : > { %13297 = vmatprep.subr.bf16.mxu0 %v19051_v27  ;;  %v13431_v27 = vrot.slane %v27495_v8, 4  ;;  %v19123_v8 = vld [vmem:[%s28566_s5 + $0x8e4] ss:$8 sps:$4 sm:$0xff]  }
 0x954   : > { %13331 = vmatpush1.bf16.msra.mxu1 %v19052_v50  ;;  %v19120_v50 = vld [vmem:[%s28566_s5 + $0x9d4] ss:$8 sps:$4 sm:$0xff]  }
 0x955   : > { %13332 = vmatprep.subr.bf16.mxu1 %v19060_v17  ;;  %v13433_v17 = vrot.slane %v27473_v15, 4  ;;  %v19118_v15 = vld [vmem:[%s28566_s5 + $0x9d0] ss:$8 sps:$4 sm:$0xff]  }
 0x956   : > { %13298 = vmatpush1.bf16.msra.mxu0 %v19049_v23  ;;  %v19115_v23 = vld [vmem:[%s28566_s5 + $0x8d0] ss:$8 sps:$4 sm:$0xff]  }
 0x957   : > { %13299 = vmatprep.subr.bf16.mxu0 %v19057_v14  ;;  %v19126_v14 = vld [vmem:[%s28566_s5 + $0x9e4] ss:$8 sps:$4 sm:$0xff]  }
 0x958   : > { %13333 = vmatpush1.bf16.msra.mxu1 %v19058_v18  ;;  %v19121_v18 = vld [vmem:[%s28566_s5 + $0x8e0] ss:$8 sps:$4 sm:$0xff]  }
 0x959   : > { %13334 = vmatprep.subr.bf16.mxu1 %v19066_v20  ;;  %v19129_v20 = vld [vmem:[%s28566_s5 + $0x8f4] ss:$8 sps:$4 sm:$0xff]  }
 0x95a   : > { %13300 = vmatpush1.bf16.msra.mxu0 %v19055_v21  ;;  %v19124_v21 = vld [vmem:[%s28566_s5 + $0x9e0] ss:$8 sps:$4 sm:$0xff]  }
 0x95b   : > { %13301 = vmatprep.subr.bf16.mxu0 %v19063_v51  ;;  %v19132_v51 = vld [vmem:[%s28566_s5 + $0x9f4] ss:$8 sps:$4 sm:$0xff]  }
 0x95c   : > { %13335 = vmatpush1.bf16.msra.mxu1 %v19064_v44  ;;  %v19127_v44 = vld [vmem:[%s28566_s5 + $0x8f0] ss:$8 sps:$4 sm:$0xff]  }
 0x95d   : > { %13336 = vmatprep.subr.bf16.mxu1 %v19072_v46  ;;  %v19135_v46 = vld [vmem:[%s28566_s5 + $0x904] ss:$8 sps:$4 sm:$0xff]  }
 0x95e   : > { %13302 = vmatpush1.bf16.msra.mxu0 %v19061_v48  ;;  %v19130_v48 = vld [vmem:[%s28566_s5 + $0x9f0] ss:$8 sps:$4 sm:$0xff]  }
 0x95f   : > { %13303 = vmatprep.subr.bf16.mxu0 %v19069_v41  ;;  %v19138_v41 = vld [vmem:[%s28566_s5 + $0xa04] ss:$8 sps:$4 sm:$0xff]  }
 0x960   : > { %13337 = vmatpush1.bf16.msra.mxu1 %v19070_v43  ;;  %v19133_v43 = vld [vmem:[%s28566_s5 + $0x900] ss:$8 sps:$4 sm:$0xff]  }
 0x961   : > { %13338 = vmatprep.subr.bf16.mxu1 %v19078_v57  ;;  %v19141_v57 = vld [vmem:[%s28566_s5 + $0x914] ss:$8 sps:$4 sm:$0xff]  }
 0x962   : > { %13304 = vmatpush1.bf16.msra.mxu0 %v19067_v4  ;;  %v19136_v4 = vld [vmem:[%s28566_s5 + $0xa00] ss:$8 sps:$4 sm:$0xff]  }
 0x963   : > { %13305 = vmatprep.subr.bf16.mxu0 %v19075_v39  ;;  %v19144_v39 = vld [vmem:[%s28566_s5 + $0xa14] ss:$8 sps:$4 sm:$0xff]  }
 0x964   : > { %13339 = vmatpush1.bf16.msra.mxu1 %v19076_v7  ;;  %v19139_v7 = vld [vmem:[%s28566_s5 + $0x910] ss:$8 sps:$4 sm:$0xff]  }
 0x965   : > { %13340 = vmatprep.subr.bf16.mxu1 %v19084_v26  ;;  %v19147_v26 = vld [vmem:[%s28566_s5 + $0x924] ss:$8 sps:$4 sm:$0xff]  }
 0x966   : > { %13306 = vmatpush1.bf16.msra.mxu0 %v19073_v11  ;;  %v19142_v11 = vld [vmem:[%s28566_s5 + $0xa10] ss:$8 sps:$4 sm:$0xff]  }
 0x967   : > { %13307 = vmatprep.subr.bf16.mxu0 %v19081_v59  ;;  %v19150_v59 = vld [vmem:[%s28566_s5 + $0xa24] ss:$8 sps:$4 sm:$0xff]  }
 0x968   : > { %13341 = vmatpush1.bf16.msra.mxu1 %v19082_v47  ;;  %v19145_v47 = vld [vmem:[%s28566_s5 + $0x920] ss:$8 sps:$4 sm:$0xff]  }
 0x969   : > { %13342 = vmatprep.subr.bf16.mxu1 %v19090_v49  ;;  %v19153_v49 = vld [vmem:[%s28566_s5 + $0x934] ss:$8 sps:$4 sm:$0xff]  }
 0x96a   : > { %13308 = vmatpush1.bf16.msra.mxu0 %v19079_v52  ;;  %v19148_v52 = vld [vmem:[%s28566_s5 + $0xa20] ss:$8 sps:$4 sm:$0xff]  }
 0x96b   : > { %13309 = vmatprep.subr.bf16.mxu0 %v19087_v12  ;;  %v19156_v12 = vld [vmem:[%s28566_s5 + $0xa34] ss:$8 sps:$4 sm:$0xff]  }
 0x96c   : > { %13343 = vmatpush1.bf16.msra.mxu1 %v19088_v63  ;;  %v19151_v63 = vld [vmem:[%s28566_s5 + $0x930] ss:$8 sps:$4 sm:$0xff]  }
 0x96d   : > { %13344 = vmatprep.subr.bf16.mxu1 %v19096_v19  ;;  %v19159_v19 = vld [vmem:[%s28566_s5 + $0x944] ss:$8 sps:$4 sm:$0xff]  }
 0x96e   : > { %13310 = vmatpush1.bf16.msra.mxu0 %v19085_v32  ;;  %v11714_v38 = vpop.f32.mrb[192].mxu1  ;;  %v19154_v32 = vld [vmem:[%s28566_s5 + $0xa30] ss:$8 sps:$4 sm:$0xff]  }
 0x96f   : > { %13311 = vmatprep.subr.bf16.mxu0 %v19093_v54  ;;  %v11716_v30 = vpop.f32.mrb[193].mxu1  ;;  %v11673_v33 = vpop.f32.mrb[192].mxu0  ;;  %v19162_v54 = vld [vmem:[%s28566_s5 + $0xa44] ss:$8 sps:$4 sm:$0xff]  }
 0x970   : > { %13345 = vmatpush1.bf16.msra.mxu1 %v19094_v3  ;;  %v11718_v10 = vpop.f32.mrb[194].mxu1  ;;  %v28113_v2 = vadd.f32 %v11714_v38, %v11673_v33  ;;  %v11675_v0 = vpop.f32.mrb[193].mxu0  ;;  %v19157_v3 = vld [vmem:[%s28566_s5 + $0x940] ss:$8 sps:$4 sm:$0xff]   ;;  %v19166_v33 = vld [vmem:[%s28566_s5 + $0xa50] ss:$8 sps:$4 sm:$0xff]  }
 0x971   : > { %v11719_v28 = vpop.f32.mrb[195].mxu1  ;;  %13346 = vmatprep.subr.bf16.mxu1 %v19102_v5  ;;  %v28118_v42 = vadd.f32 %v11716_v30, %v11675_v0  ;;  %v11677_v1 = vpop.f32.mrb[194].mxu0  ;;  %v19165_v5 = vld [vmem:[%s28566_s5 + $0x954] ss:$8 sps:$4 sm:$0xff]   ;;  %v19160_v38 = vld [vmem:[%s28566_s5 + $0xa40] ss:$8 sps:$4 sm:$0xff]  }
 0x972   : > { %13312 = vmatpush1.bf16.msra.mxu0 %v19091_v35  ;;  %v11678_v34 = vpop.f32.mrb[195].mxu0  ;;  %v19168_v35 = vld [vmem:[%s28566_s5 + $0xa54] ss:$8 sps:$4 sm:$0xff]   ;;  %v19163_v30 = vld [vmem:[%s28566_s5 + $0x950] ss:$8 sps:$4 sm:$0xff]  }
 0x973   : > { %13313 = vmatprep.subr.bf16.mxu0 %v19099_v29  ;;  %v19171_v29 = vld [vmem:[%s28566_s5 + $0x964] ss:$8 sps:$4 sm:$0xff]   ;;  %v19169_v0 = vld [vmem:[%s28566_s5 + $0x960] ss:$8 sps:$4 sm:$0xff]  }
 0x974   : > { %13347 = vmatpush1.bf16.msra.mxu1 %v19100_v36  ;;  %v19174_v10 = vld [vmem:[%s28566_s5 + $0xa64] ss:$8 sps:$4 sm:$0xff]  }
 0x975   : > { %13348 = vmatprep.subr.bf16.mxu1 %v19108_v22  ;;  %v19177_v22 = vld [vmem:[%s28566_s5 + $0x974] ss:$8 sps:$4 sm:$0xff]  }
 0x976   : > { %13314 = vmatpush1.bf16.msra.mxu0 %v19097_v53  ;;  %v19172_v53 = vld [vmem:[%s28566_s5 + $0xa60] ss:$8 sps:$4 sm:$0xff]  }
 0x977   : > { %13315 = vmatprep.subr.bf16.mxu0 %v19105_v13  ;;  %v19180_v13 = vld [vmem:[%s28566_s5 + $0xa74] ss:$8 sps:$4 sm:$0xff]  }
 0x978   : > { %13349 = vmatpush1.bf16.msra.mxu1 %v19106_v60  ;;  %v19175_v60 = vld [vmem:[%s28566_s5 + $0x970] ss:$8 sps:$4 sm:$0xff]  }
 0x979   : > { %13720 = vmatprep.subr.bf16.mxu1 %v19111_v24  ;;  %v19183_v24 = vld [vmem:[%s28566_s5 + $0x984] ss:$8 sps:$4 sm:$0xff]  }
 0x97a   : > { %13316 = vmatpush1.bf16.msra.mxu0 %v19103_v62  ;;  %v19178_v62 = vld [vmem:[%s28566_s5 + $0xa70] ss:$8 sps:$4 sm:$0xff]  }
 0x97b   : > { %13359 = vmatmul.mubr.bf16.vlgmr.msra.gmra.mrb[208].mxu1 %v27466_v58  ;;  %13761 = vmatprep.subr.bf16.mxu0 %v19114_v40  ;;  %v19186_v40 = vld [vmem:[%s28566_s5 + $0xa84] ss:$8 sps:$4 sm:$0xff]  }
 0x97c   : > { %13721 = vmatpush1.bf16.msra.mxu1 %v19109_v61  ;;  %13752 = vmatprep.mubr.bf16.mxu1 %v13431_v27  ;;  %v19181_v61 = vld [vmem:[%s28566_s5 + $0x980] ss:$8 sps:$4 sm:$0xff]   ;;  %v13432_v27 = vrot.slane %v27466_v58, 4 }
 0x97d   : > { %13318 = vmatmul.mubr.bf16.vlgmr.msra.gmra.mrb[208].mxu0 %v27454_v16  ;;  %13722 = vmatprep.subr.bf16.mxu1 %v19117_v56  ;;  %v19189_v56 = vld [vmem:[%s28566_s5 + $0x994] ss:$8 sps:$4 sm:$0xff]  }
 0x97e   : > { %13762 = vmatpush1.bf16.msra.mxu0 %v19112_v37  ;;  %16536 = vmatprep.mubr.msk.bf16.mxu0 %vm11635_vm2, %v13433_v17  ;;  %v19184_v37 = vld [vmem:[%s28566_s5 + $0xa80] ss:$8 sps:$4 sm:$0xff]   ;;  %v19187_v17 = vld [vmem:[%s28566_s5 + $0x990] ss:$8 sps:$4 sm:$0xff]  }
 0x97f   : > { %13763 = vmatprep.subr.bf16.mxu0 %v19120_v50  ;;  %v19192_v50 = vld [vmem:[%s28566_s5 + $0xa94] ss:$8 sps:$4 sm:$0xff]  }
 0x980   : > { %13723 = vmatpush1.bf16.msra.mxu1 %v19115_v23  ;;  %v19195_v23 = vld [vmem:[%s28566_s5 + $0x9a4] ss:$8 sps:$4 sm:$0xff]  }
 0x981   : > { %13724 = vmatprep.subr.bf16.mxu1 %v19123_v8  ;;  %v19190_v8 = vld [vmem:[%s28566_s5 + $0xa90] ss:$8 sps:$4 sm:$0xff]  }
 0x982   : > { %13764 = vmatpush1.bf16.msra.mxu0 %v19118_v15 }
 0x983   : > { %13765 = vmatprep.subr.bf16.mxu0 %v19126_v14 }
 0x984   : > { %13725 = vmatpush1.bf16.msra.mxu1 %v19121_v18  ;;  %v19198_v18 = vld [vmem:[%s28566_s5 + $0xaa4] ss:$8 sps:$4 sm:$0xff]  }
 0x985   : > { %13726 = vmatprep.subr.bf16.mxu1 %v19129_v20 }
 0x986   : > { %13766 = vmatpush1.bf16.msra.mxu0 %v19124_v21 }
 0x987   : > { %13767 = vmatprep.subr.bf16.mxu0 %v19132_v51 }
 0x988   : > { %13727 = vmatpush1.bf16.msra.mxu1 %v19127_v44 }
 0x989   : > { %13728 = vmatprep.subr.bf16.mxu1 %v19135_v46 }
 0x98a   : > { %13768 = vmatpush1.bf16.msra.mxu0 %v19130_v48  ;;  %v19204_v48 = vld [vmem:[%s28566_s5 + $0xab4] ss:$8 sps:$4 sm:$0xff]  }
 0x98b   : > { %13769 = vmatprep.subr.bf16.mxu0 %v19138_v41  ;;  %v19199_v41 = vld [vmem:[%s28566_s5 + $0x9b0] ss:$8 sps:$4 sm:$0xff]  }
 0x98c   : > { %13729 = vmatpush1.bf16.msra.mxu1 %v19133_v43  ;;  %v19210_v43 = vld [vmem:[%s28566_s5 + $0xb84] ss:$8 sps:$4 sm:$0xff]  }
 0x98d   : > { %13730 = vmatprep.subr.bf16.mxu1 %v19141_v57  ;;  %v19202_v57 = vld [vmem:[%s28566_s5 + $0xab0] ss:$8 sps:$4 sm:$0xff]  }
 0x98e   : > { %13770 = vmatpush1.bf16.msra.mxu0 %v19136_v4  ;;  %v19207_v4 = vld [vmem:[%s28566_s5 + $0xac4] ss:$8 sps:$4 sm:$0xff]  }
 0x98f   : > { %13771 = vmatprep.subr.bf16.mxu0 %v19144_v39  ;;  %v19208_v39 = vld [vmem:[%s28566_s5 + $0xb80] ss:$8 sps:$4 sm:$0xff]  }
 0x990   : > { %13731 = vmatpush1.bf16.msra.mxu1 %v19139_v7  ;;  %v13430_v7 = vrot.slane %v27454_v16, 4  ;;  %v19214_v16 = vld [vmem:[%s28566_s5 + $0xb90] ss:$8 sps:$4 sm:$0xff]  }
 0x991   : > { %13732 = vmatprep.subr.bf16.mxu1 %v19147_v26  ;;  %v19216_v26 = vld [vmem:[%s28566_s5 + $0xb94] ss:$8 sps:$4 sm:$0xff]  }
 0x992   : > { %13772 = vmatpush1.bf16.msra.mxu0 %v19142_v11  ;;  %v19205_v11 = vld [vmem:[%s28566_s5 + $0xac0] ss:$8 sps:$4 sm:$0xff]  }
 0x993   : > { %13773 = vmatprep.subr.bf16.mxu0 %v19150_v59  ;;  %v19213_v59 = vld [vmem:[%s28566_s5 + $0xad4] ss:$8 sps:$4 sm:$0xff]  }
 0x994   : > { %13733 = vmatpush1.bf16.msra.mxu1 %v19145_v47  ;;  %v19222_v47 = vld [vmem:[%s28566_s5 + $0xba4] ss:$8 sps:$4 sm:$0xff]  }
 0x995   : > { %13734 = vmatprep.subr.bf16.mxu1 %v19153_v49  ;;  %v19211_v49 = vld [vmem:[%s28566_s5 + $0xad0] ss:$8 sps:$4 sm:$0xff]  }
 0x996   : > { %13774 = vmatpush1.bf16.msra.mxu0 %v19148_v52  ;;  %v19219_v52 = vld [vmem:[%s28566_s5 + $0xae4] ss:$8 sps:$4 sm:$0xff]  }
 0x997   : > { %13775 = vmatprep.subr.bf16.mxu0 %v19156_v12  ;;  %v19228_v12 = vld [vmem:[%s28566_s5 + $0xbb4] ss:$8 sps:$4 sm:$0xff]  }
 0x998   : > { %13735 = vmatpush1.bf16.msra.mxu1 %v19151_v63  ;;  %v19217_v63 = vld [vmem:[%s28566_s5 + $0xae0] ss:$8 sps:$4 sm:$0xff]  }
 0x999   : > { %13736 = vmatprep.subr.bf16.mxu1 %v19159_v19  ;;  %v19225_v19 = vld [vmem:[%s28566_s5 + $0xaf4] ss:$8 sps:$4 sm:$0xff]  }
 0x99a   : > { %13776 = vmatpush1.bf16.msra.mxu0 %v19154_v32  ;;  %v19226_v32 = vld [vmem:[%s28566_s5 + $0xbb0] ss:$8 sps:$4 sm:$0xff]  }
 0x99b   : > { %13777 = vmatprep.subr.bf16.mxu0 %v19162_v54  ;;  %v19234_v54 = vld [vmem:[%s28566_s5 + $0xbc4] ss:$8 sps:$4 sm:$0xff]  }
 0x99c   : > { %13737 = vmatpush1.bf16.msra.mxu1 %v19157_v3  ;;  %v19223_v3 = vld [vmem:[%s28566_s5 + $0xaf0] ss:$8 sps:$4 sm:$0xff]  }
 0x99d   : > { %13738 = vmatprep.subr.bf16.mxu1 %v19165_v5  ;;  %v19231_v5 = vld [vmem:[%s28566_s5 + $0xb04] ss:$8 sps:$4 sm:$0xff]  }
 0x99e   : > { %13778 = vmatpush1.bf16.msra.mxu0 %v19160_v38  ;;  %v19232_v38 = vld [vmem:[%s28566_s5 + $0xbc0] ss:$8 sps:$4 sm:$0xff]  }
 0x99f   : > { %13779 = vmatprep.subr.bf16.mxu0 %v19168_v35  ;;  %v12079_v36 = vpop.f32.mrb[196].mxu0  ;;  %v19240_v35 = vld [vmem:[%s28566_s5 + $0xbd4] ss:$8 sps:$4 sm:$0xff]  }
 0x9a0   : > { %13739 = vmatpush1.bf16.msra.mxu1 %v19163_v30  ;;  %v12081_v28 = vpop.f32.mrb[197].mxu0  ;;  %v19229_v30 = vld [vmem:[%s28566_s5 + $0xb00] ss:$8 sps:$4 sm:$0xff]  }
 0x9a1   : > { %13740 = vmatprep.subr.bf16.mxu1 %v19171_v29  ;;  %v12083_v1 = vpop.f32.mrb[198].mxu0  ;;  %v19237_v29 = vld [vmem:[%s28566_s5 + $0xb14] ss:$8 sps:$4 sm:$0xff]  }
 0x9a2   : > { %13780 = vmatpush1.bf16.msra.mxu0 %v19166_v33  ;;  %v12084_v34 = vpop.f32.mrb[199].mxu0  ;;  %v19238_v33 = vld [vmem:[%s28566_s5 + $0xbd0] ss:$8 sps:$4 sm:$0xff]   ;;  %v19241_v1 = vld [vmem:[%s28566_s5 + $0xb20] ss:$8 sps:$4 sm:$0xff]  }
 0x9a3   : > { %13781 = vmatprep.subr.bf16.mxu0 %v19174_v10  ;;  %v19246_v10 = vld [vmem:[%s28566_s5 + $0xbe4] ss:$8 sps:$4 sm:$0xff]   ;;  %v19250_v34 = vld [vmem:[%s28566_s5 + $0xbf0] ss:$8 sps:$4 sm:$0xff]  }
 0x9a4   : > { %13741 = vmatpush1.bf16.msra.mxu1 %v19169_v0  ;;  %v19243_v0 = vld [vmem:[%s28566_s5 + $0xb24] ss:$8 sps:$4 sm:$0xff]  }
 0x9a5   : > { %13742 = vmatprep.subr.bf16.mxu1 %v19177_v22  ;;  %v19252_v22 = vld [vmem:[%s28566_s5 + $0xbf4] ss:$8 sps:$4 sm:$0xff]  }
 0x9a6   : > { %13782 = vmatpush1.bf16.msra.mxu0 %v19172_v53  ;;  %v19249_v53 = vld [vmem:[%s28566_s5 + $0xb34] ss:$8 sps:$4 sm:$0xff]  }
 0x9a7   : > { %13783 = vmatprep.subr.bf16.mxu0 %v19180_v13  ;;  %v19258_v13 = vld [vmem:[%s28566_s5 + $0xc04] ss:$8 sps:$4 sm:$0xff]  }
 0x9a8   : > { %13743 = vmatpush1.bf16.msra.mxu1 %v19175_v60  ;;  %v19247_v60 = vld [vmem:[%s28566_s5 + $0xb30] ss:$8 sps:$4 sm:$0xff]  }
 0x9a9   : > { %13744 = vmatprep.subr.bf16.mxu1 %v19183_v24  ;;  %v19255_v24 = vld [vmem:[%s28566_s5 + $0xb44] ss:$8 sps:$4 sm:$0xff]  }
 0x9aa   : > { %13784 = vmatpush1.bf16.msra.mxu0 %v19178_v62  ;;  %v19256_v62 = vld [vmem:[%s28566_s5 + $0xc00] ss:$8 sps:$4 sm:$0xff]  }
 0x9ab   : > { %14144 = vmatprep.subr.bf16.mxu0 %v19186_v40  ;;  %v19264_v40 = vld [vmem:[%s28566_s5 + $0xc14] ss:$8 sps:$4 sm:$0xff]  }
 0x9ac   : > { %13745 = vmatpush1.bf16.msra.mxu1 %v19181_v61  ;;  %v19253_v61 = vld [vmem:[%s28566_s5 + $0xb40] ss:$8 sps:$4 sm:$0xff]  }
 0x9ad   : > { %13794 = vmatmul.mubr.bf16.vlgmr.msra.gmra.mrb[212].mxu0 %v13432_v27  ;;  %13746 = vmatprep.subr.bf16.mxu1 %v19189_v56  ;;  %v19261_v56 = vld [vmem:[%s28566_s5 + $0xb54] ss:$8 sps:$4 sm:$0xff]   ;;  %v19270_v27 = vld [vmem:[%s28566_s5 + $0xc24] ss:$8 sps:$4 sm:$0xff]  }
 0x9ae   : > { %14145 = vmatpush1.bf16.msra.mxu0 %v19184_v37  ;;  %14176 = vmatprep.mubr.bf16.mxu0 %v27518_v25  ;;  %v12038_v58 = vpop.f32.mrb[196].mxu1  ;;  %v19193_v25 = vld [vmem:[%s28566_s5 + $0x9a0] ss:$8 sps:$4 sm:$0xff]   ;;  %v19262_v37 = vld [vmem:[%s28566_s5 + $0xc10] ss:$8 sps:$4 sm:$0xff]  }
 0x9af   : > { %v12039_v15 = vadd.f32 %v12038_v58, %v28113_v2  ;;  %v12040_v14 = vpop.f32.mrb[197].mxu1  ;;  %14146 = vmatprep.subr.bf16.mxu0 %v19192_v50  ;;  %v19201_v2 = vld [vmem:[%s28566_s5 + $0x9b4] ss:$8 sps:$4 sm:$0xff]   ;;  %v19267_v58 = vld [vmem:[%s28566_s5 + $0xb64] ss:$8 sps:$4 sm:$0xff]  }
 0x9b0   : > { %v12041_v20 = vadd.f32 %v12040_v14, %v28118_v42  ;;  %v12042_v21 = vpop.f32.mrb[198].mxu1  ;;  %13747 = vmatpush1.bf16.msra.mxu1 %v19187_v17  ;;  %v19196_v42 = vld [vmem:[%s28566_s5 + $0xaa0] ss:$8 sps:$4 sm:$0xff]   ;;  %v19259_v17 = vld [vmem:[%s28566_s5 + $0xb50] ss:$8 sps:$4 sm:$0xff]  }
 0x9b1   : > { %v28318_v51 = vadd.f32 %v12079_v36, %v12039_v15  ;;  %v12043_v44 = vpop.f32.mrb[199].mxu1  ;;  %13748 = vmatprep.subr.bf16.mxu1 %v19195_v23  ;;  %v19235_v36 = vld [vmem:[%s28566_s5 + $0xb10] ss:$8 sps:$4 sm:$0xff]   ;;  %v19268_v14 = vld [vmem:[%s28566_s5 + $0xc20] ss:$8 sps:$4 sm:$0xff]  }
 0x9b2   : > { %v28323_v46 = vadd.f32 %v12081_v28, %v12041_v20  ;;  %14147 = vmatpush1.bf16.msra.mxu0 %v19190_v8  ;;  %v19244_v28 = vld [vmem:[%s28566_s5 + $0xbe0] ss:$8 sps:$4 sm:$0xff]  }
 0x9b3   : > { %14148 = vmatprep.subr.bf16.mxu0 %v19198_v18 }
 0x9b4   : > { %13749 = vmatpush1.bf16.msra.mxu1 %v19193_v25  ;;  %v19276_v25 = vld [vmem:[%s28566_s5 + $0xc34] ss:$8 sps:$4 sm:$0xff]  }
 0x9b5   : > { %13750 = vmatprep.subr.bf16.mxu1 %v19201_v2 }
 0x9b6   : > { %14149 = vmatpush1.bf16.msra.mxu0 %v19196_v42  ;;  %v19265_v42 = vld [vmem:[%s28566_s5 + $0xb60] ss:$8 sps:$4 sm:$0xff]  }
 0x9b7   : > { %14150 = vmatprep.subr.bf16.mxu0 %v19204_v48 }
 0x9b8   : > { %13751 = vmatpush1.bf16.msra.mxu1 %v19199_v41 }
 0x9b9   : > { %14185 = vmatprep.subr.bf16.mxu1 %v19210_v43  ;;  %v19273_v43 = vld [vmem:[%s28566_s5 + $0xb74] ss:$8 sps:$4 sm:$0xff]  }
 0x9ba   : > { %14151 = vmatpush1.bf16.msra.mxu0 %v19202_v57 }
 0x9bb   : > { %13753 = vmatmul.mubr.bf16.vlgmr.msra.gmra.mrb[212].mxu1 %v13430_v7  ;;  %14152 = vmatprep.subr.bf16.mxu0 %v19207_v4  ;;  %v19274_v4 = vld [vmem:[%s28566_s5 + $0xc30] ss:$8 sps:$4 sm:$0xff]  }
 0x9bc   : > { %14186 = vmatpush1.bf16.msra.mxu1 %v19208_v39  ;;  %16649 = vmatprep.mubr.msk.bf16.mxu1 %vm11635_vm2, %v27520_v9  ;;  %v19220_v9 = vld [vmem:[%s28566_s5 + $0xba0] ss:$8 sps:$4 sm:$0xff]   ;;  %v19271_v39 = vld [vmem:[%s28566_s5 + $0xb70] ss:$8 sps:$4 sm:$0xff]  }
 0x9bd   : > { %14187 = vmatprep.subr.bf16.mxu1 %v19216_v26  ;;  %v19277_v26 = vld [vmem:[%s28568_s7 + $0x40] sm:$0xff]  }
 0x9be   : > { %14153 = vmatpush1.bf16.msra.mxu0 %v19205_v11  ;;  %v19278_v11 = vld [vmem:[%s28568_s7] sm:$0xff]  }
 0x9bf   : > { %14154 = vmatprep.subr.bf16.mxu0 %v19213_v59  ;;  %v19279_v59 = vld [vmem:[%s28568_s7 + $0x48] sm:$0xff]  }
 0x9c0   : > { %14188 = vmatpush1.bf16.msra.mxu1 %v19214_v16 }
 0x9c1   : > { %14189 = vmatprep.subr.bf16.mxu1 %v19222_v47  ;;  %v19282_v47 = vld [vmem:[%s28568_s7 + $0x10] sm:$0xff]  }
 0x9c2   : > { %14155 = vmatpush1.bf16.msra.mxu0 %v19211_v49  ;;  %v19283_v49 = vld [vmem:[%s28568_s7 + $0x58] sm:$0xff]  }
 0x9c3   : > { %14156 = vmatprep.subr.bf16.mxu0 %v19219_v52  ;;  %v19284_v52 = vld [vmem:[%s28568_s7 + $0x18] sm:$0xff]  }
 0x9c4   : > { %14190 = vmatpush1.bf16.msra.mxu1 %v19220_v9 }
 0x9c5   : > { %14191 = vmatprep.subr.bf16.mxu1 %v19228_v12  ;;  %v19285_v12 = vld [vmem:[%s28568_s7 + $0x60] sm:$0xff]  }
 0x9c6   : > { %14157 = vmatpush1.bf16.msra.mxu0 %v19217_v63 }
 0x9c7   : > { %14158 = vmatprep.subr.bf16.mxu0 %v19225_v19 }
 0x9c8   : > { %14192 = vmatpush1.bf16.msra.mxu1 %v19226_v32 }
 0x9c9   : > { %14193 = vmatprep.subr.bf16.mxu1 %v19234_v54 }
 0x9ca   : > { %14159 = vmatpush1.bf16.msra.mxu0 %v19223_v3 }
 0x9cb   : > { %14160 = vmatprep.subr.bf16.mxu0 %v19231_v5 }
 0x9cc   : > { %14194 = vmatpush1.bf16.msra.mxu1 %v19232_v38  ;;  %v19286_v38 = vld [vmem:[%s28568_s7 + $0x20] sm:$0xff]  }
 0x9cd   : > { %14195 = vmatprep.subr.bf16.mxu1 %v19240_v35 }
 0x9ce   : > { %14161 = vmatpush1.bf16.msra.mxu0 %v19229_v30  ;;  %v19287_v30 = vld [vmem:[%s28568_s7 + $0x68] sm:$0xff]  }
 0x9cf   : > { %14162 = vmatprep.subr.bf16.mxu0 %v19237_v29  ;;  %v19288_v29 = vld [vmem:[%s28568_s7 + $0x28] sm:$0xff]  }
 0x9d0   : > { %14196 = vmatpush1.bf16.msra.mxu1 %v19238_v33  ;;  %v19289_v33 = vld [vmem:[%s28568_s7 + $0x70] sm:$0xff]  }
 0x9d1   : > { %14197 = vmatprep.subr.bf16.mxu1 %v19246_v10  ;;  %v19290_v10 = vld [vmem:[%s28568_s7 + $0x30] sm:$0xff]  }
 0x9d2   : > { %14163 = vmatpush1.bf16.msra.mxu0 %v19235_v36  ;;  %v19291_v36 = vld [vmem:[%s28568_s7 + $0x78] sm:$0xff]  }
 0x9d3   : > { %14164 = vmatprep.subr.bf16.mxu0 %v19243_v0 }
 0x9d4   : > { %14198 = vmatpush1.bf16.msra.mxu1 %v19244_v28  ;;  %v19292_v28 = vld [vmem:[%s28568_s7 + $0x38] sm:$0xff]  }
 0x9d5   : > { %14199 = vmatprep.subr.bf16.mxu1 %v19252_v22 }
 0x9d6   : > { %14165 = vmatpush1.bf16.msra.mxu0 %v19241_v1 }
 0x9d7   : > { %14166 = vmatprep.subr.bf16.mxu0 %v19249_v53 }
 0x9d8   : > { %14200 = vmatpush1.bf16.msra.mxu1 %v19250_v34 }
 0x9d9   : > { %14201 = vmatprep.subr.bf16.mxu1 %v19258_v13 }
 0x9da   : > { %14167 = vmatpush1.bf16.msra.mxu0 %v19247_v60 }
 0x9db   : > { %14168 = vmatprep.subr.bf16.mxu0 %v19255_v24 }
 0x9dc   : > { %14202 = vmatpush1.bf16.msra.mxu1 %v19256_v62 }
 0x9dd   : > { %14203 = vmatprep.subr.bf16.mxu1 %v19264_v40 }
 0x9de   : > { %14169 = vmatpush1.bf16.msra.mxu0 %v19253_v61  ;;  %v12501_v50 = vpop.f32.mrb[200].mxu1 }
 0x9df   : > { %v12503_v23 = vpop.f32.mrb[201].mxu1  ;;  %14170 = vmatprep.subr.bf16.mxu0 %v19261_v56 }
 0x9e0   : > { %v12460_v8 = vpop.f32.mrb[200].mxu0  ;;  %v12505_v15 = vpop.f32.mrb[202].mxu1  ;;  %14204 = vmatpush1.bf16.msra.mxu1 %v19262_v37 }
 0x9e1   : > { %v12502_v18 = vadd.f32 %v12501_v50, %v12460_v8  ;;  %v12462_v20 = vpop.f32.mrb[201].mxu0  ;;  %v12506_v21 = vpop.f32.mrb[203].mxu1  ;;  %14205 = vmatprep.subr.bf16.mxu1 %v19270_v27 }
 0x9e2   : > { %v12504_v44 = vadd.f32 %v12503_v23, %v12462_v20  ;;  %v12464_v2 = vpop.f32.mrb[202].mxu0  ;;  %14171 = vmatpush1.bf16.msra.mxu0 %v19259_v17 }
 0x9e3   : > { %v12508_v48 = vadd.f32 %v12502_v18, %v28318_v51  ;;  %v12465_v41 = vpop.f32.mrb[203].mxu0  ;;  %14172 = vmatprep.subr.bf16.mxu0 %v19267_v58 }
 0x9e4   : > { %v12509_v57 = vadd.f32 %v12504_v44, %v28323_v46  ;;  %14206 = vmatpush1.bf16.msra.mxu1 %v19268_v14  ;;  %v14228_v44 = vld [vmem:[%s28567_s6] sm:$0x3] }
 0x9e5   : > { %14207 = vmatprep.subr.bf16.mxu1 %v19276_v25 }
 0x9e6   : > { %14173 = vmatpush1.bf16.msra.mxu0 %v19265_v42 }
 0x9e7   : > { %14174 = vmatprep.subr.bf16.mxu0 %v19273_v43  ;;  %v14233_v43 = vrot.slane %v14228_v44, %v29242_v55 }
 0x9e8   : > { %14208 = vmatpush1.bf16.msra.mxu1 %v19274_v4 }
 0x9e9   : > { %16762 = vmatprep.subr.bf16.mxu1 %v19277_v26 }
 0x9ea   : > { %14175 = vmatpush1.bf16.msra.mxu0 %v19271_v39 }
 0x9eb   : > { %14218 = vmatmul.mubr.bf16.vlgmr.msra.gmra.mrb[216].mxu1 %v27510_v31  ;;  %v19281_v31 = vld [vmem:[%s28568_s7 + $0x50] sm:$0xff]  }
 0x9ec   : > { %16763 = vmatpush3.bf16.msra.mxu1 %v19278_v11 }
 0x9ed   : > { %14177 = vmatmul.mubr.bf16.vlgmr.msra.gmra.mrb[216].mxu0 %v27505_v6  ;;  %v19280_v6 = vld [vmem:[%s28568_s7 + $0x8] sm:$0xff]   ;;  %16764 = vmatprep.subr.bf16.mxu1 %v19279_v59 }
 0x9f0   : > { %16765 = vmatpush3.bf16.msra.mxu1 %v19280_v6 }
 0x9f1   : > { %16766 = vmatprep.subr.bf16.mxu1 %v19281_v31 }
 0x9f4   : > { %16767 = vmatpush3.bf16.msra.mxu1 %v19282_v47 }
 0x9f5   : > { %16768 = vmatprep.subr.bf16.mxu1 %v19283_v49 }
 0x9f8   : > { %16769 = vmatpush3.bf16.msra.mxu1 %v19284_v52 }
 0x9f9   : > { %16770 = vmatprep.subr.bf16.mxu1 %v19285_v12 }
 0x9fc   : > { %16771 = vmatpush3.bf16.msra.mxu1 %v19286_v38 }
 0x9fd   : > { %16772 = vmatprep.subr.bf16.mxu1 %v19287_v30 }
 0xa00   : > { %16773 = vmatpush3.bf16.msra.mxu1 %v19288_v29 }
 0xa01   : > { %16774 = vmatprep.subr.bf16.mxu1 %v19289_v33 }
 0xa04   : > { %16775 = vmatpush3.bf16.msra.mxu1 %v19290_v10 }
 0xa05   : > { %16776 = vmatprep.subr.bf16.mxu1 %v19291_v36 }
 0xa08   : > { %16777 = vmatpush3.bf16.msra.mxu1 %v19292_v28 }
 0xa10   : > { %v12936_v51 = vpop.f32.mrb[204].mxu0 }
 0xa11   : > { %v12938_v46 = vpop.f32.mrb[205].mxu0 }
 0xa12   : > { %v12940_v7 = vpop.f32.mrb[206].mxu0 }
 0xa13   : > { %v12941_v16 = vpop.f32.mrb[207].mxu0 }
 0xa1e   : > { %v12895_v9 = vpop.f32.mrb[204].mxu1 }
 0xa1f   : > { %v12937_v63 = vadd.f32 %v12936_v51, %v12895_v9  ;;  %v12897_v19 = vpop.f32.mrb[205].mxu1  ;;  %v14237_v51 = vrot.slane %v14228_v44, %v29245_v45  ;;  %v16650_v45 = vld [vmem:[%s28569_s8] ss:$0 sm:$0xff] }
 0xa20   : > { %v12939_v32 = vadd.f32 %v12938_v46, %v12897_v19  ;;  %v12899_v54 = vpop.f32.mrb[206].mxu1 }
 0xa21   : > { %v12943_v3 = vadd.f32 %v12937_v63, %v12508_v48  ;;  %v12900_v5 = vpop.f32.mrb[207].mxu1 }
 0xa22   : > { %v12944_v35 = vadd.f32 %v12939_v32, %v12509_v57 }
 0xa4e   : > { %v13360_v0 = vpop.f32.mrb[208].mxu1 }
 0xa4f   : > { %v13362_v22 = vpop.f32.mrb[209].mxu1 }
 0xa50   : > { %v13319_v1 = vpop.f32.mrb[208].mxu0  ;;  %v13364_v53 = vpop.f32.mrb[210].mxu1 }
 0xa51   : > { %v13361_v34 = vadd.f32 %v13360_v0, %v13319_v1  ;;  %v13321_v13 = vpop.f32.mrb[209].mxu0  ;;  %v13365_v60 = vpop.f32.mrb[211].mxu1 }
 0xa52   : > { %v13363_v24 = vadd.f32 %v13362_v22, %v13321_v13  ;;  %v13323_v62 = vpop.f32.mrb[210].mxu0 }
 0xa53   : > { %v13367_v40 = vadd.f32 %v13361_v34, %v12943_v3  ;;  %v13324_v61 = vpop.f32.mrb[211].mxu0 }
 0xa54   : > { %v13368_v56 = vadd.f32 %v13363_v24, %v12944_v35 }
 0xa80   : > { %v13795_v37 = vpop.f32.mrb[212].mxu0 }
 0xa81   : > { %v13797_v27 = vpop.f32.mrb[213].mxu0 }
 0xa82   : > { %v13799_v50 = vpop.f32.mrb[214].mxu0 }
 0xa83   : > { %v13800_v17 = vpop.f32.mrb[215].mxu0 }
 0xa8e   : > { %v13754_v23 = vpop.f32.mrb[212].mxu1 }
 0xa8f   : > { %v13796_v58 = vadd.f32 %v13795_v37, %v13754_v23  ;;  %v13756_v8 = vpop.f32.mrb[213].mxu1 }
 0xa90   : > { %v13798_v15 = vadd.f32 %v13797_v27, %v13756_v8  ;;  %v13758_v14 = vpop.f32.mrb[214].mxu1 }
 0xa91   : > { %v13802_v18 = vadd.f32 %v13796_v58, %v13367_v40  ;;  %v13759_v20 = vpop.f32.mrb[215].mxu1 }
 0xa92   : > { %v13803_v21 = vadd.f32 %v13798_v15, %v13368_v56 }
 0xabe   : > { %v14219_v25 = vpop.f32.mrb[216].mxu1 }
 0xabf   : > { %v14221_v2 = vpop.f32.mrb[217].mxu1 }
 0xac0   : > { %v14178_v42 = vpop.f32.mrb[216].mxu0  ;;  %v14223_v48 = vpop.f32.mrb[218].mxu1 }
 0xac1   : > { %v14220_v41 = vadd.f32 %v14219_v25, %v14178_v42  ;;  %v14180_v57 = vpop.f32.mrb[217].mxu0  ;;  %v14224_v4 = vpop.f32.mrb[219].mxu1 }
 0xac2   : > { %v14222_v39 = vadd.f32 %v14221_v2, %v14180_v57  ;;  %v14182_v46 = vpop.f32.mrb[218].mxu0 }
 0xac3   : > { %v14226_v7 = vadd.f32 %v14220_v41, %v13802_v18  ;;  %v14183_v26 = vpop.f32.mrb[219].mxu0 }
 0xac4   : > { %v14227_v11 = vadd.f32 %v14222_v39, %v13803_v21 }
 0xac5   : > { %v14240_v59 = vadd.f32 %v14233_v43, %v14226_v7 }
 0xac6   : > { %v14241_v16 = vadd.f32 %v14237_v51, %v14227_v11 }
 0xac7   : > { %v14242_v6 = vmax.f32 %v14240_v59, 0.0 }
 0xac8   : > { %v14243_v31 = vmax.f32 %v14241_v16, 0.0 }
 0xac9   : > { %v14244_v49 = vpack.c.bf16 %v14242_v6, %v14242_v6 }
 0xaca   : > { %v14245_v47 = vpack.c.bf16 %v14243_v31, %v14243_v31 }
 0xacc   : > { %14413 = vmatprep.mubr.bf16.mxu1 %v14245_v47 }
 0xacd   : > { %14414 = vmatmul.mubr.bf16.vlgmr.msra.gmra.mrb[220].mxu1 %v14244_v49 }
 0xba0   : > { %v16778_v55 = vpop.f32.mrb[220].mxu1 }
 0xba1   : > { %v16779_v52 = vpop.f32.mrb[221].mxu1 }
 0xba2   : > { %v16780_v9 = vadd.f32 %v16779_v52, %v16778_v55  ;;  %v16781_v12 = vpop.f32.mrb[222].mxu1 }
 0xba3   : > { %v16782_v63 = vpop.f32.mrb[223].mxu1 }
 0xba4   : > { %v14416_v19 = vadd.f32 %v16780_v9, %v16650_v45 }
 0xba6   : > { %14421 = vst [vmem:[%s497_s24] sm:$0xff] %v14416_v19 }
 0xba7 PF: > { %p16_p9 = scmp.ge.s32.totalorder %s20167_s13, 4   ;;  %s29247_s30 = smov %s20093_s10 }
 0xba8   : > { %s29248_s10 = smov %s20176_s16  ;;  %s29249_s11 = smov %s20167_s13 }
 0xba9   :  { %18 = sbr.rel (!%p16_p9) target bundleno = 2 (0x2), region = 141 }

</bundles_post_ra>
